<compile_context>
chip_gen: v7x
topology: tpu7x:2x2x1
jax: 0.10.0
libtpu: 0.0.40
codegen_flags: <defaults>
</compile_context>

<pallas_src>
import functools
import math

import numpy as np
import jax
import jax.numpy as jnp
from jax.experimental import pallas as pl
from jax.experimental.pallas import tpu as pltpu

LN_EPS = 1e-5


# ----------------------------------------------------------------------------
# Pallas kernels
# ----------------------------------------------------------------------------
def _ln_mlp_residual_kernel(x_ref, gamma_ref, beta_ref,
                            w1_ref, b1_ref, w2_ref, b2_ref, o_ref):
    """out = x + W2 @ (W1 @ LN(x))   (no nonlinearity, matches the PyTorch code)."""
    x = x_ref[...]                                            # (tile_n, D) f32
    mu = jnp.mean(x, axis=-1, keepdims=True)
    var = jnp.mean((x - mu) ** 2, axis=-1, keepdims=True)
    xn = (x - mu) * jax.lax.rsqrt(var + LN_EPS)
    xn = xn * gamma_ref[...] + beta_ref[...]                  # (1, D) broadcast
    # bf16 MXU inputs, f32 accumulation
    h = jnp.dot(xn.astype(jnp.bfloat16), w1_ref[...],
                preferred_element_type=jnp.float32) + b1_ref[...]
    y = jnp.dot(h.astype(jnp.bfloat16), w2_ref[...],
                preferred_element_type=jnp.float32) + b2_ref[...]
    o_ref[...] = x + y
    # TODO(synk): for production model_dim (>=512) tile the 4D hidden dim over
    # a reduction grid axis with a VMEM accumulator so resident W1/W2 fit the
    # v7x 64 MiB VMEM budget.


def _window_attn_kernel(*refs, num_heads, head_dim, masked, mask_rep):
    """Fused LayerNorm + windowed multi-head self-attention over `wb` windows."""
    if masked:
        (x_ref, mask_ref, gamma_ref, beta_ref,
         wqkv_ref, bqkv_ref, wo_ref, bo_ref, o_ref) = refs
    else:
        (x_ref, gamma_ref, beta_ref,
         wqkv_ref, bqkv_ref, wo_ref, bo_ref, o_ref) = refs
        mask_ref = None

    x = x_ref[...]                                            # (wb, T, D) f32
    wb, T, D = x.shape
    xf = x.reshape(wb * T, D)                                 # flatten for the projections

    # LayerNorm (f32 statistics)
    mu = jnp.mean(xf, axis=-1, keepdims=True)
    var = jnp.mean((xf - mu) ** 2, axis=-1, keepdims=True)
    xn = (xf - mu) * jax.lax.rsqrt(var + LN_EPS)
    xn = xn * gamma_ref[...] + beta_ref[...]

    # QKV projection on the whole (wb*T, D) slab -> one big MXU pass
    qkv = jnp.dot(xn.astype(jnp.bfloat16), wqkv_ref[...],
                  preferred_element_type=jnp.float32) + bqkv_ref[...]

    if masked:
        m = mask_ref[...]                                     # (mwb, T, T)
        if mask_rep > 1:                                      # block spans mask_rep batches
            m = jnp.concatenate([m] * mask_rep, axis=0)       # (wb, T, T)

    scale = 1.0 / math.sqrt(head_dim)
    head_outs = []
    # unrolled at trace time; each head is a window-batched einsum (batch = wb)
    for h in range(num_heads):
        q = qkv[:, h * head_dim:(h + 1) * head_dim].reshape(wb, T, head_dim)
        k = qkv[:, D + h * head_dim: D + (h + 1) * head_dim].reshape(wb, T, head_dim)
        v = qkv[:, 2 * D + h * head_dim: 2 * D + (h + 1) * head_dim].reshape(wb, T, head_dim)
        s = jnp.einsum('wqd,wkd->wqk', q, k,
                       preferred_element_type=jnp.float32) * scale
        if masked:
            s = s + m
        s = s - jnp.max(s, axis=-1, keepdims=True)
        p = jnp.exp(s)
        p = p * pl.reciprocal(jnp.sum(p, axis=-1, keepdims=True), approx=True)
        ctx = jnp.einsum('wqk,wkd->wqd', p, v,
                         preferred_element_type=jnp.float32)
        head_outs.append(ctx.reshape(wb * T, head_dim))
    attn = jnp.concatenate(head_outs, axis=-1)                # (wb*T, D)

    out = jnp.dot(attn.astype(jnp.bfloat16), wo_ref[...],
                  preferred_element_type=jnp.float32) + bo_ref[...]
    o_ref[...] = out.reshape(wb, T, D)


# ----------------------------------------------------------------------------
# tiling helpers
# ----------------------------------------------------------------------------
def _choose_row_tile(n, max_rows=512):
    """Largest divisor of n that is <= max_rows."""
    best = 1
    for t in range(1, min(n, max_rows) + 1):
        if n % t == 0:
            best = t
    return best


def _choose_window_block(bw, nw, t, target_rows=256):
    """Number of windows per grid step. Must divide bw and stay aligned with the
    per-image window count nw so the shift mask can be block-indexed."""
    cands = [wb for wb in range(1, bw + 1)
             if bw % wb == 0 and (nw % wb == 0 or wb % nw == 0)]
    big = [wb for wb in cands if wb * t >= target_rows]
    return min(big) if big else max(cands)


# ----------------------------------------------------------------------------
# pallas_call wrappers
# ----------------------------------------------------------------------------
def ln_mlp_residual(x, gamma, beta, w1, b1, w2, b2):
    N, D = x.shape
    H4 = w1.shape[1]
    tile_n = _choose_row_tile(N)
    return pl.pallas_call(
        _ln_mlp_residual_kernel,
        out_shape=jax.ShapeDtypeStruct((N, D), jnp.float32),
        grid=(N // tile_n,),
        in_specs=[
            pl.BlockSpec((tile_n, D), lambda i: (i, 0)),
            pl.BlockSpec((1, D), lambda i: (0, 0)),
            pl.BlockSpec((1, D), lambda i: (0, 0)),
            pl.BlockSpec((D, H4), lambda i: (0, 0)),
            pl.BlockSpec((1, H4), lambda i: (0, 0)),
            pl.BlockSpec((H4, D), lambda i: (0, 0)),
            pl.BlockSpec((1, D), lambda i: (0, 0)),
        ],
        out_specs=pl.BlockSpec((tile_n, D), lambda i: (i, 0)),
        compiler_params=pltpu.CompilerParams(dimension_semantics=("parallel",)),
    )(x, gamma, beta, w1, b1, w2, b2)


def window_attention(x_win, gamma, beta, wqkv, bqkv, wo, bo, *,
                     num_heads, nw, mask=None):
    BW, T, D = x_win.shape
    head_dim = D // num_heads
    wb = _choose_window_block(BW, nw, T)
    masked = mask is not None

    in_specs = [pl.BlockSpec((wb, T, D), lambda i: (i, 0, 0))]
    args = [x_win]
    mask_rep = 1
    if masked:
        if wb <= nw:
            n_mb = nw // wb
            in_specs.append(pl.BlockSpec(
                (wb, T, T), lambda i, n_mb=n_mb: (i % n_mb, 0, 0)))
        else:
            mask_rep = wb // nw
            in_specs.append(pl.BlockSpec((nw, T, T), lambda i: (0, 0, 0)))
        args.append(mask)
    in_specs += [
        pl.BlockSpec((1, D), lambda i: (0, 0)),
        pl.BlockSpec((1, D), lambda i: (0, 0)),
        pl.BlockSpec((D, 3 * D), lambda i: (0, 0)),
        pl.BlockSpec((1, 3 * D), lambda i: (0, 0)),
        pl.BlockSpec((D, D), lambda i: (0, 0)),
        pl.BlockSpec((1, D), lambda i: (0, 0)),
    ]
    args += [gamma, beta, wqkv, bqkv, wo, bo]

    kernel = functools.partial(_window_attn_kernel, num_heads=num_heads,
                               head_dim=head_dim, masked=masked,
                               mask_rep=mask_rep)
    return pl.pallas_call(
        kernel,
        out_shape=jax.ShapeDtypeStruct((BW, T, D), jnp.float32),
        grid=(BW // wb,),
        in_specs=in_specs,
        out_specs=pl.BlockSpec((wb, T, D), lambda i: (i, 0, 0)),
        compiler_params=pltpu.CompilerParams(dimension_semantics=("parallel",)),
    )(*args)


# ----------------------------------------------------------------------------
# Glue: window partition / merge, shift mask
# ----------------------------------------------------------------------------
def seq_to_windows(x, H, W, ws):
    bs, L, D = x.shape
    x = x.reshape(bs, H // ws, ws, W // ws, ws, D)
    x = x.transpose(0, 1, 3, 2, 4, 5)
    return x.reshape(bs, (H // ws) * (W // ws), ws * ws, D)


def windows_to_seq(xw, H, W, ws):
    bs, nw, T, D = xw.shape
    x = xw.reshape(bs, H // ws, W // ws, ws, ws, D)
    x = x.transpose(0, 1, 3, 2, 4, 5)
    return x.reshape(bs, H * W, D)


def build_shift_mask(H, W, ws):
    """Additive mask [num_windows, ws*ws, ws*ws] for the cyclically shifted windows."""
    shift = ws // 2
    img = np.zeros((H, W), dtype=np.int32)
    cnt = 0
    for hs in (slice(0, -ws), slice(-ws, -shift), slice(-shift, None)):
        for ws_ in (slice(0, -ws), slice(-ws, -shift), slice(-shift, None)):
            img[hs, ws_] = cnt
            cnt += 1
    win = img.reshape(H // ws, ws, W // ws, ws).transpose(0, 2, 1, 3).reshape(-1, ws * ws)
    mask = (win[:, :, None] != win[:, None, :]).astype(np.float32) * (-1e9)
    return jnp.asarray(mask, dtype=jnp.float32)


# ----------------------------------------------------------------------------
# Parameter initialization (deterministic, synthetic)
# ----------------------------------------------------------------------------
def init_params(key, model_dim):
    D = model_dim
    ks = jax.random.split(key, 8)
    # matmul weights in bf16 (native MXU input, half the HBM/DMA bytes);
    # biases / LN params stay f32.
    w = lambda k, shp: (0.02 * jax.random.normal(k, shp)).astype(jnp.bfloat16)
    p = {}
    for i in range(1, 5):
        p[f"ln{i}_g"] = jnp.ones((1, D), jnp.float32)
        p[f"ln{i}_b"] = jnp.zeros((1, D), jnp.float32)
    p["wmsa_qkv_w"] = w(ks[0], (D, 3 * D)); p["wmsa_qkv_b"] = jnp.zeros((1, 3 * D), jnp.float32)
    p["wmsa_out_w"] = w(ks[1], (D, D));     p["wmsa_out_b"] = jnp.zeros((1, D), jnp.float32)
    p["swmsa_qkv_w"] = w(ks[2], (D, 3 * D)); p["swmsa_qkv_b"] = jnp.zeros((1, 3 * D), jnp.float32)
    p["swmsa_out_w"] = w(ks[3], (D, D));     p["swmsa_out_b"] = jnp.zeros((1, D), jnp.float32)
    p["wmsa_mlp1_w"] = w(ks[4], (D, 4 * D)); p["wmsa_mlp1_b"] = jnp.zeros((1, 4 * D), jnp.float32)
    p["wmsa_mlp2_w"] = w(ks[5], (4 * D, D)); p["wmsa_mlp2_b"] = jnp.zeros((1, D), jnp.float32)
    p["swmsa_mlp1_w"] = w(ks[6], (D, 4 * D)); p["swmsa_mlp1_b"] = jnp.zeros((1, 4 * D), jnp.float32)
    p["swmsa_mlp2_w"] = w(ks[7], (4 * D, D)); p["swmsa_mlp2_b"] = jnp.zeros((1, D), jnp.float32)
    return p


# ----------------------------------------------------------------------------
# Full block forward
# ----------------------------------------------------------------------------
def swin_transformer_block(x, params, *, window_size, num_heads, flatten_output=False):
    bs, L, D = x.shape
    H = W = int(math.isqrt(L))
    ws = window_size
    T = ws * ws
    nw = (H // ws) * (W // ws)

    # ---- W-MSA (layer_norm1 fused; mask-free kernel variant, no zero mask) ----
    x_win = seq_to_windows(x, H, W, ws).reshape(bs * nw, T, D)
    wmsa_out = window_attention(
        x_win, params["ln1_g"], params["ln1_b"],
        params["wmsa_qkv_w"], params["wmsa_qkv_b"],
        params["wmsa_out_w"], params["wmsa_out_b"],
        num_heads=num_heads, nw=nw)
    wmsa_seq = windows_to_seq(wmsa_out.reshape(bs, nw, T, D), H, W, ws)
    wmsa_output1 = wmsa_seq + x

    # ---- MLP 1 (layer_norm2 + two linears + residual, fused) ----
    wmsa_output2 = ln_mlp_residual(
        wmsa_output1.reshape(bs * L, D),
        params["ln2_g"], params["ln2_b"],
        params["wmsa_mlp1_w"], params["wmsa_mlp1_b"],
        params["wmsa_mlp2_w"], params["wmsa_mlp2_b"]).reshape(bs, L, D)

    # ---- SW-MSA (cyclic shift, masked window attention, shift back) ----
    # layer_norm3 is per-token and commutes with the roll/partition permutations,
    # so it is fused inside the attention kernel.
    # TODO(synk): fuse the cyclic roll + window partition/merge gather into the
    # SW-MSA pallas_call via PrefetchScalarGridSpec row-offset tables to remove
    # the extra full-tensor HBM round trips that the roll/partition cause.
    shift = ws // 2
    img = wmsa_output2.reshape(bs, H, W, D)
    shifted = jnp.roll(img, shift=(-shift, -shift), axis=(1, 2)).reshape(bs, L, D)
    sh_win = seq_to_windows(shifted, H, W, ws).reshape(bs * nw, T, D)
    shift_mask = build_shift_mask(H, W, ws)               # (nw, T, T), NOT tiled over batch
    swmsa_out = window_attention(
        sh_win, params["ln3_g"], params["ln3_b"],
        params["swmsa_qkv_w"], params["swmsa_qkv_b"],
        params["swmsa_out_w"], params["swmsa_out_b"],
        num_heads=num_heads, nw=nw, mask=shift_mask)
    swmsa_img = windows_to_seq(swmsa_out.reshape(bs, nw, T, D), H, W, ws).reshape(bs, H, W, D)
    swmsa_seq = jnp.roll(swmsa_img, shift=(shift, shift), axis=(1, 2)).reshape(bs, L, D)
    swmsa_output1 = swmsa_seq + wmsa_output2

    # ---- MLP 2 (layer_norm4 + two linears + residual, fused) ----
    swmsa_output2 = ln_mlp_residual(
        swmsa_output1.reshape(bs * L, D),
        params["ln4_g"], params["ln4_b"],
        params["swmsa_mlp1_w"], params["swmsa_mlp1_b"],
        params["swmsa_mlp2_w"], params["swmsa_mlp2_b"]).reshape(bs, L, D)

    if not flatten_output:
        # plain reshape, exactly as in the PyTorch module
        swmsa_output2 = swmsa_output2.reshape(bs, nw, T, D)
    return swmsa_output2


# ----------------------------------------------------------------------------
if __name__ == "__main__":
    model_dim = 32
    window_size = 4
    num_heads = 4
    bs = 2
    H = W = 8
    nums_patch = H * W  # 64

    key = jax.random.PRNGKey(0)
    pkey, xkey = jax.random.split(key)
    params = init_params(pkey, model_dim)
    x = jax.random.normal(xkey, (bs, nums_patch, model_dim), dtype=jnp.float32)

    fwd = jax.jit(functools.partial(
        swin_transformer_block, window_size=window_size,
        num_heads=num_heads, flatten_output=False))
    out = fwd(x, params)
    jax.block_until_ready(out)

    expected_shape = (bs, (H // window_size) * (W // window_size),
                      window_size * window_size, model_dim)
    assert out.shape == expected_shape, (out.shape, expected_shape)
    assert bool(jnp.all(jnp.isfinite(out)))
    print("KERNEL_OK")
</pallas_src>

<mosaic_0001>
module attributes {stable_mosaic.version = 11 : i64} {
  func.func @_window_attn_kernel(%arg0: i32, %arg1: memref<8x16x32xf32, #tpu.memory_space<vmem>>, %arg2: memref<1x32xf32, #tpu.memory_space<vmem>>, %arg3: memref<1x32xf32, #tpu.memory_space<vmem>>, %arg4: memref<32x96xbf16, #tpu.memory_space<vmem>>, %arg5: memref<1x96xf32, #tpu.memory_space<vmem>>, %arg6: memref<32x32xbf16, #tpu.memory_space<vmem>>, %arg7: memref<1x32xf32, #tpu.memory_space<vmem>>, %arg8: memref<8x16x32xf32, #tpu.memory_space<vmem>>) attributes {dimension_semantics = [#tpu.dimension_semantics<parallel>], iteration_bounds = array<i64: 1>, scalar_prefetch = 0 : i64, scratch_operands = 0 : i64, tpu.core_type = #tpu.core_type<tc>, window_params = [{transform_indices = @transform_0, window_bounds = array<i64: 8, 16, 32>}, {pipeline_mode = #tpu.pipeline_mode<synchronous>, transform_indices = @transform_1, window_bounds = array<i64: 1, 32>}, {pipeline_mode = #tpu.pipeline_mode<synchronous>, transform_indices = @transform_2, window_bounds = array<i64: 1, 32>}, {pipeline_mode = #tpu.pipeline_mode<synchronous>, transform_indices = @transform_3, window_bounds = array<i64: 32, 96>}, {pipeline_mode = #tpu.pipeline_mode<synchronous>, transform_indices = @transform_4, window_bounds = array<i64: 1, 96>}, {pipeline_mode = #tpu.pipeline_mode<synchronous>, transform_indices = @transform_5, window_bounds = array<i64: 32, 32>}, {pipeline_mode = #tpu.pipeline_mode<synchronous>, transform_indices = @transform_6, window_bounds = array<i64: 1, 32>}, {transform_indices = @transform_7, window_bounds = array<i64: 8, 16, 32>}]} {
    %c0 = arith.constant 0 : index
    %c0_0 = arith.constant 0 : index
    %c0_1 = arith.constant 0 : index
    %0 = vector.load %arg1[%c0, %c0_0, %c0_1] : memref<8x16x32xf32, #tpu.memory_space<vmem>>, vector<8x16x32xf32>
    %1 = vector.shape_cast %0 : vector<8x16x32xf32> to vector<128x32xf32>
    %cst = arith.constant dense<0.000000e+00> : vector<128xf32>
    %2 = vector.multi_reduction <add>, %1, %cst [1] : vector<128x32xf32> to vector<128xf32>
    %3 = vector.shape_cast %2 : vector<128xf32> to vector<128x1xf32>
    %cst_2 = arith.constant 3.200000e+01 : f32
    %4 = vector.broadcast %cst_2 : f32 to vector<128x1xf32>
    %5 = arith.divf %3, %4 : vector<128x1xf32>
    %6 = vector.broadcast %5 : vector<128x1xf32> to vector<128x32xf32>
    %7 = arith.subf %1, %6 : vector<128x32xf32>
    %8 = arith.mulf %7, %7 : vector<128x32xf32>
    %cst_3 = arith.constant dense<0.000000e+00> : vector<128xf32>
    %9 = vector.multi_reduction <add>, %8, %cst_3 [1] : vector<128x32xf32> to vector<128xf32>
    %10 = vector.shape_cast %9 : vector<128xf32> to vector<128x1xf32>
    %cst_4 = arith.constant 3.200000e+01 : f32
    %11 = vector.broadcast %cst_4 : f32 to vector<128x1xf32>
    %12 = arith.divf %10, %11 : vector<128x1xf32>
    %13 = vector.broadcast %5 : vector<128x1xf32> to vector<128x32xf32>
    %14 = arith.subf %1, %13 : vector<128x32xf32>
    %cst_5 = arith.constant 9.99999974E-6 : f32
    %15 = vector.broadcast %cst_5 : f32 to vector<128x1xf32>
    %16 = arith.addf %12, %15 : vector<128x1xf32>
    %17 = math.rsqrt %16 : vector<128x1xf32>
    %18 = vector.broadcast %17 : vector<128x1xf32> to vector<128x32xf32>
    %19 = arith.mulf %14, %18 : vector<128x32xf32>
    %c0_6 = arith.constant 0 : index
    %c0_7 = arith.constant 0 : index
    %20 = vector.load %arg2[%c0_6, %c0_7] : memref<1x32xf32, #tpu.memory_space<vmem>>, vector<1x32xf32>
    %21 = vector.broadcast %20 : vector<1x32xf32> to vector<128x32xf32>
    %22 = arith.mulf %19, %21 : vector<128x32xf32>
    %c0_8 = arith.constant 0 : index
    %c0_9 = arith.constant 0 : index
    %23 = vector.load %arg3[%c0_8, %c0_9] : memref<1x32xf32, #tpu.memory_space<vmem>>, vector<1x32xf32>
    %24 = vector.broadcast %23 : vector<1x32xf32> to vector<128x32xf32>
    %25 = arith.addf %22, %24 : vector<128x32xf32>
    %26 = arith.truncf %25 : vector<128x32xf32> to vector<128x32xbf16>
    %c0_10 = arith.constant 0 : index
    %c0_11 = arith.constant 0 : index
    %27 = vector.load %arg4[%c0_10, %c0_11] : memref<32x96xbf16, #tpu.memory_space<vmem>>, vector<32x96xbf16>
    %cst_12 = arith.constant dense<0.000000e+00> : vector<128x96xf32>
    %28 = tpu.matmul %26, %27, %cst_12 {dimension_numbers = #tpu.dot_dimension_numbers<[1], [0], [0], [1], [0, 0, 1, 1], [], []>} : vector<128x32xbf16>, vector<32x96xbf16>, vector<128x96xf32> -> vector<128x96xf32>
    %c0_13 = arith.constant 0 : index
    %c0_14 = arith.constant 0 : index
    %29 = vector.load %arg5[%c0_13, %c0_14] : memref<1x96xf32, #tpu.memory_space<vmem>>, vector<1x96xf32>
    %30 = vector.broadcast %29 : vector<1x96xf32> to vector<128x96xf32>
    %31 = arith.addf %28, %30 : vector<128x96xf32>
    %32 = vector.extract_strided_slice %31 {offsets = [0, 0], sizes = [128, 8], strides = [1, 1]} : vector<128x96xf32> to vector<128x8xf32>
    %33 = vector.shape_cast %32 : vector<128x8xf32> to vector<8x16x8xf32>
    %34 = vector.extract_strided_slice %31 {offsets = [0, 32], sizes = [128, 8], strides = [1, 1]} : vector<128x96xf32> to vector<128x8xf32>
    %35 = vector.shape_cast %34 : vector<128x8xf32> to vector<8x16x8xf32>
    %36 = vector.extract_strided_slice %31 {offsets = [0, 64], sizes = [128, 8], strides = [1, 1]} : vector<128x96xf32> to vector<128x8xf32>
    %37 = vector.shape_cast %36 : vector<128x8xf32> to vector<8x16x8xf32>
    "tpu.trace_start"() <{level = 10 : i32, message = "wqd,wkd->wqk"}> : () -> ()
    %cst_15 = arith.constant dense<0.000000e+00> : vector<8x16x16xf32>
    %38 = tpu.matmul %33, %35, %cst_15 {dimension_numbers = #tpu.dot_dimension_numbers<[2], [2], [1], [1], [0, 0, 0, 1, 1, 1], [0], [0]>} : vector<8x16x8xf32>, vector<8x16x8xf32>, vector<8x16x16xf32> -> vector<8x16x16xf32>
    "tpu.trace_stop"() : () -> ()
    %cst_16 = arith.constant 0.353553385 : f32
    %39 = vector.broadcast %cst_16 : f32 to vector<8x16x16xf32>
    %40 = arith.mulf %38, %39 : vector<8x16x16xf32>
    %cst_17 = arith.constant dense<0xFF800000> : vector<8x16xf32>
    %41 = vector.multi_reduction <maximumf>, %40, %cst_17 [2] : vector<8x16x16xf32> to vector<8x16xf32>
    %42 = vector.shape_cast %41 : vector<8x16xf32> to vector<8x16x1xf32>
    %43 = vector.broadcast %42 : vector<8x16x1xf32> to vector<8x16x16xf32>
    %44 = arith.subf %40, %43 : vector<8x16x16xf32>
    %45 = math.exp %44 : vector<8x16x16xf32>
    %cst_18 = arith.constant dense<0.000000e+00> : vector<8x16xf32>
    %46 = vector.multi_reduction <add>, %45, %cst_18 [2] : vector<8x16x16xf32> to vector<8x16xf32>
    %47 = vector.shape_cast %46 : vector<8x16xf32> to vector<8x16x1xf32>
    %48 = tpu.reciprocal %47 {approx = true} : vector<8x16x1xf32> -> vector<8x16x1xf32>
    %49 = vector.broadcast %48 : vector<8x16x1xf32> to vector<8x16x16xf32>
    %50 = arith.mulf %45, %49 : vector<8x16x16xf32>
    "tpu.trace_start"() <{level = 10 : i32, message = "wqk,wkd->wqd"}> : () -> ()
    %cst_19 = arith.constant dense<0.000000e+00> : vector<8x16x8xf32>
    %51 = tpu.matmul %50, %37, %cst_19 {dimension_numbers = #tpu.dot_dimension_numbers<[2], [1], [1], [2], [0, 0, 0, 1, 1, 2], [0], [0]>} : vector<8x16x16xf32>, vector<8x16x8xf32>, vector<8x16x8xf32> -> vector<8x16x8xf32>
    "tpu.trace_stop"() : () -> ()
    %52 = vector.shape_cast %51 : vector<8x16x8xf32> to vector<128x8xf32>
    %53 = vector.extract_strided_slice %31 {offsets = [0, 8], sizes = [128, 8], strides = [1, 1]} : vector<128x96xf32> to vector<128x8xf32>
    %54 = vector.shape_cast %53 : vector<128x8xf32> to vector<8x16x8xf32>
    %55 = vector.extract_strided_slice %31 {offsets = [0, 40], sizes = [128, 8], strides = [1, 1]} : vector<128x96xf32> to vector<128x8xf32>
    %56 = vector.shape_cast %55 : vector<128x8xf32> to vector<8x16x8xf32>
    %57 = vector.extract_strided_slice %31 {offsets = [0, 72], sizes = [128, 8], strides = [1, 1]} : vector<128x96xf32> to vector<128x8xf32>
    %58 = vector.shape_cast %57 : vector<128x8xf32> to vector<8x16x8xf32>
    "tpu.trace_start"() <{level = 10 : i32, message = "wqd,wkd->wqk"}> : () -> ()
    %cst_20 = arith.constant dense<0.000000e+00> : vector<8x16x16xf32>
    %59 = tpu.matmul %54, %56, %cst_20 {dimension_numbers = #tpu.dot_dimension_numbers<[2], [2], [1], [1], [0, 0, 0, 1, 1, 1], [0], [0]>} : vector<8x16x8xf32>, vector<8x16x8xf32>, vector<8x16x16xf32> -> vector<8x16x16xf32>
    "tpu.trace_stop"() : () -> ()
    %cst_21 = arith.constant 0.353553385 : f32
    %60 = vector.broadcast %cst_21 : f32 to vector<8x16x16xf32>
    %61 = arith.mulf %59, %60 : vector<8x16x16xf32>
    %cst_22 = arith.constant dense<0xFF800000> : vector<8x16xf32>
    %62 = vector.multi_reduction <maximumf>, %61, %cst_22 [2] : vector<8x16x16xf32> to vector<8x16xf32>
    %63 = vector.shape_cast %62 : vector<8x16xf32> to vector<8x16x1xf32>
    %64 = vector.broadcast %63 : vector<8x16x1xf32> to vector<8x16x16xf32>
    %65 = arith.subf %61, %64 : vector<8x16x16xf32>
    %66 = math.exp %65 : vector<8x16x16xf32>
    %cst_23 = arith.constant dense<0.000000e+00> : vector<8x16xf32>
    %67 = vector.multi_reduction <add>, %66, %cst_23 [2] : vector<8x16x16xf32> to vector<8x16xf32>
    %68 = vector.shape_cast %67 : vector<8x16xf32> to vector<8x16x1xf32>
    %69 = tpu.reciprocal %68 {approx = true} : vector<8x16x1xf32> -> vector<8x16x1xf32>
    %70 = vector.broadcast %69 : vector<8x16x1xf32> to vector<8x16x16xf32>
    %71 = arith.mulf %66, %70 : vector<8x16x16xf32>
    "tpu.trace_start"() <{level = 10 : i32, message = "wqk,wkd->wqd"}> : () -> ()
    %cst_24 = arith.constant dense<0.000000e+00> : vector<8x16x8xf32>
    %72 = tpu.matmul %71, %58, %cst_24 {dimension_numbers = #tpu.dot_dimension_numbers<[2], [1], [1], [2], [0, 0, 0, 1, 1, 2], [0], [0]>} : vector<8x16x16xf32>, vector<8x16x8xf32>, vector<8x16x8xf32> -> vector<8x16x8xf32>
    "tpu.trace_stop"() : () -> ()
    %73 = vector.shape_cast %72 : vector<8x16x8xf32> to vector<128x8xf32>
    %74 = vector.extract_strided_slice %31 {offsets = [0, 16], sizes = [128, 8], strides = [1, 1]} : vector<128x96xf32> to vector<128x8xf32>
    %75 = vector.shape_cast %74 : vector<128x8xf32> to vector<8x16x8xf32>
    %76 = vector.extract_strided_slice %31 {offsets = [0, 48], sizes = [128, 8], strides = [1, 1]} : vector<128x96xf32> to vector<128x8xf32>
    %77 = vector.shape_cast %76 : vector<128x8xf32> to vector<8x16x8xf32>
    %78 = vector.extract_strided_slice %31 {offsets = [0, 80], sizes = [128, 8], strides = [1, 1]} : vector<128x96xf32> to vector<128x8xf32>
    %79 = vector.shape_cast %78 : vector<128x8xf32> to vector<8x16x8xf32>
    "tpu.trace_start"() <{level = 10 : i32, message = "wqd,wkd->wqk"}> : () -> ()
    %cst_25 = arith.constant dense<0.000000e+00> : vector<8x16x16xf32>
    %80 = tpu.matmul %75, %77, %cst_25 {dimension_numbers = #tpu.dot_dimension_numbers<[2], [2], [1], [1], [0, 0, 0, 1, 1, 1], [0], [0]>} : vector<8x16x8xf32>, vector<8x16x8xf32>, vector<8x16x16xf32> -> vector<8x16x16xf32>
    "tpu.trace_stop"() : () -> ()
    %cst_26 = arith.constant 0.353553385 : f32
    %81 = vector.broadcast %cst_26 : f32 to vector<8x16x16xf32>
    %82 = arith.mulf %80, %81 : vector<8x16x16xf32>
    %cst_27 = arith.constant dense<0xFF800000> : vector<8x16xf32>
    %83 = vector.multi_reduction <maximumf>, %82, %cst_27 [2] : vector<8x16x16xf32> to vector<8x16xf32>
    %84 = vector.shape_cast %83 : vector<8x16xf32> to vector<8x16x1xf32>
    %85 = vector.broadcast %84 : vector<8x16x1xf32> to vector<8x16x16xf32>
    %86 = arith.subf %82, %85 : vector<8x16x16xf32>
    %87 = math.exp %86 : vector<8x16x16xf32>
    %cst_28 = arith.constant dense<0.000000e+00> : vector<8x16xf32>
    %88 = vector.multi_reduction <add>, %87, %cst_28 [2] : vector<8x16x16xf32> to vector<8x16xf32>
    %89 = vector.shape_cast %88 : vector<8x16xf32> to vector<8x16x1xf32>
    %90 = tpu.reciprocal %89 {approx = true} : vector<8x16x1xf32> -> vector<8x16x1xf32>
    %91 = vector.broadcast %90 : vector<8x16x1xf32> to vector<8x16x16xf32>
    %92 = arith.mulf %87, %91 : vector<8x16x16xf32>
    "tpu.trace_start"() <{level = 10 : i32, message = "wqk,wkd->wqd"}> : () -> ()
    %cst_29 = arith.constant dense<0.000000e+00> : vector<8x16x8xf32>
    %93 = tpu.matmul %92, %79, %cst_29 {dimension_numbers = #tpu.dot_dimension_numbers<[2], [1], [1], [2], [0, 0, 0, 1, 1, 2], [0], [0]>} : vector<8x16x16xf32>, vector<8x16x8xf32>, vector<8x16x8xf32> -> vector<8x16x8xf32>
    "tpu.trace_stop"() : () -> ()
    %94 = vector.shape_cast %93 : vector<8x16x8xf32> to vector<128x8xf32>
    %95 = vector.extract_strided_slice %31 {offsets = [0, 24], sizes = [128, 8], strides = [1, 1]} : vector<128x96xf32> to vector<128x8xf32>
    %96 = vector.shape_cast %95 : vector<128x8xf32> to vector<8x16x8xf32>
    %97 = vector.extract_strided_slice %31 {offsets = [0, 56], sizes = [128, 8], strides = [1, 1]} : vector<128x96xf32> to vector<128x8xf32>
    %98 = vector.shape_cast %97 : vector<128x8xf32> to vector<8x16x8xf32>
    %99 = vector.extract_strided_slice %31 {offsets = [0, 88], sizes = [128, 8], strides = [1, 1]} : vector<128x96xf32> to vector<128x8xf32>
    %100 = vector.shape_cast %99 : vector<128x8xf32> to vector<8x16x8xf32>
    "tpu.trace_start"() <{level = 10 : i32, message = "wqd,wkd->wqk"}> : () -> ()
    %cst_30 = arith.constant dense<0.000000e+00> : vector<8x16x16xf32>
    %101 = tpu.matmul %96, %98, %cst_30 {dimension_numbers = #tpu.dot_dimension_numbers<[2], [2], [1], [1], [0, 0, 0, 1, 1, 1], [0], [0]>} : vector<8x16x8xf32>, vector<8x16x8xf32>, vector<8x16x16xf32> -> vector<8x16x16xf32>
    "tpu.trace_stop"() : () -> ()
    %cst_31 = arith.constant 0.353553385 : f32
    %102 = vector.broadcast %cst_31 : f32 to vector<8x16x16xf32>
    %103 = arith.mulf %101, %102 : vector<8x16x16xf32>
    %cst_32 = arith.constant dense<0xFF800000> : vector<8x16xf32>
    %104 = vector.multi_reduction <maximumf>, %103, %cst_32 [2] : vector<8x16x16xf32> to vector<8x16xf32>
    %105 = vector.shape_cast %104 : vector<8x16xf32> to vector<8x16x1xf32>
    %106 = vector.broadcast %105 : vector<8x16x1xf32> to vector<8x16x16xf32>
    %107 = arith.subf %103, %106 : vector<8x16x16xf32>
    %108 = math.exp %107 : vector<8x16x16xf32>
    %cst_33 = arith.constant dense<0.000000e+00> : vector<8x16xf32>
    %109 = vector.multi_reduction <add>, %108, %cst_33 [2] : vector<8x16x16xf32> to vector<8x16xf32>
    %110 = vector.shape_cast %109 : vector<8x16xf32> to vector<8x16x1xf32>
    %111 = tpu.reciprocal %110 {approx = true} : vector<8x16x1xf32> -> vector<8x16x1xf32>
    %112 = vector.broadcast %111 : vector<8x16x1xf32> to vector<8x16x16xf32>
    %113 = arith.mulf %108, %112 : vector<8x16x16xf32>
    "tpu.trace_start"() <{level = 10 : i32, message = "wqk,wkd->wqd"}> : () -> ()
    %cst_34 = arith.constant dense<0.000000e+00> : vector<8x16x8xf32>
    %114 = tpu.matmul %113, %100, %cst_34 {dimension_numbers = #tpu.dot_dimension_numbers<[2], [1], [1], [2], [0, 0, 0, 1, 1, 2], [0], [0]>} : vector<8x16x16xf32>, vector<8x16x8xf32>, vector<8x16x8xf32> -> vector<8x16x8xf32>
    "tpu.trace_stop"() : () -> ()
    %115 = vector.shape_cast %114 : vector<8x16x8xf32> to vector<128x8xf32>
    %116 = tpu.concatenate %52, %73, %94, %115 in 1 : vector<128x8xf32>, vector<128x8xf32>, vector<128x8xf32>, vector<128x8xf32> -> vector<128x32xf32>
    %117 = arith.truncf %116 : vector<128x32xf32> to vector<128x32xbf16>
    %c0_35 = arith.constant 0 : index
    %c0_36 = arith.constant 0 : index
    %118 = vector.load %arg6[%c0_35, %c0_36] : memref<32x32xbf16, #tpu.memory_space<vmem>>, vector<32x32xbf16>
    %cst_37 = arith.constant dense<0.000000e+00> : vector<128x32xf32>
    %119 = tpu.matmul %117, %118, %cst_37 {dimension_numbers = #tpu.dot_dimension_numbers<[1], [0], [0], [1], [0, 0, 1, 1], [], []>} : vector<128x32xbf16>, vector<32x32xbf16>, vector<128x32xf32> -> vector<128x32xf32>
    %c0_38 = arith.constant 0 : index
    %c0_39 = arith.constant 0 : index
    %120 = vector.load %arg7[%c0_38, %c0_39] : memref<1x32xf32, #tpu.memory_space<vmem>>, vector<1x32xf32>
    %121 = vector.broadcast %120 : vector<1x32xf32> to vector<128x32xf32>
    %122 = arith.addf %119, %121 : vector<128x32xf32>
    %123 = vector.shape_cast %122 : vector<128x32xf32> to vector<8x16x32xf32>
    %c0_40 = arith.constant 0 : index
    %c0_41 = arith.constant 0 : index
    %c0_42 = arith.constant 0 : index
    %124 = vector.load %arg8[%c0_40, %c0_41, %c0_42] : memref<8x16x32xf32, #tpu.memory_space<vmem>>, vector<8x16x32xf32>
    tpu.vector_store %arg8[%c0_40, %c0_41, %c0_42], %123 {strides = array<i32>} : memref<8x16x32xf32, #tpu.memory_space<vmem>>, vector<8x16x32xf32>,
    return
  }
  func.func @transform_0(%arg0: i32) -> (i32, i32, i32) {
    %c0_i32 = arith.constant 0 : i32
    %c0_i32_0 = arith.constant 0 : i32
    %c0_i32_1 = arith.constant 0 : i32
    return %arg0, %c0_i32, %c0_i32_0 : i32, i32, i32
  }
  func.func @transform_1(%arg0: i32) -> (i32, i32) {
    %c0_i32 = arith.constant 0 : i32
    %c0_i32_0 = arith.constant 0 : i32
    %c0_i32_1 = arith.constant 0 : i32
    return %c0_i32, %c0_i32_0 : i32, i32
  }
  func.func @transform_2(%arg0: i32) -> (i32, i32) {
    %c0_i32 = arith.constant 0 : i32
    %c0_i32_0 = arith.constant 0 : i32
    %c0_i32_1 = arith.constant 0 : i32
    return %c0_i32, %c0_i32_0 : i32, i32
  }
  func.func @transform_3(%arg0: i32) -> (i32, i32) {
    %c0_i32 = arith.constant 0 : i32
    %c0_i32_0 = arith.constant 0 : i32
    %c0_i32_1 = arith.constant 0 : i32
    return %c0_i32, %c0_i32_0 : i32, i32
  }
  func.func @transform_4(%arg0: i32) -> (i32, i32) {
    %c0_i32 = arith.constant 0 : i32
    %c0_i32_0 = arith.constant 0 : i32
    %c0_i32_1 = arith.constant 0 : i32
    return %c0_i32, %c0_i32_0 : i32, i32
  }
  func.func @transform_5(%arg0: i32) -> (i32, i32) {
    %c0_i32 = arith.constant 0 : i32
    %c0_i32_0 = arith.constant 0 : i32
    %c0_i32_1 = arith.constant 0 : i32
    return %c0_i32, %c0_i32_0 : i32, i32
  }
  func.func @transform_6(%arg0: i32) -> (i32, i32) {
    %c0_i32 = arith.constant 0 : i32
    %c0_i32_0 = arith.constant 0 : i32
    %c0_i32_1 = arith.constant 0 : i32
    return %c0_i32, %c0_i32_0 : i32, i32
  }
  func.func @transform_7(%arg0: i32) -> (i32, i32, i32) {
    %c0_i32 = arith.constant 0 : i32
    %c0_i32_0 = arith.constant 0 : i32
    %c0_i32_1 = arith.constant 0 : i32
    return %arg0, %c0_i32, %c0_i32_0 : i32, i32, i32
  }
}

module attributes {stable_mosaic.version = 11 : i64} {
  func.func @_ln_mlp_residual_kernel(%arg0: i32, %arg1: memref<128x32xf32, #tpu.memory_space<vmem>>, %arg2: memref<1x32xf32, #tpu.memory_space<vmem>>, %arg3: memref<1x32xf32, #tpu.memory_space<vmem>>, %arg4: memref<32x128xbf16, #tpu.memory_space<vmem>>, %arg5: memref<1x128xf32, #tpu.memory_space<vmem>>, %arg6: memref<128x32xbf16, #tpu.memory_space<vmem>>, %arg7: memref<1x32xf32, #tpu.memory_space<vmem>>, %arg8: memref<128x32xf32, #tpu.memory_space<vmem>>) attributes {dimension_semantics = [#tpu.dimension_semantics<parallel>], iteration_bounds = array<i64: 1>, scalar_prefetch = 0 : i64, scratch_operands = 0 : i64, tpu.core_type = #tpu.core_type<tc>, window_params = [{transform_indices = @transform_0, window_bounds = array<i64: 128, 32>}, {pipeline_mode = #tpu.pipeline_mode<synchronous>, transform_indices = @transform_1, window_bounds = array<i64: 1, 32>}, {pipeline_mode = #tpu.pipeline_mode<synchronous>, transform_indices = @transform_2, window_bounds = array<i64: 1, 32>}, {pipeline_mode = #tpu.pipeline_mode<synchronous>, transform_indices = @transform_3, window_bounds = array<i64: 32, 128>}, {pipeline_mode = #tpu.pipeline_mode<synchronous>, transform_indices = @transform_4, window_bounds = array<i64: 1, 128>}, {pipeline_mode = #tpu.pipeline_mode<synchronous>, transform_indices = @transform_5, window_bounds = array<i64: 128, 32>}, {pipeline_mode = #tpu.pipeline_mode<synchronous>, transform_indices = @transform_6, window_bounds = array<i64: 1, 32>}, {transform_indices = @transform_7, window_bounds = array<i64: 128, 32>}]} {
    %c0 = arith.constant 0 : index
    %c0_0 = arith.constant 0 : index
    %0 = vector.load %arg1[%c0, %c0_0] : memref<128x32xf32, #tpu.memory_space<vmem>>, vector<128x32xf32>
    %cst = arith.constant dense<0.000000e+00> : vector<128xf32>
    %1 = vector.multi_reduction <add>, %0, %cst [1] : vector<128x32xf32> to vector<128xf32>
    %2 = vector.shape_cast %1 : vector<128xf32> to vector<128x1xf32>
    %cst_1 = arith.constant 3.200000e+01 : f32
    %3 = vector.broadcast %cst_1 : f32 to vector<128x1xf32>
    %4 = arith.divf %2, %3 : vector<128x1xf32>
    %5 = vector.broadcast %4 : vector<128x1xf32> to vector<128x32xf32>
    %6 = arith.subf %0, %5 : vector<128x32xf32>
    %7 = arith.mulf %6, %6 : vector<128x32xf32>
    %cst_2 = arith.constant dense<0.000000e+00> : vector<128xf32>
    %8 = vector.multi_reduction <add>, %7, %cst_2 [1] : vector<128x32xf32> to vector<128xf32>
    %9 = vector.shape_cast %8 : vector<128xf32> to vector<128x1xf32>
    %cst_3 = arith.constant 3.200000e+01 : f32
    %10 = vector.broadcast %cst_3 : f32 to vector<128x1xf32>
    %11 = arith.divf %9, %10 : vector<128x1xf32>
    %12 = vector.broadcast %4 : vector<128x1xf32> to vector<128x32xf32>
    %13 = arith.subf %0, %12 : vector<128x32xf32>
    %cst_4 = arith.constant 9.99999974E-6 : f32
    %14 = vector.broadcast %cst_4 : f32 to vector<128x1xf32>
    %15 = arith.addf %11, %14 : vector<128x1xf32>
    %16 = math.rsqrt %15 : vector<128x1xf32>
    %17 = vector.broadcast %16 : vector<128x1xf32> to vector<128x32xf32>
    %18 = arith.mulf %13, %17 : vector<128x32xf32>
    %c0_5 = arith.constant 0 : index
    %c0_6 = arith.constant 0 : index
    %19 = vector.load %arg2[%c0_5, %c0_6] : memref<1x32xf32, #tpu.memory_space<vmem>>, vector<1x32xf32>
    %20 = vector.broadcast %19 : vector<1x32xf32> to vector<128x32xf32>
    %21 = arith.mulf %18, %20 : vector<128x32xf32>
    %c0_7 = arith.constant 0 : index
    %c0_8 = arith.constant 0 : index
    %22 = vector.load %arg3[%c0_7, %c0_8] : memref<1x32xf32, #tpu.memory_space<vmem>>, vector<1x32xf32>
    %23 = vector.broadcast %22 : vector<1x32xf32> to vector<128x32xf32>
    %24 = arith.addf %21, %23 : vector<128x32xf32>
    %25 = arith.truncf %24 : vector<128x32xf32> to vector<128x32xbf16>
    %c0_9 = arith.constant 0 : index
    %c0_10 = arith.constant 0 : index
    %26 = vector.load %arg4[%c0_9, %c0_10] : memref<32x128xbf16, #tpu.memory_space<vmem>>, vector<32x128xbf16>
    %cst_11 = arith.constant dense<0.000000e+00> : vector<128x128xf32>
    %27 = tpu.matmul %25, %26, %cst_11 {dimension_numbers = #tpu.dot_dimension_numbers<[1], [0], [0], [1], [0, 0, 1, 1], [], []>} : vector<128x32xbf16>, vector<32x128xbf16>, vector<128x128xf32> -> vector<128x128xf32>
    %c0_12 = arith.constant 0 : index
    %c0_13 = arith.constant 0 : index
    %28 = vector.load %arg5[%c0_12, %c0_13] : memref<1x128xf32, #tpu.memory_space<vmem>>, vector<1x128xf32>
    %29 = vector.broadcast %28 : vector<1x128xf32> to vector<128x128xf32>
    %30 = arith.addf %27, %29 : vector<128x128xf32>
    %31 = arith.truncf %30 : vector<128x128xf32> to vector<128x128xbf16>
    %c0_14 = arith.constant 0 : index
    %c0_15 = arith.constant 0 : index
    %32 = vector.load %arg6[%c0_14, %c0_15] : memref<128x32xbf16, #tpu.memory_space<vmem>>, vector<128x32xbf16>
    %cst_16 = arith.constant dense<0.000000e+00> : vector<128x32xf32>
    %33 = tpu.matmul %31, %32, %cst_16 {dimension_numbers = #tpu.dot_dimension_numbers<[1], [0], [0], [1], [0, 0, 1, 1], [], []>} : vector<128x128xbf16>, vector<128x32xbf16>, vector<128x32xf32> -> vector<128x32xf32>
    %c0_17 = arith.constant 0 : index
    %c0_18 = arith.constant 0 : index
    %34 = vector.load %arg7[%c0_17, %c0_18] : memref<1x32xf32, #tpu.memory_space<vmem>>, vector<1x32xf32>
    %35 = vector.broadcast %34 : vector<1x32xf32> to vector<128x32xf32>
    %36 = arith.addf %33, %35 : vector<128x32xf32>
    %37 = arith.addf %0, %36 : vector<128x32xf32>
    %c0_19 = arith.constant 0 : index
    %c0_20 = arith.constant 0 : index
    %38 = vector.load %arg8[%c0_19, %c0_20] : memref<128x32xf32, #tpu.memory_space<vmem>>, vector<128x32xf32>
    tpu.vector_store %arg8[%c0_19, %c0_20], %37 {strides = array<i32>} : memref<128x32xf32, #tpu.memory_space<vmem>>, vector<128x32xf32>,
    return
  }
  func.func @transform_0(%arg0: i32) -> (i32, i32) {
    %c0_i32 = arith.constant 0 : i32
    %c0_i32_0 = arith.constant 0 : i32
    return %arg0, %c0_i32 : i32, i32
  }
  func.func @transform_1(%arg0: i32) -> (i32, i32) {
    %c0_i32 = arith.constant 0 : i32
    %c0_i32_0 = arith.constant 0 : i32
    %c0_i32_1 = arith.constant 0 : i32
    return %c0_i32, %c0_i32_0 : i32, i32
  }
  func.func @transform_2(%arg0: i32) -> (i32, i32) {
    %c0_i32 = arith.constant 0 : i32
    %c0_i32_0 = arith.constant 0 : i32
    %c0_i32_1 = arith.constant 0 : i32
    return %c0_i32, %c0_i32_0 : i32, i32
  }
  func.func @transform_3(%arg0: i32) -> (i32, i32) {
    %c0_i32 = arith.constant 0 : i32
    %c0_i32_0 = arith.constant 0 : i32
    %c0_i32_1 = arith.constant 0 : i32
    return %c0_i32, %c0_i32_0 : i32, i32
  }
  func.func @transform_4(%arg0: i32) -> (i32, i32) {
    %c0_i32 = arith.constant 0 : i32
    %c0_i32_0 = arith.constant 0 : i32
    %c0_i32_1 = arith.constant 0 : i32
    return %c0_i32, %c0_i32_0 : i32, i32
  }
  func.func @transform_5(%arg0: i32) -> (i32, i32) {
    %c0_i32 = arith.constant 0 : i32
    %c0_i32_0 = arith.constant 0 : i32
    %c0_i32_1 = arith.constant 0 : i32
    return %c0_i32, %c0_i32_0 : i32, i32
  }
  func.func @transform_6(%arg0: i32) -> (i32, i32) {
    %c0_i32 = arith.constant 0 : i32
    %c0_i32_0 = arith.constant 0 : i32
    %c0_i32_1 = arith.constant 0 : i32
    return %c0_i32, %c0_i32_0 : i32, i32
  }
  func.func @transform_7(%arg0: i32) -> (i32, i32) {
    %c0_i32 = arith.constant 0 : i32
    %c0_i32_0 = arith.constant 0 : i32
    return %arg0, %c0_i32 : i32, i32
  }
}

module attributes {stable_mosaic.version = 11 : i64} {
  func.func @_window_attn_kernel(%arg0: i32, %arg1: memref<8x16x32xf32, #tpu.memory_space<vmem>>, %arg2: memref<4x16x16xf32, #tpu.memory_space<vmem>>, %arg3: memref<1x32xf32, #tpu.memory_space<vmem>>, %arg4: memref<1x32xf32, #tpu.memory_space<vmem>>, %arg5: memref<32x96xbf16, #tpu.memory_space<vmem>>, %arg6: memref<1x96xf32, #tpu.memory_space<vmem>>, %arg7: memref<32x32xbf16, #tpu.memory_space<vmem>>, %arg8: memref<1x32xf32, #tpu.memory_space<vmem>>, %arg9: memref<8x16x32xf32, #tpu.memory_space<vmem>>) attributes {dimension_semantics = [#tpu.dimension_semantics<parallel>], iteration_bounds = array<i64: 1>, scalar_prefetch = 0 : i64, scratch_operands = 0 : i64, tpu.core_type = #tpu.core_type<tc>, window_params = [{transform_indices = @transform_0, window_bounds = array<i64: 8, 16, 32>}, {pipeline_mode = #tpu.pipeline_mode<synchronous>, transform_indices = @transform_1, window_bounds = array<i64: 4, 16, 16>}, {pipeline_mode = #tpu.pipeline_mode<synchronous>, transform_indices = @transform_2, window_bounds = array<i64: 1, 32>}, {pipeline_mode = #tpu.pipeline_mode<synchronous>, transform_indices = @transform_3, window_bounds = array<i64: 1, 32>}, {pipeline_mode = #tpu.pipeline_mode<synchronous>, transform_indices = @transform_4, window_bounds = array<i64: 32, 96>}, {pipeline_mode = #tpu.pipeline_mode<synchronous>, transform_indices = @transform_5, window_bounds = array<i64: 1, 96>}, {pipeline_mode = #tpu.pipeline_mode<synchronous>, transform_indices = @transform_6, window_bounds = array<i64: 32, 32>}, {pipeline_mode = #tpu.pipeline_mode<synchronous>, transform_indices = @transform_7, window_bounds = array<i64: 1, 32>}, {transform_indices = @transform_8, window_bounds = array<i64: 8, 16, 32>}]} {
    %c0 = arith.constant 0 : index
    %c0_0 = arith.constant 0 : index
    %c0_1 = arith.constant 0 : index
    %0 = vector.load %arg1[%c0, %c0_0, %c0_1] : memref<8x16x32xf32, #tpu.memory_space<vmem>>, vector<8x16x32xf32>
    %1 = vector.shape_cast %0 : vector<8x16x32xf32> to vector<128x32xf32>
    %cst = arith.constant dense<0.000000e+00> : vector<128xf32>
    %2 = vector.multi_reduction <add>, %1, %cst [1] : vector<128x32xf32> to vector<128xf32>
    %3 = vector.shape_cast %2 : vector<128xf32> to vector<128x1xf32>
    %cst_2 = arith.constant 3.200000e+01 : f32
    %4 = vector.broadcast %cst_2 : f32 to vector<128x1xf32>
    %5 = arith.divf %3, %4 : vector<128x1xf32>
    %6 = vector.broadcast %5 : vector<128x1xf32> to vector<128x32xf32>
    %7 = arith.subf %1, %6 : vector<128x32xf32>
    %8 = arith.mulf %7, %7 : vector<128x32xf32>
    %cst_3 = arith.constant dense<0.000000e+00> : vector<128xf32>
    %9 = vector.multi_reduction <add>, %8, %cst_3 [1] : vector<128x32xf32> to vector<128xf32>
    %10 = vector.shape_cast %9 : vector<128xf32> to vector<128x1xf32>
    %cst_4 = arith.constant 3.200000e+01 : f32
    %11 = vector.broadcast %cst_4 : f32 to vector<128x1xf32>
    %12 = arith.divf %10, %11 : vector<128x1xf32>
    %13 = vector.broadcast %5 : vector<128x1xf32> to vector<128x32xf32>
    %14 = arith.subf %1, %13 : vector<128x32xf32>
    %cst_5 = arith.constant 9.99999974E-6 : f32
    %15 = vector.broadcast %cst_5 : f32 to vector<128x1xf32>
    %16 = arith.addf %12, %15 : vector<128x1xf32>
    %17 = math.rsqrt %16 : vector<128x1xf32>
    %18 = vector.broadcast %17 : vector<128x1xf32> to vector<128x32xf32>
    %19 = arith.mulf %14, %18 : vector<128x32xf32>
    %c0_6 = arith.constant 0 : index
    %c0_7 = arith.constant 0 : index
    %20 = vector.load %arg3[%c0_6, %c0_7] : memref<1x32xf32, #tpu.memory_space<vmem>>, vector<1x32xf32>
    %21 = vector.broadcast %20 : vector<1x32xf32> to vector<128x32xf32>
    %22 = arith.mulf %19, %21 : vector<128x32xf32>
    %c0_8 = arith.constant 0 : index
    %c0_9 = arith.constant 0 : index
    %23 = vector.load %arg4[%c0_8, %c0_9] : memref<1x32xf32, #tpu.memory_space<vmem>>, vector<1x32xf32>
    %24 = vector.broadcast %23 : vector<1x32xf32> to vector<128x32xf32>
    %25 = arith.addf %22, %24 : vector<128x32xf32>
    %26 = arith.truncf %25 : vector<128x32xf32> to vector<128x32xbf16>
    %c0_10 = arith.constant 0 : index
    %c0_11 = arith.constant 0 : index
    %27 = vector.load %arg5[%c0_10, %c0_11] : memref<32x96xbf16, #tpu.memory_space<vmem>>, vector<32x96xbf16>
    %cst_12 = arith.constant dense<0.000000e+00> : vector<128x96xf32>
    %28 = tpu.matmul %26, %27, %cst_12 {dimension_numbers = #tpu.dot_dimension_numbers<[1], [0], [0], [1], [0, 0, 1, 1], [], []>} : vector<128x32xbf16>, vector<32x96xbf16>, vector<128x96xf32> -> vector<128x96xf32>
    %c0_13 = arith.constant 0 : index
    %c0_14 = arith.constant 0 : index
    %29 = vector.load %arg6[%c0_13, %c0_14] : memref<1x96xf32, #tpu.memory_space<vmem>>, vector<1x96xf32>
    %30 = vector.broadcast %29 : vector<1x96xf32> to vector<128x96xf32>
    %31 = arith.addf %28, %30 : vector<128x96xf32>
    %c0_15 = arith.constant 0 : index
    %c0_16 = arith.constant 0 : index
    %c0_17 = arith.constant 0 : index
    %32 = vector.load %arg2[%c0_15, %c0_16, %c0_17] : memref<4x16x16xf32, #tpu.memory_space<vmem>>, vector<4x16x16xf32>
    %33 = tpu.concatenate %32, %32 in 0 : vector<4x16x16xf32>, vector<4x16x16xf32> -> vector<8x16x16xf32>
    %34 = vector.extract_strided_slice %31 {offsets = [0, 0], sizes = [128, 8], strides = [1, 1]} : vector<128x96xf32> to vector<128x8xf32>
    %35 = vector.shape_cast %34 : vector<128x8xf32> to vector<8x16x8xf32>
    %36 = vector.extract_strided_slice %31 {offsets = [0, 32], sizes = [128, 8], strides = [1, 1]} : vector<128x96xf32> to vector<128x8xf32>
    %37 = vector.shape_cast %36 : vector<128x8xf32> to vector<8x16x8xf32>
    %38 = vector.extract_strided_slice %31 {offsets = [0, 64], sizes = [128, 8], strides = [1, 1]} : vector<128x96xf32> to vector<128x8xf32>
    %39 = vector.shape_cast %38 : vector<128x8xf32> to vector<8x16x8xf32>
    "tpu.trace_start"() <{level = 10 : i32, message = "wqd,wkd->wqk"}> : () -> ()
    %cst_18 = arith.constant dense<0.000000e+00> : vector<8x16x16xf32>
    %40 = tpu.matmul %35, %37, %cst_18 {dimension_numbers = #tpu.dot_dimension_numbers<[2], [2], [1], [1], [0, 0, 0, 1, 1, 1], [0], [0]>} : vector<8x16x8xf32>, vector<8x16x8xf32>, vector<8x16x16xf32> -> vector<8x16x16xf32>
    "tpu.trace_stop"() : () -> ()
    %cst_19 = arith.constant 0.353553385 : f32
    %41 = vector.broadcast %cst_19 : f32 to vector<8x16x16xf32>
    %42 = arith.mulf %40, %41 : vector<8x16x16xf32>
    %43 = arith.addf %42, %33 : vector<8x16x16xf32>
    %cst_20 = arith.constant dense<0xFF800000> : vector<8x16xf32>
    %44 = vector.multi_reduction <maximumf>, %43, %cst_20 [2] : vector<8x16x16xf32> to vector<8x16xf32>
    %45 = vector.shape_cast %44 : vector<8x16xf32> to vector<8x16x1xf32>
    %46 = vector.broadcast %45 : vector<8x16x1xf32> to vector<8x16x16xf32>
    %47 = arith.subf %43, %46 : vector<8x16x16xf32>
    %48 = math.exp %47 : vector<8x16x16xf32>
    %cst_21 = arith.constant dense<0.000000e+00> : vector<8x16xf32>
    %49 = vector.multi_reduction <add>, %48, %cst_21 [2] : vector<8x16x16xf32> to vector<8x16xf32>
    %50 = vector.shape_cast %49 : vector<8x16xf32> to vector<8x16x1xf32>
    %51 = tpu.reciprocal %50 {approx = true} : vector<8x16x1xf32> -> vector<8x16x1xf32>
    %52 = vector.broadcast %51 : vector<8x16x1xf32> to vector<8x16x16xf32>
    %53 = arith.mulf %48, %52 : vector<8x16x16xf32>
    "tpu.trace_start"() <{level = 10 : i32, message = "wqk,wkd->wqd"}> : () -> ()
    %cst_22 = arith.constant dense<0.000000e+00> : vector<8x16x8xf32>
    %54 = tpu.matmul %53, %39, %cst_22 {dimension_numbers = #tpu.dot_dimension_numbers<[2], [1], [1], [2], [0, 0, 0, 1, 1, 2], [0], [0]>} : vector<8x16x16xf32>, vector<8x16x8xf32>, vector<8x16x8xf32> -> vector<8x16x8xf32>
    "tpu.trace_stop"() : () -> ()
    %55 = vector.shape_cast %54 : vector<8x16x8xf32> to vector<128x8xf32>
    %56 = vector.extract_strided_slice %31 {offsets = [0, 8], sizes = [128, 8], strides = [1, 1]} : vector<128x96xf32> to vector<128x8xf32>
    %57 = vector.shape_cast %56 : vector<128x8xf32> to vector<8x16x8xf32>
    %58 = vector.extract_strided_slice %31 {offsets = [0, 40], sizes = [128, 8], strides = [1, 1]} : vector<128x96xf32> to vector<128x8xf32>
    %59 = vector.shape_cast %58 : vector<128x8xf32> to vector<8x16x8xf32>
    %60 = vector.extract_strided_slice %31 {offsets = [0, 72], sizes = [128, 8], strides = [1, 1]} : vector<128x96xf32> to vector<128x8xf32>
    %61 = vector.shape_cast %60 : vector<128x8xf32> to vector<8x16x8xf32>
    "tpu.trace_start"() <{level = 10 : i32, message = "wqd,wkd->wqk"}> : () -> ()
    %cst_23 = arith.constant dense<0.000000e+00> : vector<8x16x16xf32>
    %62 = tpu.matmul %57, %59, %cst_23 {dimension_numbers = #tpu.dot_dimension_numbers<[2], [2], [1], [1], [0, 0, 0, 1, 1, 1], [0], [0]>} : vector<8x16x8xf32>, vector<8x16x8xf32>, vector<8x16x16xf32> -> vector<8x16x16xf32>
    "tpu.trace_stop"() : () -> ()
    %cst_24 = arith.constant 0.353553385 : f32
    %63 = vector.broadcast %cst_24 : f32 to vector<8x16x16xf32>
    %64 = arith.mulf %62, %63 : vector<8x16x16xf32>
    %65 = arith.addf %64, %33 : vector<8x16x16xf32>
    %cst_25 = arith.constant dense<0xFF800000> : vector<8x16xf32>
    %66 = vector.multi_reduction <maximumf>, %65, %cst_25 [2] : vector<8x16x16xf32> to vector<8x16xf32>
    %67 = vector.shape_cast %66 : vector<8x16xf32> to vector<8x16x1xf32>
    %68 = vector.broadcast %67 : vector<8x16x1xf32> to vector<8x16x16xf32>
    %69 = arith.subf %65, %68 : vector<8x16x16xf32>
    %70 = math.exp %69 : vector<8x16x16xf32>
    %cst_26 = arith.constant dense<0.000000e+00> : vector<8x16xf32>
    %71 = vector.multi_reduction <add>, %70, %cst_26 [2] : vector<8x16x16xf32> to vector<8x16xf32>
    %72 = vector.shape_cast %71 : vector<8x16xf32> to vector<8x16x1xf32>
    %73 = tpu.reciprocal %72 {approx = true} : vector<8x16x1xf32> -> vector<8x16x1xf32>
    %74 = vector.broadcast %73 : vector<8x16x1xf32> to vector<8x16x16xf32>
    %75 = arith.mulf %70, %74 : vector<8x16x16xf32>
    "tpu.trace_start"() <{level = 10 : i32, message = "wqk,wkd->wqd"}> : () -> ()
    %cst_27 = arith.constant dense<0.000000e+00> : vector<8x16x8xf32>
    %76 = tpu.matmul %75, %61, %cst_27 {dimension_numbers = #tpu.dot_dimension_numbers<[2], [1], [1], [2], [0, 0, 0, 1, 1, 2], [0], [0]>} : vector<8x16x16xf32>, vector<8x16x8xf32>, vector<8x16x8xf32> -> vector<8x16x8xf32>
    "tpu.trace_stop"() : () -> ()
    %77 = vector.shape_cast %76 : vector<8x16x8xf32> to vector<128x8xf32>
    %78 = vector.extract_strided_slice %31 {offsets = [0, 16], sizes = [128, 8], strides = [1, 1]} : vector<128x96xf32> to vector<128x8xf32>
    %79 = vector.shape_cast %78 : vector<128x8xf32> to vector<8x16x8xf32>
    %80 = vector.extract_strided_slice %31 {offsets = [0, 48], sizes = [128, 8], strides = [1, 1]} : vector<128x96xf32> to vector<128x8xf32>
    %81 = vector.shape_cast %80 : vector<128x8xf32> to vector<8x16x8xf32>
    %82 = vector.extract_strided_slice %31 {offsets = [0, 80], sizes = [128, 8], strides = [1, 1]} : vector<128x96xf32> to vector<128x8xf32>
    %83 = vector.shape_cast %82 : vector<128x8xf32> to vector<8x16x8xf32>
    "tpu.trace_start"() <{level = 10 : i32, message = "wqd,wkd->wqk"}> : () -> ()
    %cst_28 = arith.constant dense<0.000000e+00> : vector<8x16x16xf32>
    %84 = tpu.matmul %79, %81, %cst_28 {dimension_numbers = #tpu.dot_dimension_numbers<[2], [2], [1], [1], [0, 0, 0, 1, 1, 1], [0], [0]>} : vector<8x16x8xf32>, vector<8x16x8xf32>, vector<8x16x16xf32> -> vector<8x16x16xf32>
    "tpu.trace_stop"() : () -> ()
    %cst_29 = arith.constant 0.353553385 : f32
    %85 = vector.broadcast %cst_29 : f32 to vector<8x16x16xf32>
    %86 = arith.mulf %84, %85 : vector<8x16x16xf32>
    %87 = arith.addf %86, %33 : vector<8x16x16xf32>
    %cst_30 = arith.constant dense<0xFF800000> : vector<8x16xf32>
    %88 = vector.multi_reduction <maximumf>, %87, %cst_30 [2] : vector<8x16x16xf32> to vector<8x16xf32>
    %89 = vector.shape_cast %88 : vector<8x16xf32> to vector<8x16x1xf32>
    %90 = vector.broadcast %89 : vector<8x16x1xf32> to vector<8x16x16xf32>
    %91 = arith.subf %87, %90 : vector<8x16x16xf32>
    %92 = math.exp %91 : vector<8x16x16xf32>
    %cst_31 = arith.constant dense<0.000000e+00> : vector<8x16xf32>
    %93 = vector.multi_reduction <add>, %92, %cst_31 [2] : vector<8x16x16xf32> to vector<8x16xf32>
    %94 = vector.shape_cast %93 : vector<8x16xf32> to vector<8x16x1xf32>
    %95 = tpu.reciprocal %94 {approx = true} : vector<8x16x1xf32> -> vector<8x16x1xf32>
    %96 = vector.broadcast %95 : vector<8x16x1xf32> to vector<8x16x16xf32>
    %97 = arith.mulf %92, %96 : vector<8x16x16xf32>
    "tpu.trace_start"() <{level = 10 : i32, message = "wqk,wkd->wqd"}> : () -> ()
    %cst_32 = arith.constant dense<0.000000e+00> : vector<8x16x8xf32>
    %98 = tpu.matmul %97, %83, %cst_32 {dimension_numbers = #tpu.dot_dimension_numbers<[2], [1], [1], [2], [0, 0, 0, 1, 1, 2], [0], [0]>} : vector<8x16x16xf32>, vector<8x16x8xf32>, vector<8x16x8xf32> -> vector<8x16x8xf32>
    "tpu.trace_stop"() : () -> ()
    %99 = vector.shape_cast %98 : vector<8x16x8xf32> to vector<128x8xf32>
    %100 = vector.extract_strided_slice %31 {offsets = [0, 24], sizes = [128, 8], strides = [1, 1]} : vector<128x96xf32> to vector<128x8xf32>
    %101 = vector.shape_cast %100 : vector<128x8xf32> to vector<8x16x8xf32>
    %102 = vector.extract_strided_slice %31 {offsets = [0, 56], sizes = [128, 8], strides = [1, 1]} : vector<128x96xf32> to vector<128x8xf32>
    %103 = vector.shape_cast %102 : vector<128x8xf32> to vector<8x16x8xf32>
    %104 = vector.extract_strided_slice %31 {offsets = [0, 88], sizes = [128, 8], strides = [1, 1]} : vector<128x96xf32> to vector<128x8xf32>
    %105 = vector.shape_cast %104 : vector<128x8xf32> to vector<8x16x8xf32>
    "tpu.trace_start"() <{level = 10 : i32, message = "wqd,wkd->wqk"}> : () -> ()
    %cst_33 = arith.constant dense<0.000000e+00> : vector<8x16x16xf32>
    %106 = tpu.matmul %101, %103, %cst_33 {dimension_numbers = #tpu.dot_dimension_numbers<[2], [2], [1], [1], [0, 0, 0, 1, 1, 1], [0], [0]>} : vector<8x16x8xf32>, vector<8x16x8xf32>, vector<8x16x16xf32> -> vector<8x16x16xf32>
    "tpu.trace_stop"() : () -> ()
    %cst_34 = arith.constant 0.353553385 : f32
    %107 = vector.broadcast %cst_34 : f32 to vector<8x16x16xf32>
    %108 = arith.mulf %106, %107 : vector<8x16x16xf32>
    %109 = arith.addf %108, %33 : vector<8x16x16xf32>
    %cst_35 = arith.constant dense<0xFF800000> : vector<8x16xf32>
    %110 = vector.multi_reduction <maximumf>, %109, %cst_35 [2] : vector<8x16x16xf32> to vector<8x16xf32>
    %111 = vector.shape_cast %110 : vector<8x16xf32> to vector<8x16x1xf32>
    %112 = vector.broadcast %111 : vector<8x16x1xf32> to vector<8x16x16xf32>
    %113 = arith.subf %109, %112 : vector<8x16x16xf32>
    %114 = math.exp %113 : vector<8x16x16xf32>
    %cst_36 = arith.constant dense<0.000000e+00> : vector<8x16xf32>
    %115 = vector.multi_reduction <add>, %114, %cst_36 [2] : vector<8x16x16xf32> to vector<8x16xf32>
    %116 = vector.shape_cast %115 : vector<8x16xf32> to vector<8x16x1xf32>
    %117 = tpu.reciprocal %116 {approx = true} : vector<8x16x1xf32> -> vector<8x16x1xf32>
    %118 = vector.broadcast %117 : vector<8x16x1xf32> to vector<8x16x16xf32>
    %119 = arith.mulf %114, %118 : vector<8x16x16xf32>
    "tpu.trace_start"() <{level = 10 : i32, message = "wqk,wkd->wqd"}> : () -> ()
    %cst_37 = arith.constant dense<0.000000e+00> : vector<8x16x8xf32>
    %120 = tpu.matmul %119, %105, %cst_37 {dimension_numbers = #tpu.dot_dimension_numbers<[2], [1], [1], [2], [0, 0, 0, 1, 1, 2], [0], [0]>} : vector<8x16x16xf32>, vector<8x16x8xf32>, vector<8x16x8xf32> -> vector<8x16x8xf32>
    "tpu.trace_stop"() : () -> ()
    %121 = vector.shape_cast %120 : vector<8x16x8xf32> to vector<128x8xf32>
    %122 = tpu.concatenate %55, %77, %99, %121 in 1 : vector<128x8xf32>, vector<128x8xf32>, vector<128x8xf32>, vector<128x8xf32> -> vector<128x32xf32>
    %123 = arith.truncf %122 : vector<128x32xf32> to vector<128x32xbf16>
    %c0_38 = arith.constant 0 : index
    %c0_39 = arith.constant 0 : index
    %124 = vector.load %arg7[%c0_38, %c0_39] : memref<32x32xbf16, #tpu.memory_space<vmem>>, vector<32x32xbf16>
    %cst_40 = arith.constant dense<0.000000e+00> : vector<128x32xf32>
    %125 = tpu.matmul %123, %124, %cst_40 {dimension_numbers = #tpu.dot_dimension_numbers<[1], [0], [0], [1], [0, 0, 1, 1], [], []>} : vector<128x32xbf16>, vector<32x32xbf16>, vector<128x32xf32> -> vector<128x32xf32>
    %c0_41 = arith.constant 0 : index
    %c0_42 = arith.constant 0 : index
    %126 = vector.load %arg8[%c0_41, %c0_42] : memref<1x32xf32, #tpu.memory_space<vmem>>, vector<1x32xf32>
    %127 = vector.broadcast %126 : vector<1x32xf32> to vector<128x32xf32>
    %128 = arith.addf %125, %127 : vector<128x32xf32>
    %129 = vector.shape_cast %128 : vector<128x32xf32> to vector<8x16x32xf32>
    %c0_43 = arith.constant 0 : index
    %c0_44 = arith.constant 0 : index
    %c0_45 = arith.constant 0 : index
    %130 = vector.load %arg9[%c0_43, %c0_44, %c0_45] : memref<8x16x32xf32, #tpu.memory_space<vmem>>, vector<8x16x32xf32>
    tpu.vector_store %arg9[%c0_43, %c0_44, %c0_45], %129 {strides = array<i32>} : memref<8x16x32xf32, #tpu.memory_space<vmem>>, vector<8x16x32xf32>,
    return
  }
  func.func @transform_0(%arg0: i32) -> (i32, i32, i32) {
    %c0_i32 = arith.constant 0 : i32
    %c0_i32_0 = arith.constant 0 : i32
    %c0_i32_1 = arith.constant 0 : i32
    return %arg0, %c0_i32, %c0_i32_0 : i32, i32, i32
  }
  func.func @transform_1(%arg0: i32) -> (i32, i32, i32) {
    %c0_i32 = arith.constant 0 : i32
    %c0_i32_0 = arith.constant 0 : i32
    %c0_i32_1 = arith.constant 0 : i32
    %c0_i32_2 = arith.constant 0 : i32
    return %c0_i32, %c0_i32_0, %c0_i32_1 : i32, i32, i32
  }
  func.func @transform_2(%arg0: i32) -> (i32, i32) {
    %c0_i32 = arith.constant 0 : i32
    %c0_i32_0 = arith.constant 0 : i32
    %c0_i32_1 = arith.constant 0 : i32
    return %c0_i32, %c0_i32_0 : i32, i32
  }
  func.func @transform_3(%arg0: i32) -> (i32, i32) {
    %c0_i32 = arith.constant 0 : i32
    %c0_i32_0 = arith.constant 0 : i32
    %c0_i32_1 = arith.constant 0 : i32
    return %c0_i32, %c0_i32_0 : i32, i32
  }
  func.func @transform_4(%arg0: i32) -> (i32, i32) {
    %c0_i32 = arith.constant 0 : i32
    %c0_i32_0 = arith.constant 0 : i32
    %c0_i32_1 = arith.constant 0 : i32
    return %c0_i32, %c0_i32_0 : i32, i32
  }
  func.func @transform_5(%arg0: i32) -> (i32, i32) {
    %c0_i32 = arith.constant 0 : i32
    %c0_i32_0 = arith.constant 0 : i32
    %c0_i32_1 = arith.constant 0 : i32
    return %c0_i32, %c0_i32_0 : i32, i32
  }
  func.func @transform_6(%arg0: i32) -> (i32, i32) {
    %c0_i32 = arith.constant 0 : i32
    %c0_i32_0 = arith.constant 0 : i32
    %c0_i32_1 = arith.constant 0 : i32
    return %c0_i32, %c0_i32_0 : i32, i32
  }
  func.func @transform_7(%arg0: i32) -> (i32, i32) {
    %c0_i32 = arith.constant 0 : i32
    %c0_i32_0 = arith.constant 0 : i32
    %c0_i32_1 = arith.constant 0 : i32
    return %c0_i32, %c0_i32_0 : i32, i32
  }
  func.func @transform_8(%arg0: i32) -> (i32, i32, i32) {
    %c0_i32 = arith.constant 0 : i32
    %c0_i32_0 = arith.constant 0 : i32
    %c0_i32_1 = arith.constant 0 : i32
    return %arg0, %c0_i32, %c0_i32_0 : i32, i32, i32
  }
}

module attributes {stable_mosaic.version = 11 : i64} {
  func.func @_ln_mlp_residual_kernel(%arg0: i32, %arg1: memref<128x32xf32, #tpu.memory_space<vmem>>, %arg2: memref<1x32xf32, #tpu.memory_space<vmem>>, %arg3: memref<1x32xf32, #tpu.memory_space<vmem>>, %arg4: memref<32x128xbf16, #tpu.memory_space<vmem>>, %arg5: memref<1x128xf32, #tpu.memory_space<vmem>>, %arg6: memref<128x32xbf16, #tpu.memory_space<vmem>>, %arg7: memref<1x32xf32, #tpu.memory_space<vmem>>, %arg8: memref<128x32xf32, #tpu.memory_space<vmem>>) attributes {dimension_semantics = [#tpu.dimension_semantics<parallel>], iteration_bounds = array<i64: 1>, scalar_prefetch = 0 : i64, scratch_operands = 0 : i64, tpu.core_type = #tpu.core_type<tc>, window_params = [{transform_indices = @transform_0, window_bounds = array<i64: 128, 32>}, {pipeline_mode = #tpu.pipeline_mode<synchronous>, transform_indices = @transform_1, window_bounds = array<i64: 1, 32>}, {pipeline_mode = #tpu.pipeline_mode<synchronous>, transform_indices = @transform_2, window_bounds = array<i64: 1, 32>}, {pipeline_mode = #tpu.pipeline_mode<synchronous>, transform_indices = @transform_3, window_bounds = array<i64: 32, 128>}, {pipeline_mode = #tpu.pipeline_mode<synchronous>, transform_indices = @transform_4, window_bounds = array<i64: 1, 128>}, {pipeline_mode = #tpu.pipeline_mode<synchronous>, transform_indices = @transform_5, window_bounds = array<i64: 128, 32>}, {pipeline_mode = #tpu.pipeline_mode<synchronous>, transform_indices = @transform_6, window_bounds = array<i64: 1, 32>}, {transform_indices = @transform_7, window_bounds = array<i64: 128, 32>}]} {
    %c0 = arith.constant 0 : index
    %c0_0 = arith.constant 0 : index
    %0 = vector.load %arg1[%c0, %c0_0] : memref<128x32xf32, #tpu.memory_space<vmem>>, vector<128x32xf32>
    %cst = arith.constant dense<0.000000e+00> : vector<128xf32>
    %1 = vector.multi_reduction <add>, %0, %cst [1] : vector<128x32xf32> to vector<128xf32>
    %2 = vector.shape_cast %1 : vector<128xf32> to vector<128x1xf32>
    %cst_1 = arith.constant 3.200000e+01 : f32
    %3 = vector.broadcast %cst_1 : f32 to vector<128x1xf32>
    %4 = arith.divf %2, %3 : vector<128x1xf32>
    %5 = vector.broadcast %4 : vector<128x1xf32> to vector<128x32xf32>
    %6 = arith.subf %0, %5 : vector<128x32xf32>
    %7 = arith.mulf %6, %6 : vector<128x32xf32>
    %cst_2 = arith.constant dense<0.000000e+00> : vector<128xf32>
    %8 = vector.multi_reduction <add>, %7, %cst_2 [1] : vector<128x32xf32> to vector<128xf32>
    %9 = vector.shape_cast %8 : vector<128xf32> to vector<128x1xf32>
    %cst_3 = arith.constant 3.200000e+01 : f32
    %10 = vector.broadcast %cst_3 : f32 to vector<128x1xf32>
    %11 = arith.divf %9, %10 : vector<128x1xf32>
    %12 = vector.broadcast %4 : vector<128x1xf32> to vector<128x32xf32>
    %13 = arith.subf %0, %12 : vector<128x32xf32>
    %cst_4 = arith.constant 9.99999974E-6 : f32
    %14 = vector.broadcast %cst_4 : f32 to vector<128x1xf32>
    %15 = arith.addf %11, %14 : vector<128x1xf32>
    %16 = math.rsqrt %15 : vector<128x1xf32>
    %17 = vector.broadcast %16 : vector<128x1xf32> to vector<128x32xf32>
    %18 = arith.mulf %13, %17 : vector<128x32xf32>
    %c0_5 = arith.constant 0 : index
    %c0_6 = arith.constant 0 : index
    %19 = vector.load %arg2[%c0_5, %c0_6] : memref<1x32xf32, #tpu.memory_space<vmem>>, vector<1x32xf32>
    %20 = vector.broadcast %19 : vector<1x32xf32> to vector<128x32xf32>
    %21 = arith.mulf %18, %20 : vector<128x32xf32>
    %c0_7 = arith.constant 0 : index
    %c0_8 = arith.constant 0 : index
    %22 = vector.load %arg3[%c0_7, %c0_8] : memref<1x32xf32, #tpu.memory_space<vmem>>, vector<1x32xf32>
    %23 = vector.broadcast %22 : vector<1x32xf32> to vector<128x32xf32>
    %24 = arith.addf %21, %23 : vector<128x32xf32>
    %25 = arith.truncf %24 : vector<128x32xf32> to vector<128x32xbf16>
    %c0_9 = arith.constant 0 : index
    %c0_10 = arith.constant 0 : index
    %26 = vector.load %arg4[%c0_9, %c0_10] : memref<32x128xbf16, #tpu.memory_space<vmem>>, vector<32x128xbf16>
    %cst_11 = arith.constant dense<0.000000e+00> : vector<128x128xf32>
    %27 = tpu.matmul %25, %26, %cst_11 {dimension_numbers = #tpu.dot_dimension_numbers<[1], [0], [0], [1], [0, 0, 1, 1], [], []>} : vector<128x32xbf16>, vector<32x128xbf16>, vector<128x128xf32> -> vector<128x128xf32>
    %c0_12 = arith.constant 0 : index
    %c0_13 = arith.constant 0 : index
    %28 = vector.load %arg5[%c0_12, %c0_13] : memref<1x128xf32, #tpu.memory_space<vmem>>, vector<1x128xf32>
    %29 = vector.broadcast %28 : vector<1x128xf32> to vector<128x128xf32>
    %30 = arith.addf %27, %29 : vector<128x128xf32>
    %31 = arith.truncf %30 : vector<128x128xf32> to vector<128x128xbf16>
    %c0_14 = arith.constant 0 : index
    %c0_15 = arith.constant 0 : index
    %32 = vector.load %arg6[%c0_14, %c0_15] : memref<128x32xbf16, #tpu.memory_space<vmem>>, vector<128x32xbf16>
    %cst_16 = arith.constant dense<0.000000e+00> : vector<128x32xf32>
    %33 = tpu.matmul %31, %32, %cst_16 {dimension_numbers = #tpu.dot_dimension_numbers<[1], [0], [0], [1], [0, 0, 1, 1], [], []>} : vector<128x128xbf16>, vector<128x32xbf16>, vector<128x32xf32> -> vector<128x32xf32>
    %c0_17 = arith.constant 0 : index
    %c0_18 = arith.constant 0 : index
    %34 = vector.load %arg7[%c0_17, %c0_18] : memref<1x32xf32, #tpu.memory_space<vmem>>, vector<1x32xf32>
    %35 = vector.broadcast %34 : vector<1x32xf32> to vector<128x32xf32>
    %36 = arith.addf %33, %35 : vector<128x32xf32>
    %37 = arith.addf %0, %36 : vector<128x32xf32>
    %c0_19 = arith.constant 0 : index
    %c0_20 = arith.constant 0 : index
    %38 = vector.load %arg8[%c0_19, %c0_20] : memref<128x32xf32, #tpu.memory_space<vmem>>, vector<128x32xf32>
    tpu.vector_store %arg8[%c0_19, %c0_20], %37 {strides = array<i32>} : memref<128x32xf32, #tpu.memory_space<vmem>>, vector<128x32xf32>,
    return
  }
  func.func @transform_0(%arg0: i32) -> (i32, i32) {
    %c0_i32 = arith.constant 0 : i32
    %c0_i32_0 = arith.constant 0 : i32
    return %arg0, %c0_i32 : i32, i32
  }
  func.func @transform_1(%arg0: i32) -> (i32, i32) {
    %c0_i32 = arith.constant 0 : i32
    %c0_i32_0 = arith.constant 0 : i32
    %c0_i32_1 = arith.constant 0 : i32
    return %c0_i32, %c0_i32_0 : i32, i32
  }
  func.func @transform_2(%arg0: i32) -> (i32, i32) {
    %c0_i32 = arith.constant 0 : i32
    %c0_i32_0 = arith.constant 0 : i32
    %c0_i32_1 = arith.constant 0 : i32
    return %c0_i32, %c0_i32_0 : i32, i32
  }
  func.func @transform_3(%arg0: i32) -> (i32, i32) {
    %c0_i32 = arith.constant 0 : i32
    %c0_i32_0 = arith.constant 0 : i32
    %c0_i32_1 = arith.constant 0 : i32
    return %c0_i32, %c0_i32_0 : i32, i32
  }
  func.func @transform_4(%arg0: i32) -> (i32, i32) {
    %c0_i32 = arith.constant 0 : i32
    %c0_i32_0 = arith.constant 0 : i32
    %c0_i32_1 = arith.constant 0 : i32
    return %c0_i32, %c0_i32_0 : i32, i32
  }
  func.func @transform_5(%arg0: i32) -> (i32, i32) {
    %c0_i32 = arith.constant 0 : i32
    %c0_i32_0 = arith.constant 0 : i32
    %c0_i32_1 = arith.constant 0 : i32
    return %c0_i32, %c0_i32_0 : i32, i32
  }
  func.func @transform_6(%arg0: i32) -> (i32, i32) {
    %c0_i32 = arith.constant 0 : i32
    %c0_i32_0 = arith.constant 0 : i32
    %c0_i32_1 = arith.constant 0 : i32
    return %c0_i32, %c0_i32_0 : i32, i32
  }
  func.func @transform_7(%arg0: i32) -> (i32, i32) {
    %c0_i32 = arith.constant 0 : i32
    %c0_i32_0 = arith.constant 0 : i32
    return %arg0, %c0_i32 : i32, i32
  }
}

</mosaic_0001>

<bundles_post_ra>
// kernel: swin_transformer_block.5
= control target key start
LH: loop header
LB: loop body
LE: loop exit
PB: predicated region body
PF: predicated region fallthrough
CT: control target
= control target key end

     0   :  { %vm43_vm0 = vcmask 261120   ;;  %s1287_s0 = inlined_call_operand.vmem [shape: f32[128,32], index: 0, kind: input, shape index: {}]   ;;  %s1288_s3 = inlined_call_operand.vmem [shape: bf16[32,128], index: 3, kind: input, shape index: {}]   ;;  %s1289_s5 = inlined_call_operand.vmem [shape: bf16[128,32], index: 5, kind: input, shape index: {}]   ;;  %s1290_s1 = inlined_call_operand.vmem [shape: f32[1,32], index: 1, kind: input, shape index: {}]   ;;  %s1291_s2 = inlined_call_operand.vmem [shape: f32[1,32], index: 2, kind: input, shape index: {}]   ;;  %s1292_s4 = inlined_call_operand.vmem [shape: f32[1,128], index: 4, kind: input, shape index: {}]   ;;  %s1293_s6 = inlined_call_operand.vmem [shape: f32[1,32], index: 6, kind: input, shape index: {}]   ;;  %s1294_s7 = inlined_call_operand.vmem [shape: f32[128,32], index: 7, kind: output, shape index: {}]  }
   0x1   :  { %v864_v0 = vld [vmem:[%s1287_s0] sm:$0xff]  ;;  %v869_v1 = vld [vmem:[%s1287_s0 + $0x10] sm:$0xff]  ;;  %v874_v2 = vld [vmem:[%s1287_s0 + $0x8] sm:$0xff] }
   0x2   :  { %v44_v3 = vsel %vm43_vm0, %v864_v0, 0.0  ;;  %v50_v4 = vsel %vm43_vm0, %v869_v1, 0.0  ;;  %v883_v5 = vld [vmem:[%s1287_s0 + $0x18] sm:$0xff]  ;;  %v47_v6 = vsel %vm43_vm0, %v874_v2, 0.0  ;;  %v892_v8 = vld [vmem:[%s1287_s0 + $0x20] sm:$0xff]  ;;  %v897_v9 = vld [vmem:[%s1287_s0 + $0x28] sm:$0xff] }
   0x3   :  { %45 = vadd.xlane.f32.xlu0 %v44_v3  ;;  %51 = vadd.xlane.f32.xlu1 %v50_v4  ;;  %v53_v7 = vsel %vm43_vm0, %v883_v5, 0.0  ;;  %v56_v10 = vsel %vm43_vm0, %v892_v8, 0.0  ;;  %v59_v11 = vsel %vm43_vm0, %v897_v9, 0.0  ;;  %v906_v12 = vld [vmem:[%s1287_s0 + $0x30] sm:$0xff]  ;;  %v911_v13 = vld [vmem:[%s1287_s0 + $0x38] sm:$0xff]  ;;  %v920_v16 = vld [vmem:[%s1287_s0 + $0x40] sm:$0xff] }
   0x4   :  { %v62_v14 = vsel %vm43_vm0, %v906_v12, 0.0  ;;  %v65_v15 = vsel %vm43_vm0, %v911_v13, 0.0  ;;  %v925_v17 = vld [vmem:[%s1287_s0 + $0x48] sm:$0xff]  ;;  %v68_v18 = vsel %vm43_vm0, %v920_v16, 0.0  ;;  %v934_v20 = vld [vmem:[%s1287_s0 + $0x50] sm:$0xff]  ;;  %v939_v21 = vld [vmem:[%s1287_s0 + $0x58] sm:$0xff] }
   0x5   :  { %v71_v19 = vsel %vm43_vm0, %v925_v17, 0.0  ;;  %v74_v22 = vsel %vm43_vm0, %v934_v20, 0.0  ;;  %v77_v23 = vsel %vm43_vm0, %v939_v21, 0.0  ;;  %v948_v24 = vld [vmem:[%s1287_s0 + $0x60] sm:$0xff]  ;;  %v953_v25 = vld [vmem:[%s1287_s0 + $0x68] sm:$0xff]  ;;  %v962_v28 = vld [vmem:[%s1287_s0 + $0x70] sm:$0xff] }
   0x6   :  { %v80_v26 = vsel %vm43_vm0, %v948_v24, 0.0  ;;  %v83_v27 = vsel %vm43_vm0, %v953_v25, 0.0  ;;  %v967_v29 = vld [vmem:[%s1287_s0 + $0x78] sm:$0xff]  ;;  %v86_v30 = vsel %vm43_vm0, %v962_v28, 0.0 }
   0x7   :  { %48 = vadd.xlane.f32.xlu0 %v47_v6  ;;  %54 = vadd.xlane.f32.xlu1 %v53_v7  ;;  %v89_v31 = vsel %vm43_vm0, %v967_v29, 0.0 }
   0xb   :  { %57 = vadd.xlane.f32.xlu0 %v56_v10  ;;  %60 = vadd.xlane.f32.xlu1 %v59_v11 }
   0xf   :  { %63 = vadd.xlane.f32.xlu0 %v62_v14  ;;  %66 = vadd.xlane.f32.xlu1 %v65_v15 }
  0x13   :  { %69 = vadd.xlane.f32.xlu0 %v68_v18  ;;  %72 = vadd.xlane.f32.xlu1 %v71_v19 }
  0x17   :  { %75 = vadd.xlane.f32.xlu0 %v74_v22  ;;  %78 = vadd.xlane.f32.xlu1 %v77_v23 }
  0x1b   :  { %81 = vadd.xlane.f32.xlu0 %v80_v26  ;;  %84 = vadd.xlane.f32.xlu1 %v83_v27 }
  0x1f   :  { %87 = vadd.xlane.f32.xlu0 %v86_v30  ;;  %90 = vadd.xlane.f32.xlu1 %v89_v31 }
  0x90   :  { %v46_v32 = vpop.xlane.xlu0 %45  ;;  %v52_v33 = vpop.xlane.xlu1 %51 }
  0x91   :  { %v93_v34 = vmul.f32 0.03125, %v46_v32  ;;  %v95_v35 = vmul.f32 0.03125, %v52_v33 }
  0x93   :  { %v974_v36 = vsub.f32 %v864_v0, %v93_v34  ;;  %v977_v37 = vsub.f32 %v869_v1, %v95_v35 }
  0x94   :  { %v49_v38 = vpop.xlane.xlu0 %48  ;;  %v55_v39 = vpop.xlane.xlu1 %54 }
  0x95   :  { %v94_v40 = vmul.f32 0.03125, %v49_v38  ;;  %v96_v41 = vmul.f32 0.03125, %v55_v39  ;;  %v125_v42 = vmul.f32 %v974_v36, %v974_v36  ;;  %v127_v43 = vmul.f32 %v977_v37, %v977_v37 }
  0x97   :  { %v984_v44 = vsub.f32 %v874_v2, %v94_v40  ;;  %v987_v45 = vsub.f32 %v883_v5, %v96_v41  ;;  %v141_v46 = vsel %vm43_vm0, %v125_v42, 0.0  ;;  %v147_v49 = vsel %vm43_vm0, %v127_v43, 0.0 }
  0x98   :  { %142 = vadd.xlane.f32.xlu0 %v141_v46  ;;  %v58_v47 = vpop.xlane.xlu0 %57  ;;  %v61_v48 = vpop.xlane.xlu1 %60 }
  0x99   :  { %v97_v50 = vmul.f32 0.03125, %v58_v47  ;;  %v98_v51 = vmul.f32 0.03125, %v61_v48  ;;  %v126_v52 = vmul.f32 %v984_v44, %v984_v44  ;;  %v128_v53 = vmul.f32 %v987_v45, %v987_v45 }
  0x9b   :  { %v996_v54 = vsub.f32 %v892_v8, %v97_v50  ;;  %v999_v55 = vsub.f32 %v897_v9, %v98_v51  ;;  %v144_v56 = vsel %vm43_vm0, %v126_v52, 0.0  ;;  %v150_v59 = vsel %vm43_vm0, %v128_v53, 0.0 }
  0x9c   :  { %148 = vadd.xlane.f32.xlu0 %v147_v49  ;;  %145 = vadd.xlane.f32.xlu1 %v144_v56  ;;  %v64_v57 = vpop.xlane.xlu0 %63  ;;  %v67_v58 = vpop.xlane.xlu1 %66 }
  0x9d   :  { %v99_v60 = vmul.f32 0.03125, %v64_v57  ;;  %v100_v61 = vmul.f32 0.03125, %v67_v58  ;;  %v129_v62 = vmul.f32 %v996_v54, %v996_v54  ;;  %v130_v63 = vmul.f32 %v999_v55, %v999_v55 }
  0x9f   :  { %v1008_v3 = vsub.f32 %v906_v12, %v99_v60  ;;  %v1011_v4 = vsub.f32 %v911_v13, %v100_v61  ;;  %v153_v6 = vsel %vm43_vm0, %v129_v62, 0.0  ;;  %v156_v11 = vsel %vm43_vm0, %v130_v63, 0.0 }
  0xa0   :  { %151 = vadd.xlane.f32.xlu1 %v150_v59  ;;  %154 = vadd.xlane.f32.xlu0 %v153_v6  ;;  %v70_v7 = vpop.xlane.xlu0 %69  ;;  %v73_v10 = vpop.xlane.xlu1 %72 }
  0xa1   :  { %v101_v14 = vmul.f32 0.03125, %v70_v7  ;;  %v102_v15 = vmul.f32 0.03125, %v73_v10  ;;  %v131_v18 = vmul.f32 %v1008_v3, %v1008_v3  ;;  %v132_v19 = vmul.f32 %v1011_v4, %v1011_v4 }
  0xa3   :  { %v1020_v22 = vsub.f32 %v920_v16, %v101_v14  ;;  %v1023_v23 = vsub.f32 %v925_v17, %v102_v15  ;;  %v159_v26 = vsel %vm43_vm0, %v131_v18, 0.0  ;;  %v162_v31 = vsel %vm43_vm0, %v132_v19, 0.0  ;;  %v779_v18 = vld [vmem:[%s1288_s3] sm:$0xff]   ;;  %v780_v19 = vld [vmem:[%s1288_s3 + $0x8] sm:$0xff]  }
  0xa4   :  { %157 = vadd.xlane.f32.xlu1 %v156_v11  ;;  %160 = vadd.xlane.f32.xlu0 %v159_v26  ;;  %v76_v27 = vpop.xlane.xlu0 %75  ;;  %v79_v30 = vpop.xlane.xlu1 %78  ;;  %v1078_v26 = vld [vmem:[%s1289_s5] sm:$0xff]  }
  0xa5   :  { %v103_v32 = vmul.f32 0.03125, %v76_v27  ;;  %v104_v33 = vmul.f32 0.03125, %v79_v30  ;;  %v133_v34 = vmul.f32 %v1020_v22, %v1020_v22  ;;  %v134_v35 = vmul.f32 %v1023_v23, %v1023_v23  ;;  %711 = vmatprep.subr.bf16.mxu0 %v779_v18  ;;  %v1084_v27 = vld [vmem:[%s1289_s5 + $0x8] sm:$0xff]   ;;  %763 = vmatprep.subr.bf16.mxu1 %v1078_v26  ;;  %v1092_v30 = vld [vmem:[%s1289_s5 + $0x10] sm:$0xff]  }
  0xa6   :  { %712 = vmatpush3.bf16.msra.mxu0 %v779_v18  ;;  %771 = vmatpush3.bf16.msra.mxu1 %v1078_v26 }
  0xa7   :  { %v1032_v38 = vsub.f32 %v934_v20, %v103_v32  ;;  %v1035_v39 = vsub.f32 %v939_v21, %v104_v33  ;;  %v165_v40 = vsel %vm43_vm0, %v133_v34, 0.0  ;;  %v168_v43 = vsel %vm43_vm0, %v134_v35, 0.0  ;;  %713 = vmatprep.subr.bf16.mxu0 %v780_v19  ;;  %764 = vmatprep.subr.bf16.mxu1 %v1084_v27  ;;  %v1106_v32 = vld [vmem:[%s1289_s5 + $0x20] sm:$0xff]   ;;  %v1113_v33 = vld [vmem:[%s1289_s5 + $0x28] sm:$0xff]  }
  0xa8   :  { %163 = vadd.xlane.f32.xlu1 %v162_v31  ;;  %166 = vadd.xlane.f32.xlu0 %v165_v40  ;;  %v82_v41 = vpop.xlane.xlu0 %81  ;;  %v85_v42 = vpop.xlane.xlu1 %84  ;;  %v1099_v31 = vld [vmem:[%s1289_s5 + $0x18] sm:$0xff]  }
  0xa9   :  { %v105_v46 = vmul.f32 0.03125, %v82_v41  ;;  %v106_v47 = vmul.f32 0.03125, %v85_v42  ;;  %v135_v48 = vmul.f32 %v1032_v38, %v1032_v38  ;;  %v136_v49 = vmul.f32 %v1035_v39, %v1035_v39 }
  0xaa   :  { %714 = vmatpush3.bf16.msra.mxu0 %v780_v19  ;;  %772 = vmatpush3.bf16.msra.mxu1 %v1084_v27 }
  0xab   :  { %v1044_v50 = vsub.f32 %v948_v24, %v105_v46  ;;  %v1047_v51 = vsub.f32 %v953_v25, %v106_v47  ;;  %v171_v52 = vsel %vm43_vm0, %v135_v48, 0.0  ;;  %v174_v57 = vsel %vm43_vm0, %v136_v49, 0.0  ;;  %731 = vmatprep.subr.bf16.mxu0 %v1078_v26  ;;  %765 = vmatprep.subr.bf16.mxu1 %v1092_v30 }
  0xac   :  { %169 = vadd.xlane.f32.xlu1 %v168_v43  ;;  %172 = vadd.xlane.f32.xlu0 %v171_v52  ;;  %v88_v53 = vpop.xlane.xlu0 %87  ;;  %v91_v56 = vpop.xlane.xlu1 %90 }
  0xad   :  { %v107_v58 = vmul.f32 0.03125, %v88_v53  ;;  %v108_v59 = vmul.f32 0.03125, %v91_v56  ;;  %v137_v60 = vmul.f32 %v1044_v50, %v1044_v50  ;;  %v138_v61 = vmul.f32 %v1047_v51, %v1047_v51 }
  0xae   :  { %773 = vmatpush3.bf16.msra.mxu1 %v1092_v30 }
  0xaf   :  { %v1056_v62 = vsub.f32 %v962_v28, %v107_v58  ;;  %v1059_v63 = vsub.f32 %v967_v29, %v108_v59  ;;  %v177_v6 = vsel %vm43_vm0, %v137_v60, 0.0  ;;  %v180_v7 = vsel %vm43_vm0, %v138_v61, 0.0  ;;  %766 = vmatprep.subr.bf16.mxu1 %v1099_v31 }
  0xb0   :  { %175 = vadd.xlane.f32.xlu1 %v174_v57  ;;  %178 = vadd.xlane.f32.xlu0 %v177_v6 }
  0xb1   :  { %v139_v10 = vmul.f32 %v1056_v62, %v1056_v62  ;;  %v140_v11 = vmul.f32 %v1059_v63, %v1059_v63 }
  0xb2   :  { %774 = vmatpush3.bf16.msra.mxu1 %v1099_v31 }
  0xb3   :  { %v183_v14 = vsel %vm43_vm0, %v139_v10, 0.0  ;;  %v186_v15 = vsel %vm43_vm0, %v140_v11, 0.0  ;;  %767 = vmatprep.subr.bf16.mxu1 %v1106_v32 }
  0xb4   :  { %181 = vadd.xlane.f32.xlu1 %v180_v7  ;;  %184 = vadd.xlane.f32.xlu0 %v183_v14 }
  0xb6   :  { %775 = vmatpush3.bf16.msra.mxu1 %v1106_v32 }
  0xb7   :  { %768 = vmatprep.subr.bf16.mxu1 %v1113_v33 }
  0xb8   :  { %187 = vadd.xlane.f32.xlu1 %v186_v15 }
  0xba   :  { %776 = vmatpush3.bf16.msra.mxu1 %v1113_v33 }
 0x125   :  { %v143_v34 = vpop.xlane.xlu0 %142 }
 0x126   :  { %v189_v35 = vmul.f32 0.03125, %v143_v34 }
 0x128   :  { %v205_v40 = vadd.f32 1e-05, %v189_v35  ;;  %v1122_v35 = vld [vmem:[%s1290_s1] ss:$0 sm:$0xff] }
 0x129   :  { %v146_v41 = vpop.xlane.xlu1 %145  ;;  %v149_v42 = vpop.xlane.xlu0 %148 }
 0x12a   :  { %789 = vrsqrt.f32 %v205_v40  ;;  %v190_v43 = vmul.f32 0.03125, %v146_v41  ;;  %v191_v46 = vmul.f32 0.03125, %v149_v42 }
 0x12c   :  { %v206_v47 = vadd.f32 1e-05, %v190_v43  ;;  %v207_v48 = vadd.f32 1e-05, %v191_v46 }
 0x12d   :  { %v152_v49 = vpop.xlane.xlu1 %151  ;;  %v155_v52 = vpop.xlane.xlu0 %154 }
 0x12e   :  { %791 = vrsqrt.f32 %v206_v47  ;;  %v192_v53 = vmul.f32 0.03125, %v152_v49  ;;  %v193_v56 = vmul.f32 0.03125, %v155_v52 }
 0x12f   :  { %793 = vrsqrt.f32 %v207_v48 }
 0x130   :  { %v208_v57 = vadd.f32 1e-05, %v192_v53  ;;  %v209_v58 = vadd.f32 1e-05, %v193_v56  ;;  %v1130_v56 = vld [vmem:[%s1291_s2] ss:$0 sm:$0xff] }
 0x131   :  { %v158_v59 = vpop.xlane.xlu1 %157  ;;  %v161_v60 = vpop.xlane.xlu0 %160 }
 0x132   :  { %795 = vrsqrt.f32 %v208_v57  ;;  %v194_v61 = vmul.f32 0.03125, %v158_v59  ;;  %v195_v6 = vmul.f32 0.03125, %v161_v60 }
 0x133   :  { %797 = vrsqrt.f32 %v209_v58 }
 0x134   :  { %v790_v7 = vpop.eup %789  ;;  %v210_v10 = vadd.f32 1e-05, %v194_v61  ;;  %v211_v11 = vadd.f32 1e-05, %v195_v6 }
 0x135   :  { %v164_v14 = vpop.xlane.xlu1 %163  ;;  %v167_v15 = vpop.xlane.xlu0 %166  ;;  %v237_v18 = vmul.f32 %v790_v7, %v974_v36 }
 0x136   :  { %799 = vrsqrt.f32 %v210_v10  ;;  %v196_v19 = vmul.f32 0.03125, %v164_v14  ;;  %v197_v34 = vmul.f32 0.03125, %v167_v15 }
 0x137   :  { %801 = vrsqrt.f32 %v211_v11  ;;  %v260_v49 = vmul.f32 %v1122_v35, %v237_v18 }
 0x138   :  { %v792_v40 = vpop.eup %791  ;;  %v212_v41 = vadd.f32 1e-05, %v196_v19  ;;  %v213_v42 = vadd.f32 1e-05, %v197_v34 }
 0x139   :  { %v794_v43 = vpop.eup %793  ;;  %v170_v46 = vpop.xlane.xlu1 %169  ;;  %v238_v48 = vmul.f32 %v792_v40, %v984_v44 }
 0x13a   :  { %v173_v47 = vpop.xlane.xlu0 %172  ;;  %v239_v36 = vmul.f32 %v794_v43, %v977_v37  ;;  %803 = vrsqrt.f32 %v212_v41  ;;  %v198_v52 = vmul.f32 0.03125, %v170_v46  ;;  %v283_v37 = vadd.f32 %v1130_v56, %v260_v49 }
 0x13b   :  { %v199_v53 = vmul.f32 0.03125, %v173_v47  ;;  %805 = vrsqrt.f32 %v213_v42  ;;  %v261_v57 = vmul.f32 %v1122_v35, %v238_v48 }
 0x13c   :  { %v796_v58 = vpop.eup %795  ;;  %v214_v59 = vadd.f32 1e-05, %v198_v52  ;;  %v262_v11 = vmul.f32 %v1122_v35, %v239_v36 }
 0x13d   :  { %v215_v60 = vadd.f32 1e-05, %v199_v53  ;;  %v798_v61 = vpop.eup %797  ;;  %v240_v44 = vmul.f32 %v796_v58, %v987_v45  ;;  %v176_v6 = vpop.xlane.xlu1 %175  ;;  %v284_v10 = vadd.f32 %v1130_v56, %v261_v57 }
 0x13e   :  { %v179_v7 = vpop.xlane.xlu0 %178  ;;  %v241_v14 = vmul.f32 %v798_v61, %v996_v54  ;;  %807 = vrsqrt.f32 %v214_v59  ;;  %v200_v15 = vmul.f32 0.03125, %v176_v6  ;;  %v285_v48 = vadd.f32 %v1130_v56, %v262_v11 }
 0x13f   :  { %v201_v18 = vmul.f32 0.03125, %v179_v7  ;;  %809 = vrsqrt.f32 %v215_v60  ;;  %v299_v19 = vpack.c.bf16 %v284_v10, %v283_v37  ;;  %v263_v34 = vmul.f32 %v1122_v35, %v240_v44 }
 0x140   :  { %v800_v40 = vpop.eup %799  ;;  %v216_v41 = vadd.f32 1e-05, %v200_v15  ;;  %v264_v49 = vmul.f32 %v1122_v35, %v241_v14 }
 0x141   :  { %v217_v45 = vadd.f32 1e-05, %v201_v18  ;;  %v802_v42 = vpop.eup %801  ;;  %v242_v43 = vmul.f32 %v800_v40, %v999_v55  ;;  %v182_v46 = vpop.xlane.xlu1 %181  ;;  %715 = vmatprep.mubr.msk.bf16.mxu0 %vm43_vm0, %v299_v19  ;;  %v286_v54 = vadd.f32 %v1130_v56, %v263_v34 }
 0x142   :  { %v185_v47 = vpop.xlane.xlu0 %184  ;;  %v243_v36 = vmul.f32 %v802_v42, %v1008_v3  ;;  %811 = vrsqrt.f32 %v216_v41  ;;  %v202_v52 = vmul.f32 0.03125, %v182_v46  ;;  %v287_v7 = vadd.f32 %v1130_v56, %v264_v49 }
 0x143   :  { %v203_v53 = vmul.f32 0.03125, %v185_v47  ;;  %813 = vrsqrt.f32 %v217_v45  ;;  %v300_v57 = vpack.c.bf16 %v286_v54, %v285_v48  ;;  %v265_v58 = vmul.f32 %v1122_v35, %v242_v43 }
 0x144   :  { %v804_v55 = vpop.eup %803  ;;  %v218_v59 = vadd.f32 1e-05, %v202_v52  ;;  %v266_v37 = vmul.f32 %v1122_v35, %v243_v36 }
 0x145   :  { %v219_v60 = vadd.f32 1e-05, %v203_v53  ;;  %v806_v61 = vpop.eup %805  ;;  %v244_v44 = vmul.f32 %v804_v55, %v1011_v4  ;;  %v188_v6 = vpop.xlane.xlu1 %187  ;;  %716 = vmatmul.mubr.msk.bf16.vlgmr.msra.gmra.mrb[0].mxu0 %vm43_vm0, %v300_v57  ;;  %v288_v3 = vadd.f32 %v1130_v56, %v265_v58 }
 0x146   :  { %v245_v10 = vmul.f32 %v806_v61, %v1020_v22  ;;  %815 = vrsqrt.f32 %v218_v59  ;;  %v204_v11 = vmul.f32 0.03125, %v188_v6  ;;  %732 = vmatpush3.bf16.msra.mxu0 %v1078_v26  ;;  %v289_v40 = vadd.f32 %v1130_v56, %v266_v37 }
 0x147   :  { %817 = vrsqrt.f32 %v219_v60  ;;  %v301_v14 = vpack.c.bf16 %v288_v3, %v287_v7  ;;  %v267_v15 = vmul.f32 %v1122_v35, %v244_v44  ;;  %733 = vmatprep.subr.bf16.mxu0 %v1084_v27 }
 0x148   :  { %v808_v4 = vpop.eup %807  ;;  %v220_v18 = vadd.f32 1e-05, %v204_v11  ;;  %v268_v41 = vmul.f32 %v1122_v35, %v245_v10 }
 0x149   :  { %v810_v19 = vpop.eup %809  ;;  %v246_v34 = vmul.f32 %v808_v4, %v1023_v23  ;;  %719 = vmatprep.mubr.msk.bf16.mxu0 %vm43_vm0, %v301_v14  ;;  %v290_v22 = vadd.f32 %v1130_v56, %v267_v15 }
 0x14a   :  { %v247_v26 = vmul.f32 %v810_v19, %v1032_v38  ;;  %819 = vrsqrt.f32 %v220_v18  ;;  %734 = vmatpush3.bf16.msra.mxu0 %v1084_v27  ;;  %v291_v47 = vadd.f32 %v1130_v56, %v268_v41 }
 0x14b   :  { %v302_v45 = vpack.c.bf16 %v290_v22, %v289_v40  ;;  %v269_v42 = vmul.f32 %v1122_v35, %v246_v34  ;;  %735 = vmatprep.subr.bf16.mxu0 %v1092_v30 }
 0x14c   :  { %v812_v43 = vpop.eup %811  ;;  %v270_v38 = vmul.f32 %v1122_v35, %v247_v26 }
 0x14d   :  { %v814_v23 = vpop.eup %813  ;;  %v248_v46 = vmul.f32 %v812_v43, %v1035_v39  ;;  %720 = vmatmul.mubr.msk.bf16.gmra.mrb[4].mxu0 %vm43_vm0, %v302_v45  ;;  %v292_v48 = vadd.f32 %v1130_v56, %v269_v42 }
 0x14e   :  { %v249_v54 = vmul.f32 %v814_v23, %v1044_v50  ;;  %736 = vmatpush3.bf16.msra.mxu0 %v1092_v30  ;;  %v293_v53 = vadd.f32 %v1130_v56, %v270_v38 }
 0x14f   :  { %v303_v27 = vpack.c.bf16 %v292_v48, %v291_v47  ;;  %v271_v49 = vmul.f32 %v1122_v35, %v248_v46  ;;  %737 = vmatprep.subr.bf16.mxu0 %v1099_v31 }
 0x150   :  { %v816_v36 = vpop.eup %815  ;;  %v272_v58 = vmul.f32 %v1122_v35, %v249_v54 }
 0x151   :  { %v818_v52 = vpop.eup %817  ;;  %v250_v39 = vmul.f32 %v816_v36, %v1047_v51  ;;  %723 = vmatprep.mubr.msk.bf16.mxu0 %vm43_vm0, %v303_v27  ;;  %v294_v57 = vadd.f32 %v1130_v56, %v271_v49 }
 0x152   :  { %v251_v50 = vmul.f32 %v818_v52, %v1056_v62  ;;  %738 = vmatpush3.bf16.msra.mxu0 %v1099_v31  ;;  %v295_v60 = vadd.f32 %v1130_v56, %v272_v58 }
 0x153   :  { %v304_v30 = vpack.c.bf16 %v294_v57, %v293_v53  ;;  %v273_v55 = vmul.f32 %v1122_v35, %v250_v39  ;;  %739 = vmatprep.subr.bf16.mxu0 %v1106_v32 }
 0x154   :  { %v820_v59 = vpop.eup %819  ;;  %v274_v44 = vmul.f32 %v1122_v35, %v251_v50 }
 0x155   :  { %v252_v51 = vmul.f32 %v820_v59, %v1059_v63  ;;  %724 = vmatmul.mubr.msk.bf16.gmra.mrb[8].mxu0 %vm43_vm0, %v304_v30  ;;  %v296_v61 = vadd.f32 %v1130_v56, %v273_v55 }
 0x156   :  { %740 = vmatpush3.bf16.msra.mxu0 %v1106_v32  ;;  %v297_v6 = vadd.f32 %v1130_v56, %v274_v44  ;;  %v787_v32 = vld [vmem:[%s1289_s5 + $0x30] sm:$0xff]  }
 0x157   :  { %v305_v62 = vpack.c.bf16 %v296_v61, %v295_v60  ;;  %v275_v31 = vmul.f32 %v1122_v35, %v252_v51  ;;  %741 = vmatprep.subr.bf16.mxu0 %v1113_v33  ;;  %769 = vmatprep.subr.bf16.mxu1 %v787_v32  ;;  %v788_v35 = vld [vmem:[%s1289_s5 + $0x38] sm:$0xff]  }
 0x158   :  { %777 = vmatpush3.bf16.msra.mxu1 %v787_v32 }
 0x159   :  { %727 = vmatprep.mubr.msk.bf16.mxu0 %vm43_vm0, %v305_v62  ;;  %v298_v63 = vadd.f32 %v1130_v56, %v275_v31  ;;  %770 = vmatprep.subr.bf16.mxu1 %v788_v35  ;;  %v665_v56 = vld [vmem:[%s1292_s4] ss:$0 sm:$0xff] }
 0x15a   :  { %742 = vmatpush3.bf16.msra.mxu0 %v1113_v33  ;;  %v676_v62 = vld [vmem:[%s1293_s6] ss:$0 sm:$0xff] }
 0x15b   :  { %v306_v7 = vpack.c.bf16 %v298_v63, %v297_v6  ;;  %743 = vmatprep.subr.bf16.mxu0 %v787_v32 }
 0x15c   :  { %778 = vmatpush3.bf16.msra.mxu1 %v788_v35 }
 0x15d   :  { %728 = vmatmul.mubr.msk.bf16.gmra.mrb[12].mxu0 %vm43_vm0, %v306_v7 }
 0x15e   :  { %744 = vmatpush3.bf16.msra.mxu0 %v787_v32 }
 0x15f   :  { %745 = vmatprep.subr.bf16.mxu0 %v788_v35 }
 0x162   :  { %746 = vmatpush3.bf16.msra.mxu0 %v788_v35 }
 0x218   :  { %v717_v33 = vpop.f32.mrb[0].mxu0 }
 0x219   :  { %v388_v3 = vpop.f32.mrb[1].mxu0  ;;  %v397_v10 = vadd.f32 %v717_v33, %v665_v56 }
 0x21a   :  { %v718_v37 = vpop.f32.mrb[2].mxu0  ;;  %v389_v15 = vadd.f32 %v665_v56, %v388_v3 }
 0x21b   :  { %v400_v11 = vadd.f32 %v718_v37, %v665_v56  ;;  %v391_v14 = vpop.f32.mrb[3].mxu0 }
 0x21c   :  { %v392_v4 = vadd.f32 %v665_v56, %v391_v14 }
 0x21d   :  { %v452_v18 = vpack.c.bf16 %v400_v11, %v397_v10 }
 0x21e   :  { %v451_v19 = vpack.c.bf16 %v392_v4, %v389_v15 }
 0x220   :  { %v721_v34 = vpop.f32.mrb[4].mxu0  ;;  %747 = vmatprep.mubr.bf16.mxu0 %v451_v19 }
 0x221   :  { %v404_v40 = vpop.f32.mrb[5].mxu0  ;;  %748 = vmatmul.mubr.bf16.vlgmr.msra.gmra.mrb[16].mxu0 %v452_v18  ;;  %v413_v41 = vadd.f32 %v721_v34, %v665_v56 }
 0x222   :  { %v722_v22 = vpop.f32.mrb[6].mxu0  ;;  %v405_v42 = vadd.f32 %v665_v56, %v404_v40 }
 0x223   :  { %v416_v26 = vadd.f32 %v722_v22, %v665_v56  ;;  %v407_v45 = vpop.f32.mrb[7].mxu0 }
 0x224   :  { %v408_v43 = vadd.f32 %v665_v56, %v407_v45 }
 0x225   :  { %v454_v23 = vpack.c.bf16 %v416_v26, %v413_v41 }
 0x226   :  { %v453_v46 = vpack.c.bf16 %v408_v43, %v405_v42 }
 0x228   :  { %v725_v47 = vpop.f32.mrb[8].mxu0  ;;  %751 = vmatprep.mubr.bf16.mxu1 %v453_v46 }
 0x229   :  { %v420_v48 = vpop.f32.mrb[9].mxu0  ;;  %752 = vmatmul.mubr.bf16.vlgmr.msra.gmra.mrb[0].mxu1 %v454_v23  ;;  %v429_v54 = vadd.f32 %v725_v47, %v665_v56 }
 0x22a   :  { %v726_v38 = vpop.f32.mrb[10].mxu0  ;;  %v421_v36 = vadd.f32 %v665_v56, %v420_v48 }
 0x22b   :  { %v432_v27 = vadd.f32 %v726_v38, %v665_v56  ;;  %v423_v49 = vpop.f32.mrb[11].mxu0 }
 0x22c   :  { %v424_v52 = vadd.f32 %v665_v56, %v423_v49 }
 0x22d   :  { %v456_v39 = vpack.c.bf16 %v432_v27, %v429_v54 }
 0x22e   :  { %v455_v53 = vpack.c.bf16 %v424_v52, %v421_v36 }
 0x230   :  { %v729_v57 = vpop.f32.mrb[12].mxu0  ;;  %755 = vmatprep.mubr.bf16.mxu1 %v455_v53 }
 0x231   :  { %v436_v58 = vpop.f32.mrb[13].mxu0  ;;  %756 = vmatmul.mubr.bf16.gmra.mrb[4].mxu1 %v456_v39  ;;  %v445_v30 = vadd.f32 %v729_v57, %v665_v56 }
 0x232   :  { %v730_v50 = vpop.f32.mrb[14].mxu0  ;;  %v437_v51 = vadd.f32 %v665_v56, %v436_v58 }
 0x233   :  { %v448_v55 = vadd.f32 %v730_v50, %v665_v56  ;;  %v439_v59 = vpop.f32.mrb[15].mxu0 }
 0x234   :  { %v440_v60 = vadd.f32 %v665_v56, %v439_v59 }
 0x235   :  { %v458_v61 = vpack.c.bf16 %v448_v55, %v445_v30 }
 0x236   :  { %v457_v44 = vpack.c.bf16 %v440_v60, %v437_v51 }
 0x238   :  { %759 = vmatprep.mubr.bf16.mxu1 %v457_v44 }
 0x239   :  { %760 = vmatmul.mubr.bf16.gmra.mrb[8].mxu1 %v458_v61 }
 0x2f4   :  { %v749_v31 = vpop.f32.mrb[16].mxu0 }
 0x2f5   :  { %v573_v6 = vadd.f32 %v749_v31, %v676_v62  ;;  %v564_v63 = vpop.f32.mrb[17].mxu0 }
 0x2f6   :  { %v565_v7 = vadd.f32 %v676_v62, %v564_v63  ;;  %v750_v32 = vpop.f32.mrb[18].mxu0 }
 0x2f7   :  { %v629_v35 = vadd.f32 %v573_v6, %v869_v1  ;;  %v576_v33 = vadd.f32 %v750_v32, %v676_v62  ;;  %v567_v3 = vpop.f32.mrb[19].mxu0 }
 0x2f8   :  { %v627_v37 = vadd.f32 %v565_v7, %v864_v0  ;;  %v568_v56 = vadd.f32 %v676_v62, %v567_v3 }
 0x2f9   :  { %645 = vst.msk [vmem:[%s1294_s7 + $0x10] sm:$0xff] %vm43_vm0, %v629_v35  ;;  %v630_v10 = vadd.f32 %v576_v33, %v883_v5 }
 0x2fa   :  { %643 = vst.msk [vmem:[%s1294_s7] sm:$0xff] %vm43_vm0, %v627_v37  ;;  %v628_v11 = vadd.f32 %v568_v56, %v874_v2 }
 0x2fb   :  { %646 = vst.msk [vmem:[%s1294_s7 + $0x18] sm:$0xff] %vm43_vm0, %v630_v10 }
 0x2fc   :  { %644 = vst.msk [vmem:[%s1294_s7 + $0x8] sm:$0xff] %vm43_vm0, %v628_v11  ;;  %v753_v0 = vpop.f32.mrb[0].mxu1 }
 0x2fd   :  { %v589_v1 = vadd.f32 %v753_v0, %v676_v62  ;;  %v580_v5 = vpop.f32.mrb[1].mxu1 }
 0x2fe   :  { %v581_v14 = vadd.f32 %v676_v62, %v580_v5  ;;  %v754_v15 = vpop.f32.mrb[2].mxu1 }
 0x2ff   :  { %v633_v4 = vadd.f32 %v589_v1, %v906_v12  ;;  %v592_v18 = vadd.f32 %v754_v15, %v676_v62  ;;  %v583_v19 = vpop.f32.mrb[3].mxu1 }
 0x300   :  { %v631_v2 = vadd.f32 %v581_v14, %v892_v8  ;;  %v584_v34 = vadd.f32 %v676_v62, %v583_v19 }
 0x301   :  { %649 = vst.msk [vmem:[%s1294_s7 + $0x30] sm:$0xff] %vm43_vm0, %v633_v4  ;;  %v634_v40 = vadd.f32 %v592_v18, %v911_v13 }
 0x302   :  { %647 = vst.msk [vmem:[%s1294_s7 + $0x20] sm:$0xff] %vm43_vm0, %v631_v2  ;;  %v632_v22 = vadd.f32 %v584_v34, %v897_v9 }
 0x303   :  { %650 = vst.msk [vmem:[%s1294_s7 + $0x38] sm:$0xff] %vm43_vm0, %v634_v40 }
 0x304   :  { %648 = vst.msk [vmem:[%s1294_s7 + $0x28] sm:$0xff] %vm43_vm0, %v632_v22  ;;  %v757_v8 = vpop.f32.mrb[4].mxu1 }
 0x305   :  { %v605_v12 = vadd.f32 %v757_v8, %v676_v62  ;;  %v596_v13 = vpop.f32.mrb[5].mxu1 }
 0x306   :  { %v597_v41 = vadd.f32 %v676_v62, %v596_v13  ;;  %v758_v26 = vpop.f32.mrb[6].mxu1 }
 0x307   :  { %v637_v45 = vadd.f32 %v605_v12, %v934_v20  ;;  %v608_v42 = vadd.f32 %v758_v26, %v676_v62  ;;  %v599_v43 = vpop.f32.mrb[7].mxu1 }
 0x308   :  { %v635_v9 = vadd.f32 %v597_v41, %v920_v16  ;;  %v600_v23 = vadd.f32 %v676_v62, %v599_v43 }
 0x309   :  { %653 = vst.msk [vmem:[%s1294_s7 + $0x50] sm:$0xff] %vm43_vm0, %v637_v45  ;;  %v638_v46 = vadd.f32 %v608_v42, %v939_v21 }
 0x30a   :  { %651 = vst.msk [vmem:[%s1294_s7 + $0x40] sm:$0xff] %vm43_vm0, %v635_v9  ;;  %v636_v47 = vadd.f32 %v600_v23, %v925_v17 }
 0x30b   :  { %654 = vst.msk [vmem:[%s1294_s7 + $0x58] sm:$0xff] %vm43_vm0, %v638_v46 }
 0x30c   :  { %652 = vst.msk [vmem:[%s1294_s7 + $0x48] sm:$0xff] %vm43_vm0, %v636_v47  ;;  %v761_v16 = vpop.f32.mrb[8].mxu1 }
 0x30d   :  { %v621_v20 = vadd.f32 %v761_v16, %v676_v62  ;;  %v612_v21 = vpop.f32.mrb[9].mxu1 }
 0x30e   :  { %v613_v48 = vadd.f32 %v676_v62, %v612_v21  ;;  %v762_v38 = vpop.f32.mrb[10].mxu1 }
 0x30f   :  { %v641_v54 = vadd.f32 %v621_v20, %v962_v28  ;;  %v624_v27 = vadd.f32 %v762_v38, %v676_v62  ;;  %v615_v49 = vpop.f32.mrb[11].mxu1 }
 0x310   :  { %v639_v17 = vadd.f32 %v613_v48, %v948_v24  ;;  %v616_v36 = vadd.f32 %v676_v62, %v615_v49 }
 0x311   :  { %657 = vst.msk [vmem:[%s1294_s7 + $0x70] sm:$0xff] %vm43_vm0, %v641_v54  ;;  %v642_v52 = vadd.f32 %v624_v27, %v967_v29 }
 0x312   :  { %655 = vst.msk [vmem:[%s1294_s7 + $0x60] sm:$0xff] %vm43_vm0, %v639_v17  ;;  %v640_v39 = vadd.f32 %v616_v36, %v953_v25 }
 0x313   :  { %658 = vst.msk [vmem:[%s1294_s7 + $0x78] sm:$0xff] %vm43_vm0, %v642_v52 }
 0x314   :  { %656 = vst.msk [vmem:[%s1294_s7 + $0x68] sm:$0xff] %vm43_vm0, %v640_v39 }

// kernel: swin_transformer_block.7
= control target key start
LH: loop header
LB: loop body
LE: loop exit
PB: predicated region body
PF: predicated region fallthrough
CT: control target
= control target key end

     0   :  { %vm44_vm0 = vcmask 261120   ;;  %s1294_s0 = inlined_call_operand.vmem [shape: f32[128,32], index: 0, kind: input, shape index: {}]   ;;  %s1295_s1 = inlined_call_operand.vmem [shape: f32[1,32], index: 1, kind: input, shape index: {}]   ;;  %s1296_s2 = inlined_call_operand.vmem [shape: f32[1,32], index: 2, kind: input, shape index: {}]   ;;  %s1297_s3 = inlined_call_operand.vmem [shape: bf16[32,128], index: 3, kind: input, shape index: {}]   ;;  %s1298_s4 = inlined_call_operand.vmem [shape: f32[1,128], index: 4, kind: input, shape index: {}]   ;;  %s1299_s5 = inlined_call_operand.vmem [shape: bf16[128,32], index: 5, kind: input, shape index: {}]   ;;  %s1300_s6 = inlined_call_operand.vmem [shape: f32[1,32], index: 6, kind: input, shape index: {}]   ;;  %s1301_s7 = inlined_call_operand.hbm [shape: f32[128,32], index: 7, kind: output, shape index: {}]  }
   0x1   :  { %v907_v0 = vld [vmem:[%s1294_s0] sm:$0xff]  ;;  %v912_v1 = vld [vmem:[%s1294_s0 + $0x10] sm:$0xff]  ;;  %v917_v2 = vld [vmem:[%s1294_s0 + $0x8] sm:$0xff] }
   0x2   :  { %v45_v3 = vsel %vm44_vm0, %v907_v0, 0.0  ;;  %v51_v4 = vsel %vm44_vm0, %v912_v1, 0.0  ;;  %v926_v5 = vld [vmem:[%s1294_s0 + $0x18] sm:$0xff]  ;;  %v931_v6 = vld [vmem:[%s1294_s0 + $0x20] sm:$0xff]  ;;  %v936_v7 = vld [vmem:[%s1294_s0 + $0x28] sm:$0xff]  ;;  %v48_v8 = vsel %vm44_vm0, %v917_v2, 0.0 }
   0x3   :  { %46 = vadd.xlane.f32.xlu0 %v45_v3  ;;  %52 = vadd.xlane.f32.xlu1 %v51_v4  ;;  %v54_v9 = vsel %vm44_vm0, %v926_v5, 0.0  ;;  %v945_v10 = vld [vmem:[%s1294_s0 + $0x30] sm:$0xff]  ;;  %v950_v11 = vld [vmem:[%s1294_s0 + $0x38] sm:$0xff]  ;;  %v57_v12 = vsel %vm44_vm0, %v931_v6, 0.0  ;;  %v60_v13 = vsel %vm44_vm0, %v936_v7, 0.0  ;;  %v963_v16 = vld [vmem:[%s1294_s0 + $0x40] sm:$0xff] }
   0x4   :  { %v63_v14 = vsel %vm44_vm0, %v945_v10, 0.0  ;;  %v66_v15 = vsel %vm44_vm0, %v950_v11, 0.0  ;;  %v968_v17 = vld [vmem:[%s1294_s0 + $0x48] sm:$0xff] }
   0x7   :  { %49 = vadd.xlane.f32.xlu0 %v48_v8  ;;  %55 = vadd.xlane.f32.xlu1 %v54_v9 }
   0xb   :  { %58 = vadd.xlane.f32.xlu0 %v57_v12  ;;  %61 = vadd.xlane.f32.xlu1 %v60_v13 }
   0xc   :  { %12 = vsyncpa [#allocation3], 0  ;;  %v69_v18 = vsel %vm44_vm0, %v963_v16, 0.0  ;;  %v72_v19 = vsel %vm44_vm0, %v968_v17, 0.0  ;;  %v977_v20 = vld [vmem:[%s1294_s0 + $0x50] sm:$0xff]  ;;  %v982_v21 = vld [vmem:[%s1294_s0 + $0x58] sm:$0xff] }
   0xd   :  { %v75_v22 = vsel %vm44_vm0, %v977_v20, 0.0  ;;  %v78_v23 = vsel %vm44_vm0, %v982_v21, 0.0  ;;  %v991_v24 = vld [vmem:[%s1294_s0 + $0x60] sm:$0xff]  ;;  %v996_v25 = vld [vmem:[%s1294_s0 + $0x68] sm:$0xff]  ;;  %v1005_v28 = vld [vmem:[%s1294_s0 + $0x70] sm:$0xff] }
   0xe   :  { %v81_v26 = vsel %vm44_vm0, %v991_v24, 0.0  ;;  %v84_v27 = vsel %vm44_vm0, %v996_v25, 0.0  ;;  %v1010_v29 = vld [vmem:[%s1294_s0 + $0x78] sm:$0xff]  ;;  %v87_v30 = vsel %vm44_vm0, %v1005_v28, 0.0 }
   0xf   :  { %64 = vadd.xlane.f32.xlu0 %v63_v14  ;;  %67 = vadd.xlane.f32.xlu1 %v66_v15  ;;  %v90_v31 = vsel %vm44_vm0, %v1010_v29, 0.0 }
  0x13   :  { %70 = vadd.xlane.f32.xlu0 %v69_v18  ;;  %73 = vadd.xlane.f32.xlu1 %v72_v19 }
  0x17   :  { %76 = vadd.xlane.f32.xlu0 %v75_v22  ;;  %79 = vadd.xlane.f32.xlu1 %v78_v23 }
  0x1b   :  { %82 = vadd.xlane.f32.xlu0 %v81_v26  ;;  %85 = vadd.xlane.f32.xlu1 %v84_v27 }
  0x1f   :  { %88 = vadd.xlane.f32.xlu0 %v87_v30  ;;  %91 = vadd.xlane.f32.xlu1 %v90_v31 }
  0x90   :  { %v47_v32 = vpop.xlane.xlu0 %46  ;;  %v53_v33 = vpop.xlane.xlu1 %52 }
  0x91   :  { %v94_v34 = vmul.f32 0.03125, %v47_v32  ;;  %v96_v35 = vmul.f32 0.03125, %v53_v33 }
  0x93   :  { %v1017_v36 = vsub.f32 %v907_v0, %v94_v34  ;;  %v1020_v37 = vsub.f32 %v912_v1, %v96_v35 }
  0x94   :  { %v50_v38 = vpop.xlane.xlu0 %49  ;;  %v56_v39 = vpop.xlane.xlu1 %55 }
  0x95   :  { %v95_v40 = vmul.f32 0.03125, %v50_v38  ;;  %v97_v41 = vmul.f32 0.03125, %v56_v39  ;;  %v126_v42 = vmul.f32 %v1017_v36, %v1017_v36  ;;  %v128_v43 = vmul.f32 %v1020_v37, %v1020_v37 }
  0x97   :  { %v1027_v44 = vsub.f32 %v917_v2, %v95_v40  ;;  %v1030_v45 = vsub.f32 %v926_v5, %v97_v41  ;;  %v142_v46 = vsel %vm44_vm0, %v126_v42, 0.0  ;;  %v148_v49 = vsel %vm44_vm0, %v128_v43, 0.0 }
  0x98   :  { %143 = vadd.xlane.f32.xlu0 %v142_v46  ;;  %v59_v47 = vpop.xlane.xlu0 %58  ;;  %v62_v48 = vpop.xlane.xlu1 %61 }
  0x99   :  { %v98_v50 = vmul.f32 0.03125, %v59_v47  ;;  %v99_v51 = vmul.f32 0.03125, %v62_v48  ;;  %v127_v52 = vmul.f32 %v1027_v44, %v1027_v44  ;;  %v129_v53 = vmul.f32 %v1030_v45, %v1030_v45 }
  0x9b   :  { %v1039_v54 = vsub.f32 %v931_v6, %v98_v50  ;;  %v1042_v55 = vsub.f32 %v936_v7, %v99_v51  ;;  %v145_v56 = vsel %vm44_vm0, %v127_v52, 0.0  ;;  %v151_v59 = vsel %vm44_vm0, %v129_v53, 0.0 }
  0x9c   :  { %149 = vadd.xlane.f32.xlu0 %v148_v49  ;;  %146 = vadd.xlane.f32.xlu1 %v145_v56  ;;  %v65_v57 = vpop.xlane.xlu0 %64  ;;  %v68_v58 = vpop.xlane.xlu1 %67 }
  0x9d   :  { %v100_v60 = vmul.f32 0.03125, %v65_v57  ;;  %v101_v61 = vmul.f32 0.03125, %v68_v58  ;;  %v130_v62 = vmul.f32 %v1039_v54, %v1039_v54  ;;  %v131_v63 = vmul.f32 %v1042_v55, %v1042_v55 }
  0x9f   :  { %v1051_v3 = vsub.f32 %v945_v10, %v100_v60  ;;  %v1054_v4 = vsub.f32 %v950_v11, %v101_v61  ;;  %v154_v8 = vsel %vm44_vm0, %v130_v62, 0.0  ;;  %v157_v13 = vsel %vm44_vm0, %v131_v63, 0.0 }
  0xa0   :  { %152 = vadd.xlane.f32.xlu1 %v151_v59  ;;  %155 = vadd.xlane.f32.xlu0 %v154_v8  ;;  %v71_v9 = vpop.xlane.xlu0 %70  ;;  %v74_v12 = vpop.xlane.xlu1 %73 }
  0xa1   :  { %v102_v14 = vmul.f32 0.03125, %v71_v9  ;;  %v103_v15 = vmul.f32 0.03125, %v74_v12  ;;  %v132_v18 = vmul.f32 %v1051_v3, %v1051_v3  ;;  %v133_v19 = vmul.f32 %v1054_v4, %v1054_v4 }
  0xa3   :  { %v1063_v22 = vsub.f32 %v963_v16, %v102_v14  ;;  %v1066_v23 = vsub.f32 %v968_v17, %v103_v15  ;;  %v160_v26 = vsel %vm44_vm0, %v132_v18, 0.0  ;;  %v163_v31 = vsel %vm44_vm0, %v133_v19, 0.0  ;;  %v795_v18 = vld [vmem:[%s1297_s3] sm:$0xff]   ;;  %v796_v19 = vld [vmem:[%s1297_s3 + $0x8] sm:$0xff]  }
  0xa4   :  { %158 = vadd.xlane.f32.xlu1 %v157_v13  ;;  %161 = vadd.xlane.f32.xlu0 %v160_v26  ;;  %v77_v27 = vpop.xlane.xlu0 %76  ;;  %v80_v30 = vpop.xlane.xlu1 %79  ;;  %v1121_v26 = vld [vmem:[%s1299_s5] sm:$0xff]  }
  0xa5   :  { %v104_v32 = vmul.f32 0.03125, %v77_v27  ;;  %v105_v33 = vmul.f32 0.03125, %v80_v30  ;;  %v134_v34 = vmul.f32 %v1063_v22, %v1063_v22  ;;  %v135_v35 = vmul.f32 %v1066_v23, %v1066_v23  ;;  %724 = vmatprep.subr.bf16.mxu0 %v795_v18  ;;  %v1127_v27 = vld [vmem:[%s1299_s5 + $0x8] sm:$0xff]   ;;  %776 = vmatprep.subr.bf16.mxu1 %v1121_v26  ;;  %v1135_v30 = vld [vmem:[%s1299_s5 + $0x10] sm:$0xff]  }
  0xa6   :  { %725 = vmatpush3.bf16.msra.mxu0 %v795_v18  ;;  %784 = vmatpush3.bf16.msra.mxu1 %v1121_v26 }
  0xa7   :  { %v1075_v38 = vsub.f32 %v977_v20, %v104_v32  ;;  %v1078_v39 = vsub.f32 %v982_v21, %v105_v33  ;;  %v166_v40 = vsel %vm44_vm0, %v134_v34, 0.0  ;;  %v169_v43 = vsel %vm44_vm0, %v135_v35, 0.0  ;;  %726 = vmatprep.subr.bf16.mxu0 %v796_v19  ;;  %777 = vmatprep.subr.bf16.mxu1 %v1127_v27  ;;  %v1149_v32 = vld [vmem:[%s1299_s5 + $0x20] sm:$0xff]   ;;  %v1156_v33 = vld [vmem:[%s1299_s5 + $0x28] sm:$0xff]  }
  0xa8   :  { %164 = vadd.xlane.f32.xlu1 %v163_v31  ;;  %167 = vadd.xlane.f32.xlu0 %v166_v40  ;;  %v83_v41 = vpop.xlane.xlu0 %82  ;;  %v86_v42 = vpop.xlane.xlu1 %85  ;;  %v1142_v31 = vld [vmem:[%s1299_s5 + $0x18] sm:$0xff]  }
  0xa9   :  { %v106_v46 = vmul.f32 0.03125, %v83_v41  ;;  %v107_v47 = vmul.f32 0.03125, %v86_v42  ;;  %v136_v48 = vmul.f32 %v1075_v38, %v1075_v38  ;;  %v137_v49 = vmul.f32 %v1078_v39, %v1078_v39 }
  0xaa   :  { %727 = vmatpush3.bf16.msra.mxu0 %v796_v19  ;;  %785 = vmatpush3.bf16.msra.mxu1 %v1127_v27 }
  0xab   :  { %v1087_v50 = vsub.f32 %v991_v24, %v106_v46  ;;  %v1090_v51 = vsub.f32 %v996_v25, %v107_v47  ;;  %v172_v52 = vsel %vm44_vm0, %v136_v48, 0.0  ;;  %v175_v57 = vsel %vm44_vm0, %v137_v49, 0.0  ;;  %744 = vmatprep.subr.bf16.mxu0 %v1121_v26  ;;  %778 = vmatprep.subr.bf16.mxu1 %v1135_v30 }
  0xac   :  { %170 = vadd.xlane.f32.xlu1 %v169_v43  ;;  %173 = vadd.xlane.f32.xlu0 %v172_v52  ;;  %v89_v53 = vpop.xlane.xlu0 %88  ;;  %v92_v56 = vpop.xlane.xlu1 %91 }
  0xad   :  { %v108_v58 = vmul.f32 0.03125, %v89_v53  ;;  %v109_v59 = vmul.f32 0.03125, %v92_v56  ;;  %v138_v60 = vmul.f32 %v1087_v50, %v1087_v50  ;;  %v139_v61 = vmul.f32 %v1090_v51, %v1090_v51 }
  0xae   :  { %786 = vmatpush3.bf16.msra.mxu1 %v1135_v30 }
  0xaf   :  { %v1099_v62 = vsub.f32 %v1005_v28, %v108_v58  ;;  %v1102_v63 = vsub.f32 %v1010_v29, %v109_v59  ;;  %v178_v8 = vsel %vm44_vm0, %v138_v60, 0.0  ;;  %v181_v9 = vsel %vm44_vm0, %v139_v61, 0.0  ;;  %779 = vmatprep.subr.bf16.mxu1 %v1142_v31 }
  0xb0   :  { %176 = vadd.xlane.f32.xlu1 %v175_v57  ;;  %179 = vadd.xlane.f32.xlu0 %v178_v8 }
  0xb1   :  { %v140_v12 = vmul.f32 %v1099_v62, %v1099_v62  ;;  %v141_v13 = vmul.f32 %v1102_v63, %v1102_v63 }
  0xb2   :  { %787 = vmatpush3.bf16.msra.mxu1 %v1142_v31 }
  0xb3   :  { %v184_v14 = vsel %vm44_vm0, %v140_v12, 0.0  ;;  %v187_v15 = vsel %vm44_vm0, %v141_v13, 0.0  ;;  %780 = vmatprep.subr.bf16.mxu1 %v1149_v32 }
  0xb4   :  { %182 = vadd.xlane.f32.xlu1 %v181_v9  ;;  %185 = vadd.xlane.f32.xlu0 %v184_v14 }
  0xb6   :  { %788 = vmatpush3.bf16.msra.mxu1 %v1149_v32 }
  0xb7   :  { %781 = vmatprep.subr.bf16.mxu1 %v1156_v33 }
  0xb8   :  { %188 = vadd.xlane.f32.xlu1 %v187_v15 }
  0xba   :  { %789 = vmatpush3.bf16.msra.mxu1 %v1156_v33 }
 0x125   :  { %v144_v34 = vpop.xlane.xlu0 %143 }
 0x126   :  { %v190_v35 = vmul.f32 0.03125, %v144_v34 }
 0x128   :  { %v206_v40 = vadd.f32 1e-05, %v190_v35  ;;  %v1165_v35 = vld [vmem:[%s1295_s1] ss:$0 sm:$0xff] }
 0x129   :  { %v147_v41 = vpop.xlane.xlu1 %146  ;;  %v150_v42 = vpop.xlane.xlu0 %149 }
 0x12a   :  { %805 = vrsqrt.f32 %v206_v40  ;;  %v191_v43 = vmul.f32 0.03125, %v147_v41  ;;  %v192_v46 = vmul.f32 0.03125, %v150_v42 }
 0x12c   :  { %v207_v47 = vadd.f32 1e-05, %v191_v43  ;;  %v208_v48 = vadd.f32 1e-05, %v192_v46 }
 0x12d   :  { %v153_v49 = vpop.xlane.xlu1 %152  ;;  %v156_v52 = vpop.xlane.xlu0 %155 }
 0x12e   :  { %807 = vrsqrt.f32 %v207_v47  ;;  %v193_v53 = vmul.f32 0.03125, %v153_v49  ;;  %v194_v56 = vmul.f32 0.03125, %v156_v52 }
 0x12f   :  { %809 = vrsqrt.f32 %v208_v48 }
 0x130   :  { %v209_v57 = vadd.f32 1e-05, %v193_v53  ;;  %v210_v58 = vadd.f32 1e-05, %v194_v56  ;;  %v1173_v56 = vld [vmem:[%s1296_s2] ss:$0 sm:$0xff] }
 0x131   :  { %v159_v59 = vpop.xlane.xlu1 %158  ;;  %v162_v60 = vpop.xlane.xlu0 %161 }
 0x132   :  { %811 = vrsqrt.f32 %v209_v57  ;;  %v195_v61 = vmul.f32 0.03125, %v159_v59  ;;  %v196_v8 = vmul.f32 0.03125, %v162_v60 }
 0x133   :  { %813 = vrsqrt.f32 %v210_v58 }
 0x134   :  { %v806_v9 = vpop.eup %805  ;;  %v211_v12 = vadd.f32 1e-05, %v195_v61  ;;  %v212_v13 = vadd.f32 1e-05, %v196_v8 }
 0x135   :  { %v165_v14 = vpop.xlane.xlu1 %164  ;;  %v168_v15 = vpop.xlane.xlu0 %167  ;;  %v238_v18 = vmul.f32 %v806_v9, %v1017_v36 }
 0x136   :  { %815 = vrsqrt.f32 %v211_v12  ;;  %v197_v19 = vmul.f32 0.03125, %v165_v14  ;;  %v198_v34 = vmul.f32 0.03125, %v168_v15 }
 0x137   :  { %817 = vrsqrt.f32 %v212_v13  ;;  %v261_v49 = vmul.f32 %v1165_v35, %v238_v18 }
 0x138   :  { %v808_v40 = vpop.eup %807  ;;  %v213_v41 = vadd.f32 1e-05, %v197_v19  ;;  %v214_v42 = vadd.f32 1e-05, %v198_v34 }
 0x139   :  { %v810_v43 = vpop.eup %809  ;;  %v171_v46 = vpop.xlane.xlu1 %170  ;;  %v239_v48 = vmul.f32 %v808_v40, %v1027_v44 }
 0x13a   :  { %v174_v47 = vpop.xlane.xlu0 %173  ;;  %v240_v36 = vmul.f32 %v810_v43, %v1020_v37  ;;  %819 = vrsqrt.f32 %v213_v41  ;;  %v199_v52 = vmul.f32 0.03125, %v171_v46  ;;  %v284_v37 = vadd.f32 %v1173_v56, %v261_v49 }
 0x13b   :  { %v200_v53 = vmul.f32 0.03125, %v174_v47  ;;  %821 = vrsqrt.f32 %v214_v42  ;;  %v262_v57 = vmul.f32 %v1165_v35, %v239_v48 }
 0x13c   :  { %v812_v58 = vpop.eup %811  ;;  %v215_v59 = vadd.f32 1e-05, %v199_v52  ;;  %v263_v13 = vmul.f32 %v1165_v35, %v240_v36 }
 0x13d   :  { %v216_v60 = vadd.f32 1e-05, %v200_v53  ;;  %v814_v61 = vpop.eup %813  ;;  %v241_v44 = vmul.f32 %v812_v58, %v1030_v45  ;;  %v177_v8 = vpop.xlane.xlu1 %176  ;;  %v285_v12 = vadd.f32 %v1173_v56, %v262_v57 }
 0x13e   :  { %v180_v9 = vpop.xlane.xlu0 %179  ;;  %v242_v14 = vmul.f32 %v814_v61, %v1039_v54  ;;  %823 = vrsqrt.f32 %v215_v59  ;;  %v201_v15 = vmul.f32 0.03125, %v177_v8  ;;  %v286_v48 = vadd.f32 %v1173_v56, %v263_v13 }
 0x13f   :  { %v202_v18 = vmul.f32 0.03125, %v180_v9  ;;  %825 = vrsqrt.f32 %v216_v60  ;;  %v300_v19 = vpack.c.bf16 %v285_v12, %v284_v37  ;;  %v264_v34 = vmul.f32 %v1165_v35, %v241_v44 }
 0x140   :  { %v816_v40 = vpop.eup %815  ;;  %v217_v41 = vadd.f32 1e-05, %v201_v15  ;;  %v265_v49 = vmul.f32 %v1165_v35, %v242_v14 }
 0x141   :  { %v218_v45 = vadd.f32 1e-05, %v202_v18  ;;  %v818_v42 = vpop.eup %817  ;;  %v243_v43 = vmul.f32 %v816_v40, %v1042_v55  ;;  %v183_v46 = vpop.xlane.xlu1 %182  ;;  %728 = vmatprep.mubr.msk.bf16.mxu0 %vm44_vm0, %v300_v19  ;;  %v287_v54 = vadd.f32 %v1173_v56, %v264_v34 }
 0x142   :  { %v186_v47 = vpop.xlane.xlu0 %185  ;;  %v244_v36 = vmul.f32 %v818_v42, %v1051_v3  ;;  %827 = vrsqrt.f32 %v217_v41  ;;  %v203_v52 = vmul.f32 0.03125, %v183_v46  ;;  %v288_v9 = vadd.f32 %v1173_v56, %v265_v49 }
 0x143   :  { %v204_v53 = vmul.f32 0.03125, %v186_v47  ;;  %829 = vrsqrt.f32 %v218_v45  ;;  %v301_v57 = vpack.c.bf16 %v287_v54, %v286_v48  ;;  %v266_v58 = vmul.f32 %v1165_v35, %v243_v43 }
 0x144   :  { %v820_v55 = vpop.eup %819  ;;  %v219_v59 = vadd.f32 1e-05, %v203_v52  ;;  %v267_v37 = vmul.f32 %v1165_v35, %v244_v36 }
 0x145   :  { %v220_v60 = vadd.f32 1e-05, %v204_v53  ;;  %v822_v61 = vpop.eup %821  ;;  %v245_v44 = vmul.f32 %v820_v55, %v1054_v4  ;;  %v189_v8 = vpop.xlane.xlu1 %188  ;;  %729 = vmatmul.mubr.msk.bf16.vlgmr.msra.gmra.mrb[0].mxu0 %vm44_vm0, %v301_v57  ;;  %v289_v3 = vadd.f32 %v1173_v56, %v266_v58 }
 0x146   :  { %v246_v12 = vmul.f32 %v822_v61, %v1063_v22  ;;  %831 = vrsqrt.f32 %v219_v59  ;;  %v205_v13 = vmul.f32 0.03125, %v189_v8  ;;  %745 = vmatpush3.bf16.msra.mxu0 %v1121_v26  ;;  %v290_v40 = vadd.f32 %v1173_v56, %v267_v37 }
 0x147   :  { %833 = vrsqrt.f32 %v220_v60  ;;  %v302_v14 = vpack.c.bf16 %v289_v3, %v288_v9  ;;  %v268_v15 = vmul.f32 %v1165_v35, %v245_v44  ;;  %746 = vmatprep.subr.bf16.mxu0 %v1127_v27 }
 0x148   :  { %v824_v4 = vpop.eup %823  ;;  %v221_v18 = vadd.f32 1e-05, %v205_v13  ;;  %v269_v41 = vmul.f32 %v1165_v35, %v246_v12 }
 0x149   :  { %v826_v19 = vpop.eup %825  ;;  %v247_v34 = vmul.f32 %v824_v4, %v1066_v23  ;;  %732 = vmatprep.mubr.msk.bf16.mxu0 %vm44_vm0, %v302_v14  ;;  %v291_v22 = vadd.f32 %v1173_v56, %v268_v15 }
 0x14a   :  { %v248_v26 = vmul.f32 %v826_v19, %v1075_v38  ;;  %835 = vrsqrt.f32 %v221_v18  ;;  %747 = vmatpush3.bf16.msra.mxu0 %v1127_v27  ;;  %v292_v47 = vadd.f32 %v1173_v56, %v269_v41 }
 0x14b   :  { %v303_v45 = vpack.c.bf16 %v291_v22, %v290_v40  ;;  %v270_v42 = vmul.f32 %v1165_v35, %v247_v34  ;;  %748 = vmatprep.subr.bf16.mxu0 %v1135_v30 }
 0x14c   :  { %v828_v43 = vpop.eup %827  ;;  %v271_v38 = vmul.f32 %v1165_v35, %v248_v26 }
 0x14d   :  { %v830_v23 = vpop.eup %829  ;;  %v249_v46 = vmul.f32 %v828_v43, %v1078_v39  ;;  %733 = vmatmul.mubr.msk.bf16.gmra.mrb[4].mxu0 %vm44_vm0, %v303_v45  ;;  %v293_v48 = vadd.f32 %v1173_v56, %v270_v42 }
 0x14e   :  { %v250_v54 = vmul.f32 %v830_v23, %v1087_v50  ;;  %749 = vmatpush3.bf16.msra.mxu0 %v1135_v30  ;;  %v294_v53 = vadd.f32 %v1173_v56, %v271_v38 }
 0x14f   :  { %v304_v27 = vpack.c.bf16 %v293_v48, %v292_v47  ;;  %v272_v49 = vmul.f32 %v1165_v35, %v249_v46  ;;  %750 = vmatprep.subr.bf16.mxu0 %v1142_v31 }
 0x150   :  { %v832_v36 = vpop.eup %831  ;;  %v273_v58 = vmul.f32 %v1165_v35, %v250_v54 }
 0x151   :  { %v834_v52 = vpop.eup %833  ;;  %v251_v39 = vmul.f32 %v832_v36, %v1090_v51  ;;  %736 = vmatprep.mubr.msk.bf16.mxu0 %vm44_vm0, %v304_v27  ;;  %v295_v57 = vadd.f32 %v1173_v56, %v272_v49 }
 0x152   :  { %v252_v50 = vmul.f32 %v834_v52, %v1099_v62  ;;  %751 = vmatpush3.bf16.msra.mxu0 %v1142_v31  ;;  %v296_v60 = vadd.f32 %v1173_v56, %v273_v58 }
 0x153   :  { %v305_v30 = vpack.c.bf16 %v295_v57, %v294_v53  ;;  %v274_v55 = vmul.f32 %v1165_v35, %v251_v39  ;;  %752 = vmatprep.subr.bf16.mxu0 %v1149_v32 }
 0x154   :  { %v836_v59 = vpop.eup %835  ;;  %v275_v44 = vmul.f32 %v1165_v35, %v252_v50 }
 0x155   :  { %v253_v51 = vmul.f32 %v836_v59, %v1102_v63  ;;  %737 = vmatmul.mubr.msk.bf16.gmra.mrb[8].mxu0 %vm44_vm0, %v305_v30  ;;  %v297_v61 = vadd.f32 %v1173_v56, %v274_v55 }
 0x156   :  { %753 = vmatpush3.bf16.msra.mxu0 %v1149_v32  ;;  %v298_v8 = vadd.f32 %v1173_v56, %v275_v44  ;;  %v803_v32 = vld [vmem:[%s1299_s5 + $0x30] sm:$0xff]  }
 0x157   :  { %v306_v62 = vpack.c.bf16 %v297_v61, %v296_v60  ;;  %v276_v31 = vmul.f32 %v1165_v35, %v253_v51  ;;  %754 = vmatprep.subr.bf16.mxu0 %v1156_v33  ;;  %782 = vmatprep.subr.bf16.mxu1 %v803_v32  ;;  %v804_v35 = vld [vmem:[%s1299_s5 + $0x38] sm:$0xff]  }
 0x158   :  { %790 = vmatpush3.bf16.msra.mxu1 %v803_v32 }
 0x159   :  { %740 = vmatprep.mubr.msk.bf16.mxu0 %vm44_vm0, %v306_v62  ;;  %v299_v63 = vadd.f32 %v1173_v56, %v276_v31  ;;  %783 = vmatprep.subr.bf16.mxu1 %v804_v35  ;;  %v678_v56 = vld [vmem:[%s1298_s4] ss:$0 sm:$0xff] }
 0x15a   :  { %755 = vmatpush3.bf16.msra.mxu0 %v1156_v33  ;;  %v689_v62 = vld [vmem:[%s1300_s6] ss:$0 sm:$0xff]  ;;  %s861_s6 = smov [#allocation2]  }
 0x15b   :  { %v307_v9 = vpack.c.bf16 %v299_v63, %v298_v8  ;;  %756 = vmatprep.subr.bf16.mxu0 %v803_v32  ;;  %s665_s9 = sshll.u32 %s861_s6, 4  ;;  %s666_s9 = int_to_ptr.vmem [resolvable:$true] %s665_s9 }
 0x15c   :  { %791 = vmatpush3.bf16.msra.mxu1 %v804_v35  ;;  %s837_s0 = scalar_lea.vmem %s666_s9, 2048  ;;  %p842_p1 = scmp.lt.s32.totalorder %s666_s9, %s666_s9 }
 0x15d   :  { %741 = vmatmul.mubr.msk.bf16.gmra.mrb[12].mxu0 %vm44_vm0, %v307_v9  ;;  %p838_p0 = scmp.ne.s32.totalorder %s666_s9, %s837_s0  ;;  %p843_p2 = scmp.lt.s32.totalorder %s837_s0, %s837_s0 }
 0x15e   :  { %757 = vmatpush3.bf16.msra.mxu0 %v803_v32 }
 0x15f   :  { %758 = vmatprep.subr.bf16.mxu0 %v804_v35  ;;  %p844_p3 = por %p843_p2, %p842_p1 }
 0x161   :  { %p845_p4 = pnand %p844_p3, %p838_p0 }
 0x162   :  { %759 = vmatpush3.bf16.msra.mxu0 %v804_v35 }
 0x218   :  { %v730_v33 = vpop.f32.mrb[0].mxu0 }
 0x219   :  { %v389_v3 = vpop.f32.mrb[1].mxu0  ;;  %v398_v12 = vadd.f32 %v730_v33, %v678_v56 }
 0x21a   :  { %v731_v37 = vpop.f32.mrb[2].mxu0  ;;  %v390_v15 = vadd.f32 %v678_v56, %v389_v3 }
 0x21b   :  { %v401_v13 = vadd.f32 %v731_v37, %v678_v56  ;;  %v392_v14 = vpop.f32.mrb[3].mxu0 }
 0x21c   :  { %v393_v4 = vadd.f32 %v678_v56, %v392_v14 }
 0x21d   :  { %v453_v18 = vpack.c.bf16 %v401_v13, %v398_v12 }
 0x21e   :  { %v452_v19 = vpack.c.bf16 %v393_v4, %v390_v15 }
 0x220   :  { %v734_v34 = vpop.f32.mrb[4].mxu0  ;;  %760 = vmatprep.mubr.bf16.mxu0 %v452_v19 }
 0x221   :  { %v405_v40 = vpop.f32.mrb[5].mxu0  ;;  %761 = vmatmul.mubr.bf16.vlgmr.msra.gmra.mrb[16].mxu0 %v453_v18  ;;  %v414_v41 = vadd.f32 %v734_v34, %v678_v56 }
 0x222   :  { %v735_v22 = vpop.f32.mrb[6].mxu0  ;;  %v406_v42 = vadd.f32 %v678_v56, %v405_v40 }
 0x223   :  { %v417_v26 = vadd.f32 %v735_v22, %v678_v56  ;;  %v408_v45 = vpop.f32.mrb[7].mxu0 }
 0x224   :  { %v409_v43 = vadd.f32 %v678_v56, %v408_v45 }
 0x225   :  { %v455_v23 = vpack.c.bf16 %v417_v26, %v414_v41 }
 0x226   :  { %v454_v46 = vpack.c.bf16 %v409_v43, %v406_v42 }
 0x228   :  { %v738_v47 = vpop.f32.mrb[8].mxu0  ;;  %764 = vmatprep.mubr.bf16.mxu1 %v454_v46 }
 0x229   :  { %v421_v48 = vpop.f32.mrb[9].mxu0  ;;  %765 = vmatmul.mubr.bf16.vlgmr.msra.gmra.mrb[0].mxu1 %v455_v23  ;;  %v430_v54 = vadd.f32 %v738_v47, %v678_v56 }
 0x22a   :  { %v739_v38 = vpop.f32.mrb[10].mxu0  ;;  %v422_v36 = vadd.f32 %v678_v56, %v421_v48 }
 0x22b   :  { %v433_v27 = vadd.f32 %v739_v38, %v678_v56  ;;  %v424_v49 = vpop.f32.mrb[11].mxu0 }
 0x22c   :  { %v425_v52 = vadd.f32 %v678_v56, %v424_v49 }
 0x22d   :  { %v457_v39 = vpack.c.bf16 %v433_v27, %v430_v54 }
 0x22e   :  { %v456_v53 = vpack.c.bf16 %v425_v52, %v422_v36 }
 0x230   :  { %v742_v57 = vpop.f32.mrb[12].mxu0  ;;  %768 = vmatprep.mubr.bf16.mxu1 %v456_v53 }
 0x231   :  { %v437_v58 = vpop.f32.mrb[13].mxu0  ;;  %769 = vmatmul.mubr.bf16.gmra.mrb[4].mxu1 %v457_v39  ;;  %v446_v30 = vadd.f32 %v742_v57, %v678_v56 }
 0x232   :  { %v743_v50 = vpop.f32.mrb[14].mxu0  ;;  %v438_v51 = vadd.f32 %v678_v56, %v437_v58 }
 0x233   :  { %v449_v55 = vadd.f32 %v743_v50, %v678_v56  ;;  %v440_v59 = vpop.f32.mrb[15].mxu0 }
 0x234   :  { %v441_v60 = vadd.f32 %v678_v56, %v440_v59 }
 0x235   :  { %v459_v61 = vpack.c.bf16 %v449_v55, %v446_v30 }
 0x236   :  { %v458_v44 = vpack.c.bf16 %v441_v60, %v438_v51 }
 0x238   :  { %772 = vmatprep.mubr.bf16.mxu1 %v458_v44 }
 0x239   :  { %773 = vmatmul.mubr.bf16.gmra.mrb[8].mxu1 %v459_v61 }
 0x2f4   :  { %v762_v31 = vpop.f32.mrb[16].mxu0 }
 0x2f5   :  { %v574_v8 = vadd.f32 %v762_v31, %v689_v62  ;;  %v565_v63 = vpop.f32.mrb[17].mxu0 }
 0x2f6   :  { %v566_v9 = vadd.f32 %v689_v62, %v565_v63  ;;  %v763_v32 = vpop.f32.mrb[18].mxu0 }
 0x2f7   :  { %v630_v35 = vadd.f32 %v574_v8, %v912_v1  ;;  %v577_v33 = vadd.f32 %v763_v32, %v689_v62  ;;  %v568_v3 = vpop.f32.mrb[19].mxu0 }
 0x2f8   :  { %v628_v37 = vadd.f32 %v566_v9, %v907_v0  ;;  %v569_v56 = vadd.f32 %v689_v62, %v568_v3 }
 0x2f9   :  { %646 = vst.msk [vmem:[#allocation2 + $0x10] sm:$0xff] %vm44_vm0, %v630_v35  ;;  %v631_v12 = vadd.f32 %v577_v33, %v926_v5 }
 0x2fa   :  { %644 = vst.msk [vmem:[#allocation2] sm:$0xff] %vm44_vm0, %v628_v37  ;;  %v629_v13 = vadd.f32 %v569_v56, %v917_v2 }
 0x2fb   :  { %647 = vst.msk [vmem:[#allocation2 + $0x18] sm:$0xff] %vm44_vm0, %v631_v12 }
 0x2fc   :  { %645 = vst.msk [vmem:[#allocation2 + $0x8] sm:$0xff] %vm44_vm0, %v629_v13  ;;  %v766_v14 = vpop.f32.mrb[0].mxu1 }
 0x2fd   :  { %v590_v15 = vadd.f32 %v766_v14, %v689_v62  ;;  %v581_v1 = vpop.f32.mrb[1].mxu1 }
 0x2fe   :  { %v582_v4 = vadd.f32 %v689_v62, %v581_v1  ;;  %v767_v18 = vpop.f32.mrb[2].mxu1 }
 0x2ff   :  { %v634_v0 = vadd.f32 %v590_v15, %v945_v10  ;;  %v593_v19 = vadd.f32 %v767_v18, %v689_v62  ;;  %v584_v34 = vpop.f32.mrb[3].mxu1 }
 0x300   :  { %v632_v40 = vadd.f32 %v582_v4, %v931_v6  ;;  %v585_v5 = vadd.f32 %v689_v62, %v584_v34 }
 0x301   :  { %650 = vst.msk [vmem:[#allocation2 + $0x30] sm:$0xff] %vm44_vm0, %v634_v0  ;;  %v635_v2 = vadd.f32 %v593_v19, %v950_v11 }
 0x302   :  { %648 = vst.msk [vmem:[#allocation2 + $0x20] sm:$0xff] %vm44_vm0, %v632_v40  ;;  %v633_v22 = vadd.f32 %v585_v5, %v936_v7 }
 0x303   :  { %651 = vst.msk [vmem:[#allocation2 + $0x38] sm:$0xff] %vm44_vm0, %v635_v2 }
 0x304   :  { %649 = vst.msk [vmem:[#allocation2 + $0x28] sm:$0xff] %vm44_vm0, %v633_v22  ;;  %v770_v41 = vpop.f32.mrb[4].mxu1 }
 0x305   :  { %v606_v26 = vadd.f32 %v770_v41, %v689_v62  ;;  %v597_v10 = vpop.f32.mrb[5].mxu1 }
 0x306   :  { %v598_v45 = vadd.f32 %v689_v62, %v597_v10  ;;  %v771_v42 = vpop.f32.mrb[6].mxu1 }
 0x307   :  { %v638_v6 = vadd.f32 %v606_v26, %v977_v20  ;;  %v609_v43 = vadd.f32 %v771_v42, %v689_v62  ;;  %v600_v23 = vpop.f32.mrb[7].mxu1 }
 0x308   :  { %v636_v46 = vadd.f32 %v598_v45, %v963_v16  ;;  %v601_v11 = vadd.f32 %v689_v62, %v600_v23 }
 0x309   :  { %654 = vst.msk [vmem:[#allocation2 + $0x50] sm:$0xff] %vm44_vm0, %v638_v6  ;;  %v639_v7 = vadd.f32 %v609_v43, %v982_v21 }
 0x30a   :  { %652 = vst.msk [vmem:[#allocation2 + $0x40] sm:$0xff] %vm44_vm0, %v636_v46  ;;  %v637_v47 = vadd.f32 %v601_v11, %v968_v17 }
 0x30b   :  { %655 = vst.msk [vmem:[#allocation2 + $0x58] sm:$0xff] %vm44_vm0, %v639_v7 }
 0x30c   :  { %653 = vst.msk [vmem:[#allocation2 + $0x48] sm:$0xff] %vm44_vm0, %v637_v47  ;;  %v774_v48 = vpop.f32.mrb[8].mxu1 }
 0x30d   :  { %v622_v38 = vadd.f32 %v774_v48, %v689_v62  ;;  %v613_v20 = vpop.f32.mrb[9].mxu1 }
 0x30e   :  { %v614_v54 = vadd.f32 %v689_v62, %v613_v20  ;;  %v775_v27 = vpop.f32.mrb[10].mxu1 }
 0x30f   :  { %v642_v16 = vadd.f32 %v622_v38, %v1005_v28  ;;  %v625_v49 = vadd.f32 %v775_v27, %v689_v62  ;;  %v616_v36 = vpop.f32.mrb[11].mxu1 }
 0x310   :  { %v640_v21 = vadd.f32 %v614_v54, %v991_v24  ;;  %v617_v52 = vadd.f32 %v689_v62, %v616_v36 }
 0x311   :  { %658 = vst.msk [vmem:[#allocation2 + $0x70] sm:$0xff] %vm44_vm0, %v642_v16  ;;  %v643_v17 = vadd.f32 %v625_v49, %v1010_v29 }
 0x312   :  { %656 = vst.msk [vmem:[#allocation2 + $0x60] sm:$0xff] %vm44_vm0, %v640_v21  ;;  %v641_v39 = vadd.f32 %v617_v52, %v996_v25 }
 0x313   :  { %659 = vst.msk [vmem:[#allocation2 + $0x78] sm:$0xff] %vm44_vm0, %v643_v17 }
 0x314   :  { %657 = vst.msk [vmem:[#allocation2 + $0x68] sm:$0xff] %vm44_vm0, %v641_v39 }
 0x315   :  { %848 = shalt.err (!%p845_p4)
}
 0x316   :  { %s849_s12 = scalar_lea.hbm %s1301_s7, 2048 }
 0x317   :  { %p850_p5 = scmp.ne.s32.totalorder %s1301_s7, %s849_s12  ;;  %p853_p6 = scmp.lt.u32.totalorder %s849_s12, %s1301_s7 }
 0x319   :  { %p855_p7 = pnand %p853_p6, %p850_p5 }
 0x31b   :  { %858 = shalt.err (!%p855_p7)
}
 0x31c   :  { %s862_s3 = smov 128   ;;  %s863_s17 = smov 8  }
 0x31d   :  { %671 = dma.vmem_to_hbm [thread:$0]  %s666_s9, 2048, %s1301_s7, [#allocation3], %s862_s3, %s862_s3, %s863_s17  }
 0x31e   :  { %859 = dma.done.wait [#allocation3], 2048  }
 0x31f   :  { %860 = vsyncadd [#allocation3], 4294965248 }
 0x320   :  { %675 = vsyncpa [#allocation3], 1 }

// kernel: swin_transformer_block.4
= control target key start
LH: loop header
LB: loop body
LE: loop exit
PB: predicated region body
PF: predicated region fallthrough
CT: control target
= control target key end

     0   :  { %vm43_vm0 = vcmask 261120   ;;  %vm457_vm1 = vcmask 64512   ;;  %s9365_s16 = smov 64   ;;  %s9366_s17 = smov 88   ;;  %vm1180_vm3 = vcmask 130048   ;;  %vm7125_vm4 = vcmask 195584   ;;  %s11350_s0 = inlined_call_operand.vmem [shape: f32[8,16,32], index: 0, kind: input, shape index: {}]   ;;  %s11351_s3 = inlined_call_operand.vmem [shape: bf16[32,96], index: 3, kind: input, shape index: {}]   ;;  %s11352_s1 = inlined_call_operand.vmem [shape: f32[1,32], index: 1, kind: input, shape index: {}]   ;;  %s11353_s2 = inlined_call_operand.vmem [shape: f32[1,32], index: 2, kind: input, shape index: {}]   ;;  %s11354_s4 = inlined_call_operand.vmem [shape: f32[1,96], index: 4, kind: input, shape index: {}]   ;;  %s11355_s5 = inlined_call_operand.vmem [shape: bf16[32,32], index: 5, kind: input, shape index: {}]   ;;  %s11356_s6 = inlined_call_operand.vmem [shape: f32[1,32], index: 6, kind: input, shape index: {}]   ;;  %s11357_s7 = inlined_call_operand.vmem [shape: f32[8,16,32], index: 7, kind: output, shape index: {}]  }
   0x1   :  { %v27_v0 = vld [vmem:[%s11350_s0] sm:$0xff]  ;;  %v29_v1 = vld [vmem:[%s11350_s0 + $0x10] sm:$0xff]  ;;  %v28_v2 = vld [vmem:[%s11350_s0 + $0x8] sm:$0xff]  ;;  %s9367_s18 = smov 120   ;;  %s9368_s19 = smov 56  }
   0x2   :  { %v44_v3 = vsel %vm43_vm0, %v27_v0, 0.0  ;;  %v50_v4 = vsel %vm43_vm0, %v29_v1, 0.0  ;;  %v30_v5 = vld [vmem:[%s11350_s0 + $0x18] sm:$0xff]  ;;  %v47_v6 = vsel %vm43_vm0, %v28_v2, 0.0  ;;  %v31_v8 = vld [vmem:[%s11350_s0 + $0x20] sm:$0xff]  ;;  %v32_v9 = vld [vmem:[%s11350_s0 + $0x28] sm:$0xff] }
   0x3   :  { %45 = vadd.xlane.f32.xlu0 %v44_v3  ;;  %51 = vadd.xlane.f32.xlu1 %v50_v4  ;;  %v53_v7 = vsel %vm43_vm0, %v30_v5, 0.0  ;;  %v56_v10 = vsel %vm43_vm0, %v31_v8, 0.0  ;;  %v59_v11 = vsel %vm43_vm0, %v32_v9, 0.0  ;;  %v9445_v12 = vld [vmem:[%s11350_s0 + $0x30] sm:$0xff]  ;;  %v9450_v13 = vld [vmem:[%s11350_s0 + $0x38] sm:$0xff]  ;;  %v9459_v16 = vld [vmem:[%s11350_s0 + $0x40] sm:$0xff] }
   0x4   :  { %v62_v14 = vsel %vm43_vm0, %v9445_v12, 0.0  ;;  %v65_v15 = vsel %vm43_vm0, %v9450_v13, 0.0  ;;  %v9464_v17 = vld [vmem:[%s11350_s0 + $0x48] sm:$0xff]  ;;  %v68_v18 = vsel %vm43_vm0, %v9459_v16, 0.0  ;;  %v9473_v20 = vld [vmem:[%s11350_s0 + $0x50] sm:$0xff]  ;;  %v9478_v21 = vld [vmem:[%s11350_s0 + $0x58] sm:$0xff] }
   0x5   :  { %v71_v19 = vsel %vm43_vm0, %v9464_v17, 0.0  ;;  %v74_v22 = vsel %vm43_vm0, %v9473_v20, 0.0  ;;  %v77_v23 = vsel %vm43_vm0, %v9478_v21, 0.0  ;;  %v9487_v24 = vld [vmem:[%s11350_s0 + $0x60] sm:$0xff]  ;;  %v9492_v25 = vld [vmem:[%s11350_s0 + $0x68] sm:$0xff]  ;;  %v9501_v28 = vld [vmem:[%s11350_s0 + $0x70] sm:$0xff] }
   0x6   :  { %v80_v26 = vsel %vm43_vm0, %v9487_v24, 0.0  ;;  %v83_v27 = vsel %vm43_vm0, %v9492_v25, 0.0  ;;  %v9506_v29 = vld [vmem:[%s11350_s0 + $0x78] sm:$0xff]  ;;  %v86_v30 = vsel %vm43_vm0, %v9501_v28, 0.0  ;;  %vm9779_vm2 = vmpackc.low %vm457_vm1, %vm457_vm1  ;;  %s9369_s20 = smov 80   ;;  %s9370_s21 = smov 112  }
   0x7   :  { %48 = vadd.xlane.f32.xlu0 %v47_v6  ;;  %54 = vadd.xlane.f32.xlu1 %v53_v7  ;;  %v89_v31 = vsel %vm43_vm0, %v9506_v29, 0.0  ;;  %s9371_s22 = smov 48   ;;  %s9372_s23 = smov 72  }
   0x8   :  { %s9373_s24 = smov 104   ;;  %s9374_s25 = smov 40  }
   0x9   :  { %s9375_s26 = smov 8   ;;  %s9376_s27 = smov 16  }
   0xa   :  { %s9377_s28 = smov 24  }
   0xb   :  { %57 = vadd.xlane.f32.xlu0 %v56_v10  ;;  %60 = vadd.xlane.f32.xlu1 %v59_v11 }
   0xf   :  { %63 = vadd.xlane.f32.xlu0 %v62_v14  ;;  %66 = vadd.xlane.f32.xlu1 %v65_v15 }
  0x13   :  { %69 = vadd.xlane.f32.xlu0 %v68_v18  ;;  %72 = vadd.xlane.f32.xlu1 %v71_v19 }
  0x17   :  { %75 = vadd.xlane.f32.xlu0 %v74_v22  ;;  %78 = vadd.xlane.f32.xlu1 %v77_v23 }
  0x1b   :  { %81 = vadd.xlane.f32.xlu0 %v80_v26  ;;  %84 = vadd.xlane.f32.xlu1 %v83_v27 }
  0x1f   :  { %87 = vadd.xlane.f32.xlu0 %v86_v30  ;;  %90 = vadd.xlane.f32.xlu1 %v89_v31 }
  0x90   :  { %v46_v32 = vpop.xlane.xlu0 %45  ;;  %v52_v33 = vpop.xlane.xlu1 %51 }
  0x91   :  { %v93_v34 = vmul.f32 0.03125, %v46_v32  ;;  %v95_v35 = vmul.f32 0.03125, %v52_v33 }
  0x93   :  { %v9512_v36 = vsub.f32 %v27_v0, %v93_v34  ;;  %v9514_v37 = vsub.f32 %v29_v1, %v95_v35 }
  0x94   :  { %v49_v38 = vpop.xlane.xlu0 %48  ;;  %v55_v39 = vpop.xlane.xlu1 %54 }
  0x95   :  { %v94_v40 = vmul.f32 0.03125, %v49_v38  ;;  %v96_v41 = vmul.f32 0.03125, %v55_v39  ;;  %v125_v42 = vmul.f32 %v9512_v36, %v9512_v36  ;;  %v127_v43 = vmul.f32 %v9514_v37, %v9514_v37 }
  0x97   :  { %v9520_v44 = vsub.f32 %v28_v2, %v94_v40  ;;  %v9522_v45 = vsub.f32 %v30_v5, %v96_v41  ;;  %v141_v46 = vsel %vm43_vm0, %v125_v42, 0.0  ;;  %v147_v49 = vsel %vm43_vm0, %v127_v43, 0.0 }
  0x98   :  { %142 = vadd.xlane.f32.xlu0 %v141_v46  ;;  %v58_v47 = vpop.xlane.xlu0 %57  ;;  %v61_v48 = vpop.xlane.xlu1 %60 }
  0x99   :  { %v97_v50 = vmul.f32 0.03125, %v58_v47  ;;  %v98_v51 = vmul.f32 0.03125, %v61_v48  ;;  %v126_v52 = vmul.f32 %v9520_v44, %v9520_v44  ;;  %v128_v53 = vmul.f32 %v9522_v45, %v9522_v45 }
  0x9b   :  { %v9530_v54 = vsub.f32 %v31_v8, %v97_v50  ;;  %v9532_v55 = vsub.f32 %v32_v9, %v98_v51  ;;  %v144_v56 = vsel %vm43_vm0, %v126_v52, 0.0  ;;  %v150_v59 = vsel %vm43_vm0, %v128_v53, 0.0  ;;  %v9073_v53 = vld [vmem:[%s11351_s3 + $0x8] sm:$0xff]  }
  0x9c   :  { %148 = vadd.xlane.f32.xlu0 %v147_v49  ;;  %145 = vadd.xlane.f32.xlu1 %v144_v56  ;;  %v64_v57 = vpop.xlane.xlu0 %63  ;;  %v67_v58 = vpop.xlane.xlu1 %66 }
  0x9d   :  { %v99_v60 = vmul.f32 0.03125, %v64_v57  ;;  %v100_v61 = vmul.f32 0.03125, %v67_v58  ;;  %v129_v62 = vmul.f32 %v9530_v54, %v9530_v54  ;;  %v130_v63 = vmul.f32 %v9532_v55, %v9532_v55 }
  0x9f   :  { %v9541_v0 = vsub.f32 %v9445_v12, %v99_v60  ;;  %v9544_v1 = vsub.f32 %v9450_v13, %v100_v61  ;;  %v153_v2 = vsel %vm43_vm0, %v129_v62, 0.0  ;;  %v156_v5 = vsel %vm43_vm0, %v130_v63, 0.0 }
  0xa0   :  { %151 = vadd.xlane.f32.xlu1 %v150_v59  ;;  %154 = vadd.xlane.f32.xlu0 %v153_v2  ;;  %v70_v3 = vpop.xlane.xlu0 %69  ;;  %v73_v4 = vpop.xlane.xlu1 %72 }
  0xa1   :  { %v101_v6 = vmul.f32 0.03125, %v70_v3  ;;  %v102_v7 = vmul.f32 0.03125, %v73_v4  ;;  %v131_v8 = vmul.f32 %v9541_v0, %v9541_v0  ;;  %v132_v9 = vmul.f32 %v9544_v1, %v9544_v1 }
  0xa3   :  { %v9553_v10 = vsub.f32 %v9459_v16, %v101_v6  ;;  %v9556_v11 = vsub.f32 %v9464_v17, %v102_v7  ;;  %v159_v12 = vsel %vm43_vm0, %v131_v8, 0.0  ;;  %v162_v15 = vsel %vm43_vm0, %v132_v9, 0.0 }
  0xa4   :  { %157 = vadd.xlane.f32.xlu1 %v156_v5  ;;  %160 = vadd.xlane.f32.xlu0 %v159_v12  ;;  %v76_v13 = vpop.xlane.xlu0 %75  ;;  %v79_v14 = vpop.xlane.xlu1 %78 }
  0xa5   :  { %v103_v18 = vmul.f32 0.03125, %v76_v13  ;;  %v104_v19 = vmul.f32 0.03125, %v79_v14  ;;  %v133_v22 = vmul.f32 %v9553_v10, %v9553_v10  ;;  %v134_v16 = vmul.f32 %v9556_v11, %v9556_v11 }
  0xa7   :  { %v9565_v23 = vsub.f32 %v9473_v20, %v103_v18  ;;  %v9568_v17 = vsub.f32 %v9478_v21, %v104_v19  ;;  %v165_v26 = vsel %vm43_vm0, %v133_v22, 0.0  ;;  %v168_v31 = vsel %vm43_vm0, %v134_v16, 0.0 }
  0xa8   :  { %163 = vadd.xlane.f32.xlu1 %v162_v15  ;;  %166 = vadd.xlane.f32.xlu0 %v165_v26  ;;  %v82_v27 = vpop.xlane.xlu0 %81  ;;  %v85_v30 = vpop.xlane.xlu1 %84 }
  0xa9   :  { %v105_v32 = vmul.f32 0.03125, %v82_v27  ;;  %v106_v33 = vmul.f32 0.03125, %v85_v30  ;;  %v135_v34 = vmul.f32 %v9565_v23, %v9565_v23  ;;  %v136_v20 = vmul.f32 %v9568_v17, %v9568_v17 }
  0xab   :  { %v9577_v35 = vsub.f32 %v9487_v24, %v105_v32  ;;  %v9580_v21 = vsub.f32 %v9492_v25, %v106_v33  ;;  %v171_v38 = vsel %vm43_vm0, %v135_v34, 0.0  ;;  %v174_v41 = vsel %vm43_vm0, %v136_v20, 0.0 }
  0xac   :  { %169 = vadd.xlane.f32.xlu1 %v168_v31  ;;  %172 = vadd.xlane.f32.xlu0 %v171_v38  ;;  %v88_v39 = vpop.xlane.xlu0 %87  ;;  %v91_v40 = vpop.xlane.xlu1 %90  ;;  %v9612_v31 = vld [vmem:[%s11352_s1] ss:$0 sm:$0xff] }
  0xad   :  { %v107_v42 = vmul.f32 0.03125, %v88_v39  ;;  %v108_v43 = vmul.f32 0.03125, %v91_v40  ;;  %v137_v46 = vmul.f32 %v9577_v35, %v9577_v35  ;;  %v138_v24 = vmul.f32 %v9580_v21, %v9580_v21 }
  0xaf   :  { %v9589_v47 = vsub.f32 %v9501_v28, %v107_v42  ;;  %v9592_v25 = vsub.f32 %v9506_v29, %v108_v43  ;;  %v177_v48 = vsel %vm43_vm0, %v137_v46, 0.0  ;;  %v180_v49 = vsel %vm43_vm0, %v138_v24, 0.0  ;;  %v9072_v29 = vld [vmem:[%s11351_s3] sm:$0xff]  }
  0xb0   :  { %175 = vadd.xlane.f32.xlu1 %v174_v41  ;;  %178 = vadd.xlane.f32.xlu0 %v177_v48  ;;  %v9619_v43 = vld [vmem:[%s11353_s2] ss:$0 sm:$0xff] }
  0xb1   :  { %v139_v50 = vmul.f32 %v9589_v47, %v9589_v47  ;;  %v140_v51 = vmul.f32 %v9592_v25, %v9592_v25  ;;  %7806 = vmatprep.subr.bf16.mxu0 %v9072_v29  ;;  %8614 = vmatprep.subr.bf16.mxu1 %v9072_v29 }
  0xb2   :  { %7807 = vmatpush3.bf16.msra.mxu0 %v9072_v29  ;;  %8616 = vmatpush3.bf16.msra.mxu1 %v9072_v29 }
  0xb3   :  { %v183_v52 = vsel %vm43_vm0, %v139_v50, 0.0  ;;  %v186_v28 = vsel %vm43_vm0, %v140_v51, 0.0  ;;  %7808 = vmatprep.subr.bf16.mxu0 %v9073_v53  ;;  %8615 = vmatprep.subr.bf16.mxu1 %v9073_v53 }
  0xb4   :  { %181 = vadd.xlane.f32.xlu1 %v180_v49  ;;  %184 = vadd.xlane.f32.xlu0 %v183_v52 }
  0xb6   :  { %7809 = vmatpush3.bf16.msra.mxu0 %v9073_v53  ;;  %8617 = vmatpush3.bf16.msra.mxu1 %v9073_v53 }
  0xb8   :  { %187 = vadd.xlane.f32.xlu1 %v186_v28 }
 0x125   :  { %v143_v56 = vpop.xlane.xlu0 %142 }
 0x126   :  { %v189_v57 = vmul.f32 0.03125, %v143_v56 }
 0x128   :  { %v205_v58 = vadd.f32 1e-05, %v189_v57 }
 0x129   :  { %v146_v59 = vpop.xlane.xlu1 %145  ;;  %v149_v60 = vpop.xlane.xlu0 %148 }
 0x12a   :  { %9076 = vrsqrt.f32 %v205_v58  ;;  %v190_v61 = vmul.f32 0.03125, %v146_v59  ;;  %v191_v62 = vmul.f32 0.03125, %v149_v60 }
 0x12c   :  { %v206_v63 = vadd.f32 1e-05, %v190_v61  ;;  %v207_v2 = vadd.f32 1e-05, %v191_v62 }
 0x12d   :  { %v152_v3 = vpop.xlane.xlu1 %151  ;;  %v155_v4 = vpop.xlane.xlu0 %154 }
 0x12e   :  { %9078 = vrsqrt.f32 %v206_v63  ;;  %v192_v5 = vmul.f32 0.03125, %v152_v3  ;;  %v193_v6 = vmul.f32 0.03125, %v155_v4 }
 0x12f   :  { %9080 = vrsqrt.f32 %v207_v2 }
 0x130   :  { %v208_v7 = vadd.f32 1e-05, %v192_v5  ;;  %v209_v8 = vadd.f32 1e-05, %v193_v6 }
 0x131   :  { %v158_v9 = vpop.xlane.xlu1 %157  ;;  %v161_v12 = vpop.xlane.xlu0 %160 }
 0x132   :  { %9082 = vrsqrt.f32 %v208_v7  ;;  %v194_v13 = vmul.f32 0.03125, %v158_v9  ;;  %v195_v14 = vmul.f32 0.03125, %v161_v12 }
 0x133   :  { %9084 = vrsqrt.f32 %v209_v8 }
 0x134   :  { %v9077_v15 = vpop.eup %9076  ;;  %v210_v18 = vadd.f32 1e-05, %v194_v13  ;;  %v211_v19 = vadd.f32 1e-05, %v195_v14 }
 0x135   :  { %v164_v22 = vpop.xlane.xlu1 %163  ;;  %v167_v16 = vpop.xlane.xlu0 %166  ;;  %v237_v26 = vmul.f32 %v9077_v15, %v9512_v36 }
 0x136   :  { %9086 = vrsqrt.f32 %v210_v18  ;;  %v196_v27 = vmul.f32 0.03125, %v164_v22  ;;  %v197_v30 = vmul.f32 0.03125, %v167_v16 }
 0x137   :  { %9088 = vrsqrt.f32 %v211_v19  ;;  %v260_v41 = vmul.f32 %v9612_v31, %v237_v26 }
 0x138   :  { %v9079_v32 = vpop.eup %9078  ;;  %v212_v33 = vadd.f32 1e-05, %v196_v27  ;;  %v213_v34 = vadd.f32 1e-05, %v197_v30 }
 0x139   :  { %v9081_v20 = vpop.eup %9080  ;;  %v170_v38 = vpop.xlane.xlu1 %169  ;;  %v238_v40 = vmul.f32 %v9079_v32, %v9520_v44  ;;  %v283_v28 = vadd.f32 %v9619_v43, %v260_v41 }
 0x13a   :  { %v173_v39 = vpop.xlane.xlu0 %172  ;;  %9090 = vrsqrt.f32 %v212_v33  ;;  %v198_v36 = vmul.f32 0.03125, %v170_v38  ;;  %v239_v46 = vmul.f32 %v9081_v20, %v9514_v37 }
 0x13b   :  { %v199_v42 = vmul.f32 0.03125, %v173_v39  ;;  %9092 = vrsqrt.f32 %v213_v34  ;;  %v261_v24 = vmul.f32 %v9612_v31, %v238_v40 }
 0x13c   :  { %v9083_v48 = vpop.eup %9082  ;;  %v214_v49 = vadd.f32 1e-05, %v198_v36  ;;  %v262_v56 = vmul.f32 %v9612_v31, %v239_v46 }
 0x13d   :  { %v215_v50 = vadd.f32 1e-05, %v199_v42  ;;  %v9085_v51 = vpop.eup %9084  ;;  %v176_v44 = vpop.xlane.xlu1 %175  ;;  %v284_v29 = vadd.f32 %v9619_v43, %v261_v24  ;;  %v240_v53 = vmul.f32 %v9083_v48, %v9522_v45 }
 0x13e   :  { %v179_v52 = vpop.xlane.xlu0 %178  ;;  %9094 = vrsqrt.f32 %v214_v49  ;;  %v200_v57 = vmul.f32 0.03125, %v176_v44  ;;  %v241_v60 = vmul.f32 %v9085_v51, %v9530_v54  ;;  %v285_v45 = vadd.f32 %v9619_v43, %v262_v56 }
 0x13f   :  { %v201_v37 = vmul.f32 0.03125, %v179_v52  ;;  %9096 = vrsqrt.f32 %v215_v50  ;;  %v299_v58 = vpack.c.bf16 %v284_v29, %v283_v28  ;;  %v263_v59 = vmul.f32 %v9612_v31, %v240_v53 }
 0x140   :  { %v9087_v61 = vpop.eup %9086  ;;  %v216_v62 = vadd.f32 1e-05, %v200_v57  ;;  %v264_v7 = vmul.f32 %v9612_v31, %v241_v60 }
 0x141   :  { %v217_v63 = vadd.f32 1e-05, %v201_v37  ;;  %v9089_v2 = vpop.eup %9088  ;;  %v182_v3 = vpop.xlane.xlu1 %181  ;;  %7810 = vmatprep.mubr.msk.bf16.mxu0 %vm43_vm0, %v299_v58  ;;  %v286_v5 = vadd.f32 %v9619_v43, %v263_v59  ;;  %v242_v6 = vmul.f32 %v9087_v61, %v9532_v55 }
 0x142   :  { %v185_v4 = vpop.xlane.xlu0 %184  ;;  %9098 = vrsqrt.f32 %v216_v62  ;;  %v202_v8 = vmul.f32 0.03125, %v182_v3  ;;  %v243_v54 = vmul.f32 %v9089_v2, %v9541_v0  ;;  %v287_v55 = vadd.f32 %v9619_v43, %v264_v7 }
 0x143   :  { %v203_v9 = vmul.f32 0.03125, %v185_v4  ;;  %9100 = vrsqrt.f32 %v217_v63  ;;  %v300_v12 = vpack.c.bf16 %v286_v5, %v285_v45  ;;  %v265_v13 = vmul.f32 %v9612_v31, %v242_v6  ;;  %v7316_v4 = vld [vmem:[%s11354_s4] ss:$0 sm:$0xff]  ;;  %s9364_s4 = smov 96  }
 0x144   :  { %v9091_v14 = vpop.eup %9090  ;;  %v218_v15 = vadd.f32 1e-05, %v202_v8  ;;  %v266_v27 = vmul.f32 %v9612_v31, %v243_v54 }
 0x145   :  { %v219_v18 = vadd.f32 1e-05, %v203_v9  ;;  %v9093_v19 = vpop.eup %9092  ;;  %v188_v22 = vpop.xlane.xlu1 %187  ;;  %7811 = vmatmul.mubr.msk.bf16.vlgmr.msra.gmra.mrb[0].mxu0 %vm43_vm0, %v300_v12  ;;  %v288_v16 = vadd.f32 %v9619_v43, %v265_v13  ;;  %v244_v26 = vmul.f32 %v9091_v14, %v9544_v1 }
 0x146   :  { %9102 = vrsqrt.f32 %v218_v15  ;;  %v204_v0 = vmul.f32 0.03125, %v188_v22  ;;  %v245_v30 = vmul.f32 %v9093_v19, %v9553_v10  ;;  %v289_v39 = vadd.f32 %v9619_v43, %v266_v27 }
 0x147   :  { %9104 = vrsqrt.f32 %v219_v18  ;;  %v301_v32 = vpack.c.bf16 %v288_v16, %v287_v55  ;;  %v267_v33 = vmul.f32 %v9612_v31, %v244_v26 }
 0x148   :  { %v9095_v34 = vpop.eup %9094  ;;  %v220_v20 = vadd.f32 1e-05, %v204_v0  ;;  %v268_v41 = vmul.f32 %v9612_v31, %v245_v30 }
 0x149   :  { %v9097_v38 = vpop.eup %9096  ;;  %7814 = vmatprep.mubr.msk.bf16.mxu0 %vm43_vm0, %v301_v32  ;;  %v290_v40 = vadd.f32 %v9619_v43, %v267_v33  ;;  %v246_v1 = vmul.f32 %v9095_v34, %v9556_v11 }
 0x14a   :  { %9106 = vrsqrt.f32 %v220_v20  ;;  %v247_v10 = vmul.f32 %v9097_v38, %v9565_v23  ;;  %v291_v48 = vadd.f32 %v9619_v43, %v268_v41 }
 0x14b   :  { %v302_v36 = vpack.c.bf16 %v290_v40, %v289_v39  ;;  %v269_v42 = vmul.f32 %v9612_v31, %v246_v1 }
 0x14c   :  { %v9099_v46 = vpop.eup %9098  ;;  %v270_v11 = vmul.f32 %v9612_v31, %v247_v10 }
 0x14d   :  { %v9101_v24 = vpop.eup %9100  ;;  %7815 = vmatmul.mubr.msk.bf16.gmra.mrb[4].mxu0 %vm43_vm0, %v302_v36  ;;  %v292_v49 = vadd.f32 %v9619_v43, %v269_v42  ;;  %v248_v50 = vmul.f32 %v9099_v46, %v9568_v17 }
 0x14e   :  { %v249_v51 = vmul.f32 %v9101_v24, %v9577_v35  ;;  %v293_v29 = vadd.f32 %v9619_v43, %v270_v11 }
 0x14f   :  { %v303_v44 = vpack.c.bf16 %v292_v49, %v291_v48  ;;  %v271_v23 = vmul.f32 %v9612_v31, %v248_v50 }
 0x150   :  { %v9103_v52 = vpop.eup %9102  ;;  %v272_v57 = vmul.f32 %v9612_v31, %v249_v51 }
 0x151   :  { %v9105_v28 = vpop.eup %9104  ;;  %7818 = vmatprep.mubr.msk.bf16.mxu1 %vm43_vm0, %v303_v44  ;;  %v294_v53 = vadd.f32 %v9619_v43, %v271_v23  ;;  %v250_v56 = vmul.f32 %v9103_v52, %v9580_v21 }
 0x152   :  { %v251_v17 = vmul.f32 %v9105_v28, %v9589_v47  ;;  %v295_v59 = vadd.f32 %v9619_v43, %v272_v57 }
 0x153   :  { %v304_v37 = vpack.c.bf16 %v294_v53, %v293_v29  ;;  %v273_v35 = vmul.f32 %v9612_v31, %v250_v56 }
 0x154   :  { %v9107_v58 = vpop.eup %9106  ;;  %v274_v62 = vmul.f32 %v9612_v31, %v251_v17 }
 0x155   :  { %7819 = vmatmul.mubr.msk.bf16.vlgmr.msra.gmra.mrb[0].mxu1 %vm43_vm0, %v304_v37  ;;  %v296_v60 = vadd.f32 %v9619_v43, %v273_v35  ;;  %v252_v61 = vmul.f32 %v9107_v58, %v9592_v25 }
 0x156   :  { %v297_v47 = vadd.f32 %v9619_v43, %v274_v62 }
 0x157   :  { %v305_v63 = vpack.c.bf16 %v296_v60, %v295_v59  ;;  %v275_v21 = vmul.f32 %v9612_v31, %v252_v61 }
 0x159   :  { %7822 = vmatprep.mubr.msk.bf16.mxu1 %vm43_vm0, %v305_v63  ;;  %v298_v2 = vadd.f32 %v9619_v43, %v275_v21 }
 0x15b   :  { %v306_v3 = vpack.c.bf16 %v298_v2, %v297_v47 }
 0x15d   :  { %7823 = vmatmul.mubr.msk.bf16.gmra.mrb[4].mxu1 %vm43_vm0, %v306_v3 }
 0x218   :  { %v7812_v45 = vpop.f32.mrb[0].mxu0 }
 0x219   :  { %v388_v25 = vpop.f32.mrb[1].mxu0  ;;  %v9679_v31 = vadd.f32 %v7812_v45, %v7316_v4 }
 0x21a   :  { %v9677_v5 = vadd.f32 %v7316_v4, %v388_v25  ;;  %v7813_v6 = vpop.f32.mrb[2].mxu0 }
 0x21b   :  { %v9681_v7 = vadd.f32 %v7813_v6, %v7316_v4  ;;  %v391_v8 = vpop.f32.mrb[3].mxu0 }
 0x21c   :  { %11376 = vst [vmem:[#allocation2_spill] sm:$0xff] %v9677_v5  ;;  %v9683_v9 = vadd.f32 %v7316_v4, %v391_v8  ;;  %7830 = vmatprep.mubr.msk.f32.mxu1 %vm457_vm1, %v9677_v5 }
 0x21d   :  { %v9689_v43 = vpack.i.bf16 %v9681_v7, %v9679_v31 }
 0x21e   :  { %11377 = vst [vmem:[#allocation3_spill] sm:$0xff] %v9683_v9  ;;  %v9693_v54 = vpack.i.bf16 %v9683_v9, %v9677_v5 }
 0x21f   :  { %8638 = vrot.lane.b32.xlu1 %v9689_v43, %s9364_s4 }
 0x220   :  { %8633 = vrot.lane.b32.xlu0 %v9693_v54, %s9364_s4  ;;  %v7816_v12 = vpop.f32.mrb[4].mxu0 }
 0x221   :  { %v404_v13 = vpop.f32.mrb[5].mxu0  ;;  %v9709_v16 = vadd.f32 %v7816_v12, %v7316_v4 }
 0x222   :  { %v7817_v14 = vpop.f32.mrb[6].mxu0  ;;  %v9699_v18 = vadd.f32 %v7316_v4, %v404_v13 }
 0x223   :  { %v407_v15 = vpop.f32.mrb[7].mxu0  ;;  %v9703_v22 = vadd.f32 %v7817_v14, %v7316_v4 }
 0x224   :  { %v9701_v19 = vadd.f32 %v7316_v4, %v407_v15 }
 0x225   :  { %v9717_v32 = vpack.i.bf16 %v9703_v22, %v9709_v16 }
 0x226   :  { %v9707_v55 = vpack.i.bf16 %v9701_v19, %v9699_v18 }
 0x228   :  { %8643 = vrot.lane.b32.xlu1 %v9707_v55, %s9364_s4  ;;  %v7820_v26 = vpop.f32.mrb[0].mxu1 }
 0x229   :  { %v420_v27 = vpop.f32.mrb[1].mxu1  ;;  %v9719_v33 = vadd.f32 %v7820_v26, %v7316_v4 }
 0x22a   :  { %v9713_v0 = vadd.f32 %v7316_v4, %v420_v27  ;;  %v7821_v30 = vpop.f32.mrb[2].mxu1 }
 0x22b   :  { %v9721_v34 = vadd.f32 %v7821_v30, %v7316_v4  ;;  %v423_v20 = vpop.f32.mrb[3].mxu1 }
 0x22c   :  { %v9723_v38 = vadd.f32 %v7316_v4, %v423_v20  ;;  %8648 = vrot.lane.b32.xlu1 %v9717_v32, %s9364_s4  ;;  %7858 = vmatprep.mubr.msk.f32.mxu0 %vm457_vm1, %v9713_v0 }
 0x22d   :  { %v9731_v39 = vpack.i.bf16 %v9721_v34, %v9719_v33 }
 0x22e   :  { %v9735_v40 = vpack.i.bf16 %v9723_v38, %v9713_v0 }
 0x230   :  { %8658 = vrot.lane.b32.xlu1 %v9731_v39, %s9364_s4  ;;  %8653 = vrot.lane.b32.xlu0 %v9735_v40, %s9364_s4  ;;  %v7824_v1 = vpop.f32.mrb[4].mxu1 }
 0x231   :  { %v436_v41 = vpop.f32.mrb[5].mxu1  ;;  %v9741_v36 = vadd.f32 %v7824_v1, %v7316_v4 }
 0x232   :  { %v7825_v10 = vpop.f32.mrb[6].mxu1  ;;  %v9745_v24 = vadd.f32 %v7316_v4, %v436_v41 }
 0x233   :  { %v9743_v42 = vadd.f32 %v7825_v10, %v7316_v4  ;;  %v439_v46 = vpop.f32.mrb[7].mxu1 }
 0x234   :  { %v9747_v48 = vadd.f32 %v7316_v4, %v439_v46 }
 0x235   :  { %v9751_v49 = vpack.i.bf16 %v9743_v42, %v9741_v36 }
 0x236   :  { %v9755_v50 = vpack.i.bf16 %v9747_v48, %v9745_v24 }
 0x237   :  { %8668 = vrot.lane.b32.xlu1 %v9751_v49, %s9364_s4 }
 0x238   :  { %8663 = vrot.lane.b32.xlu0 %v9755_v50, %s9364_s4 }
 0x23b   :  { %8678 = vrot.lane.b32.xlu1 %v9689_v43, %s9365_s16 }
 0x23c   :  { %8673 = vrot.lane.b32.xlu0 %v9693_v54, %s9365_s16 }
 0x23f   :  { %8683 = vrot.lane.b32.xlu1 %v9717_v32, %s9365_s16 }
 0x240   :  { %8688 = vrot.lane.b32.xlu0 %v9735_v40, %s9365_s16 }
 0x243   :  { %8693 = vrot.lane.b32.xlu1 %v9731_v39, %s9365_s16 }
 0x244   :  { %8703 = vrot.lane.b32.xlu0 %v9693_v54, %s9366_s17 }
 0x247   :  { %8698 = vrot.lane.b32.xlu1 %v9751_v49, %s9365_s16 }
 0x248   :  { %8723 = vrot.lane.b32.xlu0 %v9755_v50, %s9365_s16 }
 0x24b   :  { %8708 = vrot.lane.b32.xlu1 %v9689_v43, %s9366_s17 }
 0x24c   :  { %8728 = vrot.lane.b32.xlu0 %v9707_v55, %s9366_s17 }
 0x24f   :  { %8713 = vrot.lane.b32.xlu1 %v9717_v32, %s9366_s17 }
 0x253   :  { %8718 = vrot.lane.b32.xlu1 %v9707_v55, %s9365_s16 }
 0x291   :  { %v8639_v11 = vpop.permute.xlu1 %8638 }
 0x292   :  { %v8634_v51 = vpop.permute.xlu0 %8633  ;;  %v8641_v44 = vunpack.i.h.bf16 %v8639_v11  ;;  %v8640_v23 = vunpack.i.l.bf16 %v8639_v11 }
 0x293   :  { %v8636_v52 = vunpack.i.h.bf16 %v8634_v51  ;;  %v8635_v28 = vunpack.i.l.bf16 %v8634_v51 }
 0x294   :  { %v8300_v56 = vpack.c.bf16 %v8641_v44, %v8640_v23 }
 0x295   :  { %v8294_v53 = vpack.c.bf16 %v8636_v52, %v8635_v28 }
 0x297   :  { %8296 = vmatprep.subr.msk.bf16.mxu1 %vm9779_vm2, %v8294_v53 }
 0x298   :  { %8299 = vmatpush3.bf16.xpose.msk.msra.mxu1 %vm9779_vm2, %v8294_v53 }
 0x299   :  { %8302 = vmatprep.subr.msk.bf16.mxu1 %vm9779_vm2, %v8300_v56 }
 0x29a   :  { %v8644_v57 = vpop.permute.xlu1 %8643 }
 0x29b   :  { %v8646_v17 = vunpack.i.h.bf16 %v8644_v57  ;;  %v8645_v37 = vunpack.i.l.bf16 %v8644_v57 }
 0x29d   :  { %v8306_v35 = vpack.c.bf16 %v8646_v17, %v8645_v37 }
 0x29e   :  { %v8649_v58 = vpop.permute.xlu1 %8648 }
 0x29f   :  { %7831 = vmatmul.mubr.msk.f32.vlgmr.msra.gmra.mrb[8].mxu1 %vm457_vm1, %v9683_v9  ;;  %v8651_v60 = vunpack.i.h.bf16 %v8649_v58  ;;  %v8650_v61 = vunpack.i.l.bf16 %v8649_v58 }
 0x2a0   :  { %8305 = vmatpush3.bf16.xpose.msk.msra.mxu1 %vm9779_vm2, %v8300_v56  ;;  %7837 = vmatprep.mubr.msk.f32.mxu1 %vm457_vm1, %v9679_v31 }
 0x2a1   :  { %8308 = vmatprep.subr.msk.bf16.mxu1 %vm9779_vm2, %v8306_v35  ;;  %v8312_v2 = vpack.c.bf16 %v8651_v60, %v8650_v61 }
 0x2a2   :  { %v8654_v59 = vpop.permute.xlu0 %8653  ;;  %v8659_v21 = vpop.permute.xlu1 %8658 }
 0x2a3   :  { %v8656_v62 = vunpack.i.h.bf16 %v8654_v59  ;;  %v8655_v63 = vunpack.i.l.bf16 %v8654_v59  ;;  %v8661_v6 = vunpack.i.h.bf16 %v8659_v21  ;;  %v8660_v8 = vunpack.i.l.bf16 %v8659_v21 }
 0x2a5   :  { %v8318_v47 = vpack.c.bf16 %v8656_v62, %v8655_v63  ;;  %v8324_v27 = vpack.c.bf16 %v8661_v6, %v8660_v8 }
 0x2a7   :  { %7838 = vmatmul.mubr.msk.f32.vlgmr.msra.gmra.mrb[10].mxu1 %vm457_vm1, %v9681_v7  ;;  %8320 = vmatprep.subr.msk.bf16.mxu0 %vm9779_vm2, %v8318_v47 }
 0x2a8   :  { %8311 = vmatpush3.bf16.xpose.msk.msra.mxu1 %vm9779_vm2, %v8306_v35  ;;  %7844 = vmatprep.mubr.msk.f32.mxu1 %vm457_vm1, %v9699_v18 }
 0x2a9   :  { %8323 = vmatpush3.bf16.xpose.msk.msra.mxu0 %vm9779_vm2, %v8318_v47  ;;  %v8669_v3 = vpop.permute.xlu1 %8668  ;;  %8314 = vmatprep.subr.msk.bf16.mxu1 %vm9779_vm2, %v8312_v2 }
 0x2aa   :  { %v8664_v4 = vpop.permute.xlu0 %8663  ;;  %v8671_v1 = vunpack.i.h.bf16 %v8669_v3  ;;  %v8670_v41 = vunpack.i.l.bf16 %v8669_v3 }
 0x2ab   :  { %v8666_v45 = vunpack.i.h.bf16 %v8664_v4  ;;  %v8665_v25 = vunpack.i.l.bf16 %v8664_v4 }
 0x2ac   :  { %v8336_v46 = vpack.c.bf16 %v8671_v1, %v8670_v41 }
 0x2ad   :  { %v8330_v12 = vpack.c.bf16 %v8666_v45, %v8665_v25  ;;  %v8679_v13 = vpop.permute.xlu1 %8678 }
 0x2ae   :  { %v8674_v14 = vpop.permute.xlu0 %8673  ;;  %v8681_v51 = vunpack.i.h.bf16 %v8679_v13  ;;  %v8680_v44 = vunpack.i.l.bf16 %v8679_v13 }
 0x2af   :  { %v8676_v15 = vunpack.i.h.bf16 %v8674_v14  ;;  %v8675_v26 = vunpack.i.l.bf16 %v8674_v14  ;;  %7845 = vmatmul.mubr.msk.f32.vlgmr.msra.gmra.mrb[12].mxu1 %vm457_vm1, %v9701_v19  ;;  %8332 = vmatprep.subr.msk.bf16.mxu0 %vm9779_vm2, %v8330_v12 }
 0x2b0   :  { %7859 = vmatmul.mubr.msk.f32.vlgmr.msra.gmra.mrb[8].mxu0 %vm457_vm1, %v9723_v38  ;;  %8317 = vmatpush3.bf16.xpose.msk.msra.mxu1 %vm9779_vm2, %v8312_v2  ;;  %v8346_v52 = vpack.c.bf16 %v8681_v51, %v8680_v44 }
 0x2b1   :  { %7851 = vmatprep.mubr.msk.f32.mxu1 %vm457_vm1, %v9709_v16  ;;  %8335 = vmatpush3.bf16.xpose.msk.msra.mxu0 %vm9779_vm2, %v8330_v12  ;;  %v8684_v30 = vpop.permute.xlu1 %8683  ;;  %v8342_v20 = vpack.c.bf16 %v8676_v15, %v8675_v26 }
 0x2b2   :  { %7872 = vmatprep.mubr.msk.f32.mxu0 %vm457_vm1, %v9745_v24  ;;  %8326 = vmatprep.subr.msk.bf16.mxu1 %vm9779_vm2, %v8324_v27  ;;  %v8686_v53 = vunpack.i.h.bf16 %v8684_v30  ;;  %v8685_v56 = vunpack.i.l.bf16 %v8684_v30 }
 0x2b3   :  { %8343 = vmatprep.subr.bf16.mxu0 %v8342_v20 }
 0x2b4   :  { %v9851_v35 = vpack.c.bf16 %v8686_v53, %v8685_v56 }
 0x2b5   :  { %v9825_v10 = vpop.permute.xlu1 %8693 }
 0x2b7   :  { %7852 = vmatmul.mubr.msk.f32.vlgmr.msra.gmra.mrb[14].mxu1 %vm457_vm1, %v9703_v22 }
 0x2b8   :  { %7873 = vmatmul.mubr.msk.f32.vlgmr.msra.gmra.mrb[10].mxu0 %vm457_vm1, %v9747_v48  ;;  %8329 = vmatpush3.bf16.xpose.msk.msra.mxu1 %vm9779_vm2, %v8324_v27 }
 0x2b9   :  { %7865 = vmatprep.mubr.msk.f32.mxu1 %vm457_vm1, %v9719_v33  ;;  %8345 = vmatpush3.bf16.msra.mxu0 %v8342_v20  ;;  %v9835_v11 = vpop.permute.xlu1 %8698 }
 0x2ba   :  { %8338 = vmatprep.subr.msk.bf16.mxu1 %vm9779_vm2, %v8336_v46 }
 0x2bd   :  { %v9839_v23 = vpop.permute.xlu1 %8708 }
 0x2bf   :  { %7866 = vmatmul.mubr.msk.f32.vlgmr.msra.gmra.mrb[16].mxu1 %vm457_vm1, %v9721_v34 }
 0x2c0   :  { %8341 = vmatpush3.bf16.xpose.msk.msra.mxu1 %vm9779_vm2, %v8336_v46  ;;  %7879 = vmatprep.mubr.msk.f32.mxu1 %vm457_vm1, %v9741_v36 }
 0x2c1   :  { %v9847_v28 = vpop.permute.xlu1 %8713  ;;  %8347 = vmatprep.subr.bf16.mxu1 %v8346_v52 }
 0x2c5   :  { %v8719_v57 = vpop.permute.xlu1 %8718 }
 0x2c6   :  { %v8721_v17 = vunpack.i.h.bf16 %v8719_v57  ;;  %v8720_v37 = vunpack.i.l.bf16 %v8719_v57 }
 0x2c7   :  { %7880 = vmatmul.mubr.msk.f32.vlgmr.msra.gmra.mrb[18].mxu1 %vm457_vm1, %v9743_v42 }
 0x2c8   :  { %8349 = vmatpush3.bf16.msra.mxu1 %v8346_v52  ;;  %v9853_v58 = vpack.c.bf16 %v8721_v17, %v8720_v37 }
 0x2c9   :  { %8355 = vmatprep.subr.bf16.mxu1 %v9851_v35 }
 0x2ca   :  { %8351 = vmatprep.subr.bf16.mxu0 %v9853_v58 }
 0x372   :  { %v7832_v59 = vpop.f32.mrb[8].mxu1 }
 0x373   :  { %v9857_v60 = vmul.f32 0.35355338, %v7832_v59  ;;  %v532_v61 = vpop.f32.mrb[9].mxu1 }
 0x374   :  { %v9859_v62 = vmul.f32 0.35355338, %v532_v61 }
 0x375   :  { %v1184_v63 = vsel %vm1180_vm3, %v9857_v60, -inf }
 0x376   :  { %1185 = vmax.xlane.f32.xlu1 %v1184_v63  ;;  %v1181_v21 = vsel %vm1180_vm3, %v9859_v62, -inf }
 0x377   :  { %1182 = vmax.xlane.f32.xlu0 %v1181_v21 }
 0x37a   :  { %v7839_v47 = vpop.f32.mrb[10].mxu1 }
 0x37b   :  { %v621_v2 = vpop.f32.mrb[11].mxu1  ;;  %v9871_v13 = vmul.f32 0.35355338, %v7839_v47 }
 0x37c   :  { %v9875_v26 = vmul.f32 0.35355338, %v621_v2 }
 0x37d   :  { %v1190_v30 = vsel %vm1180_vm3, %v9871_v13, -inf }
 0x37e   :  { %v1187_v52 = vsel %vm1180_vm3, %v9875_v26, -inf }
 0x382   :  { %v7846_v3 = vpop.f32.mrb[12].mxu1 }
 0x383   :  { %v7860_v4 = vpop.f32.mrb[8].mxu0  ;;  %v710_v45 = vpop.f32.mrb[13].mxu1  ;;  %v9881_v46 = vmul.f32 0.35355338, %v7846_v3 }
 0x384   :  { %v9865_v25 = vmul.f32 0.35355338, %v7860_v4  ;;  %v888_v6 = vpop.f32.mrb[9].mxu0  ;;  %v9893_v17 = vmul.f32 0.35355338, %v710_v45 }
 0x385   :  { %v9867_v8 = vmul.f32 0.35355338, %v888_v6  ;;  %v1196_v56 = vsel %vm1180_vm3, %v9881_v46, -inf }
 0x386   :  { %v1208_v12 = vsel %vm1180_vm3, %v9865_v25, -inf  ;;  %v1193_v47 = vsel %vm1180_vm3, %v9893_v17, -inf }
 0x387   :  { %1209 = vmax.xlane.f32.xlu1 %v1208_v12  ;;  %v1205_v14 = vsel %vm1180_vm3, %v9867_v8, -inf }
 0x388   :  { %1206 = vmax.xlane.f32.xlu0 %v1205_v14 }
 0x38a   :  { %v7853_v15 = vpop.f32.mrb[14].mxu1 }
 0x38b   :  { %v7874_v27 = vpop.f32.mrb[10].mxu0  ;;  %v799_v20 = vpop.f32.mrb[15].mxu1  ;;  %v9889_v53 = vmul.f32 0.35355338, %v7853_v15 }
 0x38c   :  { %v9879_v1 = vmul.f32 0.35355338, %v7874_v27  ;;  %v1066_v41 = vpop.f32.mrb[11].mxu0  ;;  %1191 = vmax.xlane.f32.xlu0 %v1190_v30  ;;  %v9901_v21 = vmul.f32 0.35355338, %v799_v20  ;;  %v9925_v20 = vpop.permute.xlu0 %8688 }
 0x38d   :  { %v9885_v44 = vmul.f32 0.35355338, %v1066_v41  ;;  %v1202_v63 = vsel %vm1180_vm3, %v9889_v53, -inf }
 0x38e   :  { %v1220_v51 = vsel %vm1180_vm3, %v9879_v1, -inf  ;;  %v1199_v6 = vsel %vm1180_vm3, %v9901_v21, -inf }
 0x38f   :  { %1221 = vmax.xlane.f32.xlu1 %v1220_v51  ;;  %v1217_v37 = vsel %vm1180_vm3, %v9885_v44, -inf }
 0x390   :  { %1188 = vmax.xlane.f32.xlu0 %v1187_v52  ;;  %v9927_v41 = vpop.permute.xlu0 %8703 }
 0x392   :  { %v7867_v57 = vpop.f32.mrb[16].mxu1 }
 0x393   :  { %1197 = vmax.xlane.f32.xlu1 %v1196_v56  ;;  %v977_v59 = vpop.f32.mrb[17].mxu1  ;;  %v9897_v61 = vmul.f32 0.35355338, %v7867_v57 }
 0x394   :  { %1218 = vmax.xlane.f32.xlu0 %v1217_v37  ;;  %v9907_v4 = vmul.f32 0.35355338, %v977_v59  ;;  %v9929_v51 = vpop.permute.xlu0 %8723 }
 0x395   :  { %v1214_v2 = vsel %vm1180_vm3, %v9897_v61, -inf }
 0x396   :  { %v1211_v27 = vsel %vm1180_vm3, %v9907_v4, -inf }
 0x397   :  { %1203 = vmax.xlane.f32.xlu1 %v1202_v63 }
 0x398   :  { %1194 = vmax.xlane.f32.xlu0 %v1193_v47  ;;  %v9931_v52 = vpop.permute.xlu0 %8728 }
 0x39a   :  { %v7881_v3 = vpop.f32.mrb[18].mxu1 }
 0x39b   :  { %1215 = vmax.xlane.f32.xlu1 %v1214_v2  ;;  %v9909_v45 = vmul.f32 0.35355338, %v7881_v3  ;;  %v1155_v12 = vpop.f32.mrb[19].mxu1 }
 0x39c   :  { %1200 = vmax.xlane.f32.xlu0 %v1199_v6  ;;  %v9915_v15 = vmul.f32 0.35355338, %v1155_v12 }
 0x39d   :  { %v1226_v14 = vsel %vm1180_vm3, %v9909_v45, -inf }
 0x39e   :  { %v1223_v30 = vsel %vm1180_vm3, %v9915_v15, -inf }
 0x39f   :  { %1227 = vmax.xlane.f32.xlu1 %v1226_v14 }
 0x3a0   :  { %1212 = vmax.xlane.f32.xlu0 %v1211_v27 }
 0x3a4   :  { %1224 = vmax.xlane.f32.xlu0 %v1223_v30 }
 0x3b0   :  { %2055 = vrot.lane.b32.xlu1 %v9683_v9, %s9367_s18 }
 0x3ba   :  { %2053 = vrot.lane.b32.xlu0 %v9677_v5, %s9367_s18 }
 0x403   :  { %v1186_v56 = vpop.xlane.xlu1 %1185 }
 0x404   :  { %v1230_v57 = vsub.f32 %v9857_v60, %v1186_v56  ;;  %v1183_v37 = vpop.xlane.xlu0 %1182 }
 0x405   :  { %v1229_v59 = vsub.f32 %v9859_v62, %v1183_v37 }
 0x406   :  { %v1247_v63 = vmul.f32 1.442695, %v1230_v57 }
 0x407   :  { %v1245_v47 = vmul.f32 1.442695, %v1229_v59 }
 0x408   :  { %9108 = vpow2.f32 %v1247_v63 }
 0x409   :  { %9110 = vpow2.f32 %v1245_v47 }
 0x412   :  { %v9935_v2 = vpop.eup %9108 }
 0x413   :  { %v9937_v3 = vpop.eup %9110  ;;  %v1280_v6 = vsel %vm1180_vm3, %v9935_v2, 0.0 }
 0x414   :  { %v1210_v12 = vpop.xlane.xlu1 %1209  ;;  %1281 = vadd.xlane.f32.xlu1 %v1280_v6  ;;  %v1277_v14 = vsel %vm1180_vm3, %v9937_v3, 0.0 }
 0x415   :  { %v1238_v60 = vsub.f32 %v9865_v25, %v1210_v12  ;;  %v1207_v27 = vpop.xlane.xlu0 %1206  ;;  %1278 = vadd.xlane.f32.xlu0 %v1277_v14 }
 0x416   :  { %v1237_v62 = vsub.f32 %v9867_v8, %v1207_v27 }
 0x417   :  { %v1263_v30 = vmul.f32 1.442695, %v1238_v60 }
 0x418   :  { %v1261_v56 = vmul.f32 1.442695, %v1237_v62 }
 0x419   :  { %9112 = vpow2.f32 %v1263_v30  ;;  %v1192_v57 = vpop.xlane.xlu0 %1191 }
 0x41a   :  { %9114 = vpow2.f32 %v1261_v56  ;;  %v1232_v37 = vsub.f32 %v9871_v13, %v1192_v57 }
 0x41c   :  { %v1251_v59 = vmul.f32 1.442695, %v1232_v37  ;;  %v1222_v63 = vpop.xlane.xlu1 %1221 }
 0x41d   :  { %v1242_v47 = vsub.f32 %v9879_v1, %v1222_v63  ;;  %v1189_v6 = vpop.xlane.xlu0 %1188 }
 0x41e   :  { %9116 = vpow2.f32 %v1251_v59  ;;  %v1231_v5 = vsub.f32 %v9875_v26, %v1189_v6 }
 0x41f   :  { %v1271_v25 = vmul.f32 1.442695, %v1242_v47 }
 0x420   :  { %v1249_v12 = vmul.f32 1.442695, %v1231_v5  ;;  %v1198_v14 = vpop.xlane.xlu1 %1197 }
 0x421   :  { %9118 = vpow2.f32 %v1271_v25  ;;  %v1234_v8 = vsub.f32 %v9881_v46, %v1198_v14  ;;  %v1219_v60 = vpop.xlane.xlu0 %1218 }
 0x422   :  { %9120 = vpow2.f32 %v1249_v12  ;;  %v1241_v27 = vsub.f32 %v9885_v44, %v1219_v60 }
 0x423   :  { %v9950_v62 = vpop.eup %9112  ;;  %v1255_v13 = vmul.f32 1.442695, %v1234_v8 }
 0x424   :  { %v9952_v30 = vpop.eup %9114  ;;  %v1269_v1 = vmul.f32 1.442695, %v1241_v27  ;;  %v1204_v56 = vpop.xlane.xlu1 %1203  ;;  %v1304_v26 = vsel %vm1180_vm3, %v9950_v62, 0.0 }
 0x425   :  { %9122 = vpow2.f32 %v1255_v13  ;;  %v1236_v5 = vsub.f32 %v9889_v53, %v1204_v56  ;;  %v1195_v57 = vpop.xlane.xlu0 %1194  ;;  %1305 = vadd.xlane.f32.xlu1 %v1304_v26  ;;  %v1301_v46 = vsel %vm1180_vm3, %v9952_v30, 0.0 }
 0x426   :  { %9124 = vpow2.f32 %v1269_v1  ;;  %v1233_v44 = vsub.f32 %v9893_v17, %v1195_v57  ;;  %1302 = vadd.xlane.f32.xlu0 %v1301_v46 }
 0x427   :  { %v1259_v37 = vmul.f32 1.442695, %v1236_v5 }
 0x428   :  { %v9960_v59 = vpop.eup %9116  ;;  %v1253_v63 = vmul.f32 1.442695, %v1233_v44  ;;  %v1216_v47 = vpop.xlane.xlu1 %1215 }
 0x429   :  { %9126 = vpow2.f32 %v1259_v37  ;;  %v1240_v6 = vsub.f32 %v9897_v61, %v1216_v47  ;;  %v1201_v25 = vpop.xlane.xlu0 %1200  ;;  %v1286_v53 = vsel %vm1180_vm3, %v9960_v59, 0.0 }
 0x42a   :  { %9128 = vpow2.f32 %v1253_v63  ;;  %v1235_v12 = vsub.f32 %v9901_v21, %v1201_v25  ;;  %1287 = vadd.xlane.f32.xlu1 %v1286_v53 }
 0x42b   :  { %v9966_v14 = vpop.eup %9118  ;;  %v1267_v17 = vmul.f32 1.442695, %v1240_v6 }
 0x42c   :  { %v9968_v8 = vpop.eup %9120  ;;  %v1257_v60 = vmul.f32 1.442695, %v1235_v12  ;;  %v1316_v27 = vsel %vm1180_vm3, %v9966_v14, 0.0 }
 0x42d   :  { %9130 = vpow2.f32 %v1267_v17  ;;  %v1213_v13 = vpop.xlane.xlu0 %1212  ;;  %v1283_v61 = vsel %vm1180_vm3, %v9968_v8, 0.0  ;;  %v1228_v17 = vpop.xlane.xlu1 %1227 }
 0x42e   :  { %9132 = vpow2.f32 %v1257_v60  ;;  %v1239_v1 = vsub.f32 %v9907_v4, %v1213_v13  ;;  %1317 = vadd.xlane.f32.xlu1 %v1316_v27  ;;  %1284 = vadd.xlane.f32.xlu0 %v1283_v61  ;;  %v1244_v60 = vsub.f32 %v9909_v45, %v1228_v17  ;;  %v8691_v17 = vunpack.i.h.bf16 %v9925_v20 }
 0x42f   :  { %v9975_v21 = vpop.eup %9122 }
 0x430   :  { %v9977_v56 = vpop.eup %9124  ;;  %v1265_v26 = vmul.f32 1.442695, %v1239_v1  ;;  %v1292_v5 = vsel %vm1180_vm3, %v9975_v21, 0.0  ;;  %v1275_v13 = vmul.f32 1.442695, %v1244_v60  ;;  %v8690_v60 = vunpack.i.l.bf16 %v9925_v20 }
 0x431   :  { %v1313_v57 = vsel %vm1180_vm3, %v9977_v56, 0.0  ;;  %v1225_v27 = vpop.xlane.xlu0 %1224  ;;  %v10043_v45 = vpop.permute.xlu1 %2055 }
 0x432   :  { %9134 = vpow2.f32 %v1265_v26  ;;  %1293 = vadd.xlane.f32.xlu1 %v1292_v5  ;;  %1314 = vadd.xlane.f32.xlu0 %v1313_v57  ;;  %v1243_v61 = vsub.f32 %v9915_v15, %v1225_v27 }
 0x433   :  { %v9983_v46 = vpop.eup %9126  ;;  %9136 = vpow2.f32 %v1275_v13 }
 0x434   :  { %v9985_v44 = vpop.eup %9128  ;;  %v1298_v4 = vsel %vm1180_vm3, %v9983_v46, 0.0  ;;  %v1273_v1 = vmul.f32 1.442695, %v1243_v61  ;;  %v8358_v61 = vpack.c.bf16 %v8691_v17, %v8690_v60  ;;  %v8696_v17 = vunpack.i.h.bf16 %v9825_v10 }
 0x435   :  { %v1289_v37 = vsel %vm1180_vm3, %v9985_v44, 0.0  ;;  %v10047_v15 = vpop.permute.xlu0 %2053  ;;  %v8695_v60 = vunpack.i.l.bf16 %v9825_v10 }
 0x436   :  { %1299 = vadd.xlane.f32.xlu1 %v1298_v4  ;;  %1290 = vadd.xlane.f32.xlu0 %v1289_v37  ;;  %9138 = vpow2.f32 %v1273_v1 }
 0x437   :  { %v9991_v63 = vpop.eup %9130 }
 0x438   :  { %v9993_v47 = vpop.eup %9132  ;;  %v1310_v6 = vsel %vm1180_vm3, %v9991_v63, 0.0 }
 0x439   :  { %v1295_v25 = vsel %vm1180_vm3, %v9993_v47, 0.0 }
 0x43a   :  { %1311 = vadd.xlane.f32.xlu1 %v1310_v6  ;;  %1296 = vadd.xlane.f32.xlu0 %v1295_v25 }
 0x43c   :  { %v9999_v53 = vpop.eup %9134 }
 0x43d   :  { %v1307_v12 = vsel %vm1180_vm3, %v9999_v53, 0.0  ;;  %v10009_v26 = vpop.eup %9136 }
 0x43e   :  { %1308 = vadd.xlane.f32.xlu0 %v1307_v12  ;;  %v1322_v5 = vsel %vm1180_vm3, %v10009_v26, 0.0 }
 0x440   :  { %v10013_v57 = vpop.eup %9138 }
 0x441   :  { %v1319_v4 = vsel %vm1180_vm3, %v10013_v57, 0.0 }
 0x44b   :  { %2146 = vrot.lane.b32.xlu1 %v9681_v7, %s9367_s18 }
 0x454   :  { %2144 = vrot.lane.b32.xlu0 %v9679_v31, %s9367_s18 }
 0x46f   :  { %1323 = vadd.xlane.f32.xlu1 %v1322_v5 }
 0x473   :  { %1320 = vadd.xlane.f32.xlu0 %v1319_v4 }
 0x480   :  { %8738 = vrot.lane.b32.xlu1 %v9731_v39, %s9366_s17 }
 0x484   :  { %2237 = vrot.lane.b32.xlu1 %v9701_v19, %s9367_s18 }
 0x488   :  { %2328 = vrot.lane.b32.xlu1 %v9703_v22, %s9367_s18 }
 0x489   :  { %8733 = vrot.lane.b32.xlu0 %v9735_v40, %s9366_s17 }
 0x48c   :  { %8743 = vrot.lane.b32.xlu1 %v9755_v50, %s9366_s17 }
 0x48d   :  { %2235 = vrot.lane.b32.xlu0 %v9699_v18, %s9367_s18 }
 0x490   :  { %2508 = vrot.lane.b32.xlu1 %v9719_v33, %s9367_s18 }
 0x491   :  { %2326 = vrot.lane.b32.xlu0 %v9709_v16, %s9367_s18 }
 0x494   :  { %2510 = vrot.lane.b32.xlu1 %v9721_v34, %s9367_s18 }
 0x495   :  { %2417 = vrot.lane.b32.xlu0 %v9713_v0, %s9367_s18 }
 0x498   :  { %2601 = vrot.lane.b32.xlu1 %v9747_v48, %s9367_s18 }
 0x499   :  { %2419 = vrot.lane.b32.xlu0 %v9723_v38, %s9367_s18 }
 0x49c   :  { %2692 = vrot.lane.b32.xlu1 %v9743_v42, %s9367_s18 }
 0x49d   :  { %8748 = vrot.lane.b32.xlu0 %v9751_v49, %s9366_s17 }
 0x4a0   :  { %8758 = vrot.lane.b32.xlu1 %v9689_v43, %s9368_s19 }
 0x4a1   :  { %2599 = vrot.lane.b32.xlu0 %v9745_v24, %s9367_s18  ;;  %v1282_v37 = vpop.xlane.xlu1 %1281 }
 0x4a2   :  { %9140 = vrcp.f32 %v1282_v37  ;;  %v1279_v6 = vpop.xlane.xlu0 %1278 }
 0x4a3   :  { %9142 = vrcp.f32 %v1279_v6 }
 0x4a4   :  { %8763 = vrot.lane.b32.xlu1 %v9707_v55, %s9368_s19 }
 0x4a5   :  { %2690 = vrot.lane.b32.xlu0 %v9741_v36, %s9367_s18 }
 0x4a8   :  { %8768 = vrot.lane.b32.xlu1 %v9717_v32, %s9368_s19 }
 0x4a9   :  { %8753 = vrot.lane.b32.xlu0 %v9693_v54, %s9368_s19 }
 0x4ac   :  { %v9141_v25 = vpop.eup %9140  ;;  %8778 = vrot.lane.b32.xlu1 %v9731_v39, %s9368_s19 }
 0x4ad   :  { %v9143_v12 = vpop.eup %9142  ;;  %8773 = vrot.lane.b32.xlu0 %v9735_v40, %s9368_s19  ;;  %v1342_v13 = vmul.f32 %v9141_v25, %v9935_v2 }
 0x4ae   :  { %v1341_v27 = vmul.f32 %v9143_v12, %v9937_v3 }
 0x4b0   :  { %8788 = vrot.lane.b32.xlu1 %v9751_v49, %s9368_s19  ;;  %7886 = vmatprep.mubr.msk.f32.mxu0 %vm1180_vm3, %v1341_v27 }
 0x4b1   :  { %8783 = vrot.lane.b32.xlu0 %v9755_v50, %s9368_s19  ;;  %7887 = vmatmul.mubr.msk.f32.vlgmr.msra.gmra.mrb[12].mxu0 %vm1180_vm3, %v1342_v13 }
 0x4b2   :  { %v1306_v1 = vpop.xlane.xlu1 %1305  ;;  %8353 = vmatpush3.bf16.msra.mxu0 %v9853_v58 }
 0x4b3   :  { %8359 = vmatprep.subr.bf16.mxu0 %v8358_v61  ;;  %v1303_v20 = vpop.xlane.xlu0 %1302 }
 0x4b4   :  { %8798 = vrot.lane.b32.xlu1 %v9689_v43, %s9369_s20 }
 0x4b5   :  { %8793 = vrot.lane.b32.xlu0 %v9693_v54, %s9369_s20 }
 0x4b7   :  { %v1288_v2 = vpop.xlane.xlu1 %1287 }
 0x4b8   :  { %8808 = vrot.lane.b32.xlu1 %v9717_v32, %s9369_s20  ;;  %9144 = vrcp.f32 %v1288_v2 }
 0x4b9   :  { %8803 = vrot.lane.b32.xlu0 %v9707_v55, %s9369_s20 }
 0x4bb   :  { %v1318_v3 = vpop.xlane.xlu1 %1317  ;;  %v1285_v5 = vpop.xlane.xlu0 %1284 }
 0x4bc   :  { %9146 = vrcp.f32 %v1285_v5 }
 0x4bd   :  { %9148 = vrcp.f32 %v1303_v20 }
 0x4bf   :  { %v1294_v58 = vpop.xlane.xlu1 %1293  ;;  %v1315_v4 = vpop.xlane.xlu0 %1314 }
 0x4c0   :  { %9150 = vrcp.f32 %v1294_v58 }
 0x4c2   :  { %v9145_v25 = vpop.eup %9144 }
 0x4c3   :  { %v1300_v37 = vpop.xlane.xlu1 %1299  ;;  %v1291_v6 = vpop.xlane.xlu0 %1290  ;;  %v1344_v20 = vmul.f32 %v9145_v25, %v9960_v59 }
 0x4c4   :  { %9152 = vrcp.f32 %v1291_v6 }
 0x4c5   :  { %9154 = vrcp.f32 %v1306_v1  ;;  %v8362_v1 = vpack.c.bf16 %v8696_v17, %v8695_v60  ;;  %v8701_v17 = vunpack.i.h.bf16 %v9835_v11 }
 0x4c6   :  { %v9147_v12 = vpop.eup %9146  ;;  %9156 = vrcp.f32 %v1318_v3 }
 0x4c7   :  { %v1297_v27 = vpop.xlane.xlu0 %1296  ;;  %9158 = vrcp.f32 %v1300_v37  ;;  %v1312_v13 = vpop.xlane.xlu1 %1311  ;;  %v1343_v2 = vmul.f32 %v9147_v12, %v9968_v8  ;;  %v8726_v8 = vunpack.i.h.bf16 %v9929_v51  ;;  %v8725_v37 = vunpack.i.l.bf16 %v9929_v51 }
 0x4c8   :  { %9160 = vrcp.f32 %v1297_v27  ;;  %v9149_v10 = vpop.eup %9148 }
 0x4c9   :  { %9162 = vrcp.f32 %v1315_v4  ;;  %7893 = vmatprep.mubr.msk.f32.mxu1 %vm1180_vm3, %v1343_v2  ;;  %v1349_v60 = vmul.f32 %v9149_v10, %v9952_v30  ;;  %v8706_v2 = vunpack.i.h.bf16 %v9927_v41 }
 0x4ca   :  { %9164 = vrcp.f32 %v1312_v13  ;;  %7894 = vmatmul.mubr.msk.f32.vlgmr.msra.gmra.mrb[20].mxu1 %vm1180_vm3, %v1344_v20  ;;  %v9151_v3 = vpop.eup %9150  ;;  %v8366_v13 = vpack.c.bf16 %v8726_v8, %v8725_v37 }
 0x4cb   :  { %v1309_v5 = vpop.xlane.xlu0 %1308  ;;  %8357 = vmatpush3.bf16.msra.mxu1 %v9851_v35  ;;  %v1346_v25 = vmul.f32 %v9151_v3, %v9975_v21  ;;  %v8700_v35 = vunpack.i.l.bf16 %v9835_v11  ;;  %v8711_v3 = vunpack.i.h.bf16 %v9839_v23 }
 0x4cc   :  { %9166 = vrcp.f32 %v1309_v5  ;;  %8363 = vmatprep.subr.bf16.mxu1 %v8362_v1 }
 0x4cd   :  { %v8370_v10 = vpack.c.bf16 %v8701_v17, %v8700_v35 }
 0x4ce   :  { %v9153_v58 = vpop.eup %9152 }
 0x4cf   :  { %v9155_v59 = vpop.eup %9154  ;;  %v1345_v4 = vmul.f32 %v9153_v58, %v9985_v44  ;;  %v8705_v44 = vunpack.i.l.bf16 %v9927_v41  ;;  %v8710_v58 = vunpack.i.l.bf16 %v9839_v23 }
 0x4d0   :  { %v9157_v6 = vpop.eup %9156  ;;  %v1350_v30 = vmul.f32 %v9155_v59, %v9950_v62 }
 0x4d1   :  { %v9159_v12 = vpop.eup %9158  ;;  %7900 = vmatprep.mubr.msk.f32.mxu0 %vm1180_vm3, %v1345_v4  ;;  %v8380_v23 = vpack.c.bf16 %v8711_v3, %v8710_v58 }
 0x4d2   :  { %v9161_v27 = vpop.eup %9160  ;;  %7901 = vmatmul.mubr.msk.f32.vlgmr.msra.gmra.mrb[14].mxu0 %vm1180_vm3, %v1346_v25  ;;  %v1348_v11 = vmul.f32 %v9159_v12, %v9983_v46  ;;  %v1354_v46 = vmul.f32 %v9157_v6, %v9966_v14 }
 0x4d3   :  { %v9163_v51 = vpop.eup %9162  ;;  %8361 = vmatpush3.bf16.msra.mxu0 %v8358_v61  ;;  %7914 = vmatprep.mubr.msk.f32.mxu0 %vm1180_vm3, %v1349_v60  ;;  %v1347_v21 = vmul.f32 %v9161_v27, %v9993_v47  ;;  %v8374_v61 = vpack.c.bf16 %v8706_v2, %v8705_v44  ;;  %v8716_v60 = vunpack.i.h.bf16 %v9847_v28  ;;  %v8715_v27 = vunpack.i.l.bf16 %v9847_v28 }
 0x4d4   :  { %v9165_v20 = vpop.eup %9164  ;;  %8367 = vmatprep.subr.bf16.mxu0 %v8366_v13  ;;  %v1353_v41 = vmul.f32 %v9163_v51, %v9977_v56  ;;  %v8731_v56 = vunpack.i.h.bf16 %v9931_v52 }
 0x4d5   :  { %7907 = vmatprep.mubr.msk.f32.mxu1 %vm1180_vm3, %v1347_v21  ;;  %v1352_v62 = vmul.f32 %v9165_v20, %v9991_v63  ;;  %v2145_v63 = vpop.permute.xlu0 %2144 }
 0x4d6   :  { %v9167_v5 = vpop.eup %9166  ;;  %7908 = vmatmul.mubr.msk.f32.vlgmr.msra.gmra.mrb[22].mxu1 %vm1180_vm3, %v1348_v11  ;;  %7915 = vmatmul.mubr.msk.f32.vlgmr.msra.gmra.mrb[16].mxu0 %vm1180_vm3, %v1350_v30  ;;  %v8392_v11 = vpack.c.bf16 %v8716_v60, %v8715_v27 }
 0x4d7   :  { %v1351_v47 = vmul.f32 %v9167_v5, %v9999_v53  ;;  %8365 = vmatpush3.bf16.msra.mxu1 %v8362_v1  ;;  %8369 = vmatpush3.bf16.msra.mxu0 %v8366_v13  ;;  %v8730_v53 = vunpack.i.l.bf16 %v9931_v52  ;;  %v2147_v52 = vpop.permute.xlu1 %2146 }
 0x4d8   :  { %7928 = vmatprep.mubr.msk.f32.mxu0 %vm1180_vm3, %v1353_v41  ;;  %8371 = vmatprep.subr.bf16.mxu1 %v8370_v10 }
 0x4d9   :  { %8376 = vmatprep.subr.msk.bf16.mxu0 %vm9779_vm2, %v8374_v61  ;;  %7921 = vmatprep.mubr.msk.f32.mxu1 %vm1180_vm3, %v1351_v47  ;;  %v8386_v14 = vpack.c.bf16 %v8731_v56, %v8730_v53 }
 0x4da   :  { %7922 = vmatmul.mubr.msk.f32.vlgmr.msra.gmra.mrb[24].mxu1 %vm1180_vm3, %v1352_v62  ;;  %7929 = vmatmul.mubr.msk.f32.vlgmr.msra.gmra.mrb[18].mxu0 %vm1180_vm3, %v1354_v46 }
 0x4db   :  { %8373 = vmatpush3.bf16.msra.mxu1 %v8370_v10  ;;  %7942 = vmatprep.mubr.msk.f32.mxu0 %vm457_vm1, %v10047_v15 }
 0x4dc   :  { %8382 = vmatprep.subr.msk.bf16.mxu1 %vm9779_vm2, %v8380_v23 }
 0x4e0   :  { %8379 = vmatpush3.bf16.xpose.msk.msra.mxu0 %vm9779_vm2, %v8374_v61 }
 0x4e1   :  { %8388 = vmatprep.subr.msk.bf16.mxu0 %vm9779_vm2, %v8386_v14 }
 0x4e7   :  { %7943 = vmatmul.mubr.msk.f32.vlgmr.msra.gmra.mrb[20].mxu0 %vm457_vm1, %v10043_v45 }
 0x4e8   :  { %8391 = vmatpush3.bf16.xpose.msk.msra.mxu0 %vm9779_vm2, %v8386_v14 }
 0x4fc   :  { %v1324_v1 = vpop.xlane.xlu1 %1323 }
 0x4fd   :  { %9168 = vrcp.f32 %v1324_v1 }
 0x500   :  { %v8739_v15 = vpop.permute.xlu1 %8738  ;;  %v1321_v8 = vpop.xlane.xlu0 %1320 }
 0x501   :  { %9170 = vrcp.f32 %v1321_v8 }
 0x504   :  { %v2238_v37 = vpop.permute.xlu1 %2237  ;;  %v8734_v59 = vpop.permute.xlu0 %8733 }
 0x505   :  { %v8736_v4 = vunpack.i.h.bf16 %v8734_v59  ;;  %v8735_v6 = vunpack.i.l.bf16 %v8734_v59 }
 0x507   :  { %v8398_v25 = vpack.c.bf16 %v8736_v4, %v8735_v6  ;;  %v9169_v45 = vpop.eup %9168 }
 0x508   :  { %v2329_v12 = vpop.permute.xlu1 %2328  ;;  %v2236_v17 = vpop.permute.xlu0 %2235  ;;  %v1356_v20 = vmul.f32 %v9169_v45, %v10009_v26  ;;  %v8741_v26 = vunpack.i.h.bf16 %v8739_v15 }
 0x509   :  { %7956 = vmatprep.mubr.msk.f32.mxu0 %vm457_vm1, %v2236_v17  ;;  %8400 = vmatprep.subr.msk.bf16.mxu0 %vm9779_vm2, %v8398_v25 }
 0x50a   :  { %7957 = vmatmul.mubr.msk.f32.vlgmr.msra.gmra.mrb[22].mxu0 %vm457_vm1, %v2238_v37 }
 0x50b   :  { %v9171_v35 = vpop.eup %9170  ;;  %8403 = vmatpush3.bf16.xpose.msk.msra.mxu0 %vm9779_vm2, %v8398_v25 }
 0x50c   :  { %v8744_v13 = vpop.permute.xlu1 %8743  ;;  %v2327_v51 = vpop.permute.xlu0 %2326  ;;  %v1355_v2 = vmul.f32 %v9171_v35, %v10013_v57  ;;  %v8740_v57 = vunpack.i.l.bf16 %v8739_v15 }
 0x50d   :  { %v8746_v44 = vunpack.i.h.bf16 %v8744_v13  ;;  %v8745_v21 = vunpack.i.l.bf16 %v8744_v13 }
 0x50e   :  { %7935 = vmatprep.mubr.msk.f32.mxu1 %vm1180_vm3, %v1355_v2  ;;  %v8404_v58 = vpack.c.bf16 %v8741_v26, %v8740_v57 }
 0x50f   :  { %v8410_v30 = vpack.c.bf16 %v8746_v44, %v8745_v21  ;;  %7936 = vmatmul.mubr.msk.f32.vlgmr.msra.gmra.mrb[26].mxu1 %vm1180_vm3, %v1356_v20 }
 0x510   :  { %8385 = vmatpush3.bf16.xpose.msk.msra.mxu1 %vm9779_vm2, %v8380_v23  ;;  %v2509_v28 = vpop.permute.xlu1 %2508  ;;  %7949 = vmatprep.mubr.msk.f32.mxu1 %vm457_vm1, %v2145_v63  ;;  %v2418_v5 = vpop.permute.xlu0 %2417 }
 0x511   :  { %8394 = vmatprep.subr.msk.bf16.mxu1 %vm9779_vm2, %v8392_v11  ;;  %7970 = vmatprep.mubr.msk.f32.mxu0 %vm457_vm1, %v2418_v5 }
 0x512   :  { %8412 = vmatprep.subr.msk.bf16.mxu0 %vm9779_vm2, %v8410_v30 }
 0x514   :  { %v2511_v10 = vpop.permute.xlu1 %2510  ;;  %v2420_v3 = vpop.permute.xlu0 %2419 }
 0x515   :  { %7971 = vmatmul.mubr.msk.f32.vlgmr.msra.gmra.mrb[24].mxu0 %vm457_vm1, %v2420_v3 }
 0x516   :  { %8415 = vmatpush3.bf16.xpose.msk.msra.mxu0 %vm9779_vm2, %v8410_v30 }
 0x517   :  { %7950 = vmatmul.mubr.msk.f32.vlgmr.msra.gmra.mrb[28].mxu1 %vm457_vm1, %v2147_v52 }
 0x518   :  { %8397 = vmatpush3.bf16.xpose.msk.msra.mxu1 %vm9779_vm2, %v8392_v11  ;;  %7963 = vmatprep.mubr.msk.f32.mxu1 %vm457_vm1, %v2327_v51  ;;  %v2602_v41 = vpop.permute.xlu1 %2601  ;;  %v8749_v47 = vpop.permute.xlu0 %8748 }
 0x519   :  { %8406 = vmatprep.subr.msk.bf16.mxu1 %vm9779_vm2, %v8404_v58  ;;  %v8751_v61 = vunpack.i.h.bf16 %v8749_v47  ;;  %v8750_v62 = vunpack.i.l.bf16 %v8749_v47 }
 0x51b   :  { %v8416_v56 = vpack.c.bf16 %v8751_v61, %v8750_v62 }
 0x51c   :  { %v2693_v46 = vpop.permute.xlu1 %2692  ;;  %v2600_v23 = vpop.permute.xlu0 %2599 }
 0x51d   :  { %7984 = vmatprep.mubr.msk.f32.mxu0 %vm457_vm1, %v2600_v23 }
 0x51e   :  { %7985 = vmatmul.mubr.msk.f32.vlgmr.msra.gmra.mrb[26].mxu0 %vm457_vm1, %v2602_v41 }
 0x51f   :  { %7964 = vmatmul.mubr.msk.f32.vlgmr.msra.gmra.mrb[30].mxu1 %vm457_vm1, %v2329_v12 }
 0x520   :  { %8409 = vmatpush3.bf16.xpose.msk.msra.mxu1 %vm9779_vm2, %v8404_v58  ;;  %7977 = vmatprep.mubr.msk.f32.mxu1 %vm457_vm1, %v2509_v28  ;;  %v8759_v53 = vpop.permute.xlu1 %8758  ;;  %v2691_v14 = vpop.permute.xlu0 %2690 }
 0x521   :  { %8418 = vmatprep.subr.msk.bf16.mxu1 %vm9779_vm2, %v8416_v56  ;;  %v8761_v52 = vunpack.i.h.bf16 %v8759_v53  ;;  %v8760_v63 = vunpack.i.l.bf16 %v8759_v53 }
 0x523   :  { %v8426_v6 = vpack.c.bf16 %v8761_v52, %v8760_v63 }
 0x524   :  { %v8764_v1 = vpop.permute.xlu1 %8763  ;;  %v8754_v15 = vpop.permute.xlu0 %8753 }
 0x525   :  { %v8766_v8 = vunpack.i.h.bf16 %v8764_v1  ;;  %v8765_v37 = vunpack.i.l.bf16 %v8764_v1  ;;  %v8756_v59 = vunpack.i.h.bf16 %v8754_v15  ;;  %v8755_v4 = vunpack.i.l.bf16 %v8754_v15 }
 0x527   :  { %7978 = vmatmul.mubr.msk.f32.vlgmr.msra.gmra.mrb[32].mxu1 %vm457_vm1, %v2511_v10  ;;  %v8422_v25 = vpack.c.bf16 %v8756_v59, %v8755_v4  ;;  %v10168_v17 = vpack.c.bf16 %v8766_v8, %v8765_v37 }
 0x528   :  { %8421 = vmatpush3.bf16.xpose.msk.msra.mxu1 %vm9779_vm2, %v8416_v56  ;;  %7991 = vmatprep.mubr.msk.f32.mxu1 %vm457_vm1, %v2691_v14  ;;  %v8769_v12 = vpop.permute.xlu1 %8768 }
 0x529   :  { %8427 = vmatprep.subr.bf16.mxu1 %v8426_v6  ;;  %8423 = vmatprep.subr.bf16.mxu0 %v8422_v25  ;;  %v8771_v45 = vunpack.i.h.bf16 %v8769_v12  ;;  %v8770_v35 = vunpack.i.l.bf16 %v8769_v12 }
 0x52a   :  { %8425 = vmatpush3.bf16.msra.mxu0 %v8422_v25 }
 0x52b   :  { %8431 = vmatprep.subr.bf16.mxu0 %v10168_v17  ;;  %v10172_v60 = vpack.c.bf16 %v8771_v45, %v8770_v35 }
 0x52f   :  { %7992 = vmatmul.mubr.msk.f32.vlgmr.msra.gmra.mrb[34].mxu1 %vm457_vm1, %v2693_v46 }
 0x530   :  { %8429 = vmatpush3.bf16.msra.mxu1 %v8426_v6 }
 0x531   :  { %8435 = vmatprep.subr.bf16.mxu1 %v10172_v60 }
 0x584   :  { %v10175_v27 = vpop.f32.mrb[12].mxu0 }
 0x585   :  { %11380 = vst [vmem:[#allocation4_spill] sm:$0xff] %v10175_v27  ;;  %v10177_v13 = vpop.f32.mrb[13].mxu0 }
 0x586   :  { %11381 = vst [vmem:[#allocation5_spill] sm:$0xff] %v10177_v13 }
 0x59d   :  { %v10179_v51 = vpop.f32.mrb[20].mxu1 }
 0x59e   :  { %11382 = vst [vmem:[#allocation6_spill] sm:$0xff] %v10179_v51  ;;  %v10181_v2 = vpop.f32.mrb[21].mxu1 }
 0x59f   :  { %11383 = vst [vmem:[#allocation7_spill] sm:$0xff] %v10181_v2 }
 0x5a5   :  { %v10183_v44 = vpop.f32.mrb[14].mxu0 }
 0x5a6   :  { %11384 = vst [vmem:[#allocation8_spill] sm:$0xff] %v10183_v44  ;;  %v10185_v21 = vpop.f32.mrb[15].mxu0 }
 0x5a7   :  { %11385 = vst [vmem:[#allocation9_spill] sm:$0xff] %v10185_v21 }
 0x5a9   :  { %v10187_v20 = vpop.f32.mrb[22].mxu1  ;;  %v10189_v11 = vpop.f32.mrb[16].mxu0 }
 0x5aa   :  { %11386 = vst [vmem:[#allocation10_spill] sm:$0xff] %v10187_v20  ;;  %11387 = vst [vmem:[#allocation11_spill] sm:$0xff] %v10189_v11  ;;  %v10191_v30 = vpop.f32.mrb[23].mxu1  ;;  %v10193_v28 = vpop.f32.mrb[17].mxu0 }
 0x5ab   :  { %11388 = vst [vmem:[#allocation12_spill] sm:$0xff] %v10191_v30  ;;  %11389 = vst [vmem:[#allocation13_spill] sm:$0xff] %v10193_v28 }
 0x5ad   :  { %v10195_v5 = vpop.f32.mrb[24].mxu1  ;;  %v10197_v26 = vpop.f32.mrb[18].mxu0 }
 0x5ae   :  { %11390 = vst [vmem:[#allocation14_spill] sm:$0xff] %v10195_v5  ;;  %11391 = vst [vmem:[#allocation15_spill] sm:$0xff] %v10197_v26  ;;  %v10199_v57 = vpop.f32.mrb[25].mxu1  ;;  %v10201_v10 = vpop.f32.mrb[19].mxu0 }
 0x5af   :  { %11392 = vst [vmem:[#allocation16_spill] sm:$0xff] %v10199_v57  ;;  %11393 = vst [vmem:[#allocation17_spill] sm:$0xff] %v10201_v10 }
 0x5ba   :  { %v7944_v3 = vpop.f32.mrb[20].mxu0 }
 0x5bb   :  { %v10203_v58 = vmul.f32 0.35355338, %v7944_v3  ;;  %v2135_v41 = vpop.f32.mrb[21].mxu0 }
 0x5bc   :  { %v10205_v47 = vmul.f32 0.35355338, %v2135_v41 }
 0x5bd   :  { %v2800_v61 = vsel %vm1180_vm3, %v10203_v58, -inf }
 0x5be   :  { %2801 = vmax.xlane.f32.xlu1 %v2800_v61  ;;  %v2797_v62 = vsel %vm1180_vm3, %v10205_v47, -inf }
 0x5bf   :  { %2798 = vmax.xlane.f32.xlu0 %v2797_v62 }
 0x5dd   :  { %v7958_v46 = vpop.f32.mrb[22].mxu0 }
 0x5de   :  { %v10211_v23 = vmul.f32 0.35355338, %v7958_v46  ;;  %v2317_v56 = vpop.f32.mrb[23].mxu0 }
 0x5df   :  { %v10213_v53 = vmul.f32 0.35355338, %v2317_v56 }
 0x5e0   :  { %v2812_v14 = vsel %vm1180_vm3, %v10211_v23, -inf }
 0x5e1   :  { %2813 = vmax.xlane.f32.xlu1 %v2812_v14  ;;  %v2809_v52 = vsel %vm1180_vm3, %v10213_v53, -inf }
 0x5e2   :  { %v10219_v63 = vpop.f32.mrb[26].mxu1  ;;  %2810 = vmax.xlane.f32.xlu0 %v2809_v52 }
 0x5e3   :  { %11394 = vst [vmem:[#allocation18_spill] sm:$0xff] %v10219_v63  ;;  %v10221_v1 = vpop.f32.mrb[27].mxu1 }
 0x5e4   :  { %11395 = vst [vmem:[#allocation19_spill] sm:$0xff] %v10221_v1 }
 0x5e8   :  { %v7972_v15 = vpop.f32.mrb[24].mxu0 }
 0x5e9   :  { %v10223_v8 = vmul.f32 0.35355338, %v7972_v15  ;;  %v2499_v37 = vpop.f32.mrb[25].mxu0 }
 0x5ea   :  { %v7951_v59 = vpop.f32.mrb[28].mxu1  ;;  %v10233_v35 = vmul.f32 0.35355338, %v2499_v37 }
 0x5eb   :  { %v10225_v4 = vmul.f32 0.35355338, %v7951_v59  ;;  %v2226_v6 = vpop.f32.mrb[29].mxu1  ;;  %v2824_v25 = vsel %vm1180_vm3, %v10223_v8, -inf }
 0x5ec   :  { %2825 = vmax.xlane.f32.xlu1 %v2824_v25  ;;  %v10229_v12 = vmul.f32 0.35355338, %v2226_v6  ;;  %v2821_v37 = vsel %vm1180_vm3, %v10233_v35, -inf }
 0x5ed   :  { %v2806_v45 = vsel %vm1180_vm3, %v10225_v4, -inf }
 0x5ee   :  { %2807 = vmax.xlane.f32.xlu0 %v2806_v45  ;;  %v2803_v3 = vsel %vm1180_vm3, %v10229_v12, -inf }
 0x5f1   :  { %v7986_v41 = vpop.f32.mrb[26].mxu0 }
 0x5f2   :  { %2804 = vmax.xlane.f32.xlu0 %v2803_v3  ;;  %v7965_v61 = vpop.f32.mrb[30].mxu1  ;;  %v2681_v62 = vpop.f32.mrb[27].mxu0  ;;  %v10239_v14 = vmul.f32 0.35355338, %v7986_v41 }
 0x5f3   :  { %v10237_v46 = vmul.f32 0.35355338, %v7965_v61  ;;  %v2408_v56 = vpop.f32.mrb[31].mxu1  ;;  %v10247_v59 = vmul.f32 0.35355338, %v2681_v62 }
 0x5f4   :  { %v10241_v52 = vmul.f32 0.35355338, %v2408_v56  ;;  %v2836_v25 = vsel %vm1180_vm3, %v10239_v14, -inf }
 0x5f5   :  { %v2818_v15 = vsel %vm1180_vm3, %v10237_v46, -inf  ;;  %v2833_v62 = vsel %vm1180_vm3, %v10247_v59, -inf }
 0x5f6   :  { %2819 = vmax.xlane.f32.xlu1 %v2818_v15  ;;  %2822 = vmax.xlane.f32.xlu0 %v2821_v37  ;;  %v2815_v6 = vsel %vm1180_vm3, %v10241_v52, -inf }
 0x5fa   :  { %v7979_v45 = vpop.f32.mrb[32].mxu1  ;;  %2816 = vmax.xlane.f32.xlu0 %v2815_v6  ;;  %2837 = vmax.xlane.f32.xlu1 %v2836_v25 }
 0x5fb   :  { %v10253_v3 = vmul.f32 0.35355338, %v7979_v45  ;;  %v2590_v41 = vpop.f32.mrb[33].mxu1 }
 0x5fc   :  { %v10255_v61 = vmul.f32 0.35355338, %v2590_v41 }
 0x5fd   :  { %v2830_v56 = vsel %vm1180_vm3, %v10253_v3, -inf }
 0x5fe   :  { %2831 = vmax.xlane.f32.xlu1 %v2830_v56  ;;  %2834 = vmax.xlane.f32.xlu0 %v2833_v62  ;;  %v2827_v15 = vsel %vm1180_vm3, %v10255_v61, -inf  ;;  %v11396_v56 = vld [vmem:[#allocation2_spill] sm:$0xff]  ;;  %v10275_v62 = vpop.permute.xlu1 %8778 }
 0x602   :  { %v7993_v37 = vpop.f32.mrb[34].mxu1  ;;  %2828 = vmax.xlane.f32.xlu0 %v2827_v15  ;;  %v10277_v15 = vpop.permute.xlu0 %8773 }
 0x603   :  { %v10263_v6 = vmul.f32 0.35355338, %v7993_v37  ;;  %v2772_v25 = vpop.f32.mrb[35].mxu1  ;;  %v10279_v37 = vpop.permute.xlu1 %8788 }
 0x604   :  { %v10265_v45 = vmul.f32 0.35355338, %v2772_v25 }
 0x605   :  { %v2842_v41 = vsel %vm1180_vm3, %v10263_v6, -inf }
 0x606   :  { %2843 = vmax.xlane.f32.xlu1 %v2842_v41  ;;  %v2839_v1 = vsel %vm1180_vm3, %v10265_v45, -inf  ;;  %v10281_v25 = vpop.permute.xlu0 %8783 }
 0x607   :  { %2840 = vmax.xlane.f32.xlu0 %v2839_v1  ;;  %v10283_v41 = vpop.permute.xlu1 %8798 }
 0x60a   :  { %v10285_v63 = vpop.permute.xlu0 %8793 }
 0x60b   :  { %v10287_v1 = vpop.permute.xlu1 %8808 }
 0x60e   :  { %v10289_v10 = vpop.permute.xlu0 %8803 }
 0x617   :  { %3671 = vrot.lane.b32.xlu1 %v9683_v9, %s9370_s21 }
 0x61d   :  { %3669 = vrot.lane.b32.xlu0 %v11396_v56, %s9370_s21 }
 0x64b   :  { %v2802_v26 = vpop.xlane.xlu1 %2801 }
 0x64c   :  { %v2846_v57 = vsub.f32 %v10203_v58, %v2802_v26  ;;  %v2799_v5 = vpop.xlane.xlu0 %2798 }
 0x64d   :  { %v2845_v30 = vsub.f32 %v10205_v47, %v2799_v5 }
 0x64e   :  { %v2863_v20 = vmul.f32 1.442695, %v2846_v57 }
 0x64f   :  { %v2861_v28 = vmul.f32 1.442695, %v2845_v30 }
 0x650   :  { %9172 = vpow2.f32 %v2863_v20 }
 0x651   :  { %9174 = vpow2.f32 %v2861_v28 }
 0x65a   :  { %v10293_v11 = vpop.eup %9172 }
 0x65b   :  { %v10295_v2 = vpop.eup %9174  ;;  %v2896_v51 = vsel %vm1180_vm3, %v10293_v11, 0.0 }
 0x65c   :  { %2897 = vadd.xlane.f32.xlu1 %v2896_v51  ;;  %v2893_v21 = vsel %vm1180_vm3, %v10295_v2, 0.0 }
 0x65d   :  { %2894 = vadd.xlane.f32.xlu0 %v2893_v21 }
 0x66e   :  { %v2814_v26 = vpop.xlane.xlu1 %2813 }
 0x66f   :  { %v2850_v58 = vsub.f32 %v10211_v23, %v2814_v26  ;;  %v2811_v5 = vpop.xlane.xlu0 %2810 }
 0x670   :  { %v2849_v30 = vsub.f32 %v10213_v53, %v2811_v5 }
 0x671   :  { %v2871_v20 = vmul.f32 1.442695, %v2850_v58 }
 0x672   :  { %v2869_v28 = vmul.f32 1.442695, %v2849_v30 }
 0x673   :  { %9176 = vpow2.f32 %v2871_v20 }
 0x674   :  { %9178 = vpow2.f32 %v2869_v28 }
 0x679   :  { %v2826_v57 = vpop.xlane.xlu1 %2825 }
 0x67a   :  { %v2854_v47 = vsub.f32 %v10223_v8, %v2826_v57 }
 0x67b   :  { %v2808_v44 = vpop.xlane.xlu0 %2807 }
 0x67c   :  { %v2848_v51 = vsub.f32 %v10225_v4, %v2808_v44  ;;  %v2879_v21 = vmul.f32 1.442695, %v2854_v47 }
 0x67d   :  { %v10305_v13 = vpop.eup %9176 }
 0x67e   :  { %v10307_v27 = vpop.eup %9178  ;;  %v2867_v9 = vmul.f32 1.442695, %v2848_v51  ;;  %v2908_v23 = vsel %vm1180_vm3, %v10305_v13, 0.0 }
 0x67f   :  { %v2805_v53 = vpop.xlane.xlu0 %2804  ;;  %2909 = vadd.xlane.f32.xlu1 %v2908_v23  ;;  %v2905_v26 = vsel %vm1180_vm3, %v10307_v27, 0.0 }
 0x680   :  { %9180 = vpow2.f32 %v2867_v9  ;;  %v2847_v8 = vsub.f32 %v10229_v12, %v2805_v53  ;;  %2906 = vadd.xlane.f32.xlu0 %v2905_v26 }
 0x681   :  { %9182 = vpow2.f32 %v2879_v21 }
 0x682   :  { %v2865_v44 = vmul.f32 1.442695, %v2847_v8 }
 0x683   :  { %v2820_v4 = vpop.xlane.xlu1 %2819  ;;  %v2823_v58 = vpop.xlane.xlu0 %2822 }
 0x684   :  { %9184 = vpow2.f32 %v2865_v44  ;;  %v2852_v5 = vsub.f32 %v10237_v46, %v2820_v4  ;;  %v2853_v30 = vsub.f32 %v10233_v35, %v2823_v58 }
 0x686   :  { %v2875_v20 = vmul.f32 1.442695, %v2852_v5  ;;  %v2877_v28 = vmul.f32 1.442695, %v2853_v30 }
 0x687   :  { %v2817_v57 = vpop.xlane.xlu0 %2816  ;;  %v2838_v47 = vpop.xlane.xlu1 %2837 }
 0x688   :  { %9186 = vpow2.f32 %v2875_v20  ;;  %v2851_v51 = vsub.f32 %v10241_v52, %v2817_v57  ;;  %v2858_v9 = vsub.f32 %v10239_v14, %v2838_v47 }
 0x689   :  { %9188 = vpow2.f32 %v2877_v28 }
 0x68a   :  { %v10318_v12 = vpop.eup %9180  ;;  %v2873_v21 = vmul.f32 1.442695, %v2851_v51  ;;  %v2887_v23 = vmul.f32 1.442695, %v2858_v9 }
 0x68b   :  { %v2832_v53 = vpop.xlane.xlu1 %2831  ;;  %v2835_v26 = vpop.xlane.xlu0 %2834  ;;  %v2902_v46 = vsel %vm1180_vm3, %v10318_v12, 0.0 }
 0x68c   :  { %v10322_v35 = vpop.eup %9182  ;;  %9190 = vpow2.f32 %v2873_v21  ;;  %v2856_v8 = vsub.f32 %v10253_v3, %v2832_v53  ;;  %v2857_v44 = vsub.f32 %v10247_v59, %v2835_v26  ;;  %2903 = vadd.xlane.f32.xlu1 %v2902_v46 }
 0x68d   :  { %9192 = vpow2.f32 %v2887_v23  ;;  %v2920_v5 = vsel %vm1180_vm3, %v10322_v35, 0.0 }
 0x68e   :  { %v10326_v14 = vpop.eup %9184  ;;  %v2883_v52 = vmul.f32 1.442695, %v2856_v8  ;;  %v2885_v4 = vmul.f32 1.442695, %v2857_v44 }
 0x68f   :  { %v2829_v58 = vpop.xlane.xlu0 %2828  ;;  %v2899_v30 = vsel %vm1180_vm3, %v10326_v14, 0.0 }
 0x690   :  { %9194 = vpow2.f32 %v2883_v52  ;;  %v2855_v20 = vsub.f32 %v10255_v61, %v2829_v58  ;;  %2921 = vadd.xlane.f32.xlu1 %v2920_v5  ;;  %2900 = vadd.xlane.f32.xlu0 %v2899_v30 }
 0x691   :  { %9196 = vpow2.f32 %v2885_v4 }
 0x692   :  { %v10333_v59 = vpop.eup %9186  ;;  %v2881_v3 = vmul.f32 1.442695, %v2855_v20 }
 0x693   :  { %v10335_v28 = vpop.eup %9188  ;;  %v2914_v57 = vsel %vm1180_vm3, %v10333_v59, 0.0  ;;  %v2844_v52 = vpop.xlane.xlu1 %2843 }
 0x694   :  { %9198 = vpow2.f32 %v2881_v3  ;;  %2915 = vadd.xlane.f32.xlu1 %v2914_v57  ;;  %v2917_v47 = vsel %vm1180_vm3, %v10335_v28, 0.0  ;;  %v2860_v4 = vsub.f32 %v10263_v6, %v2844_v52  ;;  %v2841_v58 = vpop.xlane.xlu0 %2840  ;;  %v8776_v52 = vunpack.i.h.bf16 %v10277_v15 }
 0x695   :  { %2918 = vadd.xlane.f32.xlu0 %v2917_v47  ;;  %v2859_v30 = vsub.f32 %v10265_v45, %v2841_v58 }
 0x696   :  { %v10341_v51 = vpop.eup %9190  ;;  %v2891_v5 = vmul.f32 1.442695, %v2860_v4  ;;  %v8775_v4 = vunpack.i.l.bf16 %v10277_v15 }
 0x697   :  { %v10343_v61 = vpop.eup %9192  ;;  %v2911_v9 = vsel %vm1180_vm3, %v10341_v51, 0.0  ;;  %v2889_v20 = vmul.f32 1.442695, %v2859_v30  ;;  %v10377_v6 = vpop.permute.xlu1 %3671 }
 0x698   :  { %v2932_v21 = vsel %vm1180_vm3, %v10343_v61, 0.0  ;;  %9200 = vpow2.f32 %v2891_v5  ;;  %v10379_v45 = vpop.permute.xlu0 %3669  ;;  %v8438_v30 = vpack.c.bf16 %v8776_v52, %v8775_v4 }
 0x699   :  { %2933 = vadd.xlane.f32.xlu1 %v2932_v21  ;;  %2912 = vadd.xlane.f32.xlu0 %v2911_v9  ;;  %9202 = vpow2.f32 %v2889_v20  ;;  %v8786_v20 = vunpack.i.h.bf16 %v10281_v25 }
 0x69a   :  { %v10349_v23 = vpop.eup %9194 }
 0x69b   :  { %v10351_v53 = vpop.eup %9196  ;;  %v2926_v26 = vsel %vm1180_vm3, %v10349_v23, 0.0 }
 0x69c   :  { %v2929_v46 = vsel %vm1180_vm3, %v10351_v53, 0.0 }
 0x69d   :  { %2927 = vadd.xlane.f32.xlu1 %v2926_v26  ;;  %2930 = vadd.xlane.f32.xlu0 %v2929_v46 }
 0x69e   :  { %v10357_v8 = vpop.eup %9198 }
 0x69f   :  { %v2923_v44 = vsel %vm1180_vm3, %v10357_v8, 0.0 }
 0x6a1   :  { %2924 = vadd.xlane.f32.xlu0 %v2923_v44 }
 0x6a2   :  { %v10367_v3 = vpop.eup %9200 }
 0x6a3   :  { %v2938_v57 = vsel %vm1180_vm3, %v10367_v3, 0.0  ;;  %v10371_v47 = vpop.eup %9202 }
 0x6a4   :  { %v2935_v9 = vsel %vm1180_vm3, %v10371_v47, 0.0 }
 0x6ae   :  { %3762 = vrot.lane.b32.xlu1 %v9681_v7, %s9370_s21 }
 0x6b7   :  { %3760 = vrot.lane.b32.xlu0 %v9679_v31, %s9370_s21 }
 0x6d2   :  { %2939 = vadd.xlane.f32.xlu1 %v2938_v57  ;;  %v8785_v57 = vunpack.i.l.bf16 %v10281_v25 }
 0x6d4   :  { %v8446_v25 = vpack.c.bf16 %v8786_v20, %v8785_v57 }
 0x6d6   :  { %2936 = vadd.xlane.f32.xlu0 %v2935_v9 }
 0x6e3   :  { %8818 = vrot.lane.b32.xlu1 %v9731_v39, %s9369_s20 }
 0x6e7   :  { %3853 = vrot.lane.b32.xlu1 %v9701_v19, %s9370_s21 }
 0x6e9   :  { %v2898_v21 = vpop.xlane.xlu1 %2897 }
 0x6ea   :  { %9204 = vrcp.f32 %v2898_v21  ;;  %v2895_v26 = vpop.xlane.xlu0 %2894 }
 0x6eb   :  { %3944 = vrot.lane.b32.xlu1 %v9703_v22, %s9370_s21  ;;  %9206 = vrcp.f32 %v2895_v26 }
 0x6ec   :  { %8813 = vrot.lane.b32.xlu0 %v9735_v40, %s9369_s20 }
 0x6ef   :  { %8823 = vrot.lane.b32.xlu1 %v9755_v50, %s9369_s20 }
 0x6f0   :  { %3851 = vrot.lane.b32.xlu0 %v9699_v18, %s9370_s21 }
 0x6f3   :  { %4124 = vrot.lane.b32.xlu1 %v9719_v33, %s9370_s21 }
 0x6f4   :  { %3942 = vrot.lane.b32.xlu0 %v9709_v16, %s9370_s21  ;;  %v9205_v46 = vpop.eup %9204 }
 0x6f5   :  { %v9207_v44 = vpop.eup %9206  ;;  %v2958_v5 = vmul.f32 %v9205_v46, %v10293_v11 }
 0x6f6   :  { %v2957_v58 = vmul.f32 %v9207_v44, %v10295_v2 }
 0x6f7   :  { %4126 = vrot.lane.b32.xlu1 %v9721_v34, %s9370_s21 }
 0x6f8   :  { %4033 = vrot.lane.b32.xlu0 %v9713_v0, %s9370_s21  ;;  %7998 = vmatprep.mubr.msk.f32.mxu0 %vm1180_vm3, %v2957_v58 }
 0x6f9   :  { %7999 = vmatmul.mubr.msk.f32.vlgmr.msra.gmra.mrb[28].mxu0 %vm1180_vm3, %v2958_v5  ;;  %v8781_v5 = vunpack.i.h.bf16 %v10275_v62 }
 0x6fa   :  { %8433 = vmatpush3.bf16.msra.mxu0 %v10168_v17 }
 0x6fb   :  { %4217 = vrot.lane.b32.xlu1 %v9747_v48, %s9370_s21  ;;  %8439 = vmatprep.subr.bf16.mxu0 %v8438_v30 }
 0x6fc   :  { %4035 = vrot.lane.b32.xlu0 %v9723_v38, %s9370_s21 }
 0x6ff   :  { %4308 = vrot.lane.b32.xlu1 %v9743_v42, %s9370_s21 }
 0x700   :  { %8828 = vrot.lane.b32.xlu0 %v9751_v49, %s9369_s20 }
 0x703   :  { %8838 = vrot.lane.b32.xlu1 %v9689_v43, %s9371_s22 }
 0x704   :  { %4215 = vrot.lane.b32.xlu0 %v9745_v24, %s9370_s21 }
 0x707   :  { %8843 = vrot.lane.b32.xlu1 %v9707_v55, %s9371_s22 }
 0x708   :  { %4306 = vrot.lane.b32.xlu0 %v9741_v36, %s9370_s21 }
 0x70b   :  { %8848 = vrot.lane.b32.xlu1 %v9717_v32, %s9371_s22 }
 0x70c   :  { %8833 = vrot.lane.b32.xlu0 %v9693_v54, %s9371_s22  ;;  %v2910_v17 = vpop.xlane.xlu1 %2909 }
 0x70d   :  { %9208 = vrcp.f32 %v2910_v17  ;;  %v2907_v2 = vpop.xlane.xlu0 %2906  ;;  %v8780_v17 = vunpack.i.l.bf16 %v10275_v62 }
 0x70e   :  { %9210 = vrcp.f32 %v2907_v2 }
 0x70f   :  { %8858 = vrot.lane.b32.xlu1 %v9731_v39, %s9371_s22 }
 0x710   :  { %8853 = vrot.lane.b32.xlu0 %v9735_v40, %s9371_s22 }
 0x713   :  { %8868 = vrot.lane.b32.xlu1 %v9751_v49, %s9371_s22 }
 0x714   :  { %8863 = vrot.lane.b32.xlu0 %v9755_v50, %s9371_s22 }
 0x717   :  { %v9209_v11 = vpop.eup %9208  ;;  %8878 = vrot.lane.b32.xlu1 %v9689_v43, %s9372_s23 }
 0x718   :  { %v9211_v15 = vpop.eup %9210  ;;  %8873 = vrot.lane.b32.xlu0 %v9693_v54, %s9372_s23  ;;  %v2962_v26 = vmul.f32 %v9209_v11, %v10305_v13 }
 0x719   :  { %v2904_v9 = vpop.xlane.xlu1 %2903  ;;  %v2961_v21 = vmul.f32 %v9211_v15, %v10307_v27 }
 0x71a   :  { %9212 = vrcp.f32 %v2904_v9  ;;  %v8796_v9 = vunpack.i.h.bf16 %v10285_v63 }
 0x71b   :  { %5285 = vrot.lane.b32.xlu1 %v11396_v56, %s9373_s24  ;;  %8012 = vmatprep.mubr.msk.f32.mxu0 %vm1180_vm3, %v2961_v21  ;;  %v8795_v21 = vunpack.i.l.bf16 %v10285_v63 }
 0x71c   :  { %8883 = vrot.lane.b32.xlu0 %v9707_v55, %s9372_s23  ;;  %8013 = vmatmul.mubr.msk.f32.vlgmr.msra.gmra.mrb[30].mxu0 %vm1180_vm3, %v2962_v26  ;;  %v8442_v26 = vpack.c.bf16 %v8781_v5, %v8780_v17  ;;  %v8800_v17 = vunpack.i.l.bf16 %v10283_v41 }
 0x71d   :  { %v2922_v46 = vpop.xlane.xlu1 %2921  ;;  %8441 = vmatpush3.bf16.msra.mxu0 %v8438_v30  ;;  %v2901_v44 = vpop.xlane.xlu0 %2900 }
 0x71e   :  { %8447 = vmatprep.subr.bf16.mxu0 %v8446_v25  ;;  %9214 = vrcp.f32 %v2901_v44  ;;  %v8454_v44 = vpack.c.bf16 %v8796_v9, %v8795_v21 }
 0x71f   :  { %9216 = vrcp.f32 %v2922_v46 }
 0x721   :  { %v2916_v27 = vpop.xlane.xlu1 %2915 }
 0x722   :  { %v2919_v13 = vpop.xlane.xlu0 %2918 }
 0x723   :  { %9218 = vrcp.f32 %v2919_v13  ;;  %v8790_v13 = vunpack.i.l.bf16 %v10279_v37 }
 0x724   :  { %9220 = vrcp.f32 %v2916_v27  ;;  %v9213_v4 = vpop.eup %9212  ;;  %v8791_v27 = vunpack.i.h.bf16 %v10279_v37 }
 0x725   :  { %v2960_v15 = vmul.f32 %v9213_v4, %v10318_v12  ;;  %v8805_v4 = vunpack.i.l.bf16 %v10289_v10 }
 0x726   :  { %v2934_v52 = vpop.xlane.xlu1 %2933  ;;  %v2913_v56 = vpop.xlane.xlu0 %2912 }
 0x727   :  { %9222 = vrcp.f32 %v2913_v56  ;;  %v8806_v56 = vunpack.i.h.bf16 %v10289_v10 }
 0x728   :  { %v9215_v58 = vpop.eup %9214  ;;  %9224 = vrcp.f32 %v2934_v52 }
 0x729   :  { %v2959_v30 = vmul.f32 %v9215_v58, %v10326_v14  ;;  %v9217_v20 = vpop.eup %9216  ;;  %v8450_v58 = vpack.c.bf16 %v8791_v27, %v8790_v13 }
 0x72a   :  { %v2931_v2 = vpop.xlane.xlu0 %2930  ;;  %v2928_v11 = vpop.xlane.xlu1 %2927  ;;  %v2966_v12 = vmul.f32 %v9217_v20, %v10322_v35 }
 0x72b   :  { %9226 = vrcp.f32 %v2931_v2  ;;  %8005 = vmatprep.mubr.msk.f32.mxu1 %vm1180_vm3, %v2959_v30  ;;  %v8466_v2 = vpack.c.bf16 %v8806_v56, %v8805_v4 }
 0x72c   :  { %8006 = vmatmul.mubr.msk.f32.vlgmr.msra.gmra.mrb[36].mxu1 %vm1180_vm3, %v2960_v15  ;;  %9228 = vrcp.f32 %v2928_v11 }
 0x72d   :  { %v9219_v57 = vpop.eup %9218  ;;  %8437 = vmatpush3.bf16.msra.mxu1 %v10172_v60 }
 0x72e   :  { %v2925_v62 = vpop.xlane.xlu0 %2924  ;;  %v2965_v14 = vmul.f32 %v9219_v57, %v10335_v28  ;;  %8443 = vmatprep.subr.bf16.mxu1 %v8442_v26  ;;  %v9221_v46 = vpop.eup %9220 }
 0x72f   :  { %9230 = vrcp.f32 %v2925_v62  ;;  %v2964_v28 = vmul.f32 %v9221_v46, %v10333_v59  ;;  %v8801_v59 = vunpack.i.h.bf16 %v10283_v41 }
 0x730   :  { %8026 = vmatprep.mubr.msk.f32.mxu0 %vm1180_vm3, %v2965_v14  ;;  %v8811_v14 = vunpack.i.h.bf16 %v10287_v1 }
 0x731   :  { %8027 = vmatmul.mubr.msk.f32.vlgmr.msra.gmra.mrb[32].mxu0 %vm1180_vm3, %v2966_v12  ;;  %v9223_v63 = vpop.eup %9222  ;;  %v8460_v41 = vpack.c.bf16 %v8801_v59, %v8800_v17  ;;  %v8810_v12 = vunpack.i.l.bf16 %v10287_v1 }
 0x732   :  { %8449 = vmatpush3.bf16.msra.mxu0 %v8446_v25  ;;  %v2963_v60 = vmul.f32 %v9223_v63, %v10341_v51  ;;  %v9225_v35 = vpop.eup %9224 }
 0x733   :  { %8456 = vmatprep.subr.msk.bf16.mxu0 %vm9779_vm2, %v8454_v44  ;;  %v2970_v51 = vmul.f32 %v9225_v35, %v10343_v61 }
 0x734   :  { %8019 = vmatprep.mubr.msk.f32.mxu1 %vm1180_vm3, %v2963_v60 }
 0x735   :  { %v9227_v52 = vpop.eup %9226  ;;  %8020 = vmatmul.mubr.msk.f32.vlgmr.msra.gmra.mrb[38].mxu1 %vm1180_vm3, %v2964_v28  ;;  %v8472_v28 = vpack.c.bf16 %v8811_v14, %v8810_v12 }
 0x736   :  { %8445 = vmatpush3.bf16.msra.mxu1 %v8442_v26  ;;  %v2969_v37 = vmul.f32 %v9227_v52, %v10351_v53  ;;  %v9229_v25 = vpop.eup %9228  ;;  %v3763_v53 = vpop.permute.xlu1 %3762 }
 0x737   :  { %8451 = vmatprep.subr.bf16.mxu1 %v8450_v58  ;;  %v2968_v61 = vmul.f32 %v9229_v25, %v10349_v23  ;;  %v3761_v23 = vpop.permute.xlu0 %3760 }
 0x738   :  { %8040 = vmatprep.mubr.msk.f32.mxu0 %vm1180_vm3, %v2969_v37 }
 0x739   :  { %v9231_v5 = vpop.eup %9230  ;;  %8041 = vmatmul.mubr.msk.f32.vlgmr.msra.gmra.mrb[34].mxu0 %vm1180_vm3, %v2970_v51 }
 0x73a   :  { %v2967_v10 = vmul.f32 %v9231_v5, %v10357_v8  ;;  %8054 = vmatprep.mubr.msk.f32.mxu0 %vm457_vm1, %v10379_v45 }
 0x73b   :  { %8459 = vmatpush3.bf16.xpose.msk.msra.mxu0 %vm9779_vm2, %v8454_v44 }
 0x73c   :  { %8468 = vmatprep.subr.msk.bf16.mxu0 %vm9779_vm2, %v8466_v2  ;;  %8033 = vmatprep.mubr.msk.f32.mxu1 %vm1180_vm3, %v2967_v10 }
 0x73d   :  { %8034 = vmatmul.mubr.msk.f32.vlgmr.msra.gmra.mrb[40].mxu1 %vm1180_vm3, %v2968_v61 }
 0x73e   :  { %8453 = vmatpush3.bf16.msra.mxu1 %v8450_v58 }
 0x73f   :  { %8462 = vmatprep.subr.msk.bf16.mxu1 %vm9779_vm2, %v8460_v41 }
 0x742   :  { %8055 = vmatmul.mubr.msk.f32.vlgmr.msra.gmra.mrb[36].mxu0 %vm457_vm1, %v10377_v6 }
 0x743   :  { %8471 = vmatpush3.bf16.xpose.msk.msra.mxu0 %vm9779_vm2, %v8466_v2 }
 0x75f   :  { %v2940_v8 = vpop.xlane.xlu1 %2939 }
 0x760   :  { %9232 = vrcp.f32 %v2940_v8 }
 0x763   :  { %v8819_v45 = vpop.permute.xlu1 %8818  ;;  %v2937_v30 = vpop.xlane.xlu0 %2936 }
 0x764   :  { %9234 = vrcp.f32 %v2937_v30 }
 0x767   :  { %v3854_v11 = vpop.permute.xlu1 %3853  ;;  %v8814_v15 = vpop.permute.xlu0 %8813 }
 0x768   :  { %v8816_v20 = vunpack.i.h.bf16 %v8814_v15  ;;  %v8815_v57 = vunpack.i.l.bf16 %v8814_v15 }
 0x76a   :  { %v8478_v9 = vpack.c.bf16 %v8816_v20, %v8815_v57  ;;  %v9233_v6 = vpop.eup %9232 }
 0x76b   :  { %v3945_v21 = vpop.permute.xlu1 %3944  ;;  %v3852_v26 = vpop.permute.xlu0 %3851  ;;  %v2972_v60 = vmul.f32 %v9233_v6, %v10367_v3  ;;  %v8821_v3 = vunpack.i.h.bf16 %v8819_v45 }
 0x76c   :  { %8068 = vmatprep.mubr.msk.f32.mxu0 %vm457_vm1, %v3852_v26  ;;  %8480 = vmatprep.subr.msk.bf16.mxu0 %vm9779_vm2, %v8478_v9 }
 0x76d   :  { %8069 = vmatmul.mubr.msk.f32.vlgmr.msra.gmra.mrb[38].mxu0 %vm457_vm1, %v3854_v11 }
 0x76e   :  { %v9235_v62 = vpop.eup %9234  ;;  %8483 = vmatpush3.bf16.xpose.msk.msra.mxu0 %vm9779_vm2, %v8478_v9 }
 0x76f   :  { %v8824_v46 = vpop.permute.xlu1 %8823  ;;  %v3943_v44 = vpop.permute.xlu0 %3942  ;;  %v2971_v63 = vmul.f32 %v9235_v62, %v10371_v47  ;;  %v8820_v47 = vunpack.i.l.bf16 %v8819_v45 }
 0x770   :  { %v8826_v27 = vunpack.i.h.bf16 %v8824_v46  ;;  %v8825_v13 = vunpack.i.l.bf16 %v8824_v46 }
 0x771   :  { %8047 = vmatprep.mubr.msk.f32.mxu1 %vm1180_vm3, %v2971_v63  ;;  %v8484_v58 = vpack.c.bf16 %v8821_v3, %v8820_v47 }
 0x772   :  { %v8490_v35 = vpack.c.bf16 %v8826_v27, %v8825_v13  ;;  %8048 = vmatmul.mubr.msk.f32.vlgmr.msra.gmra.mrb[42].mxu1 %vm1180_vm3, %v2972_v60 }
 0x773   :  { %8465 = vmatpush3.bf16.xpose.msk.msra.mxu1 %vm9779_vm2, %v8460_v41  ;;  %v4125_v1 = vpop.permute.xlu1 %4124  ;;  %8061 = vmatprep.mubr.msk.f32.mxu1 %vm457_vm1, %v3761_v23  ;;  %v4034_v52 = vpop.permute.xlu0 %4033 }
 0x774   :  { %8474 = vmatprep.subr.msk.bf16.mxu1 %vm9779_vm2, %v8472_v28  ;;  %8082 = vmatprep.mubr.msk.f32.mxu0 %vm457_vm1, %v4034_v52 }
 0x775   :  { %8492 = vmatprep.subr.msk.bf16.mxu0 %vm9779_vm2, %v8490_v35 }
 0x777   :  { %v4127_v56 = vpop.permute.xlu1 %4126  ;;  %v4036_v4 = vpop.permute.xlu0 %4035 }
 0x778   :  { %8083 = vmatmul.mubr.msk.f32.vlgmr.msra.gmra.mrb[40].mxu0 %vm457_vm1, %v4036_v4 }
 0x779   :  { %8495 = vmatpush3.bf16.xpose.msk.msra.mxu0 %vm9779_vm2, %v8490_v35 }
 0x77a   :  { %8062 = vmatmul.mubr.msk.f32.vlgmr.msra.gmra.mrb[44].mxu1 %vm457_vm1, %v3763_v53 }
 0x77b   :  { %8477 = vmatpush3.bf16.xpose.msk.msra.mxu1 %vm9779_vm2, %v8472_v28  ;;  %8075 = vmatprep.mubr.msk.f32.mxu1 %vm457_vm1, %v3943_v44  ;;  %v4218_v37 = vpop.permute.xlu1 %4217  ;;  %v8829_v25 = vpop.permute.xlu0 %8828 }
 0x77c   :  { %8486 = vmatprep.subr.msk.bf16.mxu1 %vm9779_vm2, %v8484_v58  ;;  %v8831_v51 = vunpack.i.h.bf16 %v8829_v25  ;;  %v8830_v5 = vunpack.i.l.bf16 %v8829_v25 }
 0x77e   :  { %v8496_v2 = vpack.c.bf16 %v8831_v51, %v8830_v5 }
 0x77f   :  { %v4309_v59 = vpop.permute.xlu1 %4308  ;;  %v4216_v17 = vpop.permute.xlu0 %4215 }
 0x780   :  { %8096 = vmatprep.mubr.msk.f32.mxu0 %vm457_vm1, %v4216_v17 }
 0x781   :  { %8097 = vmatmul.mubr.msk.f32.vlgmr.msra.gmra.mrb[42].mxu0 %vm457_vm1, %v4218_v37 }
 0x782   :  { %8076 = vmatmul.mubr.msk.f32.vlgmr.msra.gmra.mrb[46].mxu1 %vm457_vm1, %v3945_v21 }
 0x783   :  { %8489 = vmatpush3.bf16.xpose.msk.msra.mxu1 %vm9779_vm2, %v8484_v58  ;;  %8089 = vmatprep.mubr.msk.f32.mxu1 %vm457_vm1, %v4125_v1  ;;  %v8839_v10 = vpop.permute.xlu1 %8838  ;;  %v4307_v61 = vpop.permute.xlu0 %4306 }
 0x784   :  { %8498 = vmatprep.subr.msk.bf16.mxu1 %vm9779_vm2, %v8496_v2  ;;  %v8841_v41 = vunpack.i.h.bf16 %v8839_v10  ;;  %v8840_v53 = vunpack.i.l.bf16 %v8839_v10 }
 0x786   :  { %v8506_v20 = vpack.c.bf16 %v8841_v41, %v8840_v53 }
 0x787   :  { %v8844_v23 = vpop.permute.xlu1 %8843  ;;  %v8834_v8 = vpop.permute.xlu0 %8833 }
 0x788   :  { %v8846_v45 = vunpack.i.h.bf16 %v8844_v23  ;;  %v8845_v30 = vunpack.i.l.bf16 %v8844_v23  ;;  %v8836_v11 = vunpack.i.h.bf16 %v8834_v8  ;;  %v8835_v15 = vunpack.i.l.bf16 %v8834_v8 }
 0x78a   :  { %8090 = vmatmul.mubr.msk.f32.vlgmr.msra.gmra.mrb[48].mxu1 %vm457_vm1, %v4127_v56  ;;  %v8502_v57 = vpack.c.bf16 %v8836_v11, %v8835_v15  ;;  %v10526_v21 = vpack.c.bf16 %v8846_v45, %v8845_v30 }
 0x78b   :  { %8501 = vmatpush3.bf16.xpose.msk.msra.mxu1 %vm9779_vm2, %v8496_v2  ;;  %8103 = vmatprep.mubr.msk.f32.mxu1 %vm457_vm1, %v4307_v61  ;;  %v8849_v9 = vpop.permute.xlu1 %8848 }
 0x78c   :  { %8507 = vmatprep.subr.bf16.mxu1 %v8506_v20  ;;  %8503 = vmatprep.subr.bf16.mxu0 %v8502_v57  ;;  %v8851_v26 = vunpack.i.h.bf16 %v8849_v9  ;;  %v8850_v6 = vunpack.i.l.bf16 %v8849_v9 }
 0x78d   :  { %8505 = vmatpush3.bf16.msra.mxu0 %v8502_v57 }
 0x78e   :  { %8511 = vmatprep.subr.bf16.mxu0 %v10526_v21  ;;  %v10530_v62 = vpack.c.bf16 %v8851_v26, %v8850_v6 }
 0x792   :  { %8104 = vmatmul.mubr.msk.f32.vlgmr.msra.gmra.mrb[50].mxu1 %vm457_vm1, %v4309_v59 }
 0x793   :  { %8509 = vmatpush3.bf16.msra.mxu1 %v8506_v20 }
 0x794   :  { %8515 = vmatprep.subr.bf16.mxu1 %v10530_v62 }
 0x7cc   :  { %v10533_v14 = vpop.f32.mrb[28].mxu0 }
 0x7cd   :  { %11397 = vst [vmem:[#allocation2_spill] sm:$0xff] %v10533_v14  ;;  %v10535_v12 = vpop.f32.mrb[29].mxu0 }
 0x7ce   :  { %11398 = vst [vmem:[#allocation20_spill] sm:$0xff] %v10535_v12 }
 0x7ef   :  { %v10539_v44 = vpop.f32.mrb[30].mxu0 }
 0x7f0   :  { %11399 = vst [vmem:[#allocation21_spill] sm:$0xff] %v10539_v44  ;;  %v10541_v63 = vpop.f32.mrb[31].mxu0 }
 0x7f1   :  { %11400 = vst [vmem:[#allocation22_spill] sm:$0xff] %v10541_v63 }
 0x7ff   :  { %v10545_v13 = vpop.f32.mrb[36].mxu1 }
 0x800   :  { %v10547_v60 = vpop.f32.mrb[37].mxu1 }
 0x801   :  { %11401 = vst [vmem:[#allocation23_spill] sm:$0xff] %v10547_v60 }
 0x804   :  { %v10551_v35 = vpop.f32.mrb[32].mxu0 }
 0x805   :  { %11402 = vst [vmem:[#allocation24_spill] sm:$0xff] %v10551_v35  ;;  %v10553_v1 = vpop.f32.mrb[33].mxu0 }
 0x806   :  { %11403 = vst [vmem:[#allocation25_spill] sm:$0xff] %v10553_v1 }
 0x808   :  { %v10557_v3 = vpop.f32.mrb[38].mxu1 }
 0x809   :  { %11404 = vst [vmem:[#allocation26_spill] sm:$0xff] %v10557_v3  ;;  %v10559_v47 = vpop.f32.mrb[39].mxu1 }
 0x80a   :  { %11405 = vst [vmem:[#allocation27_spill] sm:$0xff] %v10559_v47 }
 0x80c   :  { %v10563_v4 = vpop.f32.mrb[34].mxu0 }
 0x80d   :  { %11406 = vst [vmem:[#allocation28_spill] sm:$0xff] %v10563_v4  ;;  %v10565_v58 = vpop.f32.mrb[35].mxu0 }
 0x80e   :  { %11407 = vst [vmem:[#allocation29_spill] sm:$0xff] %v10565_v58 }
 0x810   :  { %v10569_v25 = vpop.f32.mrb[40].mxu1 }
 0x811   :  { %11408 = vst [vmem:[#allocation30_spill] sm:$0xff] %v10569_v25  ;;  %v10571_v51 = vpop.f32.mrb[41].mxu1 }
 0x812   :  { %11409 = vst [vmem:[#allocation31_spill] sm:$0xff] %v10571_v51 }
 0x815   :  { %v8056_v59 = vpop.f32.mrb[36].mxu0 }
 0x816   :  { %v10575_v17 = vmul.f32 0.35355338, %v8056_v59  ;;  %v3751_v2 = vpop.f32.mrb[37].mxu0 }
 0x817   :  { %v10577_v10 = vmul.f32 0.35355338, %v3751_v2 }
 0x818   :  { %v4416_v61 = vsel %vm1180_vm3, %v10575_v17, -inf }
 0x819   :  { %4417 = vmax.xlane.f32.xlu1 %v4416_v61  ;;  %v4413_v41 = vsel %vm1180_vm3, %v10577_v10, -inf }
 0x81a   :  { %4414 = vmax.xlane.f32.xlu0 %v4413_v41 }
 0x840   :  { %v8070_v53 = vpop.f32.mrb[38].mxu0 }
 0x841   :  { %v10583_v23 = vmul.f32 0.35355338, %v8070_v53  ;;  %v3933_v8 = vpop.f32.mrb[39].mxu0 }
 0x842   :  { %v10585_v45 = vmul.f32 0.35355338, %v3933_v8 }
 0x843   :  { %v4428_v30 = vsel %vm1180_vm3, %v10583_v23, -inf }
 0x844   :  { %4429 = vmax.xlane.f32.xlu1 %v4428_v30  ;;  %v4425_v11 = vsel %vm1180_vm3, %v10585_v45, -inf }
 0x845   :  { %v10591_v15 = vpop.f32.mrb[42].mxu1  ;;  %4426 = vmax.xlane.f32.xlu0 %v4425_v11 }
 0x846   :  { %11410 = vst [vmem:[#allocation32_spill] sm:$0xff] %v10591_v15  ;;  %v10593_v20 = vpop.f32.mrb[43].mxu1 }
 0x847   :  { %11411 = vst [vmem:[#allocation33_spill] sm:$0xff] %v10593_v20 }
 0x84b   :  { %v8084_v9 = vpop.f32.mrb[40].mxu0 }
 0x84c   :  { %v10597_v26 = vmul.f32 0.35355338, %v8084_v9  ;;  %v4115_v6 = vpop.f32.mrb[41].mxu0 }
 0x84d   :  { %v8063_v59 = vpop.f32.mrb[44].mxu1  ;;  %v10607_v30 = vmul.f32 0.35355338, %v4115_v6 }
 0x84e   :  { %v10599_v2 = vmul.f32 0.35355338, %v8063_v59  ;;  %v3842_v61 = vpop.f32.mrb[45].mxu1  ;;  %v4440_v41 = vsel %vm1180_vm3, %v10597_v26, -inf }
 0x84f   :  { %4441 = vmax.xlane.f32.xlu1 %v4440_v41  ;;  %v10603_v53 = vmul.f32 0.35355338, %v3842_v61  ;;  %v4437_v6 = vsel %vm1180_vm3, %v10607_v30, -inf }
 0x850   :  { %v4422_v8 = vsel %vm1180_vm3, %v10599_v2, -inf }
 0x851   :  { %4423 = vmax.xlane.f32.xlu0 %v4422_v8  ;;  %v4419_v11 = vsel %vm1180_vm3, %v10603_v53, -inf }
 0x854   :  { %v8098_v9 = vpop.f32.mrb[42].mxu0 }
 0x855   :  { %4420 = vmax.xlane.f32.xlu0 %v4419_v11  ;;  %v8077_v59 = vpop.f32.mrb[46].mxu1  ;;  %v4297_v57 = vpop.f32.mrb[43].mxu0  ;;  %v10613_v27 = vmul.f32 0.35355338, %v8098_v9 }
 0x856   :  { %v10611_v37 = vmul.f32 0.35355338, %v8077_v59  ;;  %v4024_v52 = vpop.f32.mrb[47].mxu1  ;;  %v10621_v8 = vmul.f32 0.35355338, %v4297_v57 }
 0x857   :  { %v10615_v61 = vmul.f32 0.35355338, %v4024_v52  ;;  %v4452_v59 = vsel %vm1180_vm3, %v10613_v27, -inf }
 0x858   :  { %v4434_v41 = vsel %vm1180_vm3, %v10611_v37, -inf  ;;  %v4449_v57 = vsel %vm1180_vm3, %v10621_v8, -inf }
 0x859   :  { %4435 = vmax.xlane.f32.xlu1 %v4434_v41  ;;  %4438 = vmax.xlane.f32.xlu0 %v4437_v6  ;;  %v4431_v11 = vsel %vm1180_vm3, %v10615_v61, -inf }
 0x85d   :  { %v8091_v9 = vpop.f32.mrb[48].mxu1  ;;  %4432 = vmax.xlane.f32.xlu0 %v4431_v11  ;;  %4453 = vmax.xlane.f32.xlu1 %v4452_v59 }
 0x85e   :  { %v10627_v52 = vmul.f32 0.35355338, %v8091_v9  ;;  %v4206_v5 = vpop.f32.mrb[49].mxu1 }
 0x85f   :  { %v10629_v46 = vmul.f32 0.35355338, %v4206_v5 }
 0x860   :  { %v4446_v41 = vsel %vm1180_vm3, %v10627_v52, -inf }
 0x861   :  { %4447 = vmax.xlane.f32.xlu1 %v4446_v41  ;;  %4450 = vmax.xlane.f32.xlu0 %v4449_v57  ;;  %v4443_v6 = vsel %vm1180_vm3, %v10629_v46, -inf  ;;  %v11412_v41 = vld [vmem:[#allocation3_spill] sm:$0xff]  ;;  %v10649_v57 = vpop.permute.xlu1 %8858 }
 0x865   :  { %v8105_v56 = vpop.f32.mrb[50].mxu1  ;;  %4444 = vmax.xlane.f32.xlu0 %v4443_v6  ;;  %v10653_v6 = vpop.permute.xlu1 %8868 }
 0x866   :  { %v10637_v11 = vmul.f32 0.35355338, %v8105_v56  ;;  %v4388_v59 = vpop.f32.mrb[51].mxu1  ;;  %v10651_v56 = vpop.permute.xlu0 %8853 }
 0x867   :  { %v10639_v9 = vmul.f32 0.35355338, %v4388_v59 }
 0x868   :  { %v4458_v5 = vsel %vm1180_vm3, %v10637_v11, -inf }
 0x869   :  { %4459 = vmax.xlane.f32.xlu1 %v4458_v5  ;;  %v4455_v28 = vsel %vm1180_vm3, %v10639_v9, -inf  ;;  %v10657_v20 = vpop.permute.xlu1 %8878 }
 0x86a   :  { %4456 = vmax.xlane.f32.xlu0 %v4455_v28  ;;  %v10655_v59 = vpop.permute.xlu0 %8863 }
 0x86d   :  { %v10661_v15 = vpop.permute.xlu1 %5285 }
 0x86e   :  { %v10659_v5 = vpop.permute.xlu0 %8873 }
 0x872   :  { %v10663_v28 = vpop.permute.xlu0 %8883 }
 0x87a   :  { %5287 = vrot.lane.b32.xlu1 %v11412_v41, %s9373_s24 }
 0x880   :  { %8888 = vrot.lane.b32.xlu0 %v9717_v32, %s9372_s23 }
 0x8a6   :  { %v4418_v41 = vpop.xlane.xlu1 %4417 }
 0x8a7   :  { %v4462_v58 = vsub.f32 %v10575_v17, %v4418_v41  ;;  %v4415_v4 = vpop.xlane.xlu0 %4414 }
 0x8a8   :  { %v4461_v1 = vsub.f32 %v10577_v10, %v4415_v4 }
 0x8a9   :  { %v4479_v35 = vmul.f32 1.442695, %v4462_v58 }
 0x8aa   :  { %v4477_v63 = vmul.f32 1.442695, %v4461_v1 }
 0x8ab   :  { %9236 = vpow2.f32 %v4479_v35 }
 0x8ac   :  { %9238 = vpow2.f32 %v4477_v63 }
 0x8b5   :  { %v10667_v44 = vpop.eup %9236 }
 0x8b6   :  { %v10669_v51 = vpop.eup %9238  ;;  %v4512_v25 = vsel %vm1180_vm3, %v10667_v44, 0.0 }
 0x8b7   :  { %4513 = vadd.xlane.f32.xlu1 %v4512_v25  ;;  %v4509_v12 = vsel %vm1180_vm3, %v10669_v51, 0.0 }
 0x8b8   :  { %4510 = vadd.xlane.f32.xlu0 %v4509_v12 }
 0x8d1   :  { %v4430_v17 = vpop.xlane.xlu1 %4429 }
 0x8d2   :  { %v4466_v41 = vsub.f32 %v10583_v23, %v4430_v17  ;;  %v4427_v4 = vpop.xlane.xlu0 %4426 }
 0x8d3   :  { %v4465_v1 = vsub.f32 %v10585_v45, %v4427_v4 }
 0x8d4   :  { %v4487_v35 = vmul.f32 1.442695, %v4466_v41 }
 0x8d5   :  { %v4485_v63 = vmul.f32 1.442695, %v4465_v1 }
 0x8d6   :  { %9240 = vpow2.f32 %v4487_v35 }
 0x8d7   :  { %9242 = vpow2.f32 %v4485_v63 }
 0x8dc   :  { %v4442_v58 = vpop.xlane.xlu1 %4441 }
 0x8dd   :  { %v4470_v10 = vsub.f32 %v10597_v26, %v4442_v58 }
 0x8de   :  { %v4424_v14 = vpop.xlane.xlu0 %4423 }
 0x8df   :  { %v4464_v25 = vsub.f32 %v10599_v2, %v4424_v14  ;;  %v4495_v12 = vmul.f32 1.442695, %v4470_v10 }
 0x8e0   :  { %v10679_v47 = vpop.eup %9240 }
 0x8e1   :  { %v10681_v3 = vpop.eup %9242  ;;  %v4483_v60 = vmul.f32 1.442695, %v4464_v25  ;;  %v4524_v23 = vsel %vm1180_vm3, %v10679_v47, 0.0 }
 0x8e2   :  { %v4421_v45 = vpop.xlane.xlu0 %4420  ;;  %4525 = vadd.xlane.f32.xlu1 %v4524_v23  ;;  %v4521_v17 = vsel %vm1180_vm3, %v10681_v3, 0.0 }
 0x8e3   :  { %9244 = vpow2.f32 %v4483_v60  ;;  %v4463_v26 = vsub.f32 %v10603_v53, %v4421_v45  ;;  %4522 = vadd.xlane.f32.xlu0 %v4521_v17 }
 0x8e4   :  { %9246 = vpow2.f32 %v4495_v12 }
 0x8e5   :  { %v4481_v14 = vmul.f32 1.442695, %v4463_v26 }
 0x8e6   :  { %v4436_v2 = vpop.xlane.xlu1 %4435  ;;  %v4439_v41 = vpop.xlane.xlu0 %4438 }
 0x8e7   :  { %9248 = vpow2.f32 %v4481_v14  ;;  %v4468_v4 = vsub.f32 %v10611_v37, %v4436_v2  ;;  %v4469_v1 = vsub.f32 %v10607_v30, %v4439_v41 }
 0x8e9   :  { %v4491_v35 = vmul.f32 1.442695, %v4468_v4  ;;  %v4493_v63 = vmul.f32 1.442695, %v4469_v1 }
 0x8ea   :  { %v4433_v58 = vpop.xlane.xlu0 %4432  ;;  %v4454_v10 = vpop.xlane.xlu1 %4453 }
 0x8eb   :  { %9250 = vpow2.f32 %v4491_v35  ;;  %v4467_v25 = vsub.f32 %v10615_v61, %v4433_v58  ;;  %v4474_v60 = vsub.f32 %v10613_v27, %v4454_v10 }
 0x8ec   :  { %9252 = vpow2.f32 %v4493_v63 }
 0x8ed   :  { %v10692_v53 = vpop.eup %9244  ;;  %v4489_v12 = vmul.f32 1.442695, %v4467_v25  ;;  %v4503_v23 = vmul.f32 1.442695, %v4474_v60 }
 0x8ee   :  { %v4448_v45 = vpop.xlane.xlu1 %4447  ;;  %v4451_v17 = vpop.xlane.xlu0 %4450  ;;  %v4518_v37 = vsel %vm1180_vm3, %v10692_v53, 0.0 }
 0x8ef   :  { %v10696_v30 = vpop.eup %9246  ;;  %9254 = vpow2.f32 %v4489_v12  ;;  %v4472_v26 = vsub.f32 %v10627_v52, %v4448_v45  ;;  %v4473_v14 = vsub.f32 %v10621_v8, %v4451_v17  ;;  %4519 = vadd.xlane.f32.xlu1 %v4518_v37 }
 0x8f0   :  { %9256 = vpow2.f32 %v4503_v23  ;;  %v4536_v4 = vsel %vm1180_vm3, %v10696_v30, 0.0 }
 0x8f1   :  { %v10700_v27 = vpop.eup %9248  ;;  %v4499_v61 = vmul.f32 1.442695, %v4472_v26  ;;  %v4501_v2 = vmul.f32 1.442695, %v4473_v14 }
 0x8f2   :  { %v4445_v41 = vpop.xlane.xlu0 %4444  ;;  %v4515_v1 = vsel %vm1180_vm3, %v10700_v27, 0.0 }
 0x8f3   :  { %9258 = vpow2.f32 %v4499_v61  ;;  %v4471_v35 = vsub.f32 %v10629_v46, %v4445_v41  ;;  %4537 = vadd.xlane.f32.xlu1 %v4536_v4  ;;  %4516 = vadd.xlane.f32.xlu0 %v4515_v1 }
 0x8f4   :  { %9260 = vpow2.f32 %v4501_v2 }
 0x8f5   :  { %v10707_v8 = vpop.eup %9250  ;;  %v4497_v52 = vmul.f32 1.442695, %v4471_v35 }
 0x8f6   :  { %v10709_v63 = vpop.eup %9252  ;;  %v4530_v58 = vsel %vm1180_vm3, %v10707_v8, 0.0  ;;  %v4460_v61 = vpop.xlane.xlu1 %4459 }
 0x8f7   :  { %9262 = vpow2.f32 %v4497_v52  ;;  %4531 = vadd.xlane.f32.xlu1 %v4530_v58  ;;  %v4533_v10 = vsel %vm1180_vm3, %v10709_v63, 0.0  ;;  %v4476_v2 = vsub.f32 %v10637_v11, %v4460_v61  ;;  %v4457_v41 = vpop.xlane.xlu0 %4456 }
 0x8f8   :  { %4534 = vadd.xlane.f32.xlu0 %v4533_v10  ;;  %v4475_v1 = vsub.f32 %v10639_v9, %v4457_v41  ;;  %v8861_v41 = vunpack.i.h.bf16 %v10649_v57 }
 0x8f9   :  { %v10715_v25 = vpop.eup %9254  ;;  %v4507_v4 = vmul.f32 1.442695, %v4476_v2 }
 0x8fa   :  { %v10717_v46 = vpop.eup %9256  ;;  %v4527_v60 = vsel %vm1180_vm3, %v10715_v25, 0.0  ;;  %v4505_v35 = vmul.f32 1.442695, %v4475_v1 }
 0x8fb   :  { %v4548_v12 = vsel %vm1180_vm3, %v10717_v46, 0.0  ;;  %9264 = vpow2.f32 %v4507_v4  ;;  %v10751_v11 = vpop.permute.xlu0 %8888  ;;  %v8860_v4 = vunpack.i.l.bf16 %v10649_v57 }
 0x8fc   :  { %4549 = vadd.xlane.f32.xlu1 %v4548_v12  ;;  %4528 = vadd.xlane.f32.xlu0 %v4527_v60  ;;  %9266 = vpow2.f32 %v4505_v35 }
 0x8fd   :  { %v10723_v23 = vpop.eup %9258 }
 0x8fe   :  { %v10725_v45 = vpop.eup %9260  ;;  %v4542_v17 = vsel %vm1180_vm3, %v10723_v23, 0.0 }
 0x8ff   :  { %v4545_v37 = vsel %vm1180_vm3, %v10725_v45, 0.0 }
 0x900   :  { %4543 = vadd.xlane.f32.xlu1 %v4542_v17  ;;  %4546 = vadd.xlane.f32.xlu0 %v4545_v37  ;;  %v8856_v37 = vunpack.i.h.bf16 %v10651_v56 }
 0x901   :  { %v10731_v26 = vpop.eup %9262 }
 0x902   :  { %v4539_v14 = vsel %vm1180_vm3, %v10731_v26, 0.0 }
 0x904   :  { %4540 = vadd.xlane.f32.xlu0 %v4539_v14  ;;  %v8855_v14 = vunpack.i.l.bf16 %v10651_v56 }
 0x905   :  { %v10741_v52 = vpop.eup %9264 }
 0x906   :  { %v4554_v58 = vsel %vm1180_vm3, %v10741_v52, 0.0  ;;  %v10745_v10 = vpop.eup %9266 }
 0x911   :  { %5378 = vrot.lane.b32.xlu1 %v9681_v7, %s9373_s24  ;;  %v10749_v7 = vpop.permute.xlu1 %5287 }
 0x91a   :  { %5376 = vrot.lane.b32.xlu0 %v9679_v31, %s9373_s24  ;;  %v4551_v31 = vsel %vm1180_vm3, %v10745_v10, 0.0 }
 0x935   :  { %4555 = vadd.xlane.f32.xlu1 %v4554_v58 }
 0x939   :  { %4552 = vadd.xlane.f32.xlu0 %v4551_v31 }
 0x944   :  { %v4514_v9 = vpop.xlane.xlu1 %4513 }
 0x945   :  { %9268 = vrcp.f32 %v4514_v9  ;;  %v4511_v60 = vpop.xlane.xlu0 %4510 }
 0x946   :  { %5467 = vrot.lane.b32.xlu1 %v9699_v18, %s9373_s24  ;;  %9270 = vrcp.f32 %v4511_v60 }
 0x94a   :  { %5469 = vrot.lane.b32.xlu1 %v9701_v19, %s9373_s24  ;;  %v8518_v19 = vpack.c.bf16 %v8856_v37, %v8855_v14  ;;  %v8522_v37 = vpack.c.bf16 %v8861_v41, %v8860_v4  ;;  %v8890_v41 = vunpack.i.l.bf16 %v10751_v11 }
 0x94e   :  { %5560 = vrot.lane.b32.xlu1 %v9703_v22, %s9373_s24 }
 0x94f   :  { %v9269_v12 = vpop.eup %9268  ;;  %8893 = vrot.lane.b32.xlu0 %v9735_v40, %s9372_s23 }
 0x950   :  { %v9271_v17 = vpop.eup %9270  ;;  %v4574_v18 = vmul.f32 %v9269_v12, %v10667_v44  ;;  %v8876_v12 = vunpack.i.h.bf16 %v10659_v5 }
 0x951   :  { %v4573_v61 = vmul.f32 %v9271_v17, %v10669_v51  ;;  %v8875_v17 = vunpack.i.l.bf16 %v10659_v5 }
 0x952   :  { %5649 = vrot.lane.b32.xlu1 %v9713_v0, %s9373_s24 }
 0x953   :  { %8898 = vrot.lane.b32.xlu0 %v9731_v39, %s9372_s23  ;;  %8110 = vmatprep.mubr.msk.f32.mxu0 %vm1180_vm3, %v4573_v61  ;;  %v8534_v61 = vpack.c.bf16 %v8876_v12, %v8875_v17 }
 0x954   :  { %8111 = vmatmul.mubr.msk.f32.vlgmr.msra.gmra.mrb[44].mxu0 %vm1180_vm3, %v4574_v18  ;;  %v8871_v18 = vunpack.i.h.bf16 %v10653_v6 }
 0x955   :  { %8513 = vmatpush3.bf16.msra.mxu0 %v10526_v21 }
 0x956   :  { %5651 = vrot.lane.b32.xlu1 %v9723_v38, %s9373_s24  ;;  %8519 = vmatprep.subr.bf16.mxu0 %v8518_v19  ;;  %v8866_v38 = vunpack.i.h.bf16 %v10655_v59 }
 0x957   :  { %5558 = vrot.lane.b32.xlu0 %v9709_v16, %s9373_s24 }
 0x95a   :  { %5742 = vrot.lane.b32.xlu1 %v9721_v34, %s9373_s24 }
 0x95b   :  { %8903 = vrot.lane.b32.xlu0 %v9755_v50, %s9372_s23 }
 0x95e   :  { %5833 = vrot.lane.b32.xlu1 %v9747_v48, %s9373_s24  ;;  %v8865_v48 = vunpack.i.l.bf16 %v10655_v59 }
 0x95f   :  { %8908 = vrot.lane.b32.xlu0 %v9751_v49, %s9372_s23 }
 0x962   :  { %5924 = vrot.lane.b32.xlu1 %v9743_v42, %s9373_s24 }
 0x963   :  { %5740 = vrot.lane.b32.xlu0 %v9719_v33, %s9373_s24 }
 0x967   :  { %5831 = vrot.lane.b32.xlu0 %v9745_v24, %s9373_s24 }
 0x96b   :  { %5922 = vrot.lane.b32.xlu0 %v9741_v36, %s9373_s24  ;;  %v8526_v36 = vpack.c.bf16 %v8866_v38, %v8865_v48 }
 0x96f   :  { %v4526_v22 = vpop.xlane.xlu1 %4525 }
 0x970   :  { %9272 = vrcp.f32 %v4526_v22  ;;  %v4523_v16 = vpop.xlane.xlu0 %4522 }
 0x971   :  { %9274 = vrcp.f32 %v4523_v16  ;;  %v8886_v16 = vunpack.i.h.bf16 %v10663_v28 }
 0x97a   :  { %v9273_v0 = vpop.eup %9272 }
 0x97b   :  { %v9275_v34 = vpop.eup %9274  ;;  %v4578_v33 = vmul.f32 %v9273_v0, %v10679_v47  ;;  %v8885_v0 = vunpack.i.l.bf16 %v10663_v28 }
 0x97c   :  { %v4520_v42 = vpop.xlane.xlu1 %4519  ;;  %v4577_v21 = vmul.f32 %v9275_v34, %v10681_v3 }
 0x97d   :  { %9276 = vrcp.f32 %v4520_v42  ;;  %v8880_v42 = vunpack.i.l.bf16 %v10657_v20 }
 0x97e   :  { %8124 = vmatprep.mubr.msk.f32.mxu0 %vm1180_vm3, %v4577_v21  ;;  %v8546_v21 = vpack.c.bf16 %v8886_v16, %v8885_v0 }
 0x97f   :  { %8125 = vmatmul.mubr.msk.f32.vlgmr.msra.gmra.mrb[46].mxu0 %vm1180_vm3, %v4578_v33 }
 0x980   :  { %v4538_v24 = vpop.xlane.xlu1 %4537  ;;  %8521 = vmatpush3.bf16.msra.mxu0 %v8518_v19  ;;  %v4517_v44 = vpop.xlane.xlu0 %4516  ;;  %v8870_v19 = vunpack.i.l.bf16 %v10653_v6 }
 0x981   :  { %8527 = vmatprep.subr.bf16.mxu0 %v8526_v36  ;;  %9278 = vrcp.f32 %v4517_v44 }
 0x982   :  { %9280 = vrcp.f32 %v4538_v24  ;;  %v8530_v34 = vpack.c.bf16 %v8871_v18, %v8870_v19 }
 0x984   :  { %v4532_v51 = vpop.xlane.xlu1 %4531 }
 0x985   :  { %v4535_v56 = vpop.xlane.xlu0 %4534 }
 0x986   :  { %9282 = vrcp.f32 %v4535_v56 }
 0x987   :  { %9284 = vrcp.f32 %v4532_v51  ;;  %v9277_v3 = vpop.eup %9276 }
 0x988   :  { %v4576_v58 = vmul.f32 %v9277_v3, %v10692_v53 }
 0x989   :  { %v4550_v59 = vpop.xlane.xlu1 %4549  ;;  %v4529_v2 = vpop.xlane.xlu0 %4528 }
 0x98a   :  { %9286 = vrcp.f32 %v4529_v2 }
 0x98b   :  { %v9279_v47 = vpop.eup %9278  ;;  %9288 = vrcp.f32 %v4550_v59 }
 0x98c   :  { %v4575_v35 = vmul.f32 %v9279_v47, %v10700_v27  ;;  %v9281_v9 = vpop.eup %9280  ;;  %v8891_v47 = vunpack.i.h.bf16 %v10751_v11 }
 0x98d   :  { %v4547_v1 = vpop.xlane.xlu0 %4546  ;;  %v4544_v31 = vpop.xlane.xlu1 %4543  ;;  %v4582_v27 = vmul.f32 %v9281_v9, %v10696_v30 }
 0x98e   :  { %9290 = vrcp.f32 %v4547_v1  ;;  %8117 = vmatprep.mubr.msk.f32.mxu1 %vm1180_vm3, %v4575_v35 }
 0x98f   :  { %8118 = vmatmul.mubr.msk.f32.vlgmr.msra.gmra.mrb[52].mxu1 %vm1180_vm3, %v4576_v58  ;;  %9292 = vrcp.f32 %v4544_v31  ;;  %v8552_v31 = vpack.c.bf16 %v8891_v47, %v8890_v41 }
 0x990   :  { %v9283_v60 = vpop.eup %9282  ;;  %8517 = vmatpush3.bf16.msra.mxu1 %v10530_v62 }
 0x991   :  { %v4541_v57 = vpop.xlane.xlu0 %4540  ;;  %v4581_v53 = vmul.f32 %v9283_v60, %v10709_v63  ;;  %8523 = vmatprep.subr.bf16.mxu1 %v8522_v37  ;;  %v9285_v14 = vpop.eup %9284 }
 0x992   :  { %9294 = vrcp.f32 %v4541_v57  ;;  %v4580_v30 = vmul.f32 %v9285_v14, %v10707_v8  ;;  %v8881_v8 = vunpack.i.h.bf16 %v10657_v20 }
 0x993   :  { %8138 = vmatprep.mubr.msk.f32.mxu0 %vm1180_vm3, %v4581_v53 }
 0x994   :  { %8139 = vmatmul.mubr.msk.f32.vlgmr.msra.gmra.mrb[48].mxu0 %vm1180_vm3, %v4582_v27  ;;  %v9287_v5 = vpop.eup %9286  ;;  %v8540_v20 = vpack.c.bf16 %v8881_v8, %v8880_v42 }
 0x995   :  { %8529 = vmatpush3.bf16.msra.mxu0 %v8526_v36  ;;  %v4579_v62 = vmul.f32 %v9287_v5, %v10715_v25  ;;  %v9289_v63 = vpop.eup %9288 }
 0x996   :  { %8536 = vmatprep.subr.msk.bf16.mxu0 %vm9779_vm2, %v8534_v61  ;;  %v4586_v48 = vmul.f32 %v9289_v63, %v10717_v46  ;;  %v5379_v46 = vpop.permute.xlu1 %5378 }
 0x997   :  { %8131 = vmatprep.mubr.msk.f32.mxu1 %vm1180_vm3, %v4579_v62 }
 0x998   :  { %v9291_v22 = vpop.eup %9290  ;;  %8132 = vmatmul.mubr.msk.f32.vlgmr.msra.gmra.mrb[54].mxu1 %vm1180_vm3, %v4580_v30 }
 0x999   :  { %8525 = vmatpush3.bf16.msra.mxu1 %v8522_v37  ;;  %v4585_v6 = vmul.f32 %v9291_v22, %v10725_v45  ;;  %v9293_v38 = vpop.eup %9292 }
 0x99a   :  { %8531 = vmatprep.subr.bf16.mxu1 %v8530_v34  ;;  %v4584_v33 = vmul.f32 %v9293_v38, %v10723_v23 }
 0x99b   :  { %8152 = vmatprep.mubr.msk.f32.mxu0 %vm1180_vm3, %v4585_v6 }
 0x99c   :  { %v9295_v25 = vpop.eup %9294  ;;  %8153 = vmatmul.mubr.msk.f32.vlgmr.msra.gmra.mrb[50].mxu0 %vm1180_vm3, %v4586_v48 }
 0x99d   :  { %v4583_v28 = vmul.f32 %v9295_v25, %v10731_v26  ;;  %8166 = vmatprep.mubr.msk.f32.mxu0 %vm457_vm1, %v10661_v15  ;;  %v5377_v15 = vpop.permute.xlu0 %5376 }
 0x99e   :  { %8539 = vmatpush3.bf16.xpose.msk.msra.mxu0 %vm9779_vm2, %v8534_v61 }
 0x99f   :  { %8548 = vmatprep.subr.msk.bf16.mxu0 %vm9779_vm2, %v8546_v21  ;;  %8145 = vmatprep.mubr.msk.f32.mxu1 %vm1180_vm3, %v4583_v28 }
 0x9a0   :  { %8146 = vmatmul.mubr.msk.f32.vlgmr.msra.gmra.mrb[56].mxu1 %vm1180_vm3, %v4584_v33 }
 0x9a1   :  { %8533 = vmatpush3.bf16.msra.mxu1 %v8530_v34 }
 0x9a2   :  { %8542 = vmatprep.subr.msk.bf16.mxu1 %vm9779_vm2, %v8540_v20 }
 0x9a5   :  { %8167 = vmatmul.mubr.msk.f32.vlgmr.msra.gmra.mrb[52].mxu0 %vm457_vm1, %v10749_v7 }
 0x9a6   :  { %8551 = vmatpush3.bf16.xpose.msk.msra.mxu0 %vm9779_vm2, %v8546_v21 }
 0x9c2   :  { %v4556_v23 = vpop.xlane.xlu1 %4555 }
 0x9c3   :  { %9296 = vrcp.f32 %v4556_v23 }
 0x9c6   :  { %v5468_v45 = vpop.permute.xlu1 %5467  ;;  %v4553_v26 = vpop.xlane.xlu0 %4552 }
 0x9c7   :  { %9298 = vrcp.f32 %v4553_v26  ;;  %8180 = vmatprep.mubr.msk.f32.mxu0 %vm457_vm1, %v5468_v45 }
 0x9ca   :  { %v5470_v36 = vpop.permute.xlu1 %5469  ;;  %v8894_v24 = vpop.permute.xlu0 %8893 }
 0x9cb   :  { %v8896_v44 = vunpack.i.h.bf16 %v8894_v24  ;;  %v8895_v51 = vunpack.i.l.bf16 %v8894_v24  ;;  %8181 = vmatmul.mubr.msk.f32.vlgmr.msra.gmra.mrb[54].mxu0 %vm457_vm1, %v5470_v36 }
 0x9cd   :  { %v8558_v56 = vpack.c.bf16 %v8896_v44, %v8895_v51  ;;  %v9297_v2 = vpop.eup %9296 }
 0x9ce   :  { %v5561_v7 = vpop.permute.xlu1 %5560  ;;  %v8899_v59 = vpop.permute.xlu0 %8898  ;;  %v4588_v58 = vmul.f32 %v9297_v2, %v10741_v52 }
 0x9cf   :  { %8560 = vmatprep.subr.msk.bf16.mxu0 %vm9779_vm2, %v8558_v56  ;;  %v8901_v52 = vunpack.i.h.bf16 %v8899_v59 }
 0x9d0   :  { %8563 = vmatpush3.bf16.xpose.msk.msra.mxu0 %vm9779_vm2, %v8558_v56 }
 0x9d1   :  { %v9299_v3 = vpop.eup %9298 }
 0x9d2   :  { %v5650_v4 = vpop.permute.xlu1 %5649  ;;  %v5559_v1 = vpop.permute.xlu0 %5558  ;;  %v4587_v35 = vmul.f32 %v9299_v3, %v10745_v10  ;;  %v8900_v10 = vunpack.i.l.bf16 %v8899_v59 }
 0x9d3   :  { %8194 = vmatprep.mubr.msk.f32.mxu0 %vm457_vm1, %v5650_v4 }
 0x9d4   :  { %8159 = vmatprep.mubr.msk.f32.mxu1 %vm1180_vm3, %v4587_v35  ;;  %v8564_v57 = vpack.c.bf16 %v8901_v52, %v8900_v10 }
 0x9d5   :  { %8160 = vmatmul.mubr.msk.f32.vlgmr.msra.gmra.mrb[58].mxu1 %vm1180_vm3, %v4588_v58 }
 0x9d6   :  { %8545 = vmatpush3.bf16.xpose.msk.msra.mxu1 %vm9779_vm2, %v8540_v20  ;;  %v5652_v9 = vpop.permute.xlu1 %5651  ;;  %8173 = vmatprep.mubr.msk.f32.mxu1 %vm457_vm1, %v5377_v15  ;;  %v8904_v11 = vpop.permute.xlu0 %8903 }
 0x9d7   :  { %v8906_v60 = vunpack.i.h.bf16 %v8904_v11  ;;  %v8905_v12 = vunpack.i.l.bf16 %v8904_v11  ;;  %8554 = vmatprep.subr.msk.bf16.mxu1 %vm9779_vm2, %v8552_v31  ;;  %8195 = vmatmul.mubr.msk.f32.vlgmr.msra.gmra.mrb[56].mxu0 %vm457_vm1, %v5652_v9 }
 0x9d9   :  { %v8570_v17 = vpack.c.bf16 %v8906_v60, %v8905_v12 }
 0x9da   :  { %v8909_v37 = vpop.permute.xlu0 %8908  ;;  %v5743_v53 = vpop.permute.xlu1 %5742 }
 0x9db   :  { %8572 = vmatprep.subr.msk.bf16.mxu0 %vm9779_vm2, %v8570_v17  ;;  %v8911_v14 = vunpack.i.h.bf16 %v8909_v37  ;;  %v8910_v61 = vunpack.i.l.bf16 %v8909_v37 }
 0x9dc   :  { %8575 = vmatpush3.bf16.xpose.msk.msra.mxu0 %vm9779_vm2, %v8570_v17 }
 0x9dd   :  { %8174 = vmatmul.mubr.msk.f32.vlgmr.msra.gmra.mrb[60].mxu1 %vm457_vm1, %v5379_v46  ;;  %v8576_v19 = vpack.c.bf16 %v8911_v14, %v8910_v61 }
 0x9de   :  { %8557 = vmatpush3.bf16.xpose.msk.msra.mxu1 %vm9779_vm2, %v8552_v31  ;;  %8187 = vmatprep.mubr.msk.f32.mxu1 %vm457_vm1, %v5559_v1  ;;  %v5741_v27 = vpop.permute.xlu0 %5740  ;;  %v5834_v18 = vpop.permute.xlu1 %5833 }
 0x9df   :  { %8566 = vmatprep.subr.msk.bf16.mxu1 %vm9779_vm2, %v8564_v57 }
 0x9e2   :  { %v5832_v5 = vpop.permute.xlu0 %5831  ;;  %v5925_v30 = vpop.permute.xlu1 %5924 }
 0x9e3   :  { %8208 = vmatprep.mubr.msk.f32.mxu0 %vm457_vm1, %v5832_v5 }
 0x9e4   :  { %8209 = vmatmul.mubr.msk.f32.vlgmr.msra.gmra.mrb[58].mxu0 %vm457_vm1, %v5834_v18 }
 0x9e5   :  { %8188 = vmatmul.mubr.msk.f32.vlgmr.msra.gmra.mrb[62].mxu1 %vm457_vm1, %v5561_v7 }
 0x9e6   :  { %8569 = vmatpush3.bf16.xpose.msk.msra.mxu1 %vm9779_vm2, %v8564_v57  ;;  %8201 = vmatprep.mubr.msk.f32.mxu1 %vm457_vm1, %v5741_v27  ;;  %v5923_v62 = vpop.permute.xlu0 %5922 }
 0x9e7   :  { %8578 = vmatprep.subr.msk.bf16.mxu1 %vm9779_vm2, %v8576_v19 }
 0x9ed   :  { %8202 = vmatmul.mubr.msk.f32.vlgmr.msra.gmra.mrb[64].mxu1 %vm457_vm1, %v5743_v53 }
 0x9ee   :  { %8581 = vmatpush3.bf16.xpose.msk.msra.mxu1 %vm9779_vm2, %v8576_v19  ;;  %8215 = vmatprep.mubr.msk.f32.mxu1 %vm457_vm1, %v5923_v62 }
 0x9f5   :  { %8216 = vmatmul.mubr.msk.f32.vlgmr.msra.gmra.mrb[66].mxu1 %vm457_vm1, %v5925_v30 }
 0xa27   :  { %v10885_v63 = vpop.f32.mrb[44].mxu0 }
 0xa28   :  { %v10887_v22 = vpop.f32.mrb[45].mxu0 }
 0xa29   :  { %v8962_v16 = vpack.i.bf16 %v10885_v63, %v10887_v22  ;;  %v11427_v22 = vld [vmem:[#allocation24_spill] sm:$0xff] }
 0xa52   :  { %v10891_v0 = vpop.f32.mrb[46].mxu0 }
 0xa53   :  { %v10893_v34 = vpop.f32.mrb[47].mxu0 }
 0xa54   :  { %v8982_v29 = vpack.i.bf16 %v10891_v0, %v10893_v34 }
 0xa62   :  { %v10897_v6 = vpop.f32.mrb[52].mxu1 }
 0xa63   :  { %v10899_v38 = vpop.f32.mrb[53].mxu1 }
 0xa64   :  { %v8967_v48 = vpack.i.bf16 %v10897_v6, %v10899_v38  ;;  %v11422_v6 = vld [vmem:[#allocation31_spill] sm:$0xff] }
 0xa67   :  { %v10903_v25 = vpop.f32.mrb[48].mxu0 }
 0xa68   :  { %v10905_v8 = vpop.f32.mrb[49].mxu0 }
 0xa69   :  { %v9007_v42 = vpack.i.bf16 %v10903_v25, %v10905_v8  ;;  %v9075_v25 = vld [vmem:[%s11355_s5 + $0x8] sm:$0xff]  }
 0xa6b   :  { %v10909_v21 = vpop.f32.mrb[54].mxu1 }
 0xa6c   :  { %v10911_v28 = vpop.f32.mrb[55].mxu1 }
 0xa6d   :  { %v8987_v33 = vpack.i.bf16 %v10909_v21, %v10911_v28 }
 0xa6f   :  { %v10915_v20 = vpop.f32.mrb[50].mxu0 }
 0xa70   :  { %v10917_v46 = vpop.f32.mrb[51].mxu0 }
 0xa71   :  { %v9047_v15 = vpack.i.bf16 %v10915_v20, %v10917_v46 }
 0xa73   :  { %v10921_v23 = vpop.f32.mrb[56].mxu1 }
 0xa74   :  { %v10923_v45 = vpop.f32.mrb[57].mxu1 }
 0xa75   :  { %v9022_v26 = vpack.i.bf16 %v10921_v23, %v10923_v45 }
 0xa78   :  { %v8168_v36 = vpop.f32.mrb[52].mxu0 }
 0xa79   :  { %v10927_v24 = vmul.f32 0.35355338, %v8168_v36  ;;  %v5367_v44 = vpop.f32.mrb[53].mxu0 }
 0xa7a   :  { %v10929_v51 = vmul.f32 0.35355338, %v5367_v44 }
 0xa7b   :  { %v6032_v56 = vsel %vm1180_vm3, %v10927_v24, -inf }
 0xa7c   :  { %6033 = vmax.xlane.f32.xlu1 %v6032_v56  ;;  %v6029_v7 = vsel %vm1180_vm3, %v10929_v51, -inf }
 0xa7d   :  { %6030 = vmax.xlane.f32.xlu0 %v6029_v7 }
 0xa9e   :  { %v8182_v59 = vpop.f32.mrb[54].mxu0 }
 0xa9f   :  { %v10935_v2 = vmul.f32 0.35355338, %v8182_v59  ;;  %v5549_v3 = vpop.f32.mrb[55].mxu0 }
 0xaa0   :  { %v10937_v47 = vmul.f32 0.35355338, %v5549_v3 }
 0xaa1   :  { %v6044_v41 = vsel %vm1180_vm3, %v10935_v2, -inf }
 0xaa2   :  { %6045 = vmax.xlane.f32.xlu1 %v6044_v41  ;;  %v6041_v4 = vsel %vm1180_vm3, %v10937_v47, -inf }
 0xaa3   :  { %6042 = vmax.xlane.f32.xlu0 %v6041_v4 }
 0xaa8   :  { %v10943_v1 = vpop.f32.mrb[58].mxu1 }
 0xaa9   :  { %v10945_v35 = vpop.f32.mrb[59].mxu1 }
 0xaaa   :  { %v9057_v58 = vpack.i.bf16 %v10943_v1, %v10945_v35  ;;  %v8196_v31 = vpop.f32.mrb[56].mxu0 }
 0xaab   :  { %v10949_v9 = vmul.f32 0.35355338, %v8196_v31  ;;  %v5731_v11 = vpop.f32.mrb[57].mxu0 }
 0xaac   :  { %v10959_v57 = vmul.f32 0.35355338, %v5731_v11 }
 0xaad   :  { %v6056_v60 = vsel %vm1180_vm3, %v10949_v9, -inf }
 0xaae   :  { %6057 = vmax.xlane.f32.xlu1 %v6056_v60  ;;  %v6053_v30 = vsel %vm1180_vm3, %v10959_v57, -inf }
 0xab0   :  { %v8175_v12 = vpop.f32.mrb[60].mxu1 }
 0xab1   :  { %v10953_v52 = vmul.f32 0.35355338, %v8175_v12  ;;  %v5458_v10 = vpop.f32.mrb[61].mxu1 }
 0xab2   :  { %v10955_v17 = vmul.f32 0.35355338, %v5458_v10 }
 0xab3   :  { %v6038_v37 = vsel %vm1180_vm3, %v10953_v52, -inf }
 0xab4   :  { %6039 = vmax.xlane.f32.xlu0 %v6038_v37  ;;  %v6035_v53 = vsel %vm1180_vm3, %v10955_v17, -inf }
 0xab7   :  { %v8210_v27 = vpop.f32.mrb[58].mxu0 }
 0xab8   :  { %6036 = vmax.xlane.f32.xlu0 %v6035_v53  ;;  %v8189_v14 = vpop.f32.mrb[62].mxu1  ;;  %v5913_v61 = vpop.f32.mrb[59].mxu0  ;;  %v10965_v19 = vmul.f32 0.35355338, %v8210_v27 }
 0xab9   :  { %v10963_v5 = vmul.f32 0.35355338, %v8189_v14  ;;  %v5640_v18 = vpop.f32.mrb[63].mxu1  ;;  %v10973_v44 = vmul.f32 0.35355338, %v5913_v61 }
 0xaba   :  { %v10967_v62 = vmul.f32 0.35355338, %v5640_v18  ;;  %v6068_v56 = vsel %vm1180_vm3, %v10965_v19, -inf }
 0xabb   :  { %v6050_v36 = vsel %vm1180_vm3, %v10963_v5, -inf  ;;  %v6065_v31 = vsel %vm1180_vm3, %v10973_v44, -inf }
 0xabc   :  { %6054 = vmax.xlane.f32.xlu0 %v6053_v30  ;;  %6051 = vmax.xlane.f32.xlu1 %v6050_v36  ;;  %v6047_v7 = vsel %vm1180_vm3, %v10967_v62, -inf }
 0xac0   :  { %6069 = vmax.xlane.f32.xlu1 %v6068_v56  ;;  %6048 = vmax.xlane.f32.xlu0 %v6047_v7  ;;  %v8203_v59 = vpop.f32.mrb[64].mxu1 }
 0xac1   :  { %v10979_v3 = vmul.f32 0.35355338, %v8203_v59  ;;  %v5822_v41 = vpop.f32.mrb[65].mxu1 }
 0xac2   :  { %v10981_v4 = vmul.f32 0.35355338, %v5822_v41 }
 0xac3   :  { %v6062_v11 = vsel %vm1180_vm3, %v10979_v3, -inf }
 0xac4   :  { %6066 = vmax.xlane.f32.xlu0 %v6065_v31  ;;  %6063 = vmax.xlane.f32.xlu1 %v6062_v11  ;;  %v6059_v60 = vsel %vm1180_vm3, %v10981_v4, -inf }
 0xac8   :  { %6060 = vmax.xlane.f32.xlu0 %v6059_v60  ;;  %v8217_v12 = vpop.f32.mrb[66].mxu1 }
 0xac9   :  { %v6004_v10 = vpop.f32.mrb[67].mxu1  ;;  %v10993_v37 = vmul.f32 0.35355338, %v8217_v12 }
 0xaca   :  { %v10995_v53 = vmul.f32 0.35355338, %v6004_v10 }
 0xacb   :  { %v6074_v27 = vsel %vm1180_vm3, %v10993_v37, -inf }
 0xacc   :  { %v6071_v14 = vsel %vm1180_vm3, %v10995_v53, -inf }
 0xad5   :  { %8918 = vrot.lane.b32.xlu1 %v9689_v43, %s9374_s25 }
 0xade   :  { %8913 = vrot.lane.b32.xlu0 %v9693_v54, %s9374_s25 }
 0xaf9   :  { %6075 = vmax.xlane.f32.xlu1 %v6074_v27 }
 0xafd   :  { %6072 = vmax.xlane.f32.xlu0 %v6071_v14 }
 0xb09   :  { %v6034_v61 = vpop.xlane.xlu1 %6033 }
 0xb0a   :  { %8928 = vrot.lane.b32.xlu1 %v9717_v32, %s9374_s25  ;;  %v6031_v43 = vpop.xlane.xlu0 %6030  ;;  %v6078_v18 = vsub.f32 %v10927_v24, %v6034_v61 }
 0xb0b   :  { %v6077_v54 = vsub.f32 %v10929_v51, %v6031_v43 }
 0xb0c   :  { %v6095_v36 = vmul.f32 1.442695, %v6078_v18 }
 0xb0d   :  { %v6093_v30 = vmul.f32 1.442695, %v6077_v54 }
 0xb0e   :  { %8933 = vrot.lane.b32.xlu1 %v9735_v40, %s9374_s25 }
 0xb0f   :  { %9300 = vpow2.f32 %v6093_v30 }
 0xb10   :  { %9302 = vpow2.f32 %v6095_v36 }
 0xb12   :  { %8938 = vrot.lane.b32.xlu1 %v9731_v39, %s9374_s25 }
 0xb13   :  { %8923 = vrot.lane.b32.xlu0 %v9707_v55, %s9374_s25 }
 0xb19   :  { %v11011_v32 = vpop.eup %9300 }
 0xb1a   :  { %v6125_v55 = vsel %vm1180_vm3, %v11011_v32, 0.0  ;;  %v11017_v59 = vpop.eup %9302 }
 0xb1b   :  { %v6128_v41 = vsel %vm1180_vm3, %v11017_v59, 0.0 }
 0xb2f   :  { %v6046_v56 = vpop.xlane.xlu1 %6045 }
 0xb30   :  { %v6082_v40 = vsub.f32 %v10935_v2, %v6046_v56  ;;  %v6043_v7 = vpop.xlane.xlu0 %6042 }
 0xb31   :  { %v6081_v39 = vsub.f32 %v10937_v47, %v6043_v7 }
 0xb32   :  { %v6103_v51 = vmul.f32 1.442695, %v6082_v40  ;;  %6126 = vadd.xlane.f32.xlu0 %v6125_v55 }
 0xb33   :  { %v6101_v24 = vmul.f32 1.442695, %v6081_v39 }
 0xb34   :  { %9304 = vpow2.f32 %v6103_v51 }
 0xb35   :  { %9306 = vpow2.f32 %v6101_v24 }
 0xb36   :  { %6129 = vadd.xlane.f32.xlu1 %v6128_v41 }
 0xb3b   :  { %v6058_v31 = vpop.xlane.xlu1 %6057 }
 0xb3c   :  { %v6086_v60 = vsub.f32 %v10949_v9, %v6058_v31 }
 0xb3e   :  { %v11021_v11 = vpop.eup %9304  ;;  %v6111_v14 = vmul.f32 1.442695, %v6086_v60 }
 0xb3f   :  { %v11023_v2 = vpop.eup %9306  ;;  %v6140_v47 = vsel %vm1180_vm3, %v11021_v11, 0.0 }
 0xb40   :  { %6141 = vadd.xlane.f32.xlu1 %v6140_v47  ;;  %v6137_v12 = vsel %vm1180_vm3, %v11023_v2, 0.0 }
 0xb41   :  { %v6040_v10 = vpop.xlane.xlu0 %6039  ;;  %6138 = vadd.xlane.f32.xlu0 %v6137_v12 }
 0xb42   :  { %v6080_v27 = vsub.f32 %v10953_v52, %v6040_v10 }
 0xb44   :  { %v6099_v43 = vmul.f32 1.442695, %v6080_v27 }
 0xb45   :  { %v6037_v54 = vpop.xlane.xlu0 %6036 }
 0xb46   :  { %9308 = vpow2.f32 %v6099_v43  ;;  %v6079_v61 = vsub.f32 %v10955_v17, %v6037_v54 }
 0xb47   :  { %9310 = vpow2.f32 %v6111_v14 }
 0xb48   :  { %v6097_v18 = vmul.f32 1.442695, %v6079_v61 }
 0xb49   :  { %v6055_v30 = vpop.xlane.xlu0 %6054  ;;  %v6052_v36 = vpop.xlane.xlu1 %6051 }
 0xb4a   :  { %9312 = vpow2.f32 %v6097_v18  ;;  %v6085_v9 = vsub.f32 %v10959_v57, %v6055_v30  ;;  %v6084_v56 = vsub.f32 %v10963_v5, %v6052_v36 }
 0xb4c   :  { %v6109_v40 = vmul.f32 1.442695, %v6085_v9  ;;  %v6107_v7 = vmul.f32 1.442695, %v6084_v56 }
 0xb4d   :  { %v6070_v39 = vpop.xlane.xlu1 %6069  ;;  %v6049_v55 = vpop.xlane.xlu0 %6048 }
 0xb4e   :  { %9314 = vpow2.f32 %v6109_v40  ;;  %v6090_v52 = vsub.f32 %v10965_v19, %v6070_v39  ;;  %v6083_v51 = vsub.f32 %v10967_v62, %v6049_v55 }
 0xb4f   :  { %9316 = vpow2.f32 %v6107_v7 }
 0xb50   :  { %v11036_v17 = vpop.eup %9308  ;;  %v6105_v24 = vmul.f32 1.442695, %v6083_v51  ;;  %v6119_v41 = vmul.f32 1.442695, %v6090_v52 }
 0xb51   :  { %v6067_v31 = vpop.xlane.xlu0 %6066  ;;  %v6064_v47 = vpop.xlane.xlu1 %6063  ;;  %v6134_v57 = vsel %vm1180_vm3, %v11036_v17, 0.0 }
 0xb52   :  { %v11040_v5 = vpop.eup %9310  ;;  %v6089_v60 = vsub.f32 %v10973_v44, %v6067_v31  ;;  %v6088_v12 = vsub.f32 %v10979_v3, %v6064_v47  ;;  %6135 = vadd.xlane.f32.xlu1 %v6134_v57  ;;  %9318 = vpow2.f32 %v6105_v24 }
 0xb53   :  { %9320 = vpow2.f32 %v6119_v41  ;;  %v6152_v43 = vsel %vm1180_vm3, %v11040_v5, 0.0 }
 0xb54   :  { %v11044_v19 = vpop.eup %9312  ;;  %v6117_v62 = vmul.f32 1.442695, %v6089_v60  ;;  %v6115_v10 = vmul.f32 1.442695, %v6088_v12 }
 0xb55   :  { %v8919_v27 = vpop.permute.xlu1 %8918  ;;  %v6061_v14 = vpop.xlane.xlu0 %6060  ;;  %v6131_v54 = vsel %vm1180_vm3, %v11044_v19, 0.0 }
 0xb56   :  { %9322 = vpow2.f32 %v6117_v62  ;;  %v8921_v61 = vunpack.i.h.bf16 %v8919_v27  ;;  %v8920_v44 = vunpack.i.l.bf16 %v8919_v27  ;;  %v6087_v3 = vsub.f32 %v10981_v4, %v6061_v14  ;;  %6153 = vadd.xlane.f32.xlu1 %v6152_v43  ;;  %6132 = vadd.xlane.f32.xlu0 %v6131_v54 }
 0xb57   :  { %9324 = vpow2.f32 %v6115_v10 }
 0xb58   :  { %v11051_v18 = vpop.eup %9314  ;;  %v8586_v30 = vpack.c.bf16 %v8921_v61, %v8920_v44  ;;  %v6113_v36 = vmul.f32 1.442695, %v6087_v3 }
 0xb59   :  { %v11053_v9 = vpop.eup %9316  ;;  %v8914_v56 = vpop.permute.xlu0 %8913  ;;  %v6149_v40 = vsel %vm1180_vm3, %v11051_v18, 0.0 }
 0xb5a   :  { %9326 = vpow2.f32 %v6113_v36  ;;  %v8916_v7 = vunpack.i.h.bf16 %v8914_v56  ;;  %v8915_v39 = vunpack.i.l.bf16 %v8914_v56  ;;  %8587 = vmatprep.subr.bf16.mxu1 %v8586_v30  ;;  %v6146_v4 = vsel %vm1180_vm3, %v11053_v9, 0.0  ;;  %6150 = vadd.xlane.f32.xlu0 %v6149_v40 }
 0xb5b   :  { %6147 = vadd.xlane.f32.xlu1 %v6146_v4  ;;  %8589 = vmatpush3.bf16.msra.mxu1 %v8586_v30 }
 0xb5c   :  { %v8582_v55 = vpack.c.bf16 %v8916_v7, %v8915_v39  ;;  %v11059_v52 = vpop.eup %9318 }
 0xb5d   :  { %v6143_v51 = vsel %vm1180_vm3, %v11059_v52, 0.0  ;;  %v11063_v24 = vpop.eup %9320 }
 0xb5e   :  { %8583 = vmatprep.subr.bf16.mxu0 %v8582_v55  ;;  %6144 = vadd.xlane.f32.xlu0 %v6143_v51  ;;  %v6164_v57 = vsel %vm1180_vm3, %v11063_v24, 0.0  ;;  %v11413_v51 = vld [vmem:[#allocation23_spill] sm:$0xff] }
 0xb5f   :  { %8585 = vmatpush3.bf16.msra.mxu0 %v8582_v55 }
 0xb60   :  { %v11065_v41 = vpop.eup %9322 }
 0xb61   :  { %v6161_v31 = vsel %vm1180_vm3, %v11065_v41, 0.0  ;;  %v11069_v47 = vpop.eup %9324 }
 0xb62   :  { %6162 = vadd.xlane.f32.xlu1 %v6161_v31  ;;  %6165 = vadd.xlane.f32.xlu0 %v6164_v57  ;;  %v6158_v12 = vsel %vm1180_vm3, %v11069_v47, 0.0  ;;  %v11414_v31 = vpack.i.bf16 %v10545_v13, %v11413_v51  ;;  %v11415_v57 = vld [vmem:[#allocation26_spill] sm:$0xff] }
 0xb64   :  { %v11073_v60 = vpop.eup %9326 }
 0xb65   :  { %v6155_v62 = vsel %vm1180_vm3, %v11073_v60, 0.0 }
 0xb66   :  { %6159 = vadd.xlane.f32.xlu1 %v6158_v12  ;;  %6156 = vadd.xlane.f32.xlu0 %v6155_v62  ;;  %v11416_v12 = vld [vmem:[#allocation27_spill] sm:$0xff] }
 0xb67   :  { %v11417_v62 = vpack.i.bf16 %v11415_v57, %v11416_v12 }
 0xb86   :  { %v6076_v10 = vpop.xlane.xlu1 %6075 }
 0xb87   :  { %v6092_v27 = vsub.f32 %v10993_v37, %v6076_v10  ;;  %v11419_v10 = vld [vmem:[#allocation20_spill] sm:$0xff] }
 0xb89   :  { %v6123_v14 = vmul.f32 1.442695, %v6092_v27 }
 0xb8a   :  { %v8929_v43 = vpop.permute.xlu1 %8928  ;;  %v6073_v54 = vpop.xlane.xlu0 %6072 }
 0xb8b   :  { %9328 = vpow2.f32 %v6123_v14  ;;  %v8931_v61 = vunpack.i.h.bf16 %v8929_v43  ;;  %v8930_v44 = vunpack.i.l.bf16 %v8929_v43  ;;  %v6091_v3 = vsub.f32 %v10995_v53, %v6073_v54  ;;  %v11425_v14 = vld [vmem:[#allocation22_spill] sm:$0xff] }
 0xb8d   :  { %v11081_v30 = vpack.c.bf16 %v8931_v61, %v8930_v44  ;;  %v6121_v36 = vmul.f32 1.442695, %v6091_v3 }
 0xb8e   :  { %v8924_v56 = vpop.permute.xlu0 %8923  ;;  %v8934_v13 = vpop.permute.xlu1 %8933 }
 0xb8f   :  { %9330 = vpow2.f32 %v6121_v36  ;;  %v8926_v40 = vunpack.i.h.bf16 %v8924_v56  ;;  %8595 = vmatprep.subr.bf16.mxu1 %v11081_v30  ;;  %v8925_v7 = vunpack.i.l.bf16 %v8924_v56  ;;  %v8936_v44 = vunpack.i.h.bf16 %v8934_v13 }
 0xb90   :  { %v8935_v3 = vunpack.i.l.bf16 %v8934_v13 }
 0xb91   :  { %v8590_v39 = vpack.c.bf16 %v8926_v40, %v8925_v7 }
 0xb92   :  { %v8939_v54 = vpop.permute.xlu1 %8938  ;;  %v8598_v34 = vpack.c.bf16 %v8936_v44, %v8935_v3 }
 0xb93   :  { %8591 = vmatprep.subr.bf16.mxu0 %v8590_v39 }
 0xb95   :  { %v11084_v37 = vpop.eup %9328 }
 0xb96   :  { %v6170_v4 = vsel %vm1180_vm3, %v11084_v37, 0.0 }
 0xb97   :  { %6171 = vadd.xlane.f32.xlu1 %v6170_v4 }
 0xb99   :  { %v11088_v55 = vpop.eup %9330 }
 0xb9a   :  { %v6167_v53 = vsel %vm1180_vm3, %v11088_v55, 0.0 }
 0xb9b   :  { %6168 = vadd.xlane.f32.xlu0 %v6167_v53 }
 0xba8   :  { %8948 = vrot.lane.b32.xlu1 %v9751_v49, %s9374_s25  ;;  %v11418_v49 = vld [vmem:[#allocation2_spill] sm:$0xff] }
 0xba9   :  { %v11420_v27 = vpack.i.bf16 %v11418_v49, %v11419_v10 }
 0xbac   :  { %8958 = vrot.lane.b32.xlu1 %v11414_v31, %s9375_s26 }
 0xbb0   :  { %8968 = vrot.lane.b32.xlu1 %v8967_v48, %s9376_s27  ;;  %v11424_v48 = vld [vmem:[#allocation21_spill] sm:$0xff] }
 0xbb1   :  { %8943 = vrot.lane.b32.xlu0 %v9755_v50, %s9374_s25  ;;  %v11421_v50 = vld [vmem:[#allocation30_spill] sm:$0xff]  ;;  %v11426_v43 = vpack.i.bf16 %v11424_v48, %v11425_v14 }
 0xbb2   :  { %v11423_v38 = vpack.i.bf16 %v11421_v50, %v11422_v6 }
 0xbb4   :  { %8978 = vrot.lane.b32.xlu1 %v11417_v62, %s9375_s26  ;;  %v8940_v62 = vunpack.i.l.bf16 %v8939_v54 }
 0xbb5   :  { %8953 = vrot.lane.b32.xlu0 %v11420_v27, %s9375_s26 }
 0xbb8   :  { %8988 = vrot.lane.b32.xlu1 %v8987_v33, %s9376_s27 }
 0xbb9   :  { %8963 = vrot.lane.b32.xlu0 %v8962_v16, %s9376_s27  ;;  %v11428_v16 = vld [vmem:[#allocation25_spill] sm:$0xff] }
 0xbba   :  { %v11429_v21 = vpack.i.bf16 %v11427_v22, %v11428_v16 }
 0xbbc   :  { %8998 = vrot.lane.b32.xlu1 %v11423_v38, %s9375_s26 }
 0xbbd   :  { %8973 = vrot.lane.b32.xlu0 %v11426_v43, %s9375_s26 }
 0xbbf   :  { %v6127_v61 = vpop.xlane.xlu0 %6126 }
 0xbc0   :  { %9332 = vrcp.f32 %v6127_v61 }
 0xbc1   :  { %8983 = vrot.lane.b32.xlu0 %v8982_v29, %s9376_s27 }
 0xbc3   :  { %v6130_v63 = vpop.xlane.xlu1 %6129 }
 0xbc4   :  { %9334 = vrcp.f32 %v6130_v63 }
 0xbc5   :  { %8993 = vrot.lane.b32.xlu0 %v11429_v21, %s9375_s26 }
 0xbca   :  { %v9333_v28 = vpop.eup %9332 }
 0xbcb   :  { %v6189_v33 = vmul.f32 %v9333_v28, %v11011_v32 }
 0xbcd   :  { %8222 = vmatprep.mubr.msk.f32.mxu0 %vm1180_vm3, %v6189_v33  ;;  %v6142_v36 = vpop.xlane.xlu1 %6141 }
 0xbce   :  { %v9335_v56 = vpop.eup %9334  ;;  %9336 = vrcp.f32 %v6142_v36  ;;  %v6139_v40 = vpop.xlane.xlu0 %6138 }
 0xbcf   :  { %v6190_v0 = vmul.f32 %v9335_v56, %v11017_v59  ;;  %9338 = vrcp.f32 %v6139_v40 }
 0xbd1   :  { %8223 = vmatmul.mubr.msk.f32.vlgmr.msra.gmra.mrb[60].mxu0 %vm1180_vm3, %v6190_v0 }
 0xbd2   :  { %8593 = vmatpush3.bf16.msra.mxu0 %v8590_v39 }
 0xbd3   :  { %8599 = vmatprep.subr.bf16.mxu0 %v8598_v34 }
 0xbd8   :  { %v9337_v29 = vpop.eup %9336 }
 0xbd9   :  { %v9339_v7 = vpop.eup %9338  ;;  %v6194_v4 = vmul.f32 %v9337_v29, %v11021_v11  ;;  %v8941_v11 = vunpack.i.h.bf16 %v8939_v54 }
 0xbda   :  { %v6193_v32 = vmul.f32 %v9339_v7, %v11023_v2 }
 0xbdb   :  { %v8602_v38 = vpack.c.bf16 %v8941_v11, %v8940_v62 }
 0xbdc   :  { %8236 = vmatprep.mubr.msk.f32.mxu0 %vm1180_vm3, %v6193_v32 }
 0xbdd   :  { %8237 = vmatmul.mubr.msk.f32.vlgmr.msra.gmra.mrb[62].mxu0 %vm1180_vm3, %v6194_v4 }
 0xbde   :  { %8601 = vmatpush3.bf16.msra.mxu0 %v8598_v34 }
 0xbdf   :  { %v6136_v53 = vpop.xlane.xlu1 %6135 }
 0xbe0   :  { %9340 = vrcp.f32 %v6136_v53 }
 0xbe3   :  { %v6154_v51 = vpop.xlane.xlu1 %6153  ;;  %v6133_v59 = vpop.xlane.xlu0 %6132 }
 0xbe4   :  { %9342 = vrcp.f32 %v6133_v59  ;;  %v11430_v59 = vld [vmem:[#allocation28_spill] sm:$0xff] }
 0xbe5   :  { %9344 = vrcp.f32 %v6154_v51 }
 0xbe7   :  { %v6151_v31 = vpop.xlane.xlu0 %6150 }
 0xbe8   :  { %9346 = vrcp.f32 %v6151_v31  ;;  %v6148_v39 = vpop.xlane.xlu1 %6147  ;;  %v11431_v31 = vld [vmem:[#allocation29_spill] sm:$0xff] }
 0xbe9   :  { %9348 = vrcp.f32 %v6148_v39  ;;  %v11432_v39 = vpack.i.bf16 %v11430_v59, %v11431_v31 }
 0xbea   :  { %v9341_v2 = vpop.eup %9340 }
 0xbeb   :  { %v6145_v57 = vpop.xlane.xlu0 %6144  ;;  %v6192_v50 = vmul.f32 %v9341_v2, %v11036_v17 }
 0xbec   :  { %9350 = vrcp.f32 %v6145_v57 }
 0xbee   :  { %v9343_v12 = vpop.eup %9342 }
 0xbef   :  { %v6163_v49 = vpop.xlane.xlu1 %6162  ;;  %v6166_v10 = vpop.xlane.xlu0 %6165  ;;  %v6191_v27 = vmul.f32 %v9343_v12, %v11044_v19 }
 0xbf0   :  { %9352 = vrcp.f32 %v6163_v49  ;;  %v9345_v13 = vpop.eup %9344 }
 0xbf1   :  { %8229 = vmatprep.mubr.msk.f32.mxu1 %vm1180_vm3, %v6191_v27  ;;  %v6198_v43 = vmul.f32 %v9345_v13, %v11040_v5  ;;  %v11433_v27 = vld [vmem:[#allocation32_spill] sm:$0xff]  ;;  %v11434_v13 = vld [vmem:[#allocation33_spill] sm:$0xff] }
 0xbf2   :  { %v9347_v6 = vpop.eup %9346  ;;  %8230 = vmatmul.mubr.msk.f32.vlgmr.msra.gmra.mrb[68].mxu1 %vm1180_vm3, %v6192_v50  ;;  %v11435_v50 = vpack.i.bf16 %v11433_v27, %v11434_v13 }
 0xbf3   :  { %v6160_v48 = vpop.xlane.xlu1 %6159  ;;  %v6197_v14 = vmul.f32 %v9347_v6, %v11051_v18  ;;  %8597 = vmatpush3.bf16.msra.mxu1 %v11081_v30  ;;  %v6157_v54 = vpop.xlane.xlu0 %6156 }
 0xbf4   :  { %9354 = vrcp.f32 %v6160_v48  ;;  %8603 = vmatprep.subr.bf16.mxu1 %v8602_v38  ;;  %v9349_v17 = vpop.eup %9348 }
 0xbf5   :  { %9356 = vrcp.f32 %v6157_v54  ;;  %8250 = vmatprep.mubr.msk.f32.mxu0 %vm1180_vm3, %v6197_v14  ;;  %v6196_v63 = vmul.f32 %v9349_v17, %v11053_v9 }
 0xbf6   :  { %8251 = vmatmul.mubr.msk.f32.vlgmr.msra.gmra.mrb[64].mxu0 %vm1180_vm3, %v6198_v43  ;;  %v9351_v19 = vpop.eup %9350  ;;  %9358 = vrcp.f32 %v6166_v10 }
 0xbf7   :  { %v6195_v61 = vmul.f32 %v9351_v19, %v11059_v52 }
 0xbf9   :  { %8243 = vmatprep.mubr.msk.f32.mxu1 %vm1180_vm3, %v6195_v61 }
 0xbfa   :  { %v9353_v22 = vpop.eup %9352  ;;  %8244 = vmatmul.mubr.msk.f32.vlgmr.msra.gmra.mrb[70].mxu1 %vm1180_vm3, %v6196_v63 }
 0xbfb   :  { %v6201_v5 = vmul.f32 %v9353_v22, %v11065_v41  ;;  %8605 = vmatpush3.bf16.msra.mxu1 %v8602_v38 }
 0xbfd   :  { %8264 = vmatprep.mubr.msk.f32.mxu0 %vm1180_vm3, %v6201_v5 }
 0xbfe   :  { %v9355_v18 = vpop.eup %9354 }
 0xbff   :  { %v9357_v30 = vpop.eup %9356  ;;  %v6200_v16 = vmul.f32 %v9355_v18, %v11069_v47  ;;  %v11437_v18 = vld [vmem:[#allocation5_spill] sm:$0xff] }
 0xc00   :  { %v6199_v21 = vmul.f32 %v9357_v30, %v11073_v60  ;;  %v9359_v60 = vpop.eup %9358 }
 0xc01   :  { %v6202_v34 = vmul.f32 %v9359_v60, %v11063_v24  ;;  %v9074_v24 = vld [vmem:[%s11355_s5] sm:$0xff]  }
 0xc02   :  { %8257 = vmatprep.mubr.msk.f32.mxu1 %vm1180_vm3, %v6199_v21 }
 0xc03   :  { %8258 = vmatmul.mubr.msk.f32.vlgmr.msra.gmra.mrb[72].mxu1 %vm1180_vm3, %v6200_v16 }
 0xc24   :  { %v6172_v9 = vpop.xlane.xlu1 %6171 }
 0xc25   :  { %9360 = vrcp.f32 %v6172_v9 }
 0xc28   :  { %v8949_v52 = vpop.permute.xlu1 %8948  ;;  %v6169_v28 = vpop.xlane.xlu0 %6168 }
 0xc29   :  { %v8951_v33 = vunpack.i.h.bf16 %v8949_v52  ;;  %v8950_v41 = vunpack.i.l.bf16 %v8949_v52  ;;  %9362 = vrcp.f32 %v6169_v28 }
 0xc2b   :  { %v8610_v44 = vpack.c.bf16 %v8951_v33, %v8950_v41 }
 0xc2c   :  { %v8944_v3 = vpop.permute.xlu0 %8943 }
 0xc2d   :  { %v8946_v36 = vunpack.i.h.bf16 %v8944_v3  ;;  %v8945_v56 = vunpack.i.l.bf16 %v8944_v3  ;;  %8611 = vmatprep.subr.bf16.mxu1 %v8610_v44 }
 0xc2e   :  { %8613 = vmatpush3.bf16.msra.mxu1 %v8610_v44  ;;  %v8959_v44 = vpop.permute.xlu1 %8958 }
 0xc2f   :  { %v8606_v47 = vpack.c.bf16 %v8946_v36, %v8945_v56  ;;  %v9361_v40 = vpop.eup %9360 }
 0xc30   :  { %v6204_v7 = vmul.f32 %v9361_v40, %v11084_v37  ;;  %v8954_v23 = vpop.permute.xlu0 %8953 }
 0xc31   :  { %8607 = vmatprep.subr.bf16.mxu0 %v8606_v47  ;;  %v8956_v61 = vunpack.i.h.bf16 %v8954_v23  ;;  %v8955_v63 = vunpack.i.l.bf16 %v8954_v23 }
 0xc32   :  { %8609 = vmatpush3.bf16.msra.mxu0 %v8606_v47  ;;  %v8969_v40 = vpop.permute.xlu1 %8968 }
 0xc33   :  { %v9363_v0 = vpop.eup %9362  ;;  %8274 = vmatprep.subr.bf16.mxu0 %v9074_v24  ;;  %v7093_v30 = vsel %vm457_vm1, %v11437_v18, %v8955_v63 }
 0xc34   :  { %v6203_v29 = vmul.f32 %v9363_v0, %v11088_v55  ;;  %v8964_v20 = vpop.permute.xlu0 %8963 }
 0xc35   :  { %8265 = vmatmul.mubr.msk.f32.vlgmr.msra.gmra.mrb[66].mxu0 %vm1180_vm3, %v6202_v34  ;;  %v8966_v22 = vunpack.i.h.bf16 %v8964_v20  ;;  %v8965_v1 = vunpack.i.l.bf16 %v8964_v20  ;;  %v11438_v34 = vld [vmem:[#allocation8_spill] sm:$0xff] }
 0xc36   :  { %8271 = vmatprep.mubr.msk.f32.mxu1 %vm1180_vm3, %v6203_v29  ;;  %8275 = vmatpush3.bf16.msra.mxu0 %v9074_v24  ;;  %v8979_v31 = vpop.permute.xlu1 %8978 }
 0xc37   :  { %8272 = vmatmul.mubr.msk.f32.vlgmr.msra.gmra.mrb[74].mxu1 %vm1180_vm3, %v6204_v7  ;;  %8276 = vmatprep.subr.bf16.mxu0 %v9075_v25  ;;  %v7109_v9 = vsel %vm1180_vm3, %v7093_v30, %v8965_v1  ;;  %v11439_v7 = vld [vmem:[#allocation9_spill] sm:$0xff]  ;;  %v8981_v1 = vunpack.i.h.bf16 %v8979_v31 }
 0xc38   :  { %v8974_v45 = vpop.permute.xlu0 %8973 }
 0xc39   :  { %v8976_v36 = vunpack.i.h.bf16 %v8974_v45  ;;  %v8975_v56 = vunpack.i.l.bf16 %v8974_v45 }
 0xc3a   :  { %8277 = vmatpush3.bf16.msra.mxu0 %v9075_v25  ;;  %v8961_v25 = vunpack.i.h.bf16 %v8959_v44 }
 0xc3b   :  { %v7098_v29 = vsel %vm457_vm1, %v11438_v34, %v8976_v36 }
 0xc3c   :  { %v8984_v17 = vpop.permute.xlu0 %8983 }
 0xc3d   :  { %v8986_v47 = vunpack.i.h.bf16 %v8984_v17  ;;  %v8985_v60 = vunpack.i.l.bf16 %v8984_v17 }
 0xc40   :  { %v8994_v19 = vpop.permute.xlu0 %8993 }
 0xc41   :  { %v8995_v13 = vunpack.i.l.bf16 %v8994_v19 }
 0xca4   :  { %v8224_v32 = vpop.f32.mrb[60].mxu0 }
 0xca5   :  { %v6283_v4 = vpop.f32.mrb[61].mxu0 }
 0xca6   :  { %v9002_v53 = vpack.i.bf16 %v8224_v32, %v6283_v4  ;;  %v7097_v32 = vsel %vm457_vm1, %v11439_v7, %v8975_v56 }
 0xca7   :  { %v7113_v24 = vsel %vm1180_vm3, %v7097_v32, %v8985_v60 }
 0xca8   :  { %9003 = vrot.lane.b32.xlu0 %v9002_v53, %s9377_s28 }
 0xcac   :  { %9008 = vrot.lane.b32.xlu0 %v9007_v42, %s9376_s27 }
 0xcb0   :  { %v8238_v37 = vpop.f32.mrb[62].mxu0 }
 0xcb1   :  { %v6457_v55 = vpop.f32.mrb[63].mxu0 }
 0xcb2   :  { %v9012_v51 = vpack.i.bf16 %v8238_v37, %v6457_v55  ;;  %v7114_v37 = vsel %vm1180_vm3, %v7098_v29, %v8986_v47 }
 0xcb4   :  { %9013 = vrot.lane.b32.xlu0 %v9012_v51, %s9377_s28 }
 0xcb8   :  { %9028 = vrot.lane.b32.xlu0 %v11432_v39, %s9375_s26  ;;  %v8989_v39 = vpop.permute.xlu1 %8988 }
 0xcb9   :  { %v8991_v18 = vunpack.i.h.bf16 %v8989_v39  ;;  %v8990_v30 = vunpack.i.l.bf16 %v8989_v39 }
 0xcc5   :  { %v8231_v8 = vpop.f32.mrb[68].mxu1 }
 0xcc6   :  { %v6370_v42 = vpop.f32.mrb[69].mxu1 }
 0xcc7   :  { %v9017_v57 = vpack.i.bf16 %v8231_v8, %v6370_v42  ;;  %v8960_v8 = vunpack.i.l.bf16 %v8959_v44  ;;  %v8999_v42 = vpop.permute.xlu1 %8998 }
 0xcc8   :  { %v9001_v29 = vunpack.i.h.bf16 %v8999_v42  ;;  %v9000_v7 = vunpack.i.l.bf16 %v8999_v42 }
 0xcc9   :  { %v8252_v2 = vpop.f32.mrb[64].mxu0  ;;  %9018 = vrot.lane.b32.xlu1 %v9017_v57, %s9377_s28  ;;  %v8971_v57 = vunpack.i.h.bf16 %v8969_v40 }
 0xcca   :  { %v6631_v12 = vpop.f32.mrb[65].mxu0 }
 0xccb   :  { %v9032_v11 = vpack.i.bf16 %v8252_v2, %v6631_v12  ;;  %v8970_v2 = vunpack.i.l.bf16 %v8969_v40  ;;  %v8996_v12 = vunpack.i.h.bf16 %v8994_v19 }
 0xccd   :  { %9033 = vrot.lane.b32.xlu0 %v9032_v11, %s9377_s28  ;;  %9023 = vrot.lane.b32.xlu1 %v9022_v26, %s9376_s27  ;;  %v8245_v62 = vpop.f32.mrb[70].mxu1 }
 0xcce   :  { %v6544_v49 = vpop.f32.mrb[71].mxu1 }
 0xccf   :  { %v9037_v10 = vpack.i.bf16 %v8245_v62, %v6544_v49  ;;  %v11440_v62 = vld [vmem:[#allocation6_spill] sm:$0xff] }
 0xcd0   :  { %v7096_v49 = vsel %vm457_vm1, %v11440_v62, %v8961_v25 }
 0xcd1   :  { %9048 = vrot.lane.b32.xlu0 %v9047_v15, %s9376_s27  ;;  %9038 = vrot.lane.b32.xlu1 %v9037_v10, %s9377_s28  ;;  %v11441_v10 = vld [vmem:[#allocation7_spill] sm:$0xff] }
 0xcd2   :  { %v7095_v27 = vsel %vm457_vm1, %v11441_v10, %v8960_v8 }
 0xcd3   :  { %v7111_v20 = vsel %vm1180_vm3, %v7095_v27, %v8970_v2 }
 0xcd5   :  { %9043 = vrot.lane.b32.xlu1 %v11435_v50, %s9375_s26 }
 0xcd6   :  { %v8259_v6 = vpop.f32.mrb[72].mxu1 }
 0xcd7   :  { %v6718_v38 = vpop.f32.mrb[73].mxu1 }
 0xcd8   :  { %v9052_v48 = vpack.i.bf16 %v8259_v6, %v6718_v38 }
 0xcda   :  { %9053 = vrot.lane.b32.xlu1 %v9052_v48, %s9377_s28 }
 0xcde   :  { %9058 = vrot.lane.b32.xlu1 %v9057_v58, %s9376_s27  ;;  %v11436_v58 = vld [vmem:[#allocation4_spill] sm:$0xff] }
 0xcdf   :  { %v7094_v5 = vsel %vm457_vm1, %v11436_v58, %v8956_v61 }
 0xce0   :  { %v7110_v52 = vsel %vm1180_vm3, %v7094_v5, %v8966_v22 }
 0xd08   :  { %v8266_v46 = vpop.f32.mrb[66].mxu0 }
 0xd09   :  { %v6805_v15 = vpop.f32.mrb[67].mxu0 }
 0xd0a   :  { %v9062_v26 = vpack.i.bf16 %v8266_v46, %v6805_v15  ;;  %v8273_v14 = vpop.f32.mrb[74].mxu1  ;;  %v7112_v46 = vsel %vm1180_vm3, %v7096_v49, %v8971_v57  ;;  %v11442_v15 = vld [vmem:[#allocation11_spill] sm:$0xff] }
 0xd0b   :  { %v6892_v43 = vpop.f32.mrb[75].mxu1  ;;  %v7102_v45 = vsel %vm457_vm1, %v11442_v15, %v8996_v12 }
 0xd0c   :  { %v9067_v54 = vpack.i.bf16 %v8273_v14, %v6892_v43  ;;  %9063 = vrot.lane.b32.xlu0 %v9062_v26, %s9377_s28 }
 0xd0e   :  { %9068 = vrot.lane.b32.xlu1 %v9067_v54, %s9377_s28  ;;  %v11443_v54 = vld [vmem:[#allocation13_spill] sm:$0xff] }
 0xd0f   :  { %v7101_v17 = vsel %vm457_vm1, %v11443_v54, %v8995_v13 }
 0xd1a   :  { %v9004_v35 = vpop.permute.xlu0 %9003 }
 0xd1b   :  { %v9006_v16 = vunpack.i.h.bf16 %v9004_v35  ;;  %v9005_v21 = vunpack.i.l.bf16 %v9004_v35  ;;  %v8980_v35 = vunpack.i.l.bf16 %v8979_v31 }
 0xd1d   :  { %v7126_v28 = vsel %vm7125_vm4, %v7109_v9, %v9005_v21  ;;  %v7127_v33 = vsel %vm7125_vm4, %v7110_v52, %v9006_v16 }
 0xd1e   :  { %v7142_v41 = vpack.c.bf16 %v7127_v33, %v7126_v28  ;;  %v9009_v3 = vpop.permute.xlu0 %9008  ;;  %v11444_v28 = vld [vmem:[#allocation10_spill] sm:$0xff] }
 0xd1f   :  { %v9011_v6 = vunpack.i.h.bf16 %v9009_v3  ;;  %v9010_v38 = vunpack.i.l.bf16 %v9009_v3  ;;  %v7100_v33 = vsel %vm457_vm1, %v11444_v28, %v8981_v1 }
 0xd20   :  { %8278 = vmatprep.mubr.msk.bf16.mxu0 %vm43_vm0, %v7142_v41  ;;  %v11445_v41 = vld [vmem:[#allocation12_spill] sm:$0xff]  ;;  %v7116_v47 = vsel %vm1180_vm3, %v7100_v33, %v8991_v18 }
 0xd21   :  { %v7117_v58 = vsel %vm1180_vm3, %v7101_v17, %v9010_v38  ;;  %v7118_v5 = vsel %vm1180_vm3, %v7102_v45, %v9011_v6  ;;  %v7099_v44 = vsel %vm457_vm1, %v11445_v41, %v8980_v35  ;;  %v11451_v17 = vld [vmem:[#allocation19_spill] sm:$0xff] }
 0xd22   :  { %v7115_v56 = vsel %vm1180_vm3, %v7099_v44, %v8990_v30 }
 0xd26   :  { %v9014_v0 = vpop.permute.xlu0 %9013 }
 0xd27   :  { %v9016_v4 = vunpack.i.h.bf16 %v9014_v0  ;;  %v9015_v53 = vunpack.i.l.bf16 %v9014_v0 }
 0xd29   :  { %v7131_v55 = vsel %vm7125_vm4, %v7114_v37, %v9016_v4  ;;  %v7130_v51 = vsel %vm7125_vm4, %v7113_v24, %v9015_v53  ;;  %v11446_v24 = vld [vmem:[#allocation14_spill] sm:$0xff] }
 0xd2a   :  { %v7144_v59 = vpack.c.bf16 %v7131_v55, %v7130_v51  ;;  %v11224_v11 = vpop.permute.xlu0 %9028  ;;  %v7104_v37 = vsel %vm457_vm1, %v11446_v24, %v9001_v29  ;;  %v11447_v55 = vld [vmem:[#allocation16_spill] sm:$0xff] }
 0xd2b   :  { %v7103_v51 = vsel %vm457_vm1, %v11447_v55, %v9000_v7  ;;  %v9031_v12 = vunpack.i.h.bf16 %v11224_v11  ;;  %v9030_v62 = vunpack.i.l.bf16 %v11224_v11 }
 0xd3b   :  { %v9019_v50 = vpop.permute.xlu1 %9018 }
 0xd3c   :  { %v9021_v48 = vunpack.i.h.bf16 %v9019_v50  ;;  %v9020_v23 = vunpack.i.l.bf16 %v9019_v50 }
 0xd3e   :  { %v7129_v26 = vsel %vm7125_vm4, %v7112_v46, %v9021_v48  ;;  %v7128_v14 = vsel %vm7125_vm4, %v7111_v20, %v9020_v23  ;;  %v11448_v23 = vld [vmem:[#allocation15_spill] sm:$0xff]  ;;  %v11449_v46 = vld [vmem:[#allocation17_spill] sm:$0xff] }
 0xd3f   :  { %v9034_v43 = vpop.permute.xlu0 %9033  ;;  %v7143_v19 = vpack.c.bf16 %v7129_v26, %v7128_v14  ;;  %v9024_v61 = vpop.permute.xlu1 %9023  ;;  %v7106_v20 = vsel %vm457_vm1, %v11448_v23, %v9031_v12  ;;  %v7105_v15 = vsel %vm457_vm1, %v11449_v46, %v9030_v62 }
 0xd40   :  { %v9036_v63 = vunpack.i.h.bf16 %v9034_v43  ;;  %v9035_v22 = vunpack.i.l.bf16 %v9034_v43  ;;  %v9026_v32 = vunpack.i.h.bf16 %v9024_v61  ;;  %v9025_v4 = vunpack.i.l.bf16 %v9024_v61  ;;  %v11450_v43 = vld [vmem:[#allocation18_spill] sm:$0xff] }
 0xd41   :  { %8279 = vmatmul.mubr.msk.bf16.vlgmr.msra.gmra.mrb[68].mxu0 %vm43_vm0, %v7143_v19 }
 0xd42   :  { %v7135_v16 = vsel %vm7125_vm4, %v7118_v5, %v9036_v63  ;;  %v7134_v21 = vsel %vm7125_vm4, %v7117_v58, %v9035_v22  ;;  %8282 = vmatprep.mubr.msk.bf16.mxu0 %vm43_vm0, %v7144_v59  ;;  %v7120_v39 = vsel %vm1180_vm3, %v7104_v37, %v9026_v32  ;;  %v7119_v25 = vsel %vm1180_vm3, %v7103_v51, %v9025_v4 }
 0xd43   :  { %v7146_v9 = vpack.c.bf16 %v7135_v16, %v7134_v21  ;;  %v9039_v52 = vpop.permute.xlu1 %9038  ;;  %v9049_v2 = vpop.permute.xlu0 %9048 }
 0xd44   :  { %v9041_v3 = vunpack.i.h.bf16 %v9039_v52  ;;  %v9040_v36 = vunpack.i.l.bf16 %v9039_v52  ;;  %v9051_v10 = vunpack.i.h.bf16 %v9049_v2  ;;  %v9050_v27 = vunpack.i.l.bf16 %v9049_v2 }
 0xd46   :  { %v7133_v60 = vsel %vm7125_vm4, %v7116_v47, %v9041_v3  ;;  %v7132_v40 = vsel %vm7125_vm4, %v7115_v56, %v9040_v36  ;;  %v7122_v14 = vsel %vm1180_vm3, %v7106_v20, %v9051_v10  ;;  %v7121_v11 = vsel %vm1180_vm3, %v7105_v15, %v9050_v27 }
 0xd47   :  { %v7145_v0 = vpack.c.bf16 %v7133_v60, %v7132_v40  ;;  %v9044_v34 = vpop.permute.xlu1 %9043 }
 0xd48   :  { %v9046_v13 = vunpack.i.h.bf16 %v9044_v34  ;;  %v9045_v50 = vunpack.i.l.bf16 %v9044_v34 }
 0xd49   :  { %8283 = vmatmul.mubr.msk.bf16.gmra.mrb[72].mxu0 %vm43_vm0, %v7145_v0 }
 0xd4a   :  { %8286 = vmatprep.mubr.msk.bf16.mxu0 %vm43_vm0, %v7146_v9  ;;  %v7108_v54 = vsel %vm457_vm1, %v11450_v43, %v9046_v13  ;;  %v7107_v19 = vsel %vm457_vm1, %v11451_v17, %v9045_v50  ;;  %v7519_v9 = vld [vmem:[%s11356_s6] ss:$0 sm:$0xff] }
 0xd4c   :  { %v9054_v53 = vpop.permute.xlu1 %9053 }
 0xd4d   :  { %v9056_v59 = vunpack.i.h.bf16 %v9054_v53  ;;  %v9055_v31 = vunpack.i.l.bf16 %v9054_v53 }
 0xd4f   :  { %v7137_v8 = vsel %vm7125_vm4, %v7120_v39, %v9056_v59  ;;  %v7136_v42 = vsel %vm7125_vm4, %v7119_v25, %v9055_v31 }
 0xd50   :  { %v7147_v57 = vpack.c.bf16 %v7137_v8, %v7136_v42  ;;  %v9059_v49 = vpop.permute.xlu1 %9058 }
 0xd51   :  { %v9061_v6 = vunpack.i.h.bf16 %v9059_v49  ;;  %v9060_v38 = vunpack.i.l.bf16 %v9059_v49 }
 0xd52   :  { %8287 = vmatmul.mubr.msk.bf16.gmra.mrb[76].mxu0 %vm43_vm0, %v7147_v57 }
 0xd53   :  { %v7124_v58 = vsel %vm1180_vm3, %v7108_v54, %v9061_v6  ;;  %v7123_v5 = vsel %vm1180_vm3, %v7107_v19, %v9060_v38 }
 0xd7e   :  { %v9064_v48 = vpop.permute.xlu0 %9063 }
 0xd7f   :  { %v9066_v45 = vunpack.i.h.bf16 %v9064_v48  ;;  %v9065_v26 = vunpack.i.l.bf16 %v9064_v48 }
 0xd80   :  { %v9069_v61 = vpop.permute.xlu1 %9068 }
 0xd81   :  { %v7139_v63 = vsel %vm7125_vm4, %v7122_v14, %v9066_v45  ;;  %v7138_v22 = vsel %vm7125_vm4, %v7121_v11, %v9065_v26  ;;  %v9071_v1 = vunpack.i.h.bf16 %v9069_v61  ;;  %v9070_v35 = vunpack.i.l.bf16 %v9069_v61 }
 0xd82   :  { %v7148_v18 = vpack.c.bf16 %v7139_v63, %v7138_v22 }
 0xd83   :  { %v7141_v30 = vsel %vm7125_vm4, %v7124_v58, %v9071_v1  ;;  %v7140_v16 = vsel %vm7125_vm4, %v7123_v5, %v9070_v35 }
 0xd84   :  { %v7149_v21 = vpack.c.bf16 %v7141_v30, %v7140_v16  ;;  %8290 = vmatprep.mubr.msk.bf16.mxu0 %vm43_vm0, %v7148_v18 }
 0xd86   :  { %8291 = vmatmul.mubr.msk.bf16.gmra.mrb[80].mxu0 %vm43_vm0, %v7149_v21 }
 0xe14   :  { %v8280_v52 = vpop.f32.mrb[68].mxu0 }
 0xe15   :  { %v7240_v28 = vadd.f32 %v8280_v52, %v7519_v9  ;;  %v7231_v33 = vpop.f32.mrb[69].mxu0 }
 0xe16   :  { %v7232_v41 = vadd.f32 %v7519_v9, %v7231_v33  ;;  %v8281_v44 = vpop.f32.mrb[70].mxu0 }
 0xe17   :  { %7296 = vst.msk [vmem:[%s11357_s7 + $0x10] sm:$0xff] %vm43_vm0, %v7240_v28  ;;  %v7243_v3 = vadd.f32 %v8281_v44, %v7519_v9  ;;  %v7234_v36 = vpop.f32.mrb[71].mxu0 }
 0xe18   :  { %7294 = vst.msk [vmem:[%s11357_s7] sm:$0xff] %vm43_vm0, %v7232_v41  ;;  %v7235_v56 = vadd.f32 %v7519_v9, %v7234_v36 }
 0xe19   :  { %7297 = vst.msk [vmem:[%s11357_s7 + $0x18] sm:$0xff] %vm43_vm0, %v7243_v3 }
 0xe1a   :  { %7295 = vst.msk [vmem:[%s11357_s7 + $0x8] sm:$0xff] %vm43_vm0, %v7235_v56 }
 0xe1c   :  { %v8284_v47 = vpop.f32.mrb[72].mxu0 }
 0xe1d   :  { %v7256_v60 = vadd.f32 %v8284_v47, %v7519_v9  ;;  %v7247_v40 = vpop.f32.mrb[73].mxu0 }
 0xe1e   :  { %v7248_v0 = vadd.f32 %v7519_v9, %v7247_v40  ;;  %v8285_v34 = vpop.f32.mrb[74].mxu0 }
 0xe1f   :  { %7300 = vst.msk [vmem:[%s11357_s7 + $0x30] sm:$0xff] %vm43_vm0, %v7256_v60  ;;  %v7259_v29 = vadd.f32 %v8285_v34, %v7519_v9  ;;  %v7250_v7 = vpop.f32.mrb[75].mxu0 }
 0xe20   :  { %7298 = vst.msk [vmem:[%s11357_s7 + $0x20] sm:$0xff] %vm43_vm0, %v7248_v0  ;;  %v7251_v32 = vadd.f32 %v7519_v9, %v7250_v7 }
 0xe21   :  { %7301 = vst.msk [vmem:[%s11357_s7 + $0x38] sm:$0xff] %vm43_vm0, %v7259_v29 }
 0xe22   :  { %7299 = vst.msk [vmem:[%s11357_s7 + $0x28] sm:$0xff] %vm43_vm0, %v7251_v32 }
 0xe25   :  { %v8288_v4 = vpop.f32.mrb[76].mxu0 }
 0xe26   :  { %v7272_v53 = vadd.f32 %v8288_v4, %v7519_v9  ;;  %v7263_v24 = vpop.f32.mrb[77].mxu0 }
 0xe27   :  { %v7264_v37 = vadd.f32 %v7519_v9, %v7263_v24  ;;  %v8289_v55 = vpop.f32.mrb[78].mxu0 }
 0xe28   :  { %7304 = vst.msk [vmem:[%s11357_s7 + $0x50] sm:$0xff] %vm43_vm0, %v7272_v53  ;;  %v7275_v51 = vadd.f32 %v8289_v55, %v7519_v9  ;;  %v7266_v59 = vpop.f32.mrb[79].mxu0 }
 0xe29   :  { %7302 = vst.msk [vmem:[%s11357_s7 + $0x40] sm:$0xff] %vm43_vm0, %v7264_v37  ;;  %v7267_v31 = vadd.f32 %v7519_v9, %v7266_v59 }
 0xe2a   :  { %7305 = vst.msk [vmem:[%s11357_s7 + $0x58] sm:$0xff] %vm43_vm0, %v7275_v51 }
 0xe2b   :  { %7303 = vst.msk [vmem:[%s11357_s7 + $0x48] sm:$0xff] %vm43_vm0, %v7267_v31 }
 0xe59   :  { %v8292_v39 = vpop.f32.mrb[80].mxu0 }
 0xe5a   :  { %v7288_v25 = vadd.f32 %v8292_v39, %v7519_v9  ;;  %v7279_v8 = vpop.f32.mrb[81].mxu0 }
 0xe5b   :  { %v7280_v42 = vadd.f32 %v7519_v9, %v7279_v8  ;;  %v8293_v57 = vpop.f32.mrb[82].mxu0 }
 0xe5c   :  { %7308 = vst.msk [vmem:[%s11357_s7 + $0x70] sm:$0xff] %vm43_vm0, %v7288_v25  ;;  %v7291_v2 = vadd.f32 %v8293_v57, %v7519_v9  ;;  %v7282_v12 = vpop.f32.mrb[83].mxu0 }
 0xe5d   :  { %7306 = vst.msk [vmem:[%s11357_s7 + $0x60] sm:$0xff] %vm43_vm0, %v7280_v42  ;;  %v7283_v62 = vadd.f32 %v7519_v9, %v7282_v12 }
 0xe5e   :  { %7309 = vst.msk [vmem:[%s11357_s7 + $0x78] sm:$0xff] %vm43_vm0, %v7291_v2 }
 0xe5f   :  { %7307 = vst.msk [vmem:[%s11357_s7 + $0x68] sm:$0xff] %vm43_vm0, %v7283_v62 }

// kernel: swin_transformer_block.6
= control target key start
LH: loop header
LB: loop body
LE: loop exit
PB: predicated region body
PF: predicated region fallthrough
CT: control target
= control target key end

     0   :  { %vm46_vm0 = vcmask 261120   ;;  %vm468_vm1 = vcmask 64512   ;;  %s9448_s21 = smov 64   ;;  %s9449_s22 = smov 88   ;;  %vm1207_vm3 = vcmask 130048   ;;  %vm7200_vm4 = vcmask 195584   ;;  %s11582_s0 = inlined_call_operand.vmem [shape: f32[8,16,32], index: 0, kind: input, shape index: {}]   ;;  %s11583_s4 = inlined_call_operand.vmem [shape: bf16[32,96], index: 4, kind: input, shape index: {}]   ;;  %s11584_s2 = inlined_call_operand.vmem [shape: f32[1,32], index: 2, kind: input, shape index: {}]   ;;  %s11585_s3 = inlined_call_operand.vmem [shape: f32[1,32], index: 3, kind: input, shape index: {}]   ;;  %s11586_s5 = inlined_call_operand.vmem [shape: f32[1,96], index: 5, kind: input, shape index: {}]   ;;  %s11587_s1 = inlined_call_operand.vmem [shape: f32[4,16,16], index: 1, kind: input, shape index: {}]   ;;  %s11588_s6 = inlined_call_operand.vmem [shape: bf16[32,32], index: 6, kind: input, shape index: {}]   ;;  %s11589_s7 = inlined_call_operand.vmem [shape: f32[1,32], index: 7, kind: input, shape index: {}]   ;;  %s11590_s8 = inlined_call_operand.vmem [shape: f32[8,16,32], index: 8, kind: output, shape index: {}]  }
   0x1   :  { %v30_v0 = vld [vmem:[%s11582_s0] sm:$0xff]  ;;  %v32_v1 = vld [vmem:[%s11582_s0 + $0x10] sm:$0xff]  ;;  %v31_v2 = vld [vmem:[%s11582_s0 + $0x8] sm:$0xff]  ;;  %s9450_s16 = smov 120   ;;  %s9451_s17 = smov 56  }
   0x2   :  { %v47_v3 = vsel %vm46_vm0, %v30_v0, 0.0  ;;  %v53_v4 = vsel %vm46_vm0, %v32_v1, 0.0  ;;  %v33_v5 = vld [vmem:[%s11582_s0 + $0x18] sm:$0xff]  ;;  %v50_v6 = vsel %vm46_vm0, %v31_v2, 0.0  ;;  %v34_v8 = vld [vmem:[%s11582_s0 + $0x20] sm:$0xff]  ;;  %v35_v9 = vld [vmem:[%s11582_s0 + $0x28] sm:$0xff] }
   0x3   :  { %48 = vadd.xlane.f32.xlu0 %v47_v3  ;;  %54 = vadd.xlane.f32.xlu1 %v53_v4  ;;  %v56_v7 = vsel %vm46_vm0, %v33_v5, 0.0  ;;  %v59_v10 = vsel %vm46_vm0, %v34_v8, 0.0  ;;  %v62_v11 = vsel %vm46_vm0, %v35_v9, 0.0  ;;  %v9533_v12 = vld [vmem:[%s11582_s0 + $0x30] sm:$0xff]  ;;  %v9538_v13 = vld [vmem:[%s11582_s0 + $0x38] sm:$0xff]  ;;  %v9547_v16 = vld [vmem:[%s11582_s0 + $0x40] sm:$0xff] }
   0x4   :  { %v65_v14 = vsel %vm46_vm0, %v9533_v12, 0.0  ;;  %v68_v15 = vsel %vm46_vm0, %v9538_v13, 0.0  ;;  %v9552_v17 = vld [vmem:[%s11582_s0 + $0x48] sm:$0xff]  ;;  %v71_v18 = vsel %vm46_vm0, %v9547_v16, 0.0  ;;  %v9561_v20 = vld [vmem:[%s11582_s0 + $0x50] sm:$0xff]  ;;  %v9566_v21 = vld [vmem:[%s11582_s0 + $0x58] sm:$0xff] }
   0x5   :  { %v74_v19 = vsel %vm46_vm0, %v9552_v17, 0.0  ;;  %v77_v22 = vsel %vm46_vm0, %v9561_v20, 0.0  ;;  %v80_v23 = vsel %vm46_vm0, %v9566_v21, 0.0  ;;  %v9575_v24 = vld [vmem:[%s11582_s0 + $0x60] sm:$0xff]  ;;  %v9580_v25 = vld [vmem:[%s11582_s0 + $0x68] sm:$0xff]  ;;  %v9589_v28 = vld [vmem:[%s11582_s0 + $0x70] sm:$0xff] }
   0x6   :  { %v83_v26 = vsel %vm46_vm0, %v9575_v24, 0.0  ;;  %v86_v27 = vsel %vm46_vm0, %v9580_v25, 0.0  ;;  %v9594_v29 = vld [vmem:[%s11582_s0 + $0x78] sm:$0xff]  ;;  %v89_v30 = vsel %vm46_vm0, %v9589_v28, 0.0  ;;  %vm9867_vm2 = vmpackc.low %vm468_vm1, %vm468_vm1  ;;  %s9453_s18 = smov 112   ;;  %s9454_s19 = smov 48  }
   0x7   :  { %51 = vadd.xlane.f32.xlu0 %v50_v6  ;;  %57 = vadd.xlane.f32.xlu1 %v56_v7  ;;  %v92_v31 = vsel %vm46_vm0, %v9594_v29, 0.0  ;;  %s9455_s20 = smov 72   ;;  %s9458_s13 = smov 8  }
   0x8   :  { %s9459_s14 = smov 16   ;;  %s9460_s0 = smov 24  }
   0xb   :  { %60 = vadd.xlane.f32.xlu0 %v59_v10  ;;  %63 = vadd.xlane.f32.xlu1 %v62_v11 }
   0xf   :  { %66 = vadd.xlane.f32.xlu0 %v65_v14  ;;  %69 = vadd.xlane.f32.xlu1 %v68_v15 }
  0x13   :  { %72 = vadd.xlane.f32.xlu0 %v71_v18  ;;  %75 = vadd.xlane.f32.xlu1 %v74_v19 }
  0x17   :  { %78 = vadd.xlane.f32.xlu0 %v77_v22  ;;  %81 = vadd.xlane.f32.xlu1 %v80_v23 }
  0x1b   :  { %84 = vadd.xlane.f32.xlu0 %v83_v26  ;;  %87 = vadd.xlane.f32.xlu1 %v86_v27 }
  0x1f   :  { %90 = vadd.xlane.f32.xlu0 %v89_v30  ;;  %93 = vadd.xlane.f32.xlu1 %v92_v31 }
  0x90   :  { %v49_v32 = vpop.xlane.xlu0 %48  ;;  %v55_v33 = vpop.xlane.xlu1 %54 }
  0x91   :  { %v96_v34 = vmul.f32 0.03125, %v49_v32  ;;  %v98_v35 = vmul.f32 0.03125, %v55_v33 }
  0x93   :  { %v9600_v36 = vsub.f32 %v30_v0, %v96_v34  ;;  %v9602_v37 = vsub.f32 %v32_v1, %v98_v35 }
  0x94   :  { %v52_v38 = vpop.xlane.xlu0 %51  ;;  %v58_v39 = vpop.xlane.xlu1 %57 }
  0x95   :  { %v97_v40 = vmul.f32 0.03125, %v52_v38  ;;  %v99_v41 = vmul.f32 0.03125, %v58_v39  ;;  %v128_v42 = vmul.f32 %v9600_v36, %v9600_v36  ;;  %v130_v43 = vmul.f32 %v9602_v37, %v9602_v37 }
  0x97   :  { %v9608_v44 = vsub.f32 %v31_v2, %v97_v40  ;;  %v9610_v45 = vsub.f32 %v33_v5, %v99_v41  ;;  %v144_v46 = vsel %vm46_vm0, %v128_v42, 0.0  ;;  %v150_v49 = vsel %vm46_vm0, %v130_v43, 0.0 }
  0x98   :  { %145 = vadd.xlane.f32.xlu0 %v144_v46  ;;  %v61_v47 = vpop.xlane.xlu0 %60  ;;  %v64_v48 = vpop.xlane.xlu1 %63 }
  0x99   :  { %v100_v50 = vmul.f32 0.03125, %v61_v47  ;;  %v101_v51 = vmul.f32 0.03125, %v64_v48  ;;  %v129_v52 = vmul.f32 %v9608_v44, %v9608_v44  ;;  %v131_v53 = vmul.f32 %v9610_v45, %v9610_v45 }
  0x9b   :  { %v9618_v54 = vsub.f32 %v34_v8, %v100_v50  ;;  %v9620_v55 = vsub.f32 %v35_v9, %v101_v51  ;;  %v147_v56 = vsel %vm46_vm0, %v129_v52, 0.0  ;;  %v153_v59 = vsel %vm46_vm0, %v131_v53, 0.0  ;;  %v9148_v53 = vld [vmem:[%s11583_s4 + $0x8] sm:$0xff]  }
  0x9c   :  { %151 = vadd.xlane.f32.xlu0 %v150_v49  ;;  %148 = vadd.xlane.f32.xlu1 %v147_v56  ;;  %v67_v57 = vpop.xlane.xlu0 %66  ;;  %v70_v58 = vpop.xlane.xlu1 %69 }
  0x9d   :  { %v102_v60 = vmul.f32 0.03125, %v67_v57  ;;  %v103_v61 = vmul.f32 0.03125, %v70_v58  ;;  %v132_v62 = vmul.f32 %v9618_v54, %v9618_v54  ;;  %v133_v63 = vmul.f32 %v9620_v55, %v9620_v55 }
  0x9f   :  { %v9629_v0 = vsub.f32 %v9533_v12, %v102_v60  ;;  %v9632_v1 = vsub.f32 %v9538_v13, %v103_v61  ;;  %v156_v2 = vsel %vm46_vm0, %v132_v62, 0.0  ;;  %v159_v5 = vsel %vm46_vm0, %v133_v63, 0.0 }
  0xa0   :  { %154 = vadd.xlane.f32.xlu1 %v153_v59  ;;  %157 = vadd.xlane.f32.xlu0 %v156_v2  ;;  %v73_v3 = vpop.xlane.xlu0 %72  ;;  %v76_v4 = vpop.xlane.xlu1 %75 }
  0xa1   :  { %v104_v6 = vmul.f32 0.03125, %v73_v3  ;;  %v105_v7 = vmul.f32 0.03125, %v76_v4  ;;  %v134_v8 = vmul.f32 %v9629_v0, %v9629_v0  ;;  %v135_v9 = vmul.f32 %v9632_v1, %v9632_v1 }
  0xa3   :  { %v9641_v10 = vsub.f32 %v9547_v16, %v104_v6  ;;  %v9644_v11 = vsub.f32 %v9552_v17, %v105_v7  ;;  %v162_v12 = vsel %vm46_vm0, %v134_v8, 0.0  ;;  %v165_v15 = vsel %vm46_vm0, %v135_v9, 0.0 }
  0xa4   :  { %160 = vadd.xlane.f32.xlu1 %v159_v5  ;;  %163 = vadd.xlane.f32.xlu0 %v162_v12  ;;  %v79_v13 = vpop.xlane.xlu0 %78  ;;  %v82_v14 = vpop.xlane.xlu1 %81 }
  0xa5   :  { %v106_v18 = vmul.f32 0.03125, %v79_v13  ;;  %v107_v19 = vmul.f32 0.03125, %v82_v14  ;;  %v136_v22 = vmul.f32 %v9641_v10, %v9641_v10  ;;  %v137_v16 = vmul.f32 %v9644_v11, %v9644_v11 }
  0xa7   :  { %v9653_v23 = vsub.f32 %v9561_v20, %v106_v18  ;;  %v9656_v17 = vsub.f32 %v9566_v21, %v107_v19  ;;  %v168_v26 = vsel %vm46_vm0, %v136_v22, 0.0  ;;  %v171_v31 = vsel %vm46_vm0, %v137_v16, 0.0 }
  0xa8   :  { %166 = vadd.xlane.f32.xlu1 %v165_v15  ;;  %169 = vadd.xlane.f32.xlu0 %v168_v26  ;;  %v85_v27 = vpop.xlane.xlu0 %84  ;;  %v88_v30 = vpop.xlane.xlu1 %87 }
  0xa9   :  { %v108_v32 = vmul.f32 0.03125, %v85_v27  ;;  %v109_v33 = vmul.f32 0.03125, %v88_v30  ;;  %v138_v34 = vmul.f32 %v9653_v23, %v9653_v23  ;;  %v139_v20 = vmul.f32 %v9656_v17, %v9656_v17 }
  0xab   :  { %v9665_v35 = vsub.f32 %v9575_v24, %v108_v32  ;;  %v9668_v21 = vsub.f32 %v9580_v25, %v109_v33  ;;  %v174_v38 = vsel %vm46_vm0, %v138_v34, 0.0  ;;  %v177_v41 = vsel %vm46_vm0, %v139_v20, 0.0 }
  0xac   :  { %172 = vadd.xlane.f32.xlu1 %v171_v31  ;;  %175 = vadd.xlane.f32.xlu0 %v174_v38  ;;  %v91_v39 = vpop.xlane.xlu0 %90  ;;  %v94_v40 = vpop.xlane.xlu1 %93  ;;  %v9700_v31 = vld [vmem:[%s11584_s2] ss:$0 sm:$0xff]  ;;  %s9456_s2 = smov 104  }
  0xad   :  { %v110_v42 = vmul.f32 0.03125, %v91_v39  ;;  %v111_v43 = vmul.f32 0.03125, %v94_v40  ;;  %v140_v46 = vmul.f32 %v9665_v35, %v9665_v35  ;;  %v141_v24 = vmul.f32 %v9668_v21, %v9668_v21 }
  0xaf   :  { %v9677_v47 = vsub.f32 %v9589_v28, %v110_v42  ;;  %v9680_v25 = vsub.f32 %v9594_v29, %v111_v43  ;;  %v180_v48 = vsel %vm46_vm0, %v140_v46, 0.0  ;;  %v183_v49 = vsel %vm46_vm0, %v141_v24, 0.0  ;;  %v9147_v29 = vld [vmem:[%s11583_s4] sm:$0xff]   ;;  %s9452_s4 = smov 80  }
  0xb0   :  { %178 = vadd.xlane.f32.xlu1 %v177_v41  ;;  %181 = vadd.xlane.f32.xlu0 %v180_v48  ;;  %v9707_v43 = vld [vmem:[%s11585_s3] ss:$0 sm:$0xff] }
  0xb1   :  { %v142_v50 = vmul.f32 %v9677_v47, %v9677_v47  ;;  %v143_v51 = vmul.f32 %v9680_v25, %v9680_v25  ;;  %7881 = vmatprep.subr.bf16.mxu0 %v9147_v29  ;;  %8689 = vmatprep.subr.bf16.mxu1 %v9147_v29 }
  0xb2   :  { %7882 = vmatpush3.bf16.msra.mxu0 %v9147_v29  ;;  %8691 = vmatpush3.bf16.msra.mxu1 %v9147_v29 }
  0xb3   :  { %v186_v52 = vsel %vm46_vm0, %v142_v50, 0.0  ;;  %v189_v28 = vsel %vm46_vm0, %v143_v51, 0.0  ;;  %7883 = vmatprep.subr.bf16.mxu0 %v9148_v53  ;;  %8690 = vmatprep.subr.bf16.mxu1 %v9148_v53 }
  0xb4   :  { %184 = vadd.xlane.f32.xlu1 %v183_v49  ;;  %187 = vadd.xlane.f32.xlu0 %v186_v52 }
  0xb6   :  { %7884 = vmatpush3.bf16.msra.mxu0 %v9148_v53  ;;  %8692 = vmatpush3.bf16.msra.mxu1 %v9148_v53 }
  0xb8   :  { %190 = vadd.xlane.f32.xlu1 %v189_v28 }
 0x125   :  { %v146_v56 = vpop.xlane.xlu0 %145 }
 0x126   :  { %v192_v57 = vmul.f32 0.03125, %v146_v56 }
 0x128   :  { %v208_v58 = vadd.f32 1e-05, %v192_v57 }
 0x129   :  { %v149_v59 = vpop.xlane.xlu1 %148  ;;  %v152_v60 = vpop.xlane.xlu0 %151 }
 0x12a   :  { %9151 = vrsqrt.f32 %v208_v58  ;;  %v193_v61 = vmul.f32 0.03125, %v149_v59  ;;  %v194_v62 = vmul.f32 0.03125, %v152_v60 }
 0x12c   :  { %v209_v63 = vadd.f32 1e-05, %v193_v61  ;;  %v210_v2 = vadd.f32 1e-05, %v194_v62 }
 0x12d   :  { %v155_v3 = vpop.xlane.xlu1 %154  ;;  %v158_v4 = vpop.xlane.xlu0 %157 }
 0x12e   :  { %9153 = vrsqrt.f32 %v209_v63  ;;  %v195_v5 = vmul.f32 0.03125, %v155_v3  ;;  %v196_v6 = vmul.f32 0.03125, %v158_v4 }
 0x12f   :  { %9155 = vrsqrt.f32 %v210_v2 }
 0x130   :  { %v211_v7 = vadd.f32 1e-05, %v195_v5  ;;  %v212_v8 = vadd.f32 1e-05, %v196_v6 }
 0x131   :  { %v161_v9 = vpop.xlane.xlu1 %160  ;;  %v164_v12 = vpop.xlane.xlu0 %163 }
 0x132   :  { %9157 = vrsqrt.f32 %v211_v7  ;;  %v197_v13 = vmul.f32 0.03125, %v161_v9  ;;  %v198_v14 = vmul.f32 0.03125, %v164_v12 }
 0x133   :  { %9159 = vrsqrt.f32 %v212_v8 }
 0x134   :  { %v9152_v15 = vpop.eup %9151  ;;  %v213_v18 = vadd.f32 1e-05, %v197_v13  ;;  %v214_v19 = vadd.f32 1e-05, %v198_v14 }
 0x135   :  { %v167_v22 = vpop.xlane.xlu1 %166  ;;  %v170_v16 = vpop.xlane.xlu0 %169  ;;  %v240_v26 = vmul.f32 %v9152_v15, %v9600_v36 }
 0x136   :  { %9161 = vrsqrt.f32 %v213_v18  ;;  %v199_v27 = vmul.f32 0.03125, %v167_v22  ;;  %v200_v30 = vmul.f32 0.03125, %v170_v16 }
 0x137   :  { %9163 = vrsqrt.f32 %v214_v19  ;;  %v263_v41 = vmul.f32 %v9700_v31, %v240_v26 }
 0x138   :  { %v9154_v32 = vpop.eup %9153  ;;  %v215_v33 = vadd.f32 1e-05, %v199_v27  ;;  %v216_v34 = vadd.f32 1e-05, %v200_v30 }
 0x139   :  { %v9156_v20 = vpop.eup %9155  ;;  %v173_v38 = vpop.xlane.xlu1 %172  ;;  %v241_v40 = vmul.f32 %v9154_v32, %v9608_v44  ;;  %v286_v28 = vadd.f32 %v9707_v43, %v263_v41 }
 0x13a   :  { %v176_v39 = vpop.xlane.xlu0 %175  ;;  %9165 = vrsqrt.f32 %v215_v33  ;;  %v201_v36 = vmul.f32 0.03125, %v173_v38  ;;  %v242_v46 = vmul.f32 %v9156_v20, %v9602_v37 }
 0x13b   :  { %v202_v42 = vmul.f32 0.03125, %v176_v39  ;;  %9167 = vrsqrt.f32 %v216_v34  ;;  %v264_v24 = vmul.f32 %v9700_v31, %v241_v40 }
 0x13c   :  { %v9158_v48 = vpop.eup %9157  ;;  %v217_v49 = vadd.f32 1e-05, %v201_v36  ;;  %v265_v56 = vmul.f32 %v9700_v31, %v242_v46 }
 0x13d   :  { %v218_v50 = vadd.f32 1e-05, %v202_v42  ;;  %v9160_v51 = vpop.eup %9159  ;;  %v179_v44 = vpop.xlane.xlu1 %178  ;;  %v287_v29 = vadd.f32 %v9707_v43, %v264_v24  ;;  %v243_v53 = vmul.f32 %v9158_v48, %v9610_v45 }
 0x13e   :  { %v182_v52 = vpop.xlane.xlu0 %181  ;;  %9169 = vrsqrt.f32 %v217_v49  ;;  %v203_v57 = vmul.f32 0.03125, %v179_v44  ;;  %v244_v60 = vmul.f32 %v9160_v51, %v9618_v54  ;;  %v288_v45 = vadd.f32 %v9707_v43, %v265_v56 }
 0x13f   :  { %v204_v37 = vmul.f32 0.03125, %v182_v52  ;;  %9171 = vrsqrt.f32 %v218_v50  ;;  %v302_v58 = vpack.c.bf16 %v287_v29, %v286_v28  ;;  %v266_v59 = vmul.f32 %v9700_v31, %v243_v53 }
 0x140   :  { %v9162_v61 = vpop.eup %9161  ;;  %v219_v62 = vadd.f32 1e-05, %v203_v57  ;;  %v267_v7 = vmul.f32 %v9700_v31, %v244_v60 }
 0x141   :  { %v220_v63 = vadd.f32 1e-05, %v204_v37  ;;  %v9164_v2 = vpop.eup %9163  ;;  %v185_v3 = vpop.xlane.xlu1 %184  ;;  %7885 = vmatprep.mubr.msk.bf16.mxu0 %vm46_vm0, %v302_v58  ;;  %v289_v5 = vadd.f32 %v9707_v43, %v266_v59  ;;  %v245_v6 = vmul.f32 %v9162_v61, %v9620_v55 }
 0x142   :  { %v188_v4 = vpop.xlane.xlu0 %187  ;;  %9173 = vrsqrt.f32 %v219_v62  ;;  %v205_v8 = vmul.f32 0.03125, %v185_v3  ;;  %v246_v54 = vmul.f32 %v9164_v2, %v9629_v0  ;;  %v290_v55 = vadd.f32 %v9707_v43, %v267_v7 }
 0x143   :  { %v206_v9 = vmul.f32 0.03125, %v188_v4  ;;  %9175 = vrsqrt.f32 %v220_v63  ;;  %v303_v12 = vpack.c.bf16 %v289_v5, %v288_v45  ;;  %v268_v13 = vmul.f32 %v9700_v31, %v245_v6  ;;  %v7391_v4 = vld [vmem:[%s11586_s5] ss:$0 sm:$0xff]  ;;  %s9447_s5 = smov 96  }
 0x144   :  { %v9166_v14 = vpop.eup %9165  ;;  %v221_v15 = vadd.f32 1e-05, %v205_v8  ;;  %v269_v27 = vmul.f32 %v9700_v31, %v246_v54 }
 0x145   :  { %v222_v18 = vadd.f32 1e-05, %v206_v9  ;;  %v9168_v19 = vpop.eup %9167  ;;  %v191_v22 = vpop.xlane.xlu1 %190  ;;  %7886 = vmatmul.mubr.msk.bf16.vlgmr.msra.gmra.mrb[0].mxu0 %vm46_vm0, %v303_v12  ;;  %v291_v16 = vadd.f32 %v9707_v43, %v268_v13  ;;  %v247_v26 = vmul.f32 %v9166_v14, %v9632_v1 }
 0x146   :  { %9177 = vrsqrt.f32 %v221_v15  ;;  %v207_v0 = vmul.f32 0.03125, %v191_v22  ;;  %v248_v30 = vmul.f32 %v9168_v19, %v9641_v10  ;;  %v292_v39 = vadd.f32 %v9707_v43, %v269_v27 }
 0x147   :  { %9179 = vrsqrt.f32 %v222_v18  ;;  %v304_v32 = vpack.c.bf16 %v291_v16, %v290_v55  ;;  %v270_v33 = vmul.f32 %v9700_v31, %v247_v26 }
 0x148   :  { %v9170_v34 = vpop.eup %9169  ;;  %v223_v20 = vadd.f32 1e-05, %v207_v0  ;;  %v271_v41 = vmul.f32 %v9700_v31, %v248_v30 }
 0x149   :  { %v9172_v38 = vpop.eup %9171  ;;  %7889 = vmatprep.mubr.msk.bf16.mxu0 %vm46_vm0, %v304_v32  ;;  %v293_v40 = vadd.f32 %v9707_v43, %v270_v33  ;;  %v249_v1 = vmul.f32 %v9170_v34, %v9644_v11 }
 0x14a   :  { %9181 = vrsqrt.f32 %v223_v20  ;;  %v250_v10 = vmul.f32 %v9172_v38, %v9653_v23  ;;  %v294_v48 = vadd.f32 %v9707_v43, %v271_v41 }
 0x14b   :  { %v305_v36 = vpack.c.bf16 %v293_v40, %v292_v39  ;;  %v272_v42 = vmul.f32 %v9700_v31, %v249_v1 }
 0x14c   :  { %v9174_v46 = vpop.eup %9173  ;;  %v273_v11 = vmul.f32 %v9700_v31, %v250_v10 }
 0x14d   :  { %v9176_v24 = vpop.eup %9175  ;;  %7890 = vmatmul.mubr.msk.bf16.gmra.mrb[4].mxu0 %vm46_vm0, %v305_v36  ;;  %v295_v49 = vadd.f32 %v9707_v43, %v272_v42  ;;  %v251_v50 = vmul.f32 %v9174_v46, %v9656_v17 }
 0x14e   :  { %v252_v51 = vmul.f32 %v9176_v24, %v9665_v35  ;;  %v296_v29 = vadd.f32 %v9707_v43, %v273_v11 }
 0x14f   :  { %v306_v44 = vpack.c.bf16 %v295_v49, %v294_v48  ;;  %v274_v23 = vmul.f32 %v9700_v31, %v251_v50 }
 0x150   :  { %v9178_v52 = vpop.eup %9177  ;;  %v275_v57 = vmul.f32 %v9700_v31, %v252_v51 }
 0x151   :  { %v9180_v28 = vpop.eup %9179  ;;  %7893 = vmatprep.mubr.msk.bf16.mxu1 %vm46_vm0, %v306_v44  ;;  %v297_v53 = vadd.f32 %v9707_v43, %v274_v23  ;;  %v253_v56 = vmul.f32 %v9178_v52, %v9668_v21 }
 0x152   :  { %v254_v17 = vmul.f32 %v9180_v28, %v9677_v47  ;;  %v298_v59 = vadd.f32 %v9707_v43, %v275_v57 }
 0x153   :  { %v307_v37 = vpack.c.bf16 %v297_v53, %v296_v29  ;;  %v276_v35 = vmul.f32 %v9700_v31, %v253_v56 }
 0x154   :  { %v9182_v58 = vpop.eup %9181  ;;  %v277_v62 = vmul.f32 %v9700_v31, %v254_v17 }
 0x155   :  { %7894 = vmatmul.mubr.msk.bf16.vlgmr.msra.gmra.mrb[0].mxu1 %vm46_vm0, %v307_v37  ;;  %v299_v60 = vadd.f32 %v9707_v43, %v276_v35  ;;  %v255_v61 = vmul.f32 %v9182_v58, %v9680_v25 }
 0x156   :  { %v300_v47 = vadd.f32 %v9707_v43, %v277_v62 }
 0x157   :  { %v308_v63 = vpack.c.bf16 %v299_v60, %v298_v59  ;;  %v278_v21 = vmul.f32 %v9700_v31, %v255_v61 }
 0x159   :  { %7897 = vmatprep.mubr.msk.bf16.mxu1 %vm46_vm0, %v308_v63  ;;  %v301_v2 = vadd.f32 %v9707_v43, %v278_v21 }
 0x15b   :  { %v309_v3 = vpack.c.bf16 %v301_v2, %v300_v47 }
 0x15d   :  { %7898 = vmatmul.mubr.msk.bf16.gmra.mrb[4].mxu1 %vm46_vm0, %v309_v3 }
 0x218   :  { %v7887_v45 = vpop.f32.mrb[0].mxu0 }
 0x219   :  { %v391_v25 = vpop.f32.mrb[1].mxu0  ;;  %v9767_v31 = vadd.f32 %v7887_v45, %v7391_v4 }
 0x21a   :  { %v9765_v5 = vadd.f32 %v7391_v4, %v391_v25  ;;  %v7888_v6 = vpop.f32.mrb[2].mxu0 }
 0x21b   :  { %v9769_v7 = vadd.f32 %v7888_v6, %v7391_v4  ;;  %v394_v8 = vpop.f32.mrb[3].mxu0 }
 0x21c   :  { %11635 = vst [vmem:[#allocation2_spill] sm:$0xff] %v9765_v5  ;;  %v9771_v9 = vadd.f32 %v7391_v4, %v394_v8  ;;  %7905 = vmatprep.mubr.msk.f32.mxu1 %vm468_vm1, %v9765_v5 }
 0x21d   :  { %v9777_v43 = vpack.i.bf16 %v9769_v7, %v9767_v31 }
 0x21e   :  { %11636 = vst [vmem:[#allocation3_spill] sm:$0xff] %v9771_v9  ;;  %v9781_v54 = vpack.i.bf16 %v9771_v9, %v9765_v5 }
 0x21f   :  { %11637 = vst [vmem:[#allocation4_spill] sm:$0xff] %v9777_v43  ;;  %8713 = vrot.lane.b32.xlu1 %v9777_v43, %s9447_s5 }
 0x220   :  { %11638 = vst [vmem:[#allocation5_spill] sm:$0xff] %v9781_v54  ;;  %8708 = vrot.lane.b32.xlu0 %v9781_v54, %s9447_s5  ;;  %v7891_v12 = vpop.f32.mrb[4].mxu0 }
 0x221   :  { %v407_v13 = vpop.f32.mrb[5].mxu0  ;;  %v9797_v16 = vadd.f32 %v7891_v12, %v7391_v4 }
 0x222   :  { %v7892_v14 = vpop.f32.mrb[6].mxu0  ;;  %v9787_v18 = vadd.f32 %v7391_v4, %v407_v13 }
 0x223   :  { %v410_v15 = vpop.f32.mrb[7].mxu0  ;;  %v9791_v22 = vadd.f32 %v7892_v14, %v7391_v4 }
 0x224   :  { %v9789_v19 = vadd.f32 %v7391_v4, %v410_v15 }
 0x225   :  { %v9805_v32 = vpack.i.bf16 %v9791_v22, %v9797_v16 }
 0x226   :  { %v9795_v55 = vpack.i.bf16 %v9789_v19, %v9787_v18 }
 0x227   :  { %11640 = vst [vmem:[#allocation7_spill] sm:$0xff] %v9805_v32 }
 0x228   :  { %11639 = vst [vmem:[#allocation6_spill] sm:$0xff] %v9795_v55  ;;  %8718 = vrot.lane.b32.xlu1 %v9795_v55, %s9447_s5  ;;  %v7895_v26 = vpop.f32.mrb[0].mxu1 }
 0x229   :  { %v423_v27 = vpop.f32.mrb[1].mxu1  ;;  %v9807_v33 = vadd.f32 %v7895_v26, %v7391_v4 }
 0x22a   :  { %v9801_v0 = vadd.f32 %v7391_v4, %v423_v27  ;;  %v7896_v30 = vpop.f32.mrb[2].mxu1 }
 0x22b   :  { %v9809_v34 = vadd.f32 %v7896_v30, %v7391_v4  ;;  %v426_v20 = vpop.f32.mrb[3].mxu1 }
 0x22c   :  { %v9811_v38 = vadd.f32 %v7391_v4, %v426_v20  ;;  %8723 = vrot.lane.b32.xlu1 %v9805_v32, %s9447_s5  ;;  %7933 = vmatprep.mubr.msk.f32.mxu0 %vm468_vm1, %v9801_v0 }
 0x22d   :  { %v9819_v39 = vpack.i.bf16 %v9809_v34, %v9807_v33 }
 0x22e   :  { %v9823_v40 = vpack.i.bf16 %v9811_v38, %v9801_v0 }
 0x230   :  { %8733 = vrot.lane.b32.xlu1 %v9819_v39, %s9447_s5  ;;  %8728 = vrot.lane.b32.xlu0 %v9823_v40, %s9447_s5  ;;  %v7899_v1 = vpop.f32.mrb[4].mxu1 }
 0x231   :  { %v439_v41 = vpop.f32.mrb[5].mxu1  ;;  %v9829_v36 = vadd.f32 %v7899_v1, %v7391_v4 }
 0x232   :  { %v7900_v10 = vpop.f32.mrb[6].mxu1  ;;  %v9833_v24 = vadd.f32 %v7391_v4, %v439_v41 }
 0x233   :  { %v9831_v42 = vadd.f32 %v7900_v10, %v7391_v4  ;;  %v442_v46 = vpop.f32.mrb[7].mxu1 }
 0x234   :  { %v9835_v48 = vadd.f32 %v7391_v4, %v442_v46 }
 0x235   :  { %v9839_v49 = vpack.i.bf16 %v9831_v42, %v9829_v36 }
 0x236   :  { %v9843_v50 = vpack.i.bf16 %v9835_v48, %v9833_v24 }
 0x237   :  { %8743 = vrot.lane.b32.xlu1 %v9839_v49, %s9447_s5 }
 0x238   :  { %8738 = vrot.lane.b32.xlu0 %v9843_v50, %s9447_s5 }
 0x23b   :  { %8753 = vrot.lane.b32.xlu1 %v9777_v43, %s9448_s21 }
 0x23c   :  { %8748 = vrot.lane.b32.xlu0 %v9781_v54, %s9448_s21 }
 0x23f   :  { %8758 = vrot.lane.b32.xlu1 %v9805_v32, %s9448_s21 }
 0x240   :  { %8763 = vrot.lane.b32.xlu0 %v9823_v40, %s9448_s21 }
 0x243   :  { %8768 = vrot.lane.b32.xlu1 %v9819_v39, %s9448_s21 }
 0x244   :  { %8778 = vrot.lane.b32.xlu0 %v9781_v54, %s9449_s22 }
 0x247   :  { %8773 = vrot.lane.b32.xlu1 %v9839_v49, %s9448_s21 }
 0x248   :  { %8798 = vrot.lane.b32.xlu0 %v9843_v50, %s9448_s21 }
 0x24b   :  { %8783 = vrot.lane.b32.xlu1 %v9777_v43, %s9449_s22 }
 0x24c   :  { %8803 = vrot.lane.b32.xlu0 %v9795_v55, %s9449_s22 }
 0x24f   :  { %8788 = vrot.lane.b32.xlu1 %v9805_v32, %s9449_s22 }
 0x253   :  { %8793 = vrot.lane.b32.xlu1 %v9795_v55, %s9448_s21 }
 0x291   :  { %v8714_v11 = vpop.permute.xlu1 %8713 }
 0x292   :  { %v8709_v51 = vpop.permute.xlu0 %8708  ;;  %v8716_v44 = vunpack.i.h.bf16 %v8714_v11  ;;  %v8715_v23 = vunpack.i.l.bf16 %v8714_v11 }
 0x293   :  { %v8711_v52 = vunpack.i.h.bf16 %v8709_v51  ;;  %v8710_v28 = vunpack.i.l.bf16 %v8709_v51 }
 0x294   :  { %v8375_v56 = vpack.c.bf16 %v8716_v44, %v8715_v23 }
 0x295   :  { %v8369_v53 = vpack.c.bf16 %v8711_v52, %v8710_v28 }
 0x297   :  { %8371 = vmatprep.subr.msk.bf16.mxu1 %vm9867_vm2, %v8369_v53 }
 0x298   :  { %8374 = vmatpush3.bf16.xpose.msk.msra.mxu1 %vm9867_vm2, %v8369_v53 }
 0x299   :  { %8377 = vmatprep.subr.msk.bf16.mxu1 %vm9867_vm2, %v8375_v56 }
 0x29a   :  { %v8719_v57 = vpop.permute.xlu1 %8718 }
 0x29b   :  { %v8721_v17 = vunpack.i.h.bf16 %v8719_v57  ;;  %v8720_v37 = vunpack.i.l.bf16 %v8719_v57 }
 0x29d   :  { %v8381_v35 = vpack.c.bf16 %v8721_v17, %v8720_v37 }
 0x29e   :  { %v8724_v58 = vpop.permute.xlu1 %8723 }
 0x29f   :  { %7906 = vmatmul.mubr.msk.f32.vlgmr.msra.gmra.mrb[8].mxu1 %vm468_vm1, %v9771_v9  ;;  %v8726_v60 = vunpack.i.h.bf16 %v8724_v58  ;;  %v8725_v61 = vunpack.i.l.bf16 %v8724_v58 }
 0x2a0   :  { %8380 = vmatpush3.bf16.xpose.msk.msra.mxu1 %vm9867_vm2, %v8375_v56  ;;  %7912 = vmatprep.mubr.msk.f32.mxu1 %vm468_vm1, %v9767_v31 }
 0x2a1   :  { %8383 = vmatprep.subr.msk.bf16.mxu1 %vm9867_vm2, %v8381_v35  ;;  %v8387_v2 = vpack.c.bf16 %v8726_v60, %v8725_v61  ;;  %v9948_v60 = vld [vmem:[%s11587_s1 + $0x8] sm:$0xff] }
 0x2a2   :  { %v8729_v59 = vpop.permute.xlu0 %8728  ;;  %v8734_v21 = vpop.permute.xlu1 %8733 }
 0x2a3   :  { %v8731_v62 = vunpack.i.h.bf16 %v8729_v59  ;;  %v8730_v63 = vunpack.i.l.bf16 %v8729_v59  ;;  %v8736_v6 = vunpack.i.h.bf16 %v8734_v21  ;;  %v8735_v8 = vunpack.i.l.bf16 %v8734_v21 }
 0x2a5   :  { %v8393_v47 = vpack.c.bf16 %v8731_v62, %v8730_v63  ;;  %v8399_v27 = vpack.c.bf16 %v8736_v6, %v8735_v8  ;;  %v9953_v63 = vld [vmem:[%s11587_s1] sm:$0xff] }
 0x2a6   :  { %11643 = vst [vmem:[#allocation8_spill] sm:$0xff] %v9953_v63 }
 0x2a7   :  { %7913 = vmatmul.mubr.msk.f32.vlgmr.msra.gmra.mrb[10].mxu1 %vm468_vm1, %v9769_v7  ;;  %8395 = vmatprep.subr.msk.bf16.mxu0 %vm9867_vm2, %v8393_v47 }
 0x2a8   :  { %8386 = vmatpush3.bf16.xpose.msk.msra.mxu1 %vm9867_vm2, %v8381_v35  ;;  %7919 = vmatprep.mubr.msk.f32.mxu1 %vm468_vm1, %v9787_v18 }
 0x2a9   :  { %8398 = vmatpush3.bf16.xpose.msk.msra.mxu0 %vm9867_vm2, %v8393_v47  ;;  %v8744_v3 = vpop.permute.xlu1 %8743  ;;  %8389 = vmatprep.subr.msk.bf16.mxu1 %vm9867_vm2, %v8387_v2 }
 0x2aa   :  { %v8739_v4 = vpop.permute.xlu0 %8738  ;;  %v8746_v1 = vunpack.i.h.bf16 %v8744_v3  ;;  %v8745_v41 = vunpack.i.l.bf16 %v8744_v3 }
 0x2ab   :  { %v8741_v45 = vunpack.i.h.bf16 %v8739_v4  ;;  %v8740_v25 = vunpack.i.l.bf16 %v8739_v4 }
 0x2ac   :  { %v8411_v46 = vpack.c.bf16 %v8746_v1, %v8745_v41 }
 0x2ad   :  { %v8405_v12 = vpack.c.bf16 %v8741_v45, %v8740_v25  ;;  %v8754_v13 = vpop.permute.xlu1 %8753 }
 0x2ae   :  { %v8749_v14 = vpop.permute.xlu0 %8748  ;;  %v8756_v51 = vunpack.i.h.bf16 %v8754_v13  ;;  %v8755_v44 = vunpack.i.l.bf16 %v8754_v13 }
 0x2af   :  { %v8751_v15 = vunpack.i.h.bf16 %v8749_v14  ;;  %v8750_v26 = vunpack.i.l.bf16 %v8749_v14  ;;  %7920 = vmatmul.mubr.msk.f32.vlgmr.msra.gmra.mrb[12].mxu1 %vm468_vm1, %v9789_v19  ;;  %8407 = vmatprep.subr.msk.bf16.mxu0 %vm9867_vm2, %v8405_v12 }
 0x2b0   :  { %7934 = vmatmul.mubr.msk.f32.vlgmr.msra.gmra.mrb[8].mxu0 %vm468_vm1, %v9811_v38  ;;  %8392 = vmatpush3.bf16.xpose.msk.msra.mxu1 %vm9867_vm2, %v8387_v2  ;;  %v8421_v52 = vpack.c.bf16 %v8756_v51, %v8755_v44 }
 0x2b1   :  { %7926 = vmatprep.mubr.msk.f32.mxu1 %vm468_vm1, %v9797_v16  ;;  %8410 = vmatpush3.bf16.xpose.msk.msra.mxu0 %vm9867_vm2, %v8405_v12  ;;  %v8759_v30 = vpop.permute.xlu1 %8758  ;;  %v8417_v20 = vpack.c.bf16 %v8751_v15, %v8750_v26 }
 0x2b2   :  { %7947 = vmatprep.mubr.msk.f32.mxu0 %vm468_vm1, %v9833_v24  ;;  %8401 = vmatprep.subr.msk.bf16.mxu1 %vm9867_vm2, %v8399_v27  ;;  %v8761_v53 = vunpack.i.h.bf16 %v8759_v30  ;;  %v8760_v56 = vunpack.i.l.bf16 %v8759_v30  ;;  %v9971_v30 = vld [vmem:[%s11587_s1 + $0x18] sm:$0xff] }
 0x2b3   :  { %8418 = vmatprep.subr.bf16.mxu0 %v8417_v20  ;;  %11644 = vst [vmem:[#allocation9_spill] sm:$0xff] %v9971_v30 }
 0x2b4   :  { %v9939_v35 = vpack.c.bf16 %v8761_v53, %v8760_v56 }
 0x2b5   :  { %v9913_v10 = vpop.permute.xlu1 %8768 }
 0x2b7   :  { %7927 = vmatmul.mubr.msk.f32.vlgmr.msra.gmra.mrb[14].mxu1 %vm468_vm1, %v9791_v22 }
 0x2b8   :  { %7948 = vmatmul.mubr.msk.f32.vlgmr.msra.gmra.mrb[10].mxu0 %vm468_vm1, %v9835_v48  ;;  %8404 = vmatpush3.bf16.xpose.msk.msra.mxu1 %vm9867_vm2, %v8399_v27 }
 0x2b9   :  { %7940 = vmatprep.mubr.msk.f32.mxu1 %vm468_vm1, %v9807_v33  ;;  %8420 = vmatpush3.bf16.msra.mxu0 %v8417_v20  ;;  %v9923_v11 = vpop.permute.xlu1 %8773 }
 0x2ba   :  { %8413 = vmatprep.subr.msk.bf16.mxu1 %vm9867_vm2, %v8411_v46 }
 0x2bd   :  { %v9927_v23 = vpop.permute.xlu1 %8783 }
 0x2bf   :  { %7941 = vmatmul.mubr.msk.f32.vlgmr.msra.gmra.mrb[16].mxu1 %vm468_vm1, %v9809_v34 }
 0x2c0   :  { %8416 = vmatpush3.bf16.xpose.msk.msra.mxu1 %vm9867_vm2, %v8411_v46  ;;  %7954 = vmatprep.mubr.msk.f32.mxu1 %vm468_vm1, %v9829_v36 }
 0x2c1   :  { %v9935_v28 = vpop.permute.xlu1 %8788  ;;  %8422 = vmatprep.subr.bf16.mxu1 %v8421_v52 }
 0x2c5   :  { %v8794_v57 = vpop.permute.xlu1 %8793 }
 0x2c6   :  { %v8796_v17 = vunpack.i.h.bf16 %v8794_v57  ;;  %v8795_v37 = vunpack.i.l.bf16 %v8794_v57 }
 0x2c7   :  { %7955 = vmatmul.mubr.msk.f32.vlgmr.msra.gmra.mrb[18].mxu1 %vm468_vm1, %v9831_v42 }
 0x2c8   :  { %8424 = vmatpush3.bf16.msra.mxu1 %v8421_v52  ;;  %v9941_v58 = vpack.c.bf16 %v8796_v17, %v8795_v37  ;;  %v9986_v52 = vld [vmem:[%s11587_s1 + $0x10] sm:$0xff] }
 0x2c9   :  { %8430 = vmatprep.subr.bf16.mxu1 %v9939_v35  ;;  %11645 = vst [vmem:[#allocation10_spill] sm:$0xff] %v9986_v52 }
 0x2ca   :  { %8426 = vmatprep.subr.bf16.mxu0 %v9941_v58 }
 0x372   :  { %v7907_v59 = vpop.f32.mrb[8].mxu1 }
 0x373   :  { %v1176_v61 = vmul.f32 0.35355338, %v7907_v59  ;;  %v543_v62 = vpop.f32.mrb[9].mxu1 }
 0x374   :  { %v1175_v21 = vmul.f32 0.35355338, %v543_v62  ;;  %v9993_v62 = vld [vmem:[%s11587_s1 + $0x28] sm:$0xff] }
 0x375   :  { %v9956_v47 = vadd.f32 %v1176_v61, %v9948_v60  ;;  %11646 = vst [vmem:[#allocation11_spill] sm:$0xff] %v9993_v62 }
 0x376   :  { %v9959_v2 = vadd.f32 %v1175_v21, %v9953_v63 }
 0x377   :  { %v1211_v3 = vsel %vm1207_vm3, %v9956_v47, -inf }
 0x378   :  { %1212 = vmax.xlane.f32.xlu1 %v1211_v3  ;;  %v1208_v4 = vsel %vm1207_vm3, %v9959_v2, -inf }
 0x379   :  { %1209 = vmax.xlane.f32.xlu0 %v1208_v4 }
 0x37a   :  { %v7914_v45 = vpop.f32.mrb[10].mxu1 }
 0x37b   :  { %v632_v25 = vpop.f32.mrb[11].mxu1  ;;  %v1178_v15 = vmul.f32 0.35355338, %v7914_v45 }
 0x37c   :  { %v1177_v41 = vmul.f32 0.35355338, %v632_v25 }
 0x37d   :  { %v9981_v51 = vadd.f32 %v1178_v15, %v9971_v30  ;;  %v10019_v15 = vld [vmem:[%s11587_s1 + $0x38] sm:$0xff] }
 0x37e   :  { %v9996_v21 = vadd.f32 %v1177_v41, %v9986_v52  ;;  %11648 = vst [vmem:[#allocation13_spill] sm:$0xff] %v10019_v15 }
 0x37f   :  { %v1217_v61 = vsel %vm1207_vm3, %v9981_v51, -inf }
 0x382   :  { %v7921_v6 = vpop.f32.mrb[12].mxu1 }
 0x383   :  { %v7935_v8 = vpop.f32.mrb[8].mxu0  ;;  %v721_v12 = vpop.f32.mrb[13].mxu1  ;;  %v1180_v57 = vmul.f32 0.35355338, %v7921_v6  ;;  %v10009_v6 = vld [vmem:[%s11587_s1 + $0x20] sm:$0xff] }
 0x384   :  { %v1184_v13 = vmul.f32 0.35355338, %v7935_v8  ;;  %v899_v14 = vpop.f32.mrb[9].mxu0  ;;  %11647 = vst [vmem:[#allocation12_spill] sm:$0xff] %v10009_v6  ;;  %v1179_v8 = vmul.f32 0.35355338, %v721_v12 }
 0x385   :  { %v1183_v26 = vmul.f32 0.35355338, %v899_v14  ;;  %v10004_v25 = vadd.f32 %v1180_v57, %v9993_v62 }
 0x386   :  { %v9966_v27 = vadd.f32 %v1184_v13, %v9948_v60  ;;  %v1214_v13 = vsel %vm1207_vm3, %v9996_v21, -inf  ;;  %v10029_v57 = vadd.f32 %v1179_v8, %v10009_v6 }
 0x387   :  { %v9974_v20 = vadd.f32 %v1183_v26, %v9953_v63 }
 0x388   :  { %v1235_v1 = vsel %vm1207_vm3, %v9966_v27, -inf }
 0x389   :  { %1236 = vmax.xlane.f32.xlu1 %v1235_v1  ;;  %v1232_v46 = vsel %vm1207_vm3, %v9974_v20, -inf }
 0x38a   :  { %1233 = vmax.xlane.f32.xlu0 %v1232_v46  ;;  %v7928_v44 = vpop.f32.mrb[14].mxu1  ;;  %v1223_v46 = vsel %vm1207_vm3, %v10004_v25, -inf }
 0x38b   :  { %v7949_v53 = vpop.f32.mrb[10].mxu0  ;;  %v810_v56 = vpop.f32.mrb[15].mxu1  ;;  %v1182_v4 = vmul.f32 0.35355338, %v7928_v44 }
 0x38c   :  { %v1188_v17 = vmul.f32 0.35355338, %v7949_v53  ;;  %v1077_v37 = vpop.f32.mrb[11].mxu0  ;;  %v1181_v44 = vmul.f32 0.35355338, %v810_v56 }
 0x38d   :  { %v1187_v59 = vmul.f32 0.35355338, %v1077_v37  ;;  %v10024_v12 = vadd.f32 %v1182_v4, %v10019_v15 }
 0x38e   :  { %1218 = vmax.xlane.f32.xlu0 %v1217_v61  ;;  %v9999_v3 = vadd.f32 %v1188_v17, %v9993_v62  ;;  %v10034_v17 = vld [vmem:[%s11587_s1 + $0x30] sm:$0xff]  ;;  %v1220_v61 = vsel %vm1207_vm3, %v10029_v57, -inf }
 0x38f   :  { %v10014_v14 = vadd.f32 %v1187_v59, %v10009_v6  ;;  %11649 = vst [vmem:[#allocation14_spill] sm:$0xff] %v10034_v17  ;;  %v1229_v37 = vsel %vm1207_vm3, %v10024_v12, -inf  ;;  %v10044_v4 = vadd.f32 %v1181_v44, %v10034_v17 }
 0x390   :  { %v1247_v45 = vsel %vm1207_vm3, %v9999_v3, -inf }
 0x391   :  { %1248 = vmax.xlane.f32.xlu1 %v1247_v45  ;;  %v1244_v53 = vsel %vm1207_vm3, %v10014_v14, -inf }
 0x392   :  { %1215 = vmax.xlane.f32.xlu0 %v1214_v13  ;;  %v7942_v26 = vpop.f32.mrb[16].mxu1 }
 0x393   :  { %v988_v1 = vpop.f32.mrb[17].mxu1  ;;  %v1186_v41 = vmul.f32 0.35355338, %v7942_v26 }
 0x394   :  { %v1185_v56 = vmul.f32 0.35355338, %v988_v1 }
 0x395   :  { %1224 = vmax.xlane.f32.xlu1 %v1223_v46  ;;  %v10039_v59 = vadd.f32 %v1186_v41, %v9971_v30  ;;  %v1226_v41 = vsel %vm1207_vm3, %v10044_v4, -inf }
 0x396   :  { %1245 = vmax.xlane.f32.xlu0 %v1244_v53  ;;  %v10054_v53 = vadd.f32 %v1185_v56, %v9986_v52  ;;  %v10069_v56 = vpop.permute.xlu0 %8763 }
 0x397   :  { %v1241_v26 = vsel %vm1207_vm3, %v10039_v59, -inf }
 0x399   :  { %1230 = vmax.xlane.f32.xlu1 %v1229_v37  ;;  %v1238_v37 = vsel %vm1207_vm3, %v10054_v53, -inf }
 0x39a   :  { %1221 = vmax.xlane.f32.xlu0 %v1220_v61  ;;  %v7956_v45 = vpop.f32.mrb[18].mxu1 }
 0x39b   :  { %v1190_v8 = vmul.f32 0.35355338, %v7956_v45  ;;  %v1166_v13 = vpop.f32.mrb[19].mxu1 }
 0x39c   :  { %v1189_v46 = vmul.f32 0.35355338, %v1166_v13 }
 0x39d   :  { %1242 = vmax.xlane.f32.xlu1 %v1241_v26  ;;  %v10051_v1 = vadd.f32 %v1190_v8, %v10019_v15  ;;  %v10071_v8 = vpop.permute.xlu0 %8778 }
 0x39e   :  { %1227 = vmax.xlane.f32.xlu0 %v1226_v41  ;;  %v10061_v61 = vadd.f32 %v1189_v46, %v10034_v17 }
 0x39f   :  { %v1253_v44 = vsel %vm1207_vm3, %v10051_v1, -inf }
 0x3a0   :  { %v1250_v45 = vsel %vm1207_vm3, %v10061_v61, -inf }
 0x3a1   :  { %1254 = vmax.xlane.f32.xlu1 %v1253_v44  ;;  %v10073_v13 = vpop.permute.xlu0 %8798 }
 0x3a2   :  { %1239 = vmax.xlane.f32.xlu0 %v1238_v37 }
 0x3a5   :  { %v10075_v26 = vpop.permute.xlu0 %8803 }
 0x3a6   :  { %1251 = vmax.xlane.f32.xlu0 %v1250_v45 }
 0x3b2   :  { %2082 = vrot.lane.b32.xlu1 %v9771_v9, %s9450_s16 }
 0x3bc   :  { %2080 = vrot.lane.b32.xlu0 %v9765_v5, %s9450_s16 }
 0x405   :  { %v1213_v46 = vpop.xlane.xlu1 %1212 }
 0x406   :  { %v1257_v41 = vsub.f32 %v9956_v47, %v1213_v46  ;;  %v1210_v44 = vpop.xlane.xlu0 %1209 }
 0x407   :  { %v1256_v37 = vsub.f32 %v9959_v2, %v1210_v44 }
 0x408   :  { %v1274_v45 = vmul.f32 1.442695, %v1257_v41 }
 0x409   :  { %v1272_v17 = vmul.f32 1.442695, %v1256_v37 }
 0x40a   :  { %9183 = vpow2.f32 %v1274_v45 }
 0x40b   :  { %9185 = vpow2.f32 %v1272_v17 }
 0x414   :  { %v10079_v9 = vpop.eup %9183 }
 0x415   :  { %v10081_v5 = vpop.eup %9185  ;;  %v1307_v15 = vsel %vm1207_vm3, %v10079_v9, 0.0 }
 0x416   :  { %v1237_v52 = vpop.xlane.xlu1 %1236  ;;  %1308 = vadd.xlane.f32.xlu1 %v1307_v15  ;;  %v1304_v30 = vsel %vm1207_vm3, %v10081_v5, 0.0 }
 0x417   :  { %v1265_v47 = vsub.f32 %v9966_v27, %v1237_v52  ;;  %v1234_v46 = vpop.xlane.xlu0 %1233  ;;  %1305 = vadd.xlane.f32.xlu0 %v1304_v30 }
 0x418   :  { %v1264_v2 = vsub.f32 %v9974_v20, %v1234_v46 }
 0x419   :  { %v1290_v41 = vmul.f32 1.442695, %v1265_v47 }
 0x41a   :  { %v1288_v17 = vmul.f32 1.442695, %v1264_v2 }
 0x41b   :  { %9187 = vpow2.f32 %v1290_v41  ;;  %v1219_v44 = vpop.xlane.xlu0 %1218 }
 0x41c   :  { %9189 = vpow2.f32 %v1288_v17  ;;  %v1259_v37 = vsub.f32 %v9981_v51, %v1219_v44 }
 0x41e   :  { %v1278_v45 = vmul.f32 1.442695, %v1259_v37  ;;  %v1249_v6 = vpop.xlane.xlu1 %1248 }
 0x41f   :  { %v1269_v15 = vsub.f32 %v9999_v3, %v1249_v6  ;;  %v1216_v62 = vpop.xlane.xlu0 %1215 }
 0x420   :  { %9191 = vpow2.f32 %v1278_v45  ;;  %v1258_v63 = vsub.f32 %v9996_v21, %v1216_v62 }
 0x421   :  { %v1298_v27 = vmul.f32 1.442695, %v1269_v15 }
 0x422   :  { %v1276_v52 = vmul.f32 1.442695, %v1258_v63  ;;  %v1225_v30 = vpop.xlane.xlu1 %1224 }
 0x423   :  { %9193 = vpow2.f32 %v1298_v27  ;;  %v1261_v20 = vsub.f32 %v10004_v25, %v1225_v30  ;;  %v1246_v47 = vpop.xlane.xlu0 %1245 }
 0x424   :  { %9195 = vpow2.f32 %v1276_v52  ;;  %v1268_v46 = vsub.f32 %v10014_v14, %v1246_v47 }
 0x425   :  { %v10094_v2 = vpop.eup %9187  ;;  %v1282_v51 = vmul.f32 1.442695, %v1261_v20 }
 0x426   :  { %v10096_v41 = vpop.eup %9189  ;;  %v1296_v3 = vmul.f32 1.442695, %v1268_v46  ;;  %v1231_v6 = vpop.xlane.xlu1 %1230  ;;  %v1331_v62 = vsel %vm1207_vm3, %v10094_v2, 0.0 }
 0x427   :  { %9197 = vpow2.f32 %v1282_v51  ;;  %v1263_v63 = vsub.f32 %v10024_v12, %v1231_v6  ;;  %v1222_v21 = vpop.xlane.xlu0 %1221  ;;  %1332 = vadd.xlane.f32.xlu1 %v1331_v62  ;;  %v1328_v25 = vsel %vm1207_vm3, %v10096_v41, 0.0 }
 0x428   :  { %9199 = vpow2.f32 %v1296_v3  ;;  %v1260_v14 = vsub.f32 %v10029_v57, %v1222_v21  ;;  %1329 = vadd.xlane.f32.xlu0 %v1328_v25 }
 0x429   :  { %v1286_v17 = vmul.f32 1.442695, %v1263_v63 }
 0x42a   :  { %v10104_v44 = vpop.eup %9191  ;;  %v1280_v37 = vmul.f32 1.442695, %v1260_v14  ;;  %v1243_v45 = vpop.xlane.xlu1 %1242 }
 0x42b   :  { %9201 = vpow2.f32 %v1286_v17  ;;  %v1267_v15 = vsub.f32 %v10039_v59, %v1243_v45  ;;  %v1228_v27 = vpop.xlane.xlu0 %1227  ;;  %v1313_v12 = vsel %vm1207_vm3, %v10104_v44, 0.0 }
 0x42c   :  { %9203 = vpow2.f32 %v1280_v37  ;;  %v1262_v52 = vsub.f32 %v10044_v4, %v1228_v27  ;;  %1314 = vadd.xlane.f32.xlu1 %v1313_v12 }
 0x42d   :  { %v10110_v30 = vpop.eup %9193  ;;  %v1294_v57 = vmul.f32 1.442695, %v1267_v15 }
 0x42e   :  { %v10112_v20 = vpop.eup %9195  ;;  %v1284_v47 = vmul.f32 1.442695, %v1262_v52  ;;  %v1343_v46 = vsel %vm1207_vm3, %v10110_v30, 0.0 }
 0x42f   :  { %9205 = vpow2.f32 %v1294_v57  ;;  %v1240_v51 = vpop.xlane.xlu0 %1239  ;;  %v1310_v59 = vsel %vm1207_vm3, %v10112_v20, 0.0  ;;  %v1255_v57 = vpop.xlane.xlu1 %1254 }
 0x430   :  { %9207 = vpow2.f32 %v1284_v47  ;;  %v1266_v3 = vsub.f32 %v10054_v53, %v1240_v51  ;;  %1344 = vadd.xlane.f32.xlu1 %v1343_v46  ;;  %1311 = vadd.xlane.f32.xlu0 %v1310_v59  ;;  %v1271_v47 = vsub.f32 %v10051_v1, %v1255_v57  ;;  %v8766_v57 = vunpack.i.h.bf16 %v10069_v56 }
 0x431   :  { %v10119_v4 = vpop.eup %9197 }
 0x432   :  { %v10121_v6 = vpop.eup %9199  ;;  %v1292_v62 = vmul.f32 1.442695, %v1266_v3  ;;  %v1319_v63 = vsel %vm1207_vm3, %v10119_v4, 0.0  ;;  %v1302_v51 = vmul.f32 1.442695, %v1271_v47  ;;  %v8765_v47 = vunpack.i.l.bf16 %v10069_v56 }
 0x433   :  { %v1340_v21 = vsel %vm1207_vm3, %v10121_v6, 0.0  ;;  %v1252_v46 = vpop.xlane.xlu0 %1251  ;;  %v10187_v1 = vpop.permute.xlu1 %2082 }
 0x434   :  { %9209 = vpow2.f32 %v1292_v62  ;;  %1320 = vadd.xlane.f32.xlu1 %v1319_v63  ;;  %1341 = vadd.xlane.f32.xlu0 %v1340_v21  ;;  %v1270_v59 = vsub.f32 %v10061_v61, %v1252_v46 }
 0x435   :  { %v10127_v25 = vpop.eup %9201  ;;  %9211 = vpow2.f32 %v1302_v51 }
 0x436   :  { %v10129_v14 = vpop.eup %9203  ;;  %v1325_v53 = vsel %vm1207_vm3, %v10127_v25, 0.0  ;;  %v1300_v3 = vmul.f32 1.442695, %v1270_v59  ;;  %v8433_v59 = vpack.c.bf16 %v8766_v57, %v8765_v47  ;;  %v8771_v57 = vunpack.i.h.bf16 %v9913_v10 }
 0x437   :  { %v1316_v17 = vsel %vm1207_vm3, %v10129_v14, 0.0  ;;  %v10191_v61 = vpop.permute.xlu0 %2080  ;;  %v8770_v47 = vunpack.i.l.bf16 %v9913_v10 }
 0x438   :  { %1326 = vadd.xlane.f32.xlu1 %v1325_v53  ;;  %1317 = vadd.xlane.f32.xlu0 %v1316_v17  ;;  %9213 = vpow2.f32 %v1300_v3 }
 0x439   :  { %v10135_v37 = vpop.eup %9205 }
 0x43a   :  { %v10137_v45 = vpop.eup %9207  ;;  %v1337_v15 = vsel %vm1207_vm3, %v10135_v37, 0.0 }
 0x43b   :  { %v1322_v27 = vsel %vm1207_vm3, %v10137_v45, 0.0 }
 0x43c   :  { %1338 = vadd.xlane.f32.xlu1 %v1337_v15  ;;  %1323 = vadd.xlane.f32.xlu0 %v1322_v27 }
 0x43e   :  { %v10143_v12 = vpop.eup %9209 }
 0x43f   :  { %v1334_v52 = vsel %vm1207_vm3, %v10143_v12, 0.0  ;;  %v10153_v62 = vpop.eup %9211 }
 0x440   :  { %1335 = vadd.xlane.f32.xlu0 %v1334_v52  ;;  %v1349_v63 = vsel %vm1207_vm3, %v10153_v62, 0.0 }
 0x442   :  { %v10157_v21 = vpop.eup %9213 }
 0x443   :  { %v1346_v53 = vsel %vm1207_vm3, %v10157_v21, 0.0 }
 0x44d   :  { %2173 = vrot.lane.b32.xlu1 %v9769_v7, %s9450_s16 }
 0x456   :  { %2171 = vrot.lane.b32.xlu0 %v9767_v31, %s9450_s16 }
 0x471   :  { %1350 = vadd.xlane.f32.xlu1 %v1349_v63 }
 0x475   :  { %1347 = vadd.xlane.f32.xlu0 %v1346_v53 }
 0x482   :  { %8813 = vrot.lane.b32.xlu1 %v9819_v39, %s9449_s22 }
 0x486   :  { %2264 = vrot.lane.b32.xlu1 %v9789_v19, %s9450_s16 }
 0x48a   :  { %2355 = vrot.lane.b32.xlu1 %v9791_v22, %s9450_s16 }
 0x48b   :  { %8808 = vrot.lane.b32.xlu0 %v9823_v40, %s9449_s22 }
 0x48e   :  { %8818 = vrot.lane.b32.xlu1 %v9843_v50, %s9449_s22 }
 0x48f   :  { %2262 = vrot.lane.b32.xlu0 %v9787_v18, %s9450_s16 }
 0x492   :  { %2535 = vrot.lane.b32.xlu1 %v9807_v33, %s9450_s16 }
 0x493   :  { %2353 = vrot.lane.b32.xlu0 %v9797_v16, %s9450_s16 }
 0x496   :  { %2537 = vrot.lane.b32.xlu1 %v9809_v34, %s9450_s16 }
 0x497   :  { %2444 = vrot.lane.b32.xlu0 %v9801_v0, %s9450_s16 }
 0x49a   :  { %2628 = vrot.lane.b32.xlu1 %v9835_v48, %s9450_s16 }
 0x49b   :  { %2446 = vrot.lane.b32.xlu0 %v9811_v38, %s9450_s16 }
 0x49e   :  { %2719 = vrot.lane.b32.xlu1 %v9831_v42, %s9450_s16 }
 0x49f   :  { %8823 = vrot.lane.b32.xlu0 %v9839_v49, %s9449_s22 }
 0x4a2   :  { %8833 = vrot.lane.b32.xlu1 %v9777_v43, %s9451_s17 }
 0x4a3   :  { %2626 = vrot.lane.b32.xlu0 %v9833_v24, %s9450_s16  ;;  %v1309_v17 = vpop.xlane.xlu1 %1308 }
 0x4a4   :  { %9215 = vrcp.f32 %v1309_v17  ;;  %v1306_v15 = vpop.xlane.xlu0 %1305 }
 0x4a5   :  { %9217 = vrcp.f32 %v1306_v15 }
 0x4a6   :  { %8838 = vrot.lane.b32.xlu1 %v9795_v55, %s9451_s17 }
 0x4a7   :  { %2717 = vrot.lane.b32.xlu0 %v9829_v36, %s9450_s16 }
 0x4aa   :  { %8843 = vrot.lane.b32.xlu1 %v9805_v32, %s9451_s17 }
 0x4ab   :  { %8828 = vrot.lane.b32.xlu0 %v9781_v54, %s9451_s17 }
 0x4ae   :  { %v9216_v27 = vpop.eup %9215  ;;  %8853 = vrot.lane.b32.xlu1 %v9819_v39, %s9451_s17 }
 0x4af   :  { %v9218_v52 = vpop.eup %9217  ;;  %8848 = vrot.lane.b32.xlu0 %v9823_v40, %s9451_s17  ;;  %v1369_v51 = vmul.f32 %v9216_v27, %v10079_v9 }
 0x4b0   :  { %v1368_v46 = vmul.f32 %v9218_v52, %v10081_v5 }
 0x4b2   :  { %8863 = vrot.lane.b32.xlu1 %v9839_v49, %s9451_s17  ;;  %7961 = vmatprep.mubr.msk.f32.mxu0 %vm1207_vm3, %v1368_v46 }
 0x4b3   :  { %8858 = vrot.lane.b32.xlu0 %v9843_v50, %s9451_s17  ;;  %7962 = vmatmul.mubr.msk.f32.vlgmr.msra.gmra.mrb[12].mxu0 %vm1207_vm3, %v1369_v51 }
 0x4b4   :  { %v1333_v3 = vpop.xlane.xlu1 %1332  ;;  %8428 = vmatpush3.bf16.msra.mxu0 %v9941_v58 }
 0x4b5   :  { %8434 = vmatprep.subr.bf16.mxu0 %v8433_v59  ;;  %v1330_v5 = vpop.xlane.xlu0 %1329 }
 0x4b6   :  { %8873 = vrot.lane.b32.xlu1 %v9777_v43, %s9452_s4 }
 0x4b7   :  { %8868 = vrot.lane.b32.xlu0 %v9781_v54, %s9452_s4 }
 0x4b9   :  { %v1315_v9 = vpop.xlane.xlu1 %1314 }
 0x4ba   :  { %8883 = vrot.lane.b32.xlu1 %v9805_v32, %s9452_s4  ;;  %9219 = vrcp.f32 %v1315_v9 }
 0x4bb   :  { %8878 = vrot.lane.b32.xlu0 %v9795_v55, %s9452_s4 }
 0x4bd   :  { %v1345_v56 = vpop.xlane.xlu1 %1344  ;;  %v1312_v63 = vpop.xlane.xlu0 %1311 }
 0x4be   :  { %9221 = vrcp.f32 %v1312_v63 }
 0x4bf   :  { %9223 = vrcp.f32 %v1330_v5 }
 0x4c1   :  { %v1321_v58 = vpop.xlane.xlu1 %1320  ;;  %v1342_v53 = vpop.xlane.xlu0 %1341 }
 0x4c2   :  { %9225 = vrcp.f32 %v1321_v58 }
 0x4c4   :  { %v9220_v27 = vpop.eup %9219 }
 0x4c5   :  { %v1327_v17 = vpop.xlane.xlu1 %1326  ;;  %v1318_v15 = vpop.xlane.xlu0 %1317  ;;  %v1371_v5 = vmul.f32 %v9220_v27, %v10104_v44 }
 0x4c6   :  { %9227 = vrcp.f32 %v1318_v15 }
 0x4c7   :  { %9229 = vrcp.f32 %v1333_v3  ;;  %v8437_v3 = vpack.c.bf16 %v8771_v57, %v8770_v47  ;;  %v8776_v57 = vunpack.i.h.bf16 %v9923_v11 }
 0x4c8   :  { %v9222_v52 = vpop.eup %9221  ;;  %9231 = vrcp.f32 %v1345_v56 }
 0x4c9   :  { %v1324_v46 = vpop.xlane.xlu0 %1323  ;;  %9233 = vrcp.f32 %v1327_v17  ;;  %v1339_v51 = vpop.xlane.xlu1 %1338  ;;  %v1370_v9 = vmul.f32 %v9222_v52, %v10112_v20  ;;  %v8801_v20 = vunpack.i.h.bf16 %v10073_v13  ;;  %v8800_v17 = vunpack.i.l.bf16 %v10073_v13 }
 0x4ca   :  { %9235 = vrcp.f32 %v1324_v46  ;;  %v9224_v10 = vpop.eup %9223 }
 0x4cb   :  { %9237 = vrcp.f32 %v1342_v53  ;;  %7968 = vmatprep.mubr.msk.f32.mxu1 %vm1207_vm3, %v1370_v9  ;;  %v1376_v47 = vmul.f32 %v9224_v10, %v10096_v41  ;;  %v8781_v9 = vunpack.i.h.bf16 %v10071_v8 }
 0x4cc   :  { %9239 = vrcp.f32 %v1339_v51  ;;  %7969 = vmatmul.mubr.msk.f32.vlgmr.msra.gmra.mrb[20].mxu1 %vm1207_vm3, %v1371_v5  ;;  %v9226_v56 = vpop.eup %9225  ;;  %v8441_v51 = vpack.c.bf16 %v8801_v20, %v8800_v17 }
 0x4cd   :  { %v1336_v63 = vpop.xlane.xlu0 %1335  ;;  %8432 = vmatpush3.bf16.msra.mxu1 %v9939_v35  ;;  %v1373_v27 = vmul.f32 %v9226_v56, %v10119_v4  ;;  %v8775_v35 = vunpack.i.l.bf16 %v9923_v11  ;;  %v8786_v56 = vunpack.i.h.bf16 %v9927_v23 }
 0x4ce   :  { %9241 = vrcp.f32 %v1336_v63  ;;  %8438 = vmatprep.subr.bf16.mxu1 %v8437_v3 }
 0x4cf   :  { %v8445_v10 = vpack.c.bf16 %v8776_v57, %v8775_v35 }
 0x4d0   :  { %v9228_v58 = vpop.eup %9227 }
 0x4d1   :  { %v9230_v44 = vpop.eup %9229  ;;  %v1372_v53 = vmul.f32 %v9228_v58, %v10129_v14  ;;  %v8780_v14 = vunpack.i.l.bf16 %v10071_v8  ;;  %v8785_v58 = vunpack.i.l.bf16 %v9927_v23 }
 0x4d2   :  { %v9232_v15 = vpop.eup %9231  ;;  %v1377_v41 = vmul.f32 %v9230_v44, %v10094_v2 }
 0x4d3   :  { %v9234_v52 = vpop.eup %9233  ;;  %7975 = vmatprep.mubr.msk.f32.mxu0 %vm1207_vm3, %v1372_v53  ;;  %v8455_v23 = vpack.c.bf16 %v8786_v56, %v8785_v58 }
 0x4d4   :  { %v9236_v46 = vpop.eup %9235  ;;  %7976 = vmatmul.mubr.msk.f32.vlgmr.msra.gmra.mrb[14].mxu0 %vm1207_vm3, %v1373_v27  ;;  %v1375_v11 = vmul.f32 %v9234_v52, %v10127_v25  ;;  %v1381_v25 = vmul.f32 %v9232_v15, %v10110_v30 }
 0x4d5   :  { %v9238_v13 = vpop.eup %9237  ;;  %8436 = vmatpush3.bf16.msra.mxu0 %v8433_v59  ;;  %7989 = vmatprep.mubr.msk.f32.mxu0 %vm1207_vm3, %v1376_v47  ;;  %v1374_v4 = vmul.f32 %v9236_v46, %v10137_v45  ;;  %v8449_v59 = vpack.c.bf16 %v8781_v9, %v8780_v14  ;;  %v8791_v47 = vunpack.i.h.bf16 %v9935_v28  ;;  %v8790_v46 = vunpack.i.l.bf16 %v9935_v28 }
 0x4d6   :  { %v9240_v5 = vpop.eup %9239  ;;  %8442 = vmatprep.subr.bf16.mxu0 %v8441_v51  ;;  %v1380_v8 = vmul.f32 %v9238_v13, %v10121_v6  ;;  %v8806_v6 = vunpack.i.h.bf16 %v10075_v26 }
 0x4d7   :  { %7982 = vmatprep.mubr.msk.f32.mxu1 %vm1207_vm3, %v1374_v4  ;;  %v1379_v2 = vmul.f32 %v9240_v5, %v10135_v37  ;;  %v2172_v37 = vpop.permute.xlu0 %2171 }
 0x4d8   :  { %v9242_v63 = vpop.eup %9241  ;;  %7983 = vmatmul.mubr.msk.f32.vlgmr.msra.gmra.mrb[22].mxu1 %vm1207_vm3, %v1375_v11  ;;  %7990 = vmatmul.mubr.msk.f32.vlgmr.msra.gmra.mrb[16].mxu0 %vm1207_vm3, %v1377_v41  ;;  %v8467_v11 = vpack.c.bf16 %v8791_v47, %v8790_v46 }
 0x4d9   :  { %v1378_v45 = vmul.f32 %v9242_v63, %v10143_v12  ;;  %8440 = vmatpush3.bf16.msra.mxu1 %v8437_v3  ;;  %8444 = vmatpush3.bf16.msra.mxu0 %v8441_v51  ;;  %v8805_v12 = vunpack.i.l.bf16 %v10075_v26  ;;  %v2174_v26 = vpop.permute.xlu1 %2173 }
 0x4da   :  { %8003 = vmatprep.mubr.msk.f32.mxu0 %vm1207_vm3, %v1380_v8  ;;  %8446 = vmatprep.subr.bf16.mxu1 %v8445_v10 }
 0x4db   :  { %8451 = vmatprep.subr.msk.bf16.mxu0 %vm9867_vm2, %v8449_v59  ;;  %7996 = vmatprep.mubr.msk.f32.mxu1 %vm1207_vm3, %v1378_v45  ;;  %v8461_v30 = vpack.c.bf16 %v8806_v6, %v8805_v12 }
 0x4dc   :  { %7997 = vmatmul.mubr.msk.f32.vlgmr.msra.gmra.mrb[24].mxu1 %vm1207_vm3, %v1379_v2  ;;  %8004 = vmatmul.mubr.msk.f32.vlgmr.msra.gmra.mrb[18].mxu0 %vm1207_vm3, %v1381_v25 }
 0x4dd   :  { %8448 = vmatpush3.bf16.msra.mxu1 %v8445_v10  ;;  %8017 = vmatprep.mubr.msk.f32.mxu0 %vm468_vm1, %v10191_v61 }
 0x4de   :  { %8457 = vmatprep.subr.msk.bf16.mxu1 %vm9867_vm2, %v8455_v23 }
 0x4e2   :  { %8454 = vmatpush3.bf16.xpose.msk.msra.mxu0 %vm9867_vm2, %v8449_v59 }
 0x4e3   :  { %8463 = vmatprep.subr.msk.bf16.mxu0 %vm9867_vm2, %v8461_v30 }
 0x4e9   :  { %8018 = vmatmul.mubr.msk.f32.vlgmr.msra.gmra.mrb[20].mxu0 %vm468_vm1, %v10187_v1 }
 0x4ea   :  { %8466 = vmatpush3.bf16.xpose.msk.msra.mxu0 %vm9867_vm2, %v8461_v30 }
 0x4fe   :  { %v1351_v3 = vpop.xlane.xlu1 %1350 }
 0x4ff   :  { %9243 = vrcp.f32 %v1351_v3 }
 0x502   :  { %v8814_v61 = vpop.permute.xlu1 %8813  ;;  %v1348_v20 = vpop.xlane.xlu0 %1347 }
 0x503   :  { %9245 = vrcp.f32 %v1348_v20 }
 0x506   :  { %v2265_v17 = vpop.permute.xlu1 %2264  ;;  %v8809_v44 = vpop.permute.xlu0 %8808 }
 0x507   :  { %v8811_v53 = vunpack.i.h.bf16 %v8809_v44  ;;  %v8810_v15 = vunpack.i.l.bf16 %v8809_v44 }
 0x509   :  { %v8473_v27 = vpack.c.bf16 %v8811_v53, %v8810_v15  ;;  %v9244_v1 = vpop.eup %9243 }
 0x50a   :  { %v2356_v52 = vpop.permute.xlu1 %2355  ;;  %v2263_v57 = vpop.permute.xlu0 %2262  ;;  %v1383_v5 = vmul.f32 %v9244_v1, %v10153_v62  ;;  %v8816_v62 = vunpack.i.h.bf16 %v8814_v61 }
 0x50b   :  { %8031 = vmatprep.mubr.msk.f32.mxu0 %vm468_vm1, %v2263_v57  ;;  %8475 = vmatprep.subr.msk.bf16.mxu0 %vm9867_vm2, %v8473_v27 }
 0x50c   :  { %8032 = vmatmul.mubr.msk.f32.vlgmr.msra.gmra.mrb[22].mxu0 %vm468_vm1, %v2265_v17 }
 0x50d   :  { %v9246_v35 = vpop.eup %9245  ;;  %8478 = vmatpush3.bf16.xpose.msk.msra.mxu0 %vm9867_vm2, %v8473_v27 }
 0x50e   :  { %v8819_v51 = vpop.permute.xlu1 %8818  ;;  %v2354_v13 = vpop.permute.xlu0 %2353  ;;  %v1382_v9 = vmul.f32 %v9246_v35, %v10157_v21  ;;  %v8815_v21 = vunpack.i.l.bf16 %v8814_v61 }
 0x50f   :  { %v8821_v14 = vunpack.i.h.bf16 %v8819_v51  ;;  %v8820_v4 = vunpack.i.l.bf16 %v8819_v51 }
 0x510   :  { %8010 = vmatprep.mubr.msk.f32.mxu1 %vm1207_vm3, %v1382_v9  ;;  %v8479_v58 = vpack.c.bf16 %v8816_v62, %v8815_v21 }
 0x511   :  { %v8485_v41 = vpack.c.bf16 %v8821_v14, %v8820_v4  ;;  %8011 = vmatmul.mubr.msk.f32.vlgmr.msra.gmra.mrb[26].mxu1 %vm1207_vm3, %v1383_v5 }
 0x512   :  { %8460 = vmatpush3.bf16.xpose.msk.msra.mxu1 %vm9867_vm2, %v8455_v23  ;;  %v2536_v28 = vpop.permute.xlu1 %2535  ;;  %8024 = vmatprep.mubr.msk.f32.mxu1 %vm468_vm1, %v2172_v37  ;;  %v2445_v63 = vpop.permute.xlu0 %2444 }
 0x513   :  { %8469 = vmatprep.subr.msk.bf16.mxu1 %vm9867_vm2, %v8467_v11  ;;  %8045 = vmatprep.mubr.msk.f32.mxu0 %vm468_vm1, %v2445_v63 }
 0x514   :  { %8487 = vmatprep.subr.msk.bf16.mxu0 %vm9867_vm2, %v8485_v41 }
 0x516   :  { %v2538_v10 = vpop.permute.xlu1 %2537  ;;  %v2447_v56 = vpop.permute.xlu0 %2446 }
 0x517   :  { %8046 = vmatmul.mubr.msk.f32.vlgmr.msra.gmra.mrb[24].mxu0 %vm468_vm1, %v2447_v56 }
 0x518   :  { %8490 = vmatpush3.bf16.xpose.msk.msra.mxu0 %vm9867_vm2, %v8485_v41 }
 0x519   :  { %8025 = vmatmul.mubr.msk.f32.vlgmr.msra.gmra.mrb[28].mxu1 %vm468_vm1, %v2174_v26 }
 0x51a   :  { %8472 = vmatpush3.bf16.xpose.msk.msra.mxu1 %vm9867_vm2, %v8467_v11  ;;  %8038 = vmatprep.mubr.msk.f32.mxu1 %vm468_vm1, %v2354_v13  ;;  %v2629_v8 = vpop.permute.xlu1 %2628  ;;  %v8824_v45 = vpop.permute.xlu0 %8823 }
 0x51b   :  { %8481 = vmatprep.subr.msk.bf16.mxu1 %vm9867_vm2, %v8479_v58  ;;  %v8826_v59 = vunpack.i.h.bf16 %v8824_v45  ;;  %v8825_v2 = vunpack.i.l.bf16 %v8824_v45 }
 0x51d   :  { %v8491_v6 = vpack.c.bf16 %v8826_v59, %v8825_v2  ;;  %v11664_v2 = vld [vmem:[#allocation8_spill] sm:$0xff] }
 0x51e   :  { %v2720_v25 = vpop.permute.xlu1 %2719  ;;  %v2627_v23 = vpop.permute.xlu0 %2626 }
 0x51f   :  { %8059 = vmatprep.mubr.msk.f32.mxu0 %vm468_vm1, %v2627_v23 }
 0x520   :  { %8060 = vmatmul.mubr.msk.f32.vlgmr.msra.gmra.mrb[26].mxu0 %vm468_vm1, %v2629_v8 }
 0x521   :  { %8039 = vmatmul.mubr.msk.f32.vlgmr.msra.gmra.mrb[30].mxu1 %vm468_vm1, %v2356_v52 }
 0x522   :  { %8484 = vmatpush3.bf16.xpose.msk.msra.mxu1 %vm9867_vm2, %v8479_v58  ;;  %8052 = vmatprep.mubr.msk.f32.mxu1 %vm468_vm1, %v2536_v28  ;;  %v8834_v12 = vpop.permute.xlu1 %8833  ;;  %v2718_v30 = vpop.permute.xlu0 %2717 }
 0x523   :  { %8493 = vmatprep.subr.msk.bf16.mxu1 %vm9867_vm2, %v8491_v6  ;;  %v8836_v26 = vunpack.i.h.bf16 %v8834_v12  ;;  %v8835_v37 = vunpack.i.l.bf16 %v8834_v12 }
 0x525   :  { %v8501_v15 = vpack.c.bf16 %v8836_v26, %v8835_v37 }
 0x526   :  { %v8839_v3 = vpop.permute.xlu1 %8838  ;;  %v8829_v61 = vpop.permute.xlu0 %8828 }
 0x527   :  { %v8841_v20 = vunpack.i.h.bf16 %v8839_v3  ;;  %v8840_v17 = vunpack.i.l.bf16 %v8839_v3  ;;  %v8831_v44 = vunpack.i.h.bf16 %v8829_v61  ;;  %v8830_v53 = vunpack.i.l.bf16 %v8829_v61  ;;  %v11665_v3 = vld [vmem:[#allocation11_spill] sm:$0xff] }
 0x529   :  { %8053 = vmatmul.mubr.msk.f32.vlgmr.msra.gmra.mrb[32].mxu1 %vm468_vm1, %v2538_v10  ;;  %v8497_v27 = vpack.c.bf16 %v8831_v44, %v8830_v53  ;;  %v10312_v57 = vpack.c.bf16 %v8841_v20, %v8840_v17  ;;  %v11666_v20 = vld [vmem:[#allocation12_spill] sm:$0xff] }
 0x52a   :  { %8496 = vmatpush3.bf16.xpose.msk.msra.mxu1 %vm9867_vm2, %v8491_v6  ;;  %8066 = vmatprep.mubr.msk.f32.mxu1 %vm468_vm1, %v2718_v30  ;;  %v8844_v52 = vpop.permute.xlu1 %8843 }
 0x52b   :  { %8502 = vmatprep.subr.bf16.mxu1 %v8501_v15  ;;  %8498 = vmatprep.subr.bf16.mxu0 %v8497_v27  ;;  %v8846_v1 = vunpack.i.h.bf16 %v8844_v52  ;;  %v8845_v35 = vunpack.i.l.bf16 %v8844_v52 }
 0x52c   :  { %8500 = vmatpush3.bf16.msra.mxu0 %v8497_v27 }
 0x52d   :  { %8506 = vmatprep.subr.bf16.mxu0 %v10312_v57  ;;  %v10316_v47 = vpack.c.bf16 %v8846_v1, %v8845_v35 }
 0x531   :  { %8067 = vmatmul.mubr.msk.f32.vlgmr.msra.gmra.mrb[34].mxu1 %vm468_vm1, %v2720_v25 }
 0x532   :  { %8504 = vmatpush3.bf16.msra.mxu1 %v8501_v15 }
 0x533   :  { %8510 = vmatprep.subr.bf16.mxu1 %v10316_v47 }
 0x586   :  { %v10319_v46 = vpop.f32.mrb[12].mxu0 }
 0x587   :  { %11650 = vst [vmem:[#allocation15_spill] sm:$0xff] %v10319_v46  ;;  %v10321_v51 = vpop.f32.mrb[13].mxu0 }
 0x588   :  { %11651 = vst [vmem:[#allocation16_spill] sm:$0xff] %v10321_v51 }
 0x59f   :  { %v10323_v13 = vpop.f32.mrb[20].mxu1 }
 0x5a0   :  { %11652 = vst [vmem:[#allocation17_spill] sm:$0xff] %v10323_v13  ;;  %v10325_v9 = vpop.f32.mrb[21].mxu1 }
 0x5a1   :  { %11653 = vst [vmem:[#allocation18_spill] sm:$0xff] %v10325_v9 }
 0x5a7   :  { %v10327_v14 = vpop.f32.mrb[14].mxu0 }
 0x5a8   :  { %11654 = vst [vmem:[#allocation19_spill] sm:$0xff] %v10327_v14  ;;  %v10329_v4 = vpop.f32.mrb[15].mxu0 }
 0x5a9   :  { %11655 = vst [vmem:[#allocation20_spill] sm:$0xff] %v10329_v4 }
 0x5ab   :  { %v10331_v5 = vpop.f32.mrb[22].mxu1  ;;  %v10333_v11 = vpop.f32.mrb[16].mxu0 }
 0x5ac   :  { %11656 = vst [vmem:[#allocation21_spill] sm:$0xff] %v10331_v5  ;;  %11657 = vst [vmem:[#allocation22_spill] sm:$0xff] %v10333_v11  ;;  %v10335_v41 = vpop.f32.mrb[23].mxu1  ;;  %v10337_v28 = vpop.f32.mrb[17].mxu0 }
 0x5ad   :  { %11658 = vst [vmem:[#allocation23_spill] sm:$0xff] %v10335_v41  ;;  %11659 = vst [vmem:[#allocation24_spill] sm:$0xff] %v10337_v28 }
 0x5af   :  { %v10339_v63 = vpop.f32.mrb[24].mxu1  ;;  %v10341_v62 = vpop.f32.mrb[18].mxu0 }
 0x5b0   :  { %11660 = vst [vmem:[#allocation25_spill] sm:$0xff] %v10339_v63  ;;  %11661 = vst [vmem:[#allocation26_spill] sm:$0xff] %v10341_v62  ;;  %v10343_v21 = vpop.f32.mrb[25].mxu1  ;;  %v10345_v10 = vpop.f32.mrb[19].mxu0 }
 0x5b1   :  { %11662 = vst [vmem:[#allocation27_spill] sm:$0xff] %v10343_v21  ;;  %11663 = vst [vmem:[#allocation28_spill] sm:$0xff] %v10345_v10 }
 0x5bc   :  { %v8019_v56 = vpop.f32.mrb[20].mxu0 }
 0x5bd   :  { %v2809_v58 = vmul.f32 0.35355338, %v8019_v56  ;;  %v2162_v8 = vpop.f32.mrb[21].mxu0 }
 0x5be   :  { %v2808_v45 = vmul.f32 0.35355338, %v2162_v8 }
 0x5bf   :  { %v10348_v59 = vadd.f32 %v2809_v58, %v9948_v60 }
 0x5c0   :  { %v10351_v25 = vadd.f32 %v2808_v45, %v11664_v2 }
 0x5c1   :  { %v2843_v23 = vsel %vm1207_vm3, %v10348_v59, -inf }
 0x5c2   :  { %2844 = vmax.xlane.f32.xlu1 %v2843_v23  ;;  %v2840_v6 = vsel %vm1207_vm3, %v10351_v25, -inf }
 0x5c3   :  { %2841 = vmax.xlane.f32.xlu0 %v2840_v6  ;;  %v11669_v6 = vld [vmem:[#allocation9_spill] sm:$0xff] }
 0x5df   :  { %v8033_v12 = vpop.f32.mrb[22].mxu0 }
 0x5e0   :  { %v2813_v30 = vmul.f32 0.35355338, %v8033_v12  ;;  %v2344_v26 = vpop.f32.mrb[23].mxu0 }
 0x5e1   :  { %v2812_v37 = vmul.f32 0.35355338, %v2344_v26 }
 0x5e2   :  { %v10358_v61 = vadd.f32 %v2813_v30, %v11665_v3 }
 0x5e3   :  { %v10361_v17 = vadd.f32 %v2812_v37, %v11666_v20  ;;  %v11670_v37 = vld [vmem:[#allocation10_spill] sm:$0xff] }
 0x5e4   :  { %v10363_v44 = vpop.f32.mrb[26].mxu1  ;;  %v2855_v53 = vsel %vm1207_vm3, %v10358_v61, -inf }
 0x5e5   :  { %11667 = vst [vmem:[#allocation8_spill] sm:$0xff] %v10363_v44  ;;  %v10367_v15 = vpop.f32.mrb[27].mxu1  ;;  %2856 = vmax.xlane.f32.xlu1 %v2855_v53  ;;  %v2852_v27 = vsel %vm1207_vm3, %v10361_v17, -inf }
 0x5e6   :  { %11668 = vst [vmem:[#allocation11_spill] sm:$0xff] %v10367_v15  ;;  %2853 = vmax.xlane.f32.xlu0 %v2852_v27 }
 0x5ea   :  { %v8047_v52 = vpop.f32.mrb[24].mxu0 }
 0x5eb   :  { %v2817_v1 = vmul.f32 0.35355338, %v8047_v52  ;;  %v2526_v35 = vpop.f32.mrb[25].mxu0 }
 0x5ec   :  { %v8026_v56 = vpop.f32.mrb[28].mxu1  ;;  %v2816_v26 = vmul.f32 0.35355338, %v2526_v35 }
 0x5ed   :  { %v10372_v58 = vadd.f32 %v2817_v1, %v9948_v60  ;;  %v2811_v8 = vmul.f32 0.35355338, %v8026_v56  ;;  %v2253_v45 = vpop.f32.mrb[29].mxu1 }
 0x5ee   :  { %v2810_v23 = vmul.f32 0.35355338, %v2253_v45  ;;  %v10385_v52 = vadd.f32 %v2816_v26, %v11664_v2  ;;  %v11672_v2 = vld [vmem:[#allocation14_spill] sm:$0xff] }
 0x5ef   :  { %v10375_v12 = vadd.f32 %v2811_v8, %v11669_v6  ;;  %v2867_v30 = vsel %vm1207_vm3, %v10372_v58, -inf }
 0x5f0   :  { %2868 = vmax.xlane.f32.xlu1 %v2867_v30  ;;  %v10380_v53 = vadd.f32 %v2810_v23, %v11670_v37  ;;  %v11671_v23 = vld [vmem:[#allocation13_spill] sm:$0xff] }
 0x5f1   :  { %v2849_v27 = vsel %vm1207_vm3, %v10375_v12, -inf }
 0x5f2   :  { %2850 = vmax.xlane.f32.xlu0 %v2849_v27  ;;  %v2846_v35 = vsel %vm1207_vm3, %v10380_v53, -inf  ;;  %v2864_v27 = vsel %vm1207_vm3, %v10385_v52, -inf }
 0x5f3   :  { %v8061_v60 = vpop.f32.mrb[26].mxu0 }
 0x5f4   :  { %v8040_v1 = vpop.f32.mrb[30].mxu1  ;;  %v2708_v56 = vpop.f32.mrb[27].mxu0  ;;  %v2821_v45 = vmul.f32 0.35355338, %v8061_v60 }
 0x5f5   :  { %v2815_v8 = vmul.f32 0.35355338, %v8040_v1  ;;  %v2435_v15 = vpop.f32.mrb[31].mxu1  ;;  %v2820_v1 = vmul.f32 0.35355338, %v2708_v56 }
 0x5f6   :  { %v2814_v30 = vmul.f32 0.35355338, %v2435_v15  ;;  %2847 = vmax.xlane.f32.xlu0 %v2846_v35  ;;  %v10395_v10 = vadd.f32 %v2821_v45, %v11665_v3 }
 0x5f7   :  { %v10390_v44 = vadd.f32 %v2815_v8, %v11671_v23  ;;  %v10403_v35 = vadd.f32 %v2820_v1, %v11666_v20 }
 0x5f8   :  { %v10398_v26 = vadd.f32 %v2814_v30, %v11672_v2  ;;  %v2879_v3 = vsel %vm1207_vm3, %v10395_v10, -inf }
 0x5f9   :  { %v2861_v60 = vsel %vm1207_vm3, %v10390_v44, -inf }
 0x5fa   :  { %2862 = vmax.xlane.f32.xlu1 %v2861_v60  ;;  %2865 = vmax.xlane.f32.xlu0 %v2864_v27  ;;  %v2858_v21 = vsel %vm1207_vm3, %v10398_v26, -inf  ;;  %v2876_v27 = vsel %vm1207_vm3, %v10403_v35, -inf }
 0x5fc   :  { %v8054_v15 = vpop.f32.mrb[32].mxu1 }
 0x5fd   :  { %v2819_v8 = vmul.f32 0.35355338, %v8054_v15  ;;  %v2617_v62 = vpop.f32.mrb[33].mxu1 }
 0x5fe   :  { %v2818_v45 = vmul.f32 0.35355338, %v2617_v62  ;;  %2859 = vmax.xlane.f32.xlu0 %v2858_v21  ;;  %2880 = vmax.xlane.f32.xlu1 %v2879_v3 }
 0x5ff   :  { %v10410_v56 = vadd.f32 %v2819_v8, %v11669_v6 }
 0x600   :  { %v10413_v30 = vadd.f32 %v2818_v45, %v11670_v37  ;;  %v11673_v45 = vld [vmem:[#allocation3_spill] sm:$0xff] }
 0x601   :  { %v2873_v20 = vsel %vm1207_vm3, %v10410_v56, -inf }
 0x602   :  { %2874 = vmax.xlane.f32.xlu1 %v2873_v20  ;;  %2877 = vmax.xlane.f32.xlu0 %v2876_v27  ;;  %v2870_v62 = vsel %vm1207_vm3, %v10413_v30, -inf  ;;  %v11674_v20 = vld [vmem:[#allocation2_spill] sm:$0xff]  ;;  %v10437_v27 = vpop.permute.xlu0 %8848 }
 0x604   :  { %v8068_v1 = vpop.f32.mrb[34].mxu1 }
 0x605   :  { %v2823_v60 = vmul.f32 0.35355338, %v8068_v1  ;;  %v2799_v15 = vpop.f32.mrb[35].mxu1 }
 0x606   :  { %v2822_v21 = vmul.f32 0.35355338, %v2799_v15  ;;  %2871 = vmax.xlane.f32.xlu0 %v2870_v62  ;;  %v10441_v1 = vpop.permute.xlu0 %8858 }
 0x607   :  { %v10422_v6 = vadd.f32 %v2823_v60, %v11671_v23  ;;  %v10435_v23 = vpop.permute.xlu1 %8853 }
 0x608   :  { %v10425_v37 = vadd.f32 %v2822_v21, %v11672_v2 }
 0x609   :  { %v2885_v8 = vsel %vm1207_vm3, %v10422_v6, -inf }
 0x60a   :  { %2886 = vmax.xlane.f32.xlu1 %v2885_v8  ;;  %v2882_v3 = vsel %vm1207_vm3, %v10425_v37, -inf  ;;  %v10445_v15 = vpop.permute.xlu0 %8868 }
 0x60b   :  { %2883 = vmax.xlane.f32.xlu0 %v2882_v3  ;;  %v10439_v2 = vpop.permute.xlu1 %8863 }
 0x60e   :  { %v10449_v21 = vpop.permute.xlu0 %8878 }
 0x60f   :  { %v10443_v60 = vpop.permute.xlu1 %8873 }
 0x613   :  { %v10447_v62 = vpop.permute.xlu1 %8883 }
 0x61b   :  { %3714 = vrot.lane.b32.xlu1 %v11673_v45, %s9453_s18 }
 0x621   :  { %3712 = vrot.lane.b32.xlu0 %v11674_v20, %s9453_s18 }
 0x64f   :  { %v2845_v8 = vpop.xlane.xlu1 %2844 }
 0x650   :  { %v2889_v3 = vsub.f32 %v10348_v59, %v2845_v8  ;;  %v2842_v63 = vpop.xlane.xlu0 %2841 }
 0x651   :  { %v2888_v41 = vsub.f32 %v10351_v25, %v2842_v63 }
 0x652   :  { %v2906_v5 = vmul.f32 1.442695, %v2889_v3 }
 0x653   :  { %v2904_v28 = vmul.f32 1.442695, %v2888_v41 }
 0x654   :  { %9247 = vpow2.f32 %v2906_v5 }
 0x655   :  { %9249 = vpow2.f32 %v2904_v28 }
 0x65e   :  { %v10453_v11 = vpop.eup %9247 }
 0x65f   :  { %v10455_v9 = vpop.eup %9249  ;;  %v2939_v13 = vsel %vm1207_vm3, %v10453_v11, 0.0 }
 0x660   :  { %2940 = vadd.xlane.f32.xlu1 %v2939_v13  ;;  %v2936_v4 = vsel %vm1207_vm3, %v10455_v9, 0.0 }
 0x661   :  { %2937 = vadd.xlane.f32.xlu0 %v2936_v4 }
 0x672   :  { %v2857_v59 = vpop.xlane.xlu1 %2856 }
 0x673   :  { %v2893_v8 = vsub.f32 %v10358_v61, %v2857_v59  ;;  %v2854_v63 = vpop.xlane.xlu0 %2853 }
 0x674   :  { %v2892_v41 = vsub.f32 %v10361_v17, %v2854_v63 }
 0x675   :  { %v2914_v5 = vmul.f32 1.442695, %v2893_v8 }
 0x676   :  { %v2912_v28 = vmul.f32 1.442695, %v2892_v41 }
 0x677   :  { %9251 = vpow2.f32 %v2914_v5 }
 0x678   :  { %9253 = vpow2.f32 %v2912_v28 }
 0x67d   :  { %v2869_v25 = vpop.xlane.xlu1 %2868 }
 0x67e   :  { %v2897_v3 = vsub.f32 %v10372_v58, %v2869_v25 }
 0x67f   :  { %v2851_v14 = vpop.xlane.xlu0 %2850 }
 0x680   :  { %v2891_v13 = vsub.f32 %v10375_v12, %v2851_v14  ;;  %v2922_v4 = vmul.f32 1.442695, %v2897_v3 }
 0x681   :  { %v10465_v51 = vpop.eup %9251 }
 0x682   :  { %v10467_v46 = vpop.eup %9253  ;;  %v2910_v45 = vmul.f32 1.442695, %v2891_v13  ;;  %v2951_v61 = vsel %vm1207_vm3, %v10465_v51, 0.0 }
 0x683   :  { %v2848_v17 = vpop.xlane.xlu0 %2847  ;;  %2952 = vadd.xlane.f32.xlu1 %v2951_v61  ;;  %v2948_v59 = vsel %vm1207_vm3, %v10467_v46, 0.0 }
 0x684   :  { %9255 = vpow2.f32 %v2910_v45  ;;  %v2890_v58 = vsub.f32 %v10380_v53, %v2848_v17  ;;  %2949 = vadd.xlane.f32.xlu0 %v2948_v59 }
 0x685   :  { %9257 = vpow2.f32 %v2922_v4 }
 0x686   :  { %v2908_v14 = vmul.f32 1.442695, %v2890_v58 }
 0x687   :  { %v2863_v12 = vpop.xlane.xlu1 %2862  ;;  %v2866_v8 = vpop.xlane.xlu0 %2865 }
 0x688   :  { %9259 = vpow2.f32 %v2908_v14  ;;  %v2895_v63 = vsub.f32 %v10390_v44, %v2863_v12  ;;  %v2896_v41 = vsub.f32 %v10385_v52, %v2866_v8 }
 0x68a   :  { %v2918_v5 = vmul.f32 1.442695, %v2895_v63  ;;  %v2920_v28 = vmul.f32 1.442695, %v2896_v41 }
 0x68b   :  { %v2860_v25 = vpop.xlane.xlu0 %2859  ;;  %v2881_v3 = vpop.xlane.xlu1 %2880 }
 0x68c   :  { %9261 = vpow2.f32 %v2918_v5  ;;  %v2894_v13 = vsub.f32 %v10398_v26, %v2860_v25  ;;  %v2901_v45 = vsub.f32 %v10395_v10, %v2881_v3 }
 0x68d   :  { %9263 = vpow2.f32 %v2920_v28 }
 0x68e   :  { %v10478_v53 = vpop.eup %9255  ;;  %v2916_v4 = vmul.f32 1.442695, %v2894_v13  ;;  %v2930_v61 = vmul.f32 1.442695, %v2901_v45 }
 0x68f   :  { %v2875_v17 = vpop.xlane.xlu1 %2874  ;;  %v2878_v59 = vpop.xlane.xlu0 %2877  ;;  %v2945_v44 = vsel %vm1207_vm3, %v10478_v53, 0.0 }
 0x690   :  { %v10482_v52 = vpop.eup %9257  ;;  %9265 = vpow2.f32 %v2916_v4  ;;  %v2899_v58 = vsub.f32 %v10410_v56, %v2875_v17  ;;  %v2900_v14 = vsub.f32 %v10403_v35, %v2878_v59  ;;  %2946 = vadd.xlane.f32.xlu1 %v2945_v44 }
 0x691   :  { %9267 = vpow2.f32 %v2930_v61  ;;  %v2963_v63 = vsel %vm1207_vm3, %v10482_v52, 0.0 }
 0x692   :  { %v10486_v10 = vpop.eup %9259  ;;  %v2926_v26 = vmul.f32 1.442695, %v2899_v58  ;;  %v2928_v12 = vmul.f32 1.442695, %v2900_v14 }
 0x693   :  { %v2872_v8 = vpop.xlane.xlu0 %2871  ;;  %v2942_v41 = vsel %vm1207_vm3, %v10486_v10, 0.0 }
 0x694   :  { %9269 = vpow2.f32 %v2926_v26  ;;  %v2898_v5 = vsub.f32 %v10413_v30, %v2872_v8  ;;  %2964 = vadd.xlane.f32.xlu1 %v2963_v63  ;;  %2943 = vadd.xlane.f32.xlu0 %v2942_v41 }
 0x695   :  { %9271 = vpow2.f32 %v2928_v12 }
 0x696   :  { %v10493_v35 = vpop.eup %9261  ;;  %v2924_v56 = vmul.f32 1.442695, %v2898_v5 }
 0x697   :  { %v10495_v28 = vpop.eup %9263  ;;  %v2957_v25 = vsel %vm1207_vm3, %v10493_v35, 0.0  ;;  %v2887_v26 = vpop.xlane.xlu1 %2886 }
 0x698   :  { %9273 = vpow2.f32 %v2924_v56  ;;  %2958 = vadd.xlane.f32.xlu1 %v2957_v25  ;;  %v2960_v3 = vsel %vm1207_vm3, %v10495_v28, 0.0  ;;  %v2903_v12 = vsub.f32 %v10422_v6, %v2887_v26  ;;  %v2884_v8 = vpop.xlane.xlu0 %2883  ;;  %v8851_v26 = vunpack.i.h.bf16 %v10437_v27 }
 0x699   :  { %2961 = vadd.xlane.f32.xlu0 %v2960_v3  ;;  %v2902_v41 = vsub.f32 %v10425_v37, %v2884_v8 }
 0x69a   :  { %v10501_v13 = vpop.eup %9265  ;;  %v2934_v63 = vmul.f32 1.442695, %v2903_v12  ;;  %v8850_v12 = vunpack.i.l.bf16 %v10437_v27 }
 0x69b   :  { %v10503_v30 = vpop.eup %9267  ;;  %v2954_v45 = vsel %vm1207_vm3, %v10501_v13, 0.0  ;;  %v2932_v5 = vmul.f32 1.442695, %v2902_v41  ;;  %v10537_v6 = vpop.permute.xlu1 %3714 }
 0x69c   :  { %v2975_v4 = vsel %vm1207_vm3, %v10503_v30, 0.0  ;;  %9275 = vpow2.f32 %v2934_v63  ;;  %v10539_v37 = vpop.permute.xlu0 %3712  ;;  %v8513_v41 = vpack.c.bf16 %v8851_v26, %v8850_v12 }
 0x69d   :  { %2976 = vadd.xlane.f32.xlu1 %v2975_v4  ;;  %2955 = vadd.xlane.f32.xlu0 %v2954_v45  ;;  %9277 = vpow2.f32 %v2932_v5  ;;  %v8861_v5 = vunpack.i.h.bf16 %v10441_v1 }
 0x69e   :  { %v10509_v61 = vpop.eup %9269 }
 0x69f   :  { %v10511_v17 = vpop.eup %9271  ;;  %v2969_v59 = vsel %vm1207_vm3, %v10509_v61, 0.0 }
 0x6a0   :  { %v2972_v44 = vsel %vm1207_vm3, %v10511_v17, 0.0 }
 0x6a1   :  { %2970 = vadd.xlane.f32.xlu1 %v2969_v59  ;;  %2973 = vadd.xlane.f32.xlu0 %v2972_v44 }
 0x6a2   :  { %v10517_v58 = vpop.eup %9273 }
 0x6a3   :  { %v2966_v14 = vsel %vm1207_vm3, %v10517_v58, 0.0 }
 0x6a5   :  { %2967 = vadd.xlane.f32.xlu0 %v2966_v14 }
 0x6a6   :  { %v10527_v56 = vpop.eup %9275 }
 0x6a7   :  { %v2981_v25 = vsel %vm1207_vm3, %v10527_v56, 0.0  ;;  %v10531_v3 = vpop.eup %9277 }
 0x6a8   :  { %v2978_v45 = vsel %vm1207_vm3, %v10531_v3, 0.0 }
 0x6b2   :  { %3805 = vrot.lane.b32.xlu1 %v9769_v7, %s9453_s18 }
 0x6bb   :  { %3803 = vrot.lane.b32.xlu0 %v9767_v31, %s9453_s18 }
 0x6d6   :  { %2982 = vadd.xlane.f32.xlu1 %v2981_v25  ;;  %v8860_v25 = vunpack.i.l.bf16 %v10441_v1 }
 0x6d8   :  { %v8521_v1 = vpack.c.bf16 %v8861_v5, %v8860_v25 }
 0x6da   :  { %2979 = vadd.xlane.f32.xlu0 %v2978_v45 }
 0x6e7   :  { %8893 = vrot.lane.b32.xlu1 %v9819_v39, %s9452_s4 }
 0x6eb   :  { %3896 = vrot.lane.b32.xlu1 %v9789_v19, %s9453_s18 }
 0x6ed   :  { %v2941_v4 = vpop.xlane.xlu1 %2940 }
 0x6ee   :  { %9279 = vrcp.f32 %v2941_v4  ;;  %v2938_v59 = vpop.xlane.xlu0 %2937 }
 0x6ef   :  { %3987 = vrot.lane.b32.xlu1 %v9791_v22, %s9453_s18  ;;  %9281 = vrcp.f32 %v2938_v59 }
 0x6f0   :  { %8888 = vrot.lane.b32.xlu0 %v9823_v40, %s9452_s4 }
 0x6f3   :  { %8898 = vrot.lane.b32.xlu1 %v9843_v50, %s9452_s4 }
 0x6f4   :  { %3894 = vrot.lane.b32.xlu0 %v9787_v18, %s9453_s18 }
 0x6f7   :  { %4167 = vrot.lane.b32.xlu1 %v9807_v33, %s9453_s18 }
 0x6f8   :  { %3985 = vrot.lane.b32.xlu0 %v9797_v16, %s9453_s18  ;;  %v9280_v44 = vpop.eup %9279 }
 0x6f9   :  { %v9282_v14 = vpop.eup %9281  ;;  %v3001_v63 = vmul.f32 %v9280_v44, %v10453_v11 }
 0x6fa   :  { %v3000_v8 = vmul.f32 %v9282_v14, %v10455_v9 }
 0x6fb   :  { %4169 = vrot.lane.b32.xlu1 %v9809_v34, %s9453_s18 }
 0x6fc   :  { %4076 = vrot.lane.b32.xlu0 %v9801_v0, %s9453_s18  ;;  %8073 = vmatprep.mubr.msk.f32.mxu0 %vm1207_vm3, %v3000_v8 }
 0x6fd   :  { %8074 = vmatmul.mubr.msk.f32.vlgmr.msra.gmra.mrb[28].mxu0 %vm1207_vm3, %v3001_v63  ;;  %v8856_v63 = vunpack.i.h.bf16 %v10435_v23 }
 0x6fe   :  { %8508 = vmatpush3.bf16.msra.mxu0 %v10312_v57 }
 0x6ff   :  { %4260 = vrot.lane.b32.xlu1 %v9835_v48, %s9453_s18  ;;  %8514 = vmatprep.subr.bf16.mxu0 %v8513_v41 }
 0x700   :  { %4078 = vrot.lane.b32.xlu0 %v9811_v38, %s9453_s18 }
 0x703   :  { %4351 = vrot.lane.b32.xlu1 %v9831_v42, %s9453_s18 }
 0x704   :  { %8903 = vrot.lane.b32.xlu0 %v9839_v49, %s9452_s4 }
 0x707   :  { %8913 = vrot.lane.b32.xlu1 %v9777_v43, %s9454_s19 }
 0x708   :  { %4258 = vrot.lane.b32.xlu0 %v9833_v24, %s9453_s18 }
 0x70b   :  { %8918 = vrot.lane.b32.xlu1 %v9795_v55, %s9454_s19 }
 0x70c   :  { %4349 = vrot.lane.b32.xlu0 %v9829_v36, %s9453_s18 }
 0x70f   :  { %8923 = vrot.lane.b32.xlu1 %v9805_v32, %s9454_s19 }
 0x710   :  { %8908 = vrot.lane.b32.xlu0 %v9781_v54, %s9454_s19  ;;  %v2953_v57 = vpop.xlane.xlu1 %2952 }
 0x711   :  { %9283 = vrcp.f32 %v2953_v57  ;;  %v2950_v9 = vpop.xlane.xlu0 %2949  ;;  %v8855_v57 = vunpack.i.l.bf16 %v10435_v23 }
 0x712   :  { %9285 = vrcp.f32 %v2950_v9 }
 0x713   :  { %8933 = vrot.lane.b32.xlu1 %v9819_v39, %s9454_s19 }
 0x714   :  { %8928 = vrot.lane.b32.xlu0 %v9823_v40, %s9454_s19 }
 0x717   :  { %8943 = vrot.lane.b32.xlu1 %v9839_v49, %s9454_s19 }
 0x718   :  { %8938 = vrot.lane.b32.xlu0 %v9843_v50, %s9454_s19 }
 0x71b   :  { %v9284_v11 = vpop.eup %9283  ;;  %8953 = vrot.lane.b32.xlu1 %v9777_v43, %s9455_s20 }
 0x71c   :  { %v9286_v27 = vpop.eup %9285  ;;  %8948 = vrot.lane.b32.xlu0 %v9781_v54, %s9455_s20  ;;  %v3005_v59 = vmul.f32 %v9284_v11, %v10465_v51 }
 0x71d   :  { %v2947_v45 = vpop.xlane.xlu1 %2946  ;;  %v3004_v4 = vmul.f32 %v9286_v27, %v10467_v46 }
 0x71e   :  { %9287 = vrcp.f32 %v2947_v45  ;;  %v8871_v45 = vunpack.i.h.bf16 %v10445_v15 }
 0x71f   :  { %5344 = vrot.lane.b32.xlu1 %v11674_v20, %s9456_s2  ;;  %8087 = vmatprep.mubr.msk.f32.mxu0 %vm1207_vm3, %v3004_v4  ;;  %v8870_v4 = vunpack.i.l.bf16 %v10445_v15 }
 0x720   :  { %8958 = vrot.lane.b32.xlu0 %v9795_v55, %s9455_s20  ;;  %8088 = vmatmul.mubr.msk.f32.vlgmr.msra.gmra.mrb[30].mxu0 %vm1207_vm3, %v3005_v59  ;;  %v8517_v59 = vpack.c.bf16 %v8856_v63, %v8855_v57  ;;  %v8875_v57 = vunpack.i.l.bf16 %v10443_v60 }
 0x721   :  { %v2965_v44 = vpop.xlane.xlu1 %2964  ;;  %8516 = vmatpush3.bf16.msra.mxu0 %v8513_v41  ;;  %v2944_v14 = vpop.xlane.xlu0 %2943 }
 0x722   :  { %8522 = vmatprep.subr.bf16.mxu0 %v8521_v1  ;;  %9289 = vrcp.f32 %v2944_v14  ;;  %v8529_v14 = vpack.c.bf16 %v8871_v45, %v8870_v4 }
 0x723   :  { %9291 = vrcp.f32 %v2965_v44 }
 0x725   :  { %v2959_v46 = vpop.xlane.xlu1 %2958 }
 0x726   :  { %v2962_v51 = vpop.xlane.xlu0 %2961 }
 0x727   :  { %9293 = vrcp.f32 %v2962_v51  ;;  %v8865_v51 = vunpack.i.l.bf16 %v10439_v2 }
 0x728   :  { %9295 = vrcp.f32 %v2959_v46  ;;  %v9288_v12 = vpop.eup %9287  ;;  %v8866_v46 = vunpack.i.h.bf16 %v10439_v2 }
 0x729   :  { %v3003_v27 = vmul.f32 %v9288_v12, %v10478_v53  ;;  %v8880_v12 = vunpack.i.l.bf16 %v10449_v21 }
 0x72a   :  { %v2977_v26 = vpop.xlane.xlu1 %2976  ;;  %v2956_v20 = vpop.xlane.xlu0 %2955 }
 0x72b   :  { %9297 = vrcp.f32 %v2956_v20  ;;  %v8881_v20 = vunpack.i.h.bf16 %v10449_v21 }
 0x72c   :  { %v9290_v8 = vpop.eup %9289  ;;  %9299 = vrcp.f32 %v2977_v26 }
 0x72d   :  { %v3002_v41 = vmul.f32 %v9290_v8, %v10486_v10  ;;  %v9292_v5 = vpop.eup %9291  ;;  %v8525_v8 = vpack.c.bf16 %v8866_v46, %v8865_v51 }
 0x72e   :  { %v2974_v9 = vpop.xlane.xlu0 %2973  ;;  %v2971_v11 = vpop.xlane.xlu1 %2970  ;;  %v3009_v53 = vmul.f32 %v9292_v5, %v10482_v52 }
 0x72f   :  { %9301 = vrcp.f32 %v2974_v9  ;;  %8080 = vmatprep.mubr.msk.f32.mxu1 %vm1207_vm3, %v3002_v41  ;;  %v8541_v9 = vpack.c.bf16 %v8881_v20, %v8880_v12 }
 0x730   :  { %8081 = vmatmul.mubr.msk.f32.vlgmr.msra.gmra.mrb[36].mxu1 %vm1207_vm3, %v3003_v27  ;;  %9303 = vrcp.f32 %v2971_v11 }
 0x731   :  { %v9294_v25 = vpop.eup %9293  ;;  %8512 = vmatpush3.bf16.msra.mxu1 %v10316_v47 }
 0x732   :  { %v2968_v23 = vpop.xlane.xlu0 %2967  ;;  %v3008_v10 = vmul.f32 %v9294_v25, %v10495_v28  ;;  %8518 = vmatprep.subr.bf16.mxu1 %v8517_v59  ;;  %v9296_v44 = vpop.eup %9295 }
 0x733   :  { %9305 = vrcp.f32 %v2968_v23  ;;  %v3007_v28 = vmul.f32 %v9296_v44, %v10493_v35  ;;  %v8876_v35 = vunpack.i.h.bf16 %v10443_v60 }
 0x734   :  { %8101 = vmatprep.mubr.msk.f32.mxu0 %vm1207_vm3, %v3008_v10  ;;  %v8886_v10 = vunpack.i.h.bf16 %v10447_v62 }
 0x735   :  { %8102 = vmatmul.mubr.msk.f32.vlgmr.msra.gmra.mrb[32].mxu0 %vm1207_vm3, %v3009_v53  ;;  %v9298_v15 = vpop.eup %9297  ;;  %v8535_v60 = vpack.c.bf16 %v8876_v35, %v8875_v57  ;;  %v8885_v53 = vunpack.i.l.bf16 %v10447_v62 }
 0x736   :  { %8524 = vmatpush3.bf16.msra.mxu0 %v8521_v1  ;;  %v3006_v47 = vmul.f32 %v9298_v15, %v10501_v13  ;;  %v9300_v52 = vpop.eup %9299 }
 0x737   :  { %8531 = vmatprep.subr.msk.bf16.mxu0 %vm9867_vm2, %v8529_v14  ;;  %v3013_v13 = vmul.f32 %v9300_v52, %v10503_v30 }
 0x738   :  { %8094 = vmatprep.mubr.msk.f32.mxu1 %vm1207_vm3, %v3006_v47 }
 0x739   :  { %v9302_v26 = vpop.eup %9301  ;;  %8095 = vmatmul.mubr.msk.f32.vlgmr.msra.gmra.mrb[38].mxu1 %vm1207_vm3, %v3007_v28  ;;  %v8547_v28 = vpack.c.bf16 %v8886_v10, %v8885_v53 }
 0x73a   :  { %8520 = vmatpush3.bf16.msra.mxu1 %v8517_v59  ;;  %v3012_v2 = vmul.f32 %v9302_v26, %v10511_v17  ;;  %v9304_v1 = vpop.eup %9303  ;;  %v3806_v17 = vpop.permute.xlu1 %3805 }
 0x73b   :  { %8526 = vmatprep.subr.bf16.mxu1 %v8525_v8  ;;  %v3011_v30 = vmul.f32 %v9304_v1, %v10509_v61  ;;  %v3804_v61 = vpop.permute.xlu0 %3803 }
 0x73c   :  { %8115 = vmatprep.mubr.msk.f32.mxu0 %vm1207_vm3, %v3012_v2 }
 0x73d   :  { %v9306_v63 = vpop.eup %9305  ;;  %8116 = vmatmul.mubr.msk.f32.vlgmr.msra.gmra.mrb[34].mxu0 %vm1207_vm3, %v3013_v13 }
 0x73e   :  { %v3010_v21 = vmul.f32 %v9306_v63, %v10517_v58  ;;  %8129 = vmatprep.mubr.msk.f32.mxu0 %vm468_vm1, %v10539_v37 }
 0x73f   :  { %8534 = vmatpush3.bf16.xpose.msk.msra.mxu0 %vm9867_vm2, %v8529_v14 }
 0x740   :  { %8543 = vmatprep.subr.msk.bf16.mxu0 %vm9867_vm2, %v8541_v9  ;;  %8108 = vmatprep.mubr.msk.f32.mxu1 %vm1207_vm3, %v3010_v21 }
 0x741   :  { %8109 = vmatmul.mubr.msk.f32.vlgmr.msra.gmra.mrb[40].mxu1 %vm1207_vm3, %v3011_v30 }
 0x742   :  { %8528 = vmatpush3.bf16.msra.mxu1 %v8525_v8 }
 0x743   :  { %8537 = vmatprep.subr.msk.bf16.mxu1 %vm9867_vm2, %v8535_v60 }
 0x746   :  { %8130 = vmatmul.mubr.msk.f32.vlgmr.msra.gmra.mrb[36].mxu0 %vm468_vm1, %v10537_v6 }
 0x747   :  { %8546 = vmatpush3.bf16.xpose.msk.msra.mxu0 %vm9867_vm2, %v8541_v9 }
 0x763   :  { %v2983_v58 = vpop.xlane.xlu1 %2982 }
 0x764   :  { %9307 = vrcp.f32 %v2983_v58 }
 0x767   :  { %v8894_v37 = vpop.permute.xlu1 %8893  ;;  %v2980_v41 = vpop.xlane.xlu0 %2979 }
 0x768   :  { %9309 = vrcp.f32 %v2980_v41 }
 0x76b   :  { %v3897_v11 = vpop.permute.xlu1 %3896  ;;  %v8889_v27 = vpop.permute.xlu0 %8888 }
 0x76c   :  { %v8891_v5 = vunpack.i.h.bf16 %v8889_v27  ;;  %v8890_v25 = vunpack.i.l.bf16 %v8889_v27 }
 0x76e   :  { %v8553_v45 = vpack.c.bf16 %v8891_v5, %v8890_v25  ;;  %v9308_v6 = vpop.eup %9307 }
 0x76f   :  { %v3988_v4 = vpop.permute.xlu1 %3987  ;;  %v3895_v59 = vpop.permute.xlu0 %3894  ;;  %v3015_v47 = vmul.f32 %v9308_v6, %v10527_v56  ;;  %v8896_v56 = vunpack.i.h.bf16 %v8894_v37 }
 0x770   :  { %8143 = vmatprep.mubr.msk.f32.mxu0 %vm468_vm1, %v3895_v59  ;;  %8555 = vmatprep.subr.msk.bf16.mxu0 %vm9867_vm2, %v8553_v45 }
 0x771   :  { %8144 = vmatmul.mubr.msk.f32.vlgmr.msra.gmra.mrb[38].mxu0 %vm468_vm1, %v3897_v11 }
 0x772   :  { %v9310_v23 = vpop.eup %9309  ;;  %8558 = vmatpush3.bf16.xpose.msk.msra.mxu0 %vm9867_vm2, %v8553_v45 }
 0x773   :  { %v8899_v44 = vpop.permute.xlu1 %8898  ;;  %v3986_v14 = vpop.permute.xlu0 %3985  ;;  %v3014_v15 = vmul.f32 %v9310_v23, %v10531_v3  ;;  %v8895_v3 = vunpack.i.l.bf16 %v8894_v37 }
 0x774   :  { %v8901_v46 = vunpack.i.h.bf16 %v8899_v44  ;;  %v8900_v51 = vunpack.i.l.bf16 %v8899_v44 }
 0x775   :  { %8122 = vmatprep.mubr.msk.f32.mxu1 %vm1207_vm3, %v3014_v15  ;;  %v8559_v8 = vpack.c.bf16 %v8896_v56, %v8895_v3 }
 0x776   :  { %v8565_v52 = vpack.c.bf16 %v8901_v46, %v8900_v51  ;;  %8123 = vmatmul.mubr.msk.f32.vlgmr.msra.gmra.mrb[42].mxu1 %vm1207_vm3, %v3015_v47 }
 0x777   :  { %8540 = vmatpush3.bf16.xpose.msk.msra.mxu1 %vm9867_vm2, %v8535_v60  ;;  %v4168_v62 = vpop.permute.xlu1 %4167  ;;  %8136 = vmatprep.mubr.msk.f32.mxu1 %vm468_vm1, %v3804_v61  ;;  %v4077_v26 = vpop.permute.xlu0 %4076 }
 0x778   :  { %8549 = vmatprep.subr.msk.bf16.mxu1 %vm9867_vm2, %v8547_v28  ;;  %8157 = vmatprep.mubr.msk.f32.mxu0 %vm468_vm1, %v4077_v26 }
 0x779   :  { %8567 = vmatprep.subr.msk.bf16.mxu0 %vm9867_vm2, %v8565_v52 }
 0x77b   :  { %v4170_v20 = vpop.permute.xlu1 %4169  ;;  %v4079_v12 = vpop.permute.xlu0 %4078 }
 0x77c   :  { %8158 = vmatmul.mubr.msk.f32.vlgmr.msra.gmra.mrb[40].mxu0 %vm468_vm1, %v4079_v12 }
 0x77d   :  { %8570 = vmatpush3.bf16.xpose.msk.msra.mxu0 %vm9867_vm2, %v8565_v52 }
 0x77e   :  { %8137 = vmatmul.mubr.msk.f32.vlgmr.msra.gmra.mrb[44].mxu1 %vm468_vm1, %v3806_v17 }
 0x77f   :  { %8552 = vmatpush3.bf16.xpose.msk.msra.mxu1 %vm9867_vm2, %v8547_v28  ;;  %8150 = vmatprep.mubr.msk.f32.mxu1 %vm468_vm1, %v3986_v14  ;;  %v4261_v2 = vpop.permute.xlu1 %4260  ;;  %v8904_v1 = vpop.permute.xlu0 %8903 }
 0x780   :  { %8561 = vmatprep.subr.msk.bf16.mxu1 %vm9867_vm2, %v8559_v8  ;;  %v8906_v13 = vunpack.i.h.bf16 %v8904_v1  ;;  %v8905_v63 = vunpack.i.l.bf16 %v8904_v1 }
 0x782   :  { %v8571_v9 = vpack.c.bf16 %v8906_v13, %v8905_v63 }
 0x783   :  { %v4352_v35 = vpop.permute.xlu1 %4351  ;;  %v4259_v57 = vpop.permute.xlu0 %4258 }
 0x784   :  { %8171 = vmatprep.mubr.msk.f32.mxu0 %vm468_vm1, %v4259_v57 }
 0x785   :  { %8172 = vmatmul.mubr.msk.f32.vlgmr.msra.gmra.mrb[42].mxu0 %vm468_vm1, %v4261_v2 }
 0x786   :  { %8151 = vmatmul.mubr.msk.f32.vlgmr.msra.gmra.mrb[46].mxu1 %vm468_vm1, %v3988_v4 }
 0x787   :  { %8564 = vmatpush3.bf16.xpose.msk.msra.mxu1 %vm9867_vm2, %v8559_v8  ;;  %8164 = vmatprep.mubr.msk.f32.mxu1 %vm468_vm1, %v4168_v62  ;;  %v8914_v21 = vpop.permute.xlu1 %8913  ;;  %v4350_v30 = vpop.permute.xlu0 %4349 }
 0x788   :  { %8573 = vmatprep.subr.msk.bf16.mxu1 %vm9867_vm2, %v8571_v9  ;;  %v8916_v60 = vunpack.i.h.bf16 %v8914_v21  ;;  %v8915_v17 = vunpack.i.l.bf16 %v8914_v21 }
 0x78a   :  { %v8581_v5 = vpack.c.bf16 %v8916_v60, %v8915_v17  ;;  %v10746_v17 = vld [vmem:[%s11587_s1] sm:$0xff] }
 0x78b   :  { %v8919_v61 = vpop.permute.xlu1 %8918  ;;  %v8909_v58 = vpop.permute.xlu0 %8908 }
 0x78c   :  { %v8921_v37 = vunpack.i.h.bf16 %v8919_v61  ;;  %v8920_v41 = vunpack.i.l.bf16 %v8919_v61  ;;  %v8911_v11 = vunpack.i.h.bf16 %v8909_v58  ;;  %v8910_v27 = vunpack.i.l.bf16 %v8909_v58 }
 0x78e   :  { %8165 = vmatmul.mubr.msk.f32.vlgmr.msra.gmra.mrb[48].mxu1 %vm468_vm1, %v4170_v20  ;;  %v8577_v25 = vpack.c.bf16 %v8911_v11, %v8910_v27  ;;  %v10686_v4 = vpack.c.bf16 %v8921_v37, %v8920_v41 }
 0x78f   :  { %8576 = vmatpush3.bf16.xpose.msk.msra.mxu1 %vm9867_vm2, %v8571_v9  ;;  %8178 = vmatprep.mubr.msk.f32.mxu1 %vm468_vm1, %v4350_v30  ;;  %v8924_v45 = vpop.permute.xlu1 %8923  ;;  %v10738_v30 = vld [vmem:[%s11587_s1 + $0x8] sm:$0xff] }
 0x790   :  { %8582 = vmatprep.subr.bf16.mxu1 %v8581_v5  ;;  %8578 = vmatprep.subr.bf16.mxu0 %v8577_v25  ;;  %v8926_v59 = vunpack.i.h.bf16 %v8924_v45  ;;  %v8925_v6 = vunpack.i.l.bf16 %v8924_v45 }
 0x791   :  { %8580 = vmatpush3.bf16.msra.mxu0 %v8577_v25  ;;  %v10758_v25 = vld [vmem:[%s11587_s1 + $0x28] sm:$0xff] }
 0x792   :  { %8586 = vmatprep.subr.bf16.mxu0 %v10686_v4  ;;  %v10690_v23 = vpack.c.bf16 %v8926_v59, %v8925_v6  ;;  %v10766_v59 = vld [vmem:[%s11587_s1 + $0x20] sm:$0xff] }
 0x796   :  { %8179 = vmatmul.mubr.msk.f32.vlgmr.msra.gmra.mrb[50].mxu1 %vm468_vm1, %v4352_v35 }
 0x797   :  { %8584 = vmatpush3.bf16.msra.mxu1 %v8581_v5 }
 0x798   :  { %8590 = vmatprep.subr.bf16.mxu1 %v10690_v23 }
 0x7d0   :  { %v10693_v10 = vpop.f32.mrb[28].mxu0 }
 0x7d1   :  { %11675 = vst [vmem:[#allocation12_spill] sm:$0xff] %v10693_v10  ;;  %v10695_v53 = vpop.f32.mrb[29].mxu0 }
 0x7d2   :  { %11676 = vst [vmem:[#allocation9_spill] sm:$0xff] %v10695_v53 }
 0x7f3   :  { %v10699_v14 = vpop.f32.mrb[30].mxu0 }
 0x7f4   :  { %11677 = vst [vmem:[#allocation10_spill] sm:$0xff] %v10699_v14  ;;  %v10701_v15 = vpop.f32.mrb[31].mxu0 }
 0x7f5   :  { %11678 = vst [vmem:[#allocation13_spill] sm:$0xff] %v10701_v15 }
 0x803   :  { %v10705_v51 = vpop.f32.mrb[36].mxu1 }
 0x804   :  { %11679 = vst [vmem:[#allocation14_spill] sm:$0xff] %v10705_v51  ;;  %v10707_v47 = vpop.f32.mrb[37].mxu1 }
 0x805   :  { %11680 = vst [vmem:[#allocation2_spill] sm:$0xff] %v10707_v47 }
 0x808   :  { %v10711_v52 = vpop.f32.mrb[32].mxu0 }
 0x809   :  { %11681 = vst [vmem:[#allocation29_spill] sm:$0xff] %v10711_v52  ;;  %v10713_v62 = vpop.f32.mrb[33].mxu0 }
 0x80a   :  { %11682 = vst [vmem:[#allocation30_spill] sm:$0xff] %v10713_v62 }
 0x80c   :  { %v10717_v56 = vpop.f32.mrb[38].mxu1 }
 0x80d   :  { %11683 = vst [vmem:[#allocation31_spill] sm:$0xff] %v10717_v56  ;;  %v10719_v3 = vpop.f32.mrb[39].mxu1 }
 0x80e   :  { %11684 = vst [vmem:[#allocation32_spill] sm:$0xff] %v10719_v3 }
 0x810   :  { %v10723_v12 = vpop.f32.mrb[34].mxu0 }
 0x811   :  { %11685 = vst [vmem:[#allocation33_spill] sm:$0xff] %v10723_v12  ;;  %v10725_v8 = vpop.f32.mrb[35].mxu0 }
 0x812   :  { %11686 = vst [vmem:[#allocation34_spill] sm:$0xff] %v10725_v8 }
 0x814   :  { %v10729_v1 = vpop.f32.mrb[40].mxu1 }
 0x815   :  { %11687 = vst [vmem:[#allocation35_spill] sm:$0xff] %v10729_v1  ;;  %v10731_v13 = vpop.f32.mrb[41].mxu1 }
 0x816   :  { %11688 = vst [vmem:[#allocation36_spill] sm:$0xff] %v10731_v13 }
 0x819   :  { %v8131_v35 = vpop.f32.mrb[36].mxu0 }
 0x81a   :  { %v4441_v57 = vmul.f32 0.35355338, %v8131_v35  ;;  %v3794_v9 = vpop.f32.mrb[37].mxu0 }
 0x81b   :  { %v4440_v21 = vmul.f32 0.35355338, %v3794_v9 }
 0x81c   :  { %v10741_v60 = vadd.f32 %v10738_v30, %v4441_v57 }
 0x81d   :  { %v10749_v61 = vadd.f32 %v10746_v17, %v4440_v21 }
 0x81e   :  { %v4475_v58 = vsel %vm1207_vm3, %v10741_v60, -inf }
 0x81f   :  { %4476 = vmax.xlane.f32.xlu1 %v4475_v58  ;;  %v4472_v37 = vsel %vm1207_vm3, %v10749_v61, -inf }
 0x820   :  { %4473 = vmax.xlane.f32.xlu0 %v4472_v37 }
 0x844   :  { %v8145_v41 = vpop.f32.mrb[38].mxu0 }
 0x845   :  { %v4445_v11 = vmul.f32 0.35355338, %v8145_v41  ;;  %v3976_v27 = vpop.f32.mrb[39].mxu0 }
 0x846   :  { %v4444_v5 = vmul.f32 0.35355338, %v3976_v27 }
 0x847   :  { %v10761_v45 = vadd.f32 %v10758_v25, %v4445_v11 }
 0x848   :  { %v10769_v6 = vadd.f32 %v10766_v59, %v4444_v5 }
 0x849   :  { %v10771_v35 = vpop.f32.mrb[42].mxu1  ;;  %v4487_v57 = vsel %vm1207_vm3, %v10761_v45, -inf }
 0x84a   :  { %11689 = vst [vmem:[#allocation37_spill] sm:$0xff] %v10771_v35  ;;  %v10775_v9 = vpop.f32.mrb[43].mxu1  ;;  %4488 = vmax.xlane.f32.xlu1 %v4487_v57  ;;  %v4484_v21 = vsel %vm1207_vm3, %v10769_v6, -inf  ;;  %v10787_v57 = vld [vmem:[%s11587_s1 + $0x18] sm:$0xff] }
 0x84b   :  { %11690 = vst [vmem:[#allocation38_spill] sm:$0xff] %v10775_v9  ;;  %4485 = vmax.xlane.f32.xlu0 %v4484_v21 }
 0x84f   :  { %v8159_v37 = vpop.f32.mrb[40].mxu0 }
 0x850   :  { %v4449_v41 = vmul.f32 0.35355338, %v8159_v37  ;;  %v4158_v11 = vpop.f32.mrb[41].mxu0 }
 0x851   :  { %v8138_v27 = vpop.f32.mrb[44].mxu1  ;;  %v4448_v37 = vmul.f32 0.35355338, %v4158_v11 }
 0x852   :  { %v10782_v5 = vadd.f32 %v10738_v30, %v4449_v41  ;;  %v4443_v2 = vmul.f32 0.35355338, %v8138_v27  ;;  %v3885_v26 = vpop.f32.mrb[45].mxu1  ;;  %v10797_v41 = vld [vmem:[%s11587_s1 + $0x10] sm:$0xff] }
 0x853   :  { %v4442_v46 = vmul.f32 0.35355338, %v3885_v26  ;;  %11691 = vst [vmem:[#allocation39_spill] sm:$0xff] %v10797_v41 }
 0x854   :  { %v10790_v63 = vadd.f32 %v10787_v57, %v4443_v2  ;;  %v4499_v21 = vsel %vm1207_vm3, %v10782_v5, -inf  ;;  %v10805_v2 = vadd.f32 %v10746_v17, %v4448_v37 }
 0x855   :  { %4500 = vmax.xlane.f32.xlu1 %v4499_v21  ;;  %v10800_v26 = vadd.f32 %v10797_v41, %v4442_v46  ;;  %v10812_v46 = vld [vmem:[%s11587_s1 + $0x38] sm:$0xff] }
 0x856   :  { %v4481_v27 = vsel %vm1207_vm3, %v10790_v63, -inf  ;;  %11692 = vst [vmem:[#allocation40_spill] sm:$0xff] %v10812_v46  ;;  %v4496_v37 = vsel %vm1207_vm3, %v10805_v2, -inf }
 0x857   :  { %4482 = vmax.xlane.f32.xlu0 %v4481_v27  ;;  %v4478_v9 = vsel %vm1207_vm3, %v10800_v26, -inf }
 0x858   :  { %v8173_v58 = vpop.f32.mrb[42].mxu0 }
 0x859   :  { %v8152_v44 = vpop.f32.mrb[46].mxu1  ;;  %v4340_v20 = vpop.f32.mrb[43].mxu0  ;;  %v4453_v21 = vmul.f32 0.35355338, %v8173_v58  ;;  %v10825_v58 = vld [vmem:[%s11587_s1 + $0x30] sm:$0xff]  ;;  %s9457_s1 = smov 40  }
 0x85a   :  { %v4447_v11 = vmul.f32 0.35355338, %v8152_v44  ;;  %v4067_v28 = vpop.f32.mrb[47].mxu1  ;;  %11693 = vst [vmem:[#allocation41_spill] sm:$0xff] %v10825_v58 }
 0x85b   :  { %v4446_v35 = vmul.f32 0.35355338, %v4067_v28  ;;  %4479 = vmax.xlane.f32.xlu0 %v4478_v9  ;;  %v10820_v44 = vadd.f32 %v10758_v25, %v4453_v21  ;;  %v4452_v9 = vmul.f32 0.35355338, %v4340_v20 }
 0x85c   :  { %v10815_v27 = vadd.f32 %v10812_v46, %v4447_v11 }
 0x85d   :  { %v10828_v28 = vadd.f32 %v10825_v58, %v4446_v35  ;;  %v10833_v12 = vadd.f32 %v10766_v59, %v4452_v9  ;;  %v4511_v15 = vsel %vm1207_vm3, %v10820_v44, -inf }
 0x85e   :  { %v4493_v8 = vsel %vm1207_vm3, %v10815_v27, -inf }
 0x85f   :  { %4494 = vmax.xlane.f32.xlu1 %v4493_v8  ;;  %4497 = vmax.xlane.f32.xlu0 %v4496_v37  ;;  %v4490_v52 = vsel %vm1207_vm3, %v10828_v28, -inf  ;;  %v4508_v9 = vsel %vm1207_vm3, %v10833_v12, -inf }
 0x861   :  { %v8166_v11 = vpop.f32.mrb[48].mxu1 }
 0x862   :  { %v4451_v21 = vmul.f32 0.35355338, %v8166_v11  ;;  %v4249_v62 = vpop.f32.mrb[49].mxu1 }
 0x863   :  { %v4450_v35 = vmul.f32 0.35355338, %v4249_v62  ;;  %4491 = vmax.xlane.f32.xlu0 %v4490_v52  ;;  %4512 = vmax.xlane.f32.xlu1 %v4511_v15 }
 0x864   :  { %v10840_v20 = vadd.f32 %v10787_v57, %v4451_v21 }
 0x865   :  { %v10843_v8 = vadd.f32 %v10797_v41, %v4450_v35 }
 0x866   :  { %v4505_v37 = vsel %vm1207_vm3, %v10840_v20, -inf }
 0x867   :  { %4506 = vmax.xlane.f32.xlu1 %v4505_v37  ;;  %4509 = vmax.xlane.f32.xlu0 %v4508_v9  ;;  %v4502_v15 = vsel %vm1207_vm3, %v10843_v8, -inf  ;;  %v11694_v9 = vld [vmem:[#allocation3_spill] sm:$0xff] }
 0x869   :  { %v8180_v11 = vpop.f32.mrb[50].mxu1 }
 0x86a   :  { %v4455_v14 = vmul.f32 0.35355338, %v8180_v11  ;;  %v4431_v13 = vpop.f32.mrb[51].mxu1 }
 0x86b   :  { %v4454_v52 = vmul.f32 0.35355338, %v4431_v13  ;;  %4503 = vmax.xlane.f32.xlu0 %v4502_v15  ;;  %v10865_v13 = vpop.permute.xlu1 %8933 }
 0x86c   :  { %v10852_v62 = vadd.f32 %v10812_v46, %v4455_v14  ;;  %v10867_v14 = vpop.permute.xlu0 %8928 }
 0x86d   :  { %v10855_v21 = vadd.f32 %v10825_v58, %v4454_v52 }
 0x86e   :  { %v4517_v35 = vsel %vm1207_vm3, %v10852_v62, -inf }
 0x86f   :  { %4518 = vmax.xlane.f32.xlu1 %v4517_v35  ;;  %v4514_v37 = vsel %vm1207_vm3, %v10855_v21, -inf  ;;  %v10869_v11 = vpop.permute.xlu1 %8943 }
 0x870   :  { %4515 = vmax.xlane.f32.xlu0 %v4514_v37  ;;  %v10871_v15 = vpop.permute.xlu0 %8938 }
 0x873   :  { %v10873_v52 = vpop.permute.xlu1 %8953 }
 0x874   :  { %v10875_v35 = vpop.permute.xlu0 %8948 }
 0x877   :  { %v10877_v1 = vpop.permute.xlu1 %5344 }
 0x878   :  { %v10879_v37 = vpop.permute.xlu0 %8958 }
 0x880   :  { %5346 = vrot.lane.b32.xlu1 %v11694_v9, %s9456_s2 }
 0x886   :  { %8963 = vrot.lane.b32.xlu0 %v9805_v32, %s9455_s20 }
 0x8ac   :  { %v4477_v9 = vpop.xlane.xlu1 %4476 }
 0x8ad   :  { %v4521_v53 = vsub.f32 %v10741_v60, %v4477_v9  ;;  %v4474_v10 = vpop.xlane.xlu0 %4473 }
 0x8ae   :  { %v4520_v3 = vsub.f32 %v10749_v61, %v4474_v10 }
 0x8af   :  { %v4538_v56 = vmul.f32 1.442695, %v4521_v53 }
 0x8b0   :  { %v4536_v47 = vmul.f32 1.442695, %v4520_v3 }
 0x8b1   :  { %9311 = vpow2.f32 %v4538_v56 }
 0x8b2   :  { %9313 = vpow2.f32 %v4536_v47 }
 0x8bb   :  { %v10883_v51 = vpop.eup %9311 }
 0x8bc   :  { %v10885_v55 = vpop.eup %9313  ;;  %v4571_v32 = vsel %vm1207_vm3, %v10883_v51, 0.0 }
 0x8bd   :  { %4572 = vadd.xlane.f32.xlu1 %v4571_v32  ;;  %v4568_v54 = vsel %vm1207_vm3, %v10885_v55, 0.0 }
 0x8be   :  { %4569 = vadd.xlane.f32.xlu0 %v4568_v54 }
 0x8d7   :  { %v4489_v60 = vpop.xlane.xlu1 %4488 }
 0x8d8   :  { %v4525_v9 = vsub.f32 %v10761_v45, %v4489_v60  ;;  %v4486_v10 = vpop.xlane.xlu0 %4485 }
 0x8d9   :  { %v4524_v53 = vsub.f32 %v10769_v6, %v4486_v10 }
 0x8da   :  { %v4546_v56 = vmul.f32 1.442695, %v4525_v9 }
 0x8db   :  { %v4544_v47 = vmul.f32 1.442695, %v4524_v53 }
 0x8dc   :  { %9315 = vpow2.f32 %v4546_v56 }
 0x8dd   :  { %9317 = vpow2.f32 %v4544_v47 }
 0x8e2   :  { %v4501_v3 = vpop.xlane.xlu1 %4500 }
 0x8e3   :  { %v4529_v61 = vsub.f32 %v10782_v5, %v4501_v3 }
 0x8e4   :  { %v4483_v43 = vpop.xlane.xlu0 %4482 }
 0x8e5   :  { %v4523_v32 = vsub.f32 %v10790_v63, %v4483_v43  ;;  %v4554_v54 = vmul.f32 1.442695, %v4529_v61 }
 0x8e6   :  { %v10895_v58 = vpop.eup %9315 }
 0x8e7   :  { %v10897_v46 = vpop.eup %9317  ;;  %v4542_v41 = vmul.f32 1.442695, %v4523_v32  ;;  %v4583_v45 = vsel %vm1207_vm3, %v10895_v58, 0.0 }
 0x8e8   :  { %v4480_v6 = vpop.xlane.xlu0 %4479  ;;  %4584 = vadd.xlane.f32.xlu1 %v4583_v45  ;;  %v4580_v60 = vsel %vm1207_vm3, %v10897_v46, 0.0 }
 0x8e9   :  { %9319 = vpow2.f32 %v4542_v41  ;;  %v4522_v5 = vsub.f32 %v10800_v26, %v4480_v6  ;;  %4581 = vadd.xlane.f32.xlu0 %v4580_v60 }
 0x8ea   :  { %9321 = vpow2.f32 %v4554_v54 }
 0x8eb   :  { %v4540_v43 = vmul.f32 1.442695, %v4522_v5 }
 0x8ec   :  { %v4495_v63 = vpop.xlane.xlu1 %4494  ;;  %v4498_v9 = vpop.xlane.xlu0 %4497 }
 0x8ed   :  { %9323 = vpow2.f32 %v4540_v43  ;;  %v4527_v10 = vsub.f32 %v10815_v27, %v4495_v63  ;;  %v4528_v53 = vsub.f32 %v10805_v2, %v4498_v9 }
 0x8ef   :  { %v4550_v56 = vmul.f32 1.442695, %v4527_v10  ;;  %v4552_v47 = vmul.f32 1.442695, %v4528_v53 }
 0x8f0   :  { %v4492_v3 = vpop.xlane.xlu0 %4491  ;;  %v4513_v61 = vpop.xlane.xlu1 %4512 }
 0x8f1   :  { %9325 = vpow2.f32 %v4550_v56  ;;  %v4526_v32 = vsub.f32 %v10828_v28, %v4492_v3  ;;  %v4533_v41 = vsub.f32 %v10820_v44, %v4513_v61 }
 0x8f2   :  { %9327 = vpow2.f32 %v4552_v47 }
 0x8f3   :  { %v10908_v26 = vpop.eup %9319  ;;  %v4548_v54 = vmul.f32 1.442695, %v4526_v32  ;;  %v4562_v45 = vmul.f32 1.442695, %v4533_v41 }
 0x8f4   :  { %v4507_v6 = vpop.xlane.xlu1 %4506  ;;  %v4510_v60 = vpop.xlane.xlu0 %4509  ;;  %v4577_v27 = vsel %vm1207_vm3, %v10908_v26, 0.0 }
 0x8f5   :  { %v10912_v2 = vpop.eup %9321  ;;  %9329 = vpow2.f32 %v4548_v54  ;;  %v4531_v5 = vsub.f32 %v10840_v20, %v4507_v6  ;;  %v4532_v43 = vsub.f32 %v10833_v12, %v4510_v60  ;;  %4578 = vadd.xlane.f32.xlu1 %v4577_v27 }
 0x8f6   :  { %9331 = vpow2.f32 %v4562_v45  ;;  %v4595_v10 = vsel %vm1207_vm3, %v10912_v2, 0.0 }
 0x8f7   :  { %v10916_v44 = vpop.eup %9323  ;;  %v4558_v28 = vmul.f32 1.442695, %v4531_v5  ;;  %v4560_v63 = vmul.f32 1.442695, %v4532_v43 }
 0x8f8   :  { %v4504_v9 = vpop.xlane.xlu0 %4503  ;;  %v4574_v53 = vsel %vm1207_vm3, %v10916_v44, 0.0 }
 0x8f9   :  { %9333 = vpow2.f32 %v4558_v28  ;;  %v4530_v56 = vsub.f32 %v10843_v8, %v4504_v9  ;;  %4596 = vadd.xlane.f32.xlu1 %v4595_v10  ;;  %4575 = vadd.xlane.f32.xlu0 %v4574_v53 }
 0x8fa   :  { %9335 = vpow2.f32 %v4560_v63 }
 0x8fb   :  { %v10923_v12 = vpop.eup %9325  ;;  %v4556_v20 = vmul.f32 1.442695, %v4530_v56 }
 0x8fc   :  { %v10925_v47 = vpop.eup %9327  ;;  %v4589_v3 = vsel %vm1207_vm3, %v10923_v12, 0.0  ;;  %v4519_v28 = vpop.xlane.xlu1 %4518 }
 0x8fd   :  { %9337 = vpow2.f32 %v4556_v20  ;;  %4590 = vadd.xlane.f32.xlu1 %v4589_v3  ;;  %v4592_v61 = vsel %vm1207_vm3, %v10925_v47, 0.0  ;;  %v4535_v63 = vsub.f32 %v10852_v62, %v4519_v28  ;;  %v4516_v9 = vpop.xlane.xlu0 %4515 }
 0x8fe   :  { %4593 = vadd.xlane.f32.xlu0 %v4592_v61  ;;  %v4534_v53 = vsub.f32 %v10855_v21, %v4516_v9  ;;  %v8936_v9 = vunpack.i.h.bf16 %v10865_v13 }
 0x8ff   :  { %v10931_v32 = vpop.eup %9329  ;;  %v4566_v10 = vmul.f32 1.442695, %v4535_v63 }
 0x900   :  { %v10933_v8 = vpop.eup %9331  ;;  %v4586_v41 = vsel %vm1207_vm3, %v10931_v32, 0.0  ;;  %v4564_v56 = vmul.f32 1.442695, %v4534_v53 }
 0x901   :  { %v4607_v54 = vsel %vm1207_vm3, %v10933_v8, 0.0  ;;  %9339 = vpow2.f32 %v4566_v10  ;;  %v10967_v62 = vpop.permute.xlu0 %8963  ;;  %v8935_v10 = vunpack.i.l.bf16 %v10865_v13 }
 0x902   :  { %4608 = vadd.xlane.f32.xlu1 %v4607_v54  ;;  %4587 = vadd.xlane.f32.xlu0 %v4586_v41  ;;  %9341 = vpow2.f32 %v4564_v56 }
 0x903   :  { %v10939_v45 = vpop.eup %9333 }
 0x904   :  { %v10941_v6 = vpop.eup %9335  ;;  %v4601_v60 = vsel %vm1207_vm3, %v10939_v45, 0.0 }
 0x905   :  { %v4604_v27 = vsel %vm1207_vm3, %v10941_v6, 0.0 }
 0x906   :  { %4602 = vadd.xlane.f32.xlu1 %v4601_v60  ;;  %4605 = vadd.xlane.f32.xlu0 %v4604_v27  ;;  %v8931_v27 = vunpack.i.h.bf16 %v10867_v14 }
 0x907   :  { %v10947_v5 = vpop.eup %9337 }
 0x908   :  { %v4598_v43 = vsel %vm1207_vm3, %v10947_v5, 0.0 }
 0x90a   :  { %4599 = vadd.xlane.f32.xlu0 %v4598_v43  ;;  %v8930_v43 = vunpack.i.l.bf16 %v10867_v14 }
 0x90b   :  { %v10957_v20 = vpop.eup %9339 }
 0x90c   :  { %v4613_v3 = vsel %vm1207_vm3, %v10957_v20, 0.0  ;;  %v10961_v61 = vpop.eup %9341 }
 0x917   :  { %5437 = vrot.lane.b32.xlu1 %v9769_v7, %s9456_s2  ;;  %v10965_v7 = vpop.permute.xlu1 %5346 }
 0x920   :  { %5435 = vrot.lane.b32.xlu0 %v9767_v31, %s9456_s2  ;;  %v4610_v31 = vsel %vm1207_vm3, %v10961_v61, 0.0 }
 0x93b   :  { %4614 = vadd.xlane.f32.xlu1 %v4613_v3 }
 0x93f   :  { %4611 = vadd.xlane.f32.xlu0 %v4610_v31 }
 0x94a   :  { %v4573_v21 = vpop.xlane.xlu1 %4572 }
 0x94b   :  { %9343 = vrcp.f32 %v4573_v21  ;;  %v4570_v41 = vpop.xlane.xlu0 %4569 }
 0x94c   :  { %5526 = vrot.lane.b32.xlu1 %v9787_v18, %s9456_s2  ;;  %9345 = vrcp.f32 %v4570_v41 }
 0x950   :  { %5528 = vrot.lane.b32.xlu1 %v9789_v19, %s9456_s2  ;;  %v8593_v19 = vpack.c.bf16 %v8931_v27, %v8930_v43  ;;  %v8597_v27 = vpack.c.bf16 %v8936_v9, %v8935_v10  ;;  %v8965_v9 = vunpack.i.l.bf16 %v10967_v62 }
 0x954   :  { %5619 = vrot.lane.b32.xlu1 %v9791_v22, %s9456_s2 }
 0x955   :  { %v9344_v54 = vpop.eup %9343  ;;  %8968 = vrot.lane.b32.xlu0 %v9823_v40, %s9455_s20 }
 0x956   :  { %v9346_v60 = vpop.eup %9345  ;;  %v4633_v18 = vmul.f32 %v9344_v54, %v10883_v51  ;;  %v8951_v54 = vunpack.i.h.bf16 %v10875_v35 }
 0x957   :  { %v4632_v28 = vmul.f32 %v9346_v60, %v10885_v55  ;;  %v8950_v60 = vunpack.i.l.bf16 %v10875_v35 }
 0x958   :  { %5708 = vrot.lane.b32.xlu1 %v9801_v0, %s9456_s2 }
 0x959   :  { %8973 = vrot.lane.b32.xlu0 %v9819_v39, %s9455_s20  ;;  %8185 = vmatprep.mubr.msk.f32.mxu0 %vm1207_vm3, %v4632_v28  ;;  %v8609_v28 = vpack.c.bf16 %v8951_v54, %v8950_v60 }
 0x95a   :  { %8186 = vmatmul.mubr.msk.f32.vlgmr.msra.gmra.mrb[44].mxu0 %vm1207_vm3, %v4633_v18  ;;  %v8946_v18 = vunpack.i.h.bf16 %v10869_v11 }
 0x95b   :  { %8588 = vmatpush3.bf16.msra.mxu0 %v10686_v4 }
 0x95c   :  { %5710 = vrot.lane.b32.xlu1 %v9811_v38, %s9456_s2  ;;  %8594 = vmatprep.subr.bf16.mxu0 %v8593_v19  ;;  %v8940_v38 = vunpack.i.l.bf16 %v10871_v15 }
 0x95d   :  { %5617 = vrot.lane.b32.xlu0 %v9797_v16, %s9456_s2 }
 0x960   :  { %5801 = vrot.lane.b32.xlu1 %v9809_v34, %s9456_s2  ;;  %v8941_v34 = vunpack.i.h.bf16 %v10871_v15 }
 0x961   :  { %8978 = vrot.lane.b32.xlu0 %v9843_v50, %s9455_s20 }
 0x964   :  { %5892 = vrot.lane.b32.xlu1 %v9835_v48, %s9456_s2 }
 0x965   :  { %8983 = vrot.lane.b32.xlu0 %v9839_v49, %s9455_s20 }
 0x968   :  { %5983 = vrot.lane.b32.xlu1 %v9831_v42, %s9456_s2 }
 0x969   :  { %5799 = vrot.lane.b32.xlu0 %v9807_v33, %s9456_s2 }
 0x96d   :  { %5890 = vrot.lane.b32.xlu0 %v9833_v24, %s9456_s2 }
 0x971   :  { %5981 = vrot.lane.b32.xlu0 %v9829_v36, %s9456_s2  ;;  %v8601_v36 = vpack.c.bf16 %v8941_v34, %v8940_v38 }
 0x975   :  { %v4585_v22 = vpop.xlane.xlu1 %4584 }
 0x976   :  { %9347 = vrcp.f32 %v4585_v22  ;;  %v4582_v55 = vpop.xlane.xlu0 %4581 }
 0x977   :  { %9349 = vrcp.f32 %v4582_v55  ;;  %v8961_v55 = vunpack.i.h.bf16 %v10879_v37 }
 0x980   :  { %v9348_v16 = vpop.eup %9347 }
 0x981   :  { %v9350_v0 = vpop.eup %9349  ;;  %v4637_v33 = vmul.f32 %v9348_v16, %v10895_v58  ;;  %v8960_v16 = vunpack.i.l.bf16 %v10879_v37 }
 0x982   :  { %v4579_v42 = vpop.xlane.xlu1 %4578  ;;  %v4636_v48 = vmul.f32 %v9350_v0, %v10897_v46 }
 0x983   :  { %9351 = vrcp.f32 %v4579_v42  ;;  %v8955_v42 = vunpack.i.l.bf16 %v10873_v52 }
 0x984   :  { %8199 = vmatprep.mubr.msk.f32.mxu0 %vm1207_vm3, %v4636_v48  ;;  %v8621_v48 = vpack.c.bf16 %v8961_v55, %v8960_v16 }
 0x985   :  { %8200 = vmatmul.mubr.msk.f32.vlgmr.msra.gmra.mrb[46].mxu0 %vm1207_vm3, %v4637_v33 }
 0x986   :  { %v4597_v24 = vpop.xlane.xlu1 %4596  ;;  %8596 = vmatpush3.bf16.msra.mxu0 %v8593_v19  ;;  %v4576_v4 = vpop.xlane.xlu0 %4575  ;;  %v8945_v19 = vunpack.i.l.bf16 %v10869_v11 }
 0x987   :  { %8602 = vmatprep.subr.bf16.mxu0 %v8601_v36  ;;  %9353 = vrcp.f32 %v4576_v4 }
 0x988   :  { %9355 = vrcp.f32 %v4597_v24  ;;  %v8605_v0 = vpack.c.bf16 %v8946_v18, %v8945_v19 }
 0x98a   :  { %v4591_v51 = vpop.xlane.xlu1 %4590 }
 0x98b   :  { %v4594_v14 = vpop.xlane.xlu0 %4593 }
 0x98c   :  { %9357 = vrcp.f32 %v4594_v14 }
 0x98d   :  { %9359 = vrcp.f32 %v4591_v51  ;;  %v9352_v46 = vpop.eup %9351 }
 0x98e   :  { %v4635_v3 = vmul.f32 %v9352_v46, %v10908_v26 }
 0x98f   :  { %v4609_v15 = vpop.xlane.xlu1 %4608  ;;  %v4588_v63 = vpop.xlane.xlu0 %4587 }
 0x990   :  { %9361 = vrcp.f32 %v4588_v63 }
 0x991   :  { %v9354_v58 = vpop.eup %9353  ;;  %9363 = vrcp.f32 %v4609_v15 }
 0x992   :  { %v4634_v56 = vmul.f32 %v9354_v58, %v10916_v44  ;;  %v9356_v21 = vpop.eup %9355  ;;  %v8966_v58 = vunpack.i.h.bf16 %v10967_v62 }
 0x993   :  { %v4606_v53 = vpop.xlane.xlu0 %4605  ;;  %v4603_v31 = vpop.xlane.xlu1 %4602  ;;  %v4641_v44 = vmul.f32 %v9356_v21, %v10912_v2 }
 0x994   :  { %9365 = vrcp.f32 %v4606_v53  ;;  %8192 = vmatprep.mubr.msk.f32.mxu1 %vm1207_vm3, %v4634_v56 }
 0x995   :  { %8193 = vmatmul.mubr.msk.f32.vlgmr.msra.gmra.mrb[52].mxu1 %vm1207_vm3, %v4635_v3  ;;  %9367 = vrcp.f32 %v4603_v31  ;;  %v8627_v31 = vpack.c.bf16 %v8966_v58, %v8965_v9 }
 0x996   :  { %v9358_v41 = vpop.eup %9357  ;;  %8592 = vmatpush3.bf16.msra.mxu1 %v10690_v23 }
 0x997   :  { %v4600_v13 = vpop.xlane.xlu0 %4599  ;;  %v4640_v26 = vmul.f32 %v9358_v41, %v10925_v47  ;;  %8598 = vmatprep.subr.bf16.mxu1 %v8597_v27  ;;  %v9360_v43 = vpop.eup %9359 }
 0x998   :  { %9369 = vrcp.f32 %v4600_v13  ;;  %v4639_v2 = vmul.f32 %v9360_v43, %v10923_v12  ;;  %v8956_v12 = vunpack.i.h.bf16 %v10873_v52 }
 0x999   :  { %8213 = vmatprep.mubr.msk.f32.mxu0 %vm1207_vm3, %v4640_v26 }
 0x99a   :  { %8214 = vmatmul.mubr.msk.f32.vlgmr.msra.gmra.mrb[48].mxu0 %vm1207_vm3, %v4641_v44  ;;  %v9362_v35 = vpop.eup %9361  ;;  %v8615_v52 = vpack.c.bf16 %v8956_v12, %v8955_v42 }
 0x99b   :  { %8604 = vmatpush3.bf16.msra.mxu0 %v8601_v36  ;;  %v4638_v23 = vmul.f32 %v9362_v35, %v10931_v32  ;;  %v9364_v47 = vpop.eup %9363 }
 0x99c   :  { %8611 = vmatprep.subr.msk.bf16.mxu0 %vm9867_vm2, %v8609_v28  ;;  %v4645_v38 = vmul.f32 %v9364_v47, %v10933_v8  ;;  %v5438_v8 = vpop.permute.xlu1 %5437 }
 0x99d   :  { %8206 = vmatprep.mubr.msk.f32.mxu1 %vm1207_vm3, %v4638_v23 }
 0x99e   :  { %v9366_v22 = vpop.eup %9365  ;;  %8207 = vmatmul.mubr.msk.f32.vlgmr.msra.gmra.mrb[54].mxu1 %vm1207_vm3, %v4639_v2 }
 0x99f   :  { %8600 = vmatpush3.bf16.msra.mxu1 %v8597_v27  ;;  %v4644_v11 = vmul.f32 %v9366_v22, %v10941_v6  ;;  %v9368_v34 = vpop.eup %9367 }
 0x9a0   :  { %8606 = vmatprep.subr.bf16.mxu1 %v8605_v0  ;;  %v4643_v33 = vmul.f32 %v9368_v34, %v10939_v45 }
 0x9a1   :  { %8227 = vmatprep.mubr.msk.f32.mxu0 %vm1207_vm3, %v4644_v11 }
 0x9a2   :  { %v9370_v32 = vpop.eup %9369  ;;  %8228 = vmatmul.mubr.msk.f32.vlgmr.msra.gmra.mrb[50].mxu0 %vm1207_vm3, %v4645_v38 }
 0x9a3   :  { %v4642_v37 = vmul.f32 %v9370_v32, %v10947_v5  ;;  %8241 = vmatprep.mubr.msk.f32.mxu0 %vm468_vm1, %v10877_v1  ;;  %v5436_v1 = vpop.permute.xlu0 %5435 }
 0x9a4   :  { %8614 = vmatpush3.bf16.xpose.msk.msra.mxu0 %vm9867_vm2, %v8609_v28 }
 0x9a5   :  { %8623 = vmatprep.subr.msk.bf16.mxu0 %vm9867_vm2, %v8621_v48  ;;  %8220 = vmatprep.mubr.msk.f32.mxu1 %vm1207_vm3, %v4642_v37 }
 0x9a6   :  { %8221 = vmatmul.mubr.msk.f32.vlgmr.msra.gmra.mrb[56].mxu1 %vm1207_vm3, %v4643_v33 }
 0x9a7   :  { %8608 = vmatpush3.bf16.msra.mxu1 %v8605_v0 }
 0x9a8   :  { %8617 = vmatprep.subr.msk.bf16.mxu1 %vm9867_vm2, %v8615_v52 }
 0x9ab   :  { %8242 = vmatmul.mubr.msk.f32.vlgmr.msra.gmra.mrb[52].mxu0 %vm468_vm1, %v10965_v7 }
 0x9ac   :  { %8626 = vmatpush3.bf16.xpose.msk.msra.mxu0 %vm9867_vm2, %v8621_v48 }
 0x9c8   :  { %v4615_v45 = vpop.xlane.xlu1 %4614 }
 0x9c9   :  { %9371 = vrcp.f32 %v4615_v45 }
 0x9cc   :  { %v5527_v6 = vpop.permute.xlu1 %5526  ;;  %v4612_v5 = vpop.xlane.xlu0 %4611 }
 0x9cd   :  { %9373 = vrcp.f32 %v4612_v5  ;;  %8255 = vmatprep.mubr.msk.f32.mxu0 %vm468_vm1, %v5527_v6 }
 0x9d0   :  { %v5529_v36 = vpop.permute.xlu1 %5528  ;;  %v8969_v24 = vpop.permute.xlu0 %8968 }
 0x9d1   :  { %v8971_v4 = vunpack.i.h.bf16 %v8969_v24  ;;  %v8970_v51 = vunpack.i.l.bf16 %v8969_v24  ;;  %8256 = vmatmul.mubr.msk.f32.vlgmr.msra.gmra.mrb[54].mxu0 %vm468_vm1, %v5529_v36 }
 0x9d3   :  { %v8633_v14 = vpack.c.bf16 %v8971_v4, %v8970_v51  ;;  %v9372_v63 = vpop.eup %9371 }
 0x9d4   :  { %v5620_v7 = vpop.permute.xlu1 %5619  ;;  %v8974_v15 = vpop.permute.xlu0 %8973  ;;  %v4647_v3 = vmul.f32 %v9372_v63, %v10957_v20 }
 0x9d5   :  { %8635 = vmatprep.subr.msk.bf16.mxu0 %vm9867_vm2, %v8633_v14  ;;  %v8976_v20 = vunpack.i.h.bf16 %v8974_v15 }
 0x9d6   :  { %8638 = vmatpush3.bf16.xpose.msk.msra.mxu0 %vm9867_vm2, %v8633_v14 }
 0x9d7   :  { %v9374_v46 = vpop.eup %9373 }
 0x9d8   :  { %v5709_v10 = vpop.permute.xlu1 %5708  ;;  %v5618_v53 = vpop.permute.xlu0 %5617  ;;  %v4646_v56 = vmul.f32 %v9374_v46, %v10961_v61  ;;  %v8975_v61 = vunpack.i.l.bf16 %v8974_v15 }
 0x9d9   :  { %8269 = vmatprep.mubr.msk.f32.mxu0 %vm468_vm1, %v5709_v10 }
 0x9da   :  { %8234 = vmatprep.mubr.msk.f32.mxu1 %vm1207_vm3, %v4646_v56  ;;  %v8639_v13 = vpack.c.bf16 %v8976_v20, %v8975_v61 }
 0x9db   :  { %8235 = vmatmul.mubr.msk.f32.vlgmr.msra.gmra.mrb[58].mxu1 %vm1207_vm3, %v4647_v3 }
 0x9dc   :  { %8620 = vmatpush3.bf16.xpose.msk.msra.mxu1 %vm9867_vm2, %v8615_v52  ;;  %v5711_v21 = vpop.permute.xlu1 %5710  ;;  %8248 = vmatprep.mubr.msk.f32.mxu1 %vm468_vm1, %v5436_v1  ;;  %v8979_v62 = vpop.permute.xlu0 %8978 }
 0x9dd   :  { %v8981_v41 = vunpack.i.h.bf16 %v8979_v62  ;;  %v8980_v54 = vunpack.i.l.bf16 %v8979_v62  ;;  %8629 = vmatprep.subr.msk.bf16.mxu1 %vm9867_vm2, %v8627_v31  ;;  %8270 = vmatmul.mubr.msk.f32.vlgmr.msra.gmra.mrb[56].mxu0 %vm468_vm1, %v5711_v21 }
 0x9df   :  { %v8645_v60 = vpack.c.bf16 %v8981_v41, %v8980_v54 }
 0x9e0   :  { %v8984_v27 = vpop.permute.xlu0 %8983  ;;  %v5802_v26 = vpop.permute.xlu1 %5801 }
 0x9e1   :  { %8647 = vmatprep.subr.msk.bf16.mxu0 %vm9867_vm2, %v8645_v60  ;;  %v8986_v43 = vunpack.i.h.bf16 %v8984_v27  ;;  %v8985_v28 = vunpack.i.l.bf16 %v8984_v27 }
 0x9e2   :  { %8650 = vmatpush3.bf16.xpose.msk.msra.mxu0 %vm9867_vm2, %v8645_v60 }
 0x9e3   :  { %8249 = vmatmul.mubr.msk.f32.vlgmr.msra.gmra.mrb[60].mxu1 %vm468_vm1, %v5438_v8  ;;  %v8651_v19 = vpack.c.bf16 %v8986_v43, %v8985_v28 }
 0x9e4   :  { %8632 = vmatpush3.bf16.xpose.msk.msra.mxu1 %vm9867_vm2, %v8627_v31  ;;  %8262 = vmatprep.mubr.msk.f32.mxu1 %vm468_vm1, %v5618_v53  ;;  %v5800_v44 = vpop.permute.xlu0 %5799  ;;  %v5893_v18 = vpop.permute.xlu1 %5892 }
 0x9e5   :  { %8641 = vmatprep.subr.msk.bf16.mxu1 %vm9867_vm2, %v8639_v13 }
 0x9e8   :  { %v5891_v35 = vpop.permute.xlu0 %5890  ;;  %v5984_v2 = vpop.permute.xlu1 %5983 }
 0x9e9   :  { %8283 = vmatprep.mubr.msk.f32.mxu0 %vm468_vm1, %v5891_v35 }
 0x9ea   :  { %8284 = vmatmul.mubr.msk.f32.vlgmr.msra.gmra.mrb[58].mxu0 %vm468_vm1, %v5893_v18  ;;  %v11695_v18 = vld [vmem:[#allocation39_spill] sm:$0xff] }
 0x9eb   :  { %8263 = vmatmul.mubr.msk.f32.vlgmr.msra.gmra.mrb[62].mxu1 %vm468_vm1, %v5620_v7 }
 0x9ec   :  { %8644 = vmatpush3.bf16.xpose.msk.msra.mxu1 %vm9867_vm2, %v8639_v13  ;;  %8276 = vmatprep.mubr.msk.f32.mxu1 %vm468_vm1, %v5800_v44  ;;  %v5982_v23 = vpop.permute.xlu0 %5981 }
 0x9ed   :  { %8653 = vmatprep.subr.msk.bf16.mxu1 %vm9867_vm2, %v8651_v19 }
 0x9f3   :  { %8277 = vmatmul.mubr.msk.f32.vlgmr.msra.gmra.mrb[64].mxu1 %vm468_vm1, %v5802_v26 }
 0x9f4   :  { %8656 = vmatpush3.bf16.xpose.msk.msra.mxu1 %vm9867_vm2, %v8651_v19  ;;  %8290 = vmatprep.mubr.msk.f32.mxu1 %vm468_vm1, %v5982_v23 }
 0x9fb   :  { %8291 = vmatmul.mubr.msk.f32.vlgmr.msra.gmra.mrb[66].mxu1 %vm468_vm1, %v5984_v2 }
 0xa2d   :  { %v11101_v47 = vpop.f32.mrb[44].mxu0 }
 0xa2e   :  { %v11103_v22 = vpop.f32.mrb[45].mxu0 }
 0xa2f   :  { %v9037_v55 = vpack.i.bf16 %v11101_v47, %v11103_v22  ;;  %v11717_v22 = vld [vmem:[#allocation29_spill] sm:$0xff] }
 0xa58   :  { %v11107_v16 = vpop.f32.mrb[46].mxu0 }
 0xa59   :  { %v11109_v0 = vpop.f32.mrb[47].mxu0 }
 0xa5a   :  { %v9057_v29 = vpack.i.bf16 %v11107_v16, %v11109_v0 }
 0xa68   :  { %v11113_v11 = vpop.f32.mrb[52].mxu1 }
 0xa69   :  { %v11115_v34 = vpop.f32.mrb[53].mxu1 }
 0xa6a   :  { %v9042_v38 = vpack.i.bf16 %v11113_v11, %v11115_v34  ;;  %v11712_v34 = vld [vmem:[#allocation36_spill] sm:$0xff] }
 0xa6d   :  { %v11119_v32 = vpop.f32.mrb[48].mxu0 }
 0xa6e   :  { %v11121_v12 = vpop.f32.mrb[49].mxu0 }
 0xa6f   :  { %v9082_v42 = vpack.i.bf16 %v11119_v32, %v11121_v12  ;;  %v9150_v32 = vld [vmem:[%s11588_s6 + $0x8] sm:$0xff]  }
 0xa71   :  { %v11125_v48 = vpop.f32.mrb[54].mxu1 }
 0xa72   :  { %v11127_v37 = vpop.f32.mrb[55].mxu1 }
 0xa73   :  { %v9062_v33 = vpack.i.bf16 %v11125_v48, %v11127_v37 }
 0xa75   :  { %v11131_v52 = vpop.f32.mrb[50].mxu0 }
 0xa76   :  { %v11133_v8 = vpop.f32.mrb[51].mxu0 }
 0xa77   :  { %v9122_v1 = vpack.i.bf16 %v11131_v52, %v11133_v8 }
 0xa79   :  { %v11137_v45 = vpop.f32.mrb[56].mxu1 }
 0xa7a   :  { %v11139_v6 = vpop.f32.mrb[57].mxu1 }
 0xa7b   :  { %v9097_v5 = vpack.i.bf16 %v11137_v45, %v11139_v6 }
 0xa7e   :  { %v8243_v36 = vpop.f32.mrb[52].mxu0 }
 0xa7f   :  { %v6073_v24 = vmul.f32 0.35355338, %v8243_v36  ;;  %v5426_v4 = vpop.f32.mrb[53].mxu0 }
 0xa80   :  { %v6072_v51 = vmul.f32 0.35355338, %v5426_v4 }
 0xa81   :  { %v11144_v14 = vadd.f32 %v10738_v30, %v6073_v24 }
 0xa82   :  { %v11147_v7 = vadd.f32 %v10746_v17, %v6072_v51 }
 0xa83   :  { %v6107_v15 = vsel %vm1207_vm3, %v11144_v14, -inf }
 0xa84   :  { %6108 = vmax.xlane.f32.xlu1 %v6107_v15  ;;  %v6104_v63 = vsel %vm1207_vm3, %v11147_v7, -inf }
 0xa85   :  { %6105 = vmax.xlane.f32.xlu0 %v6104_v63 }
 0xaa4   :  { %v8257_v46 = vpop.f32.mrb[54].mxu0 }
 0xaa5   :  { %v6077_v58 = vmul.f32 0.35355338, %v8257_v46  ;;  %v5608_v9 = vpop.f32.mrb[55].mxu0 }
 0xaa6   :  { %v6076_v10 = vmul.f32 0.35355338, %v5608_v9 }
 0xaa7   :  { %v11154_v53 = vadd.f32 %v10758_v25, %v6077_v58  ;;  %v11696_v58 = vld [vmem:[#allocation40_spill] sm:$0xff] }
 0xaa8   :  { %v11157_v56 = vadd.f32 %v10766_v59, %v6076_v10 }
 0xaa9   :  { %v6119_v3 = vsel %vm1207_vm3, %v11154_v53, -inf }
 0xaaa   :  { %6120 = vmax.xlane.f32.xlu1 %v6119_v3  ;;  %v6116_v31 = vsel %vm1207_vm3, %v11157_v56, -inf }
 0xaab   :  { %6117 = vmax.xlane.f32.xlu0 %v6116_v31 }
 0xaae   :  { %v11163_v21 = vpop.f32.mrb[58].mxu1 }
 0xaaf   :  { %v11165_v62 = vpop.f32.mrb[59].mxu1 }
 0xab0   :  { %v9132_v41 = vpack.i.bf16 %v11163_v21, %v11165_v62  ;;  %v8271_v54 = vpop.f32.mrb[56].mxu0 }
 0xab1   :  { %v6081_v20 = vmul.f32 0.35355338, %v8271_v54  ;;  %v5790_v61 = vpop.f32.mrb[57].mxu0 }
 0xab2   :  { %v6080_v35 = vmul.f32 0.35355338, %v5790_v61 }
 0xab3   :  { %v11170_v60 = vadd.f32 %v10738_v30, %v6081_v20 }
 0xab4   :  { %v11183_v2 = vadd.f32 %v10746_v17, %v6080_v35  ;;  %v11697_v17 = vld [vmem:[#allocation41_spill] sm:$0xff] }
 0xab5   :  { %v6131_v27 = vsel %vm1207_vm3, %v11170_v60, -inf }
 0xab6   :  { %v8250_v13 = vpop.f32.mrb[60].mxu1  ;;  %6132 = vmax.xlane.f32.xlu1 %v6131_v27  ;;  %v6128_v10 = vsel %vm1207_vm3, %v11183_v2, -inf }
 0xab7   :  { %v6075_v26 = vmul.f32 0.35355338, %v8250_v13  ;;  %v5517_v44 = vpop.f32.mrb[61].mxu1 }
 0xab8   :  { %v6074_v43 = vmul.f32 0.35355338, %v5517_v44 }
 0xab9   :  { %v11175_v28 = vadd.f32 %v10787_v57, %v6075_v26 }
 0xaba   :  { %v11178_v19 = vadd.f32 %v11695_v18, %v6074_v43 }
 0xabb   :  { %v6113_v23 = vsel %vm1207_vm3, %v11175_v28, -inf }
 0xabc   :  { %6114 = vmax.xlane.f32.xlu0 %v6113_v23  ;;  %v6110_v63 = vsel %vm1207_vm3, %v11178_v19, -inf }
 0xabd   :  { %v8285_v30 = vpop.f32.mrb[58].mxu0 }
 0xabe   :  { %v8264_v36 = vpop.f32.mrb[62].mxu1  ;;  %v5972_v24 = vpop.f32.mrb[59].mxu0  ;;  %v6085_v51 = vmul.f32 0.35355338, %v8285_v30 }
 0xabf   :  { %v6079_v4 = vmul.f32 0.35355338, %v8264_v36  ;;  %v5699_v15 = vpop.f32.mrb[63].mxu1  ;;  %v6084_v54 = vmul.f32 0.35355338, %v5972_v24 }
 0xac0   :  { %v6078_v46 = vmul.f32 0.35355338, %v5699_v15  ;;  %6111 = vmax.xlane.f32.xlu0 %v6110_v63  ;;  %v11193_v3 = vadd.f32 %v10758_v25, %v6085_v51 }
 0xac1   :  { %v11188_v9 = vadd.f32 %v11696_v58, %v6079_v4  ;;  %v11201_v27 = vadd.f32 %v10766_v59, %v6084_v54 }
 0xac2   :  { %v11196_v31 = vadd.f32 %v11697_v17, %v6078_v46  ;;  %v6143_v44 = vsel %vm1207_vm3, %v11193_v3, -inf }
 0xac3   :  { %v6125_v20 = vsel %vm1207_vm3, %v11188_v9, -inf  ;;  %v6140_v59 = vsel %vm1207_vm3, %v11201_v27, -inf }
 0xac4   :  { %6129 = vmax.xlane.f32.xlu0 %v6128_v10  ;;  %6126 = vmax.xlane.f32.xlu1 %v6125_v20  ;;  %v6122_v25 = vsel %vm1207_vm3, %v11196_v31, -inf  ;;  %v11700_v20 = vld [vmem:[#allocation7_spill] sm:$0xff] }
 0xac6   :  { %v8278_v61 = vpop.f32.mrb[64].mxu1 }
 0xac7   :  { %v6083_v13 = vmul.f32 0.35355338, %v8278_v61  ;;  %v5881_v26 = vpop.f32.mrb[65].mxu1 }
 0xac8   :  { %v6082_v43 = vmul.f32 0.35355338, %v5881_v26  ;;  %6144 = vmax.xlane.f32.xlu1 %v6143_v44  ;;  %6123 = vmax.xlane.f32.xlu0 %v6122_v25 }
 0xac9   :  { %v11208_v35 = vadd.f32 %v10787_v57, %v6083_v13  ;;  %v11698_v57 = vld [vmem:[#allocation4_spill] sm:$0xff] }
 0xaca   :  { %v11211_v23 = vadd.f32 %v11695_v18, %v6082_v43  ;;  %v11699_v18 = vld [vmem:[#allocation5_spill] sm:$0xff] }
 0xacb   :  { %v6137_v30 = vsel %vm1207_vm3, %v11208_v35, -inf }
 0xacc   :  { %6141 = vmax.xlane.f32.xlu0 %v6140_v59  ;;  %6138 = vmax.xlane.f32.xlu1 %v6137_v30  ;;  %v6134_v4 = vsel %vm1207_vm3, %v11211_v23, -inf }
 0xace   :  { %v8292_v36 = vpop.f32.mrb[66].mxu1 }
 0xacf   :  { %v6063_v24 = vpop.f32.mrb[67].mxu1  ;;  %v6087_v51 = vmul.f32 0.35355338, %v8292_v36 }
 0xad0   :  { %6135 = vmax.xlane.f32.xlu0 %v6134_v4  ;;  %v6086_v63 = vmul.f32 0.35355338, %v6063_v24 }
 0xad1   :  { %v11224_v15 = vadd.f32 %v11696_v58, %v6087_v51  ;;  %v11701_v58 = vld [vmem:[#allocation6_spill] sm:$0xff] }
 0xad2   :  { %v11227_v46 = vadd.f32 %v11697_v17, %v6086_v63 }
 0xad3   :  { %v6149_v10 = vsel %vm1207_vm3, %v11224_v15, -inf }
 0xad4   :  { %v6146_v54 = vsel %vm1207_vm3, %v11227_v46, -inf }
 0xadd   :  { %8993 = vrot.lane.b32.xlu1 %v11698_v57, %s9457_s1 }
 0xae6   :  { %8988 = vrot.lane.b32.xlu0 %v11699_v18, %s9457_s1 }
 0xb01   :  { %6150 = vmax.xlane.f32.xlu1 %v6149_v10 }
 0xb05   :  { %6147 = vmax.xlane.f32.xlu0 %v6146_v54 }
 0xb11   :  { %v6109_v13 = vpop.xlane.xlu1 %6108 }
 0xb12   :  { %9003 = vrot.lane.b32.xlu1 %v11700_v20, %s9457_s1  ;;  %v6106_v17 = vpop.xlane.xlu0 %6105  ;;  %v6153_v26 = vsub.f32 %v11144_v14, %v6109_v13 }
 0xb13   :  { %v6152_v61 = vsub.f32 %v11147_v7, %v6106_v17 }
 0xb14   :  { %v6170_v25 = vmul.f32 1.442695, %v6153_v26 }
 0xb15   :  { %v6168_v44 = vmul.f32 1.442695, %v6152_v61 }
 0xb16   :  { %9008 = vrot.lane.b32.xlu1 %v9823_v40, %s9457_s1 }
 0xb17   :  { %9375 = vpow2.f32 %v6168_v44 }
 0xb18   :  { %9377 = vpow2.f32 %v6170_v25 }
 0xb1a   :  { %9013 = vrot.lane.b32.xlu1 %v9819_v39, %s9457_s1 }
 0xb1b   :  { %8998 = vrot.lane.b32.xlu0 %v11701_v58, %s9457_s1 }
 0xb21   :  { %v11243_v43 = vpop.eup %9375 }
 0xb22   :  { %v6200_v36 = vsel %vm1207_vm3, %v11243_v43, 0.0  ;;  %v11249_v24 = vpop.eup %9377 }
 0xb23   :  { %v6203_v4 = vsel %vm1207_vm3, %v11249_v24, 0.0 }
 0xb37   :  { %v6121_v59 = vpop.xlane.xlu1 %6120 }
 0xb38   :  { %v6157_v40 = vsub.f32 %v11154_v53, %v6121_v59  ;;  %v6118_v30 = vpop.xlane.xlu0 %6117 }
 0xb39   :  { %v6156_v39 = vsub.f32 %v11157_v56, %v6118_v30 }
 0xb3a   :  { %v6178_v7 = vmul.f32 1.442695, %v6157_v40  ;;  %6201 = vadd.xlane.f32.xlu0 %v6200_v36 }
 0xb3b   :  { %v6176_v14 = vmul.f32 1.442695, %v6156_v39 }
 0xb3c   :  { %9379 = vpow2.f32 %v6178_v7 }
 0xb3d   :  { %9381 = vpow2.f32 %v6176_v14 }
 0xb3e   :  { %6204 = vadd.xlane.f32.xlu1 %v6203_v4 }
 0xb43   :  { %v6133_v57 = vpop.xlane.xlu1 %6132 }
 0xb44   :  { %v6161_v51 = vsub.f32 %v11170_v60, %v6133_v57 }
 0xb46   :  { %v11253_v18 = vpop.eup %9379  ;;  %v6186_v20 = vmul.f32 1.442695, %v6161_v51 }
 0xb47   :  { %v11255_v53 = vpop.eup %9381  ;;  %v6215_v56 = vsel %vm1207_vm3, %v11253_v18, 0.0 }
 0xb48   :  { %6216 = vadd.xlane.f32.xlu1 %v6215_v56  ;;  %v6212_v63 = vsel %vm1207_vm3, %v11255_v53, 0.0 }
 0xb49   :  { %v6115_v10 = vpop.xlane.xlu0 %6114  ;;  %6213 = vadd.xlane.f32.xlu0 %v6212_v63 }
 0xb4a   :  { %v6155_v54 = vsub.f32 %v11175_v28, %v6115_v10 }
 0xb4c   :  { %v6174_v58 = vmul.f32 1.442695, %v6155_v54 }
 0xb4d   :  { %v6112_v17 = vpop.xlane.xlu0 %6111 }
 0xb4e   :  { %9383 = vpow2.f32 %v6174_v58  ;;  %v6154_v61 = vsub.f32 %v11178_v19, %v6112_v17 }
 0xb4f   :  { %9385 = vpow2.f32 %v6186_v20 }
 0xb50   :  { %v6172_v13 = vmul.f32 1.442695, %v6154_v61 }
 0xb51   :  { %v6130_v26 = vpop.xlane.xlu0 %6129  ;;  %v6127_v44 = vpop.xlane.xlu1 %6126 }
 0xb52   :  { %9387 = vpow2.f32 %v6172_v13  ;;  %v6160_v60 = vsub.f32 %v11183_v2, %v6130_v26  ;;  %v6159_v25 = vsub.f32 %v11188_v9, %v6127_v44 }
 0xb54   :  { %v6184_v59 = vmul.f32 1.442695, %v6160_v60  ;;  %v6182_v40 = vmul.f32 1.442695, %v6159_v25 }
 0xb55   :  { %v6145_v30 = vpop.xlane.xlu1 %6144  ;;  %v6124_v39 = vpop.xlane.xlu0 %6123 }
 0xb56   :  { %9389 = vpow2.f32 %v6184_v59  ;;  %v6165_v28 = vsub.f32 %v11193_v3, %v6145_v30  ;;  %v6158_v36 = vsub.f32 %v11196_v31, %v6124_v39 }
 0xb57   :  { %9391 = vpow2.f32 %v6182_v40 }
 0xb58   :  { %v11268_v19 = vpop.eup %9383  ;;  %v6180_v7 = vmul.f32 1.442695, %v6158_v36  ;;  %v6194_v14 = vmul.f32 1.442695, %v6165_v28 }
 0xb59   :  { %v6142_v4 = vpop.xlane.xlu0 %6141  ;;  %v6139_v57 = vpop.xlane.xlu1 %6138  ;;  %v6209_v2 = vsel %vm1207_vm3, %v11268_v19, 0.0 }
 0xb5a   :  { %v11272_v9 = vpop.eup %9385  ;;  %v6164_v56 = vsub.f32 %v11201_v27, %v6142_v4  ;;  %v6163_v51 = vsub.f32 %v11208_v35, %v6139_v57  ;;  %6210 = vadd.xlane.f32.xlu1 %v6209_v2  ;;  %9393 = vpow2.f32 %v6180_v7 }
 0xb5b   :  { %9395 = vpow2.f32 %v6194_v14  ;;  %v6227_v20 = vsel %vm1207_vm3, %v11272_v9, 0.0 }
 0xb5c   :  { %v11276_v3 = vpop.eup %9387  ;;  %v6192_v31 = vmul.f32 1.442695, %v6164_v56  ;;  %v6190_v63 = vmul.f32 1.442695, %v6163_v51 }
 0xb5d   :  { %v8994_v10 = vpop.permute.xlu1 %8993  ;;  %v6136_v54 = vpop.xlane.xlu0 %6135  ;;  %v6206_v58 = vsel %vm1207_vm3, %v11276_v3, 0.0 }
 0xb5e   :  { %9397 = vpow2.f32 %v6192_v31  ;;  %v8996_v17 = vunpack.i.h.bf16 %v8994_v10  ;;  %v8995_v27 = vunpack.i.l.bf16 %v8994_v10  ;;  %v6162_v35 = vsub.f32 %v11211_v23, %v6136_v54  ;;  %6228 = vadd.xlane.f32.xlu1 %v6227_v20  ;;  %6207 = vadd.xlane.f32.xlu0 %v6206_v58 }
 0xb5f   :  { %9399 = vpow2.f32 %v6190_v63 }
 0xb60   :  { %v11283_v61 = vpop.eup %9389  ;;  %v8661_v13 = vpack.c.bf16 %v8996_v17, %v8995_v27  ;;  %v6188_v26 = vmul.f32 1.442695, %v6162_v35 }
 0xb61   :  { %v11285_v44 = vpop.eup %9391  ;;  %v8989_v60 = vpop.permute.xlu0 %8988  ;;  %v6224_v25 = vsel %vm1207_vm3, %v11283_v61, 0.0 }
 0xb62   :  { %9401 = vpow2.f32 %v6188_v26  ;;  %v8991_v59 = vunpack.i.h.bf16 %v8989_v60  ;;  %v8990_v40 = vunpack.i.l.bf16 %v8989_v60  ;;  %8662 = vmatprep.subr.bf16.mxu1 %v8661_v13  ;;  %v6221_v23 = vsel %vm1207_vm3, %v11285_v44, 0.0  ;;  %6225 = vadd.xlane.f32.xlu0 %v6224_v25 }
 0xb63   :  { %6222 = vadd.xlane.f32.xlu1 %v6221_v23  ;;  %8664 = vmatpush3.bf16.msra.mxu1 %v8661_v13 }
 0xb64   :  { %v8657_v30 = vpack.c.bf16 %v8991_v59, %v8990_v40  ;;  %v11291_v39 = vpop.eup %9393 }
 0xb65   :  { %v6218_v28 = vsel %vm1207_vm3, %v11291_v39, 0.0  ;;  %v11295_v36 = vpop.eup %9395 }
 0xb66   :  { %8658 = vmatprep.subr.bf16.mxu0 %v8657_v30  ;;  %6219 = vadd.xlane.f32.xlu0 %v6218_v28  ;;  %v6239_v57 = vsel %vm1207_vm3, %v11295_v36, 0.0  ;;  %v11703_v28 = vld [vmem:[#allocation2_spill] sm:$0xff] }
 0xb67   :  { %8660 = vmatpush3.bf16.msra.mxu0 %v8657_v30  ;;  %v11702_v30 = vld [vmem:[#allocation14_spill] sm:$0xff] }
 0xb68   :  { %v11297_v7 = vpop.eup %9397 }
 0xb69   :  { %v6236_v14 = vsel %vm1207_vm3, %v11297_v7, 0.0  ;;  %v11301_v4 = vpop.eup %9399 }
 0xb6a   :  { %6237 = vadd.xlane.f32.xlu1 %v6236_v14  ;;  %6240 = vadd.xlane.f32.xlu0 %v6239_v57  ;;  %v6233_v56 = vsel %vm1207_vm3, %v11301_v4, 0.0  ;;  %v11704_v14 = vpack.i.bf16 %v11702_v30, %v11703_v28  ;;  %v11705_v57 = vld [vmem:[#allocation31_spill] sm:$0xff] }
 0xb6c   :  { %v11305_v2 = vpop.eup %9401 }
 0xb6d   :  { %v6230_v51 = vsel %vm1207_vm3, %v11305_v2, 0.0 }
 0xb6e   :  { %6234 = vadd.xlane.f32.xlu1 %v6233_v56  ;;  %6231 = vadd.xlane.f32.xlu0 %v6230_v51  ;;  %v11706_v56 = vld [vmem:[#allocation32_spill] sm:$0xff] }
 0xb6f   :  { %v11707_v51 = vpack.i.bf16 %v11705_v57, %v11706_v56 }
 0xb8e   :  { %v6151_v31 = vpop.xlane.xlu1 %6150 }
 0xb8f   :  { %v6167_v63 = vsub.f32 %v11224_v15, %v6151_v31  ;;  %v11709_v31 = vld [vmem:[#allocation9_spill] sm:$0xff] }
 0xb91   :  { %v6198_v10 = vmul.f32 1.442695, %v6167_v63 }
 0xb92   :  { %v9004_v54 = vpop.permute.xlu1 %9003  ;;  %v6148_v20 = vpop.xlane.xlu0 %6147 }
 0xb93   :  { %9403 = vpow2.f32 %v6198_v10  ;;  %v9006_v58 = vunpack.i.h.bf16 %v9004_v54  ;;  %v9005_v17 = vunpack.i.l.bf16 %v9004_v54  ;;  %v6166_v27 = vsub.f32 %v11227_v46, %v6148_v20  ;;  %v11714_v10 = vld [vmem:[#allocation10_spill] sm:$0xff]  ;;  %v11715_v54 = vld [vmem:[#allocation13_spill] sm:$0xff] }
 0xb94   :  { %v11716_v20 = vpack.i.bf16 %v11714_v10, %v11715_v54 }
 0xb95   :  { %v11313_v35 = vpack.c.bf16 %v9006_v58, %v9005_v17  ;;  %v6196_v13 = vmul.f32 1.442695, %v6166_v27 }
 0xb96   :  { %v8999_v26 = vpop.permute.xlu0 %8998  ;;  %v9009_v11 = vpop.permute.xlu1 %9008 }
 0xb97   :  { %9405 = vpow2.f32 %v6196_v13  ;;  %v9001_v60 = vunpack.i.h.bf16 %v8999_v26  ;;  %8670 = vmatprep.subr.bf16.mxu1 %v11313_v35  ;;  %v9000_v25 = vunpack.i.l.bf16 %v8999_v26  ;;  %v9011_v27 = vunpack.i.h.bf16 %v9009_v11 }
 0xb98   :  { %v9010_v13 = vunpack.i.l.bf16 %v9009_v11 }
 0xb99   :  { %v8665_v59 = vpack.c.bf16 %v9001_v60, %v9000_v25 }
 0xb9a   :  { %v9014_v58 = vpop.permute.xlu1 %9013  ;;  %v8673_v0 = vpack.c.bf16 %v9011_v27, %v9010_v13 }
 0xb9b   :  { %8666 = vmatprep.subr.bf16.mxu0 %v8665_v59 }
 0xb9d   :  { %v11316_v15 = vpop.eup %9403 }
 0xb9e   :  { %v6245_v40 = vsel %vm1207_vm3, %v11316_v15, 0.0 }
 0xb9f   :  { %6246 = vadd.xlane.f32.xlu1 %v6245_v40 }
 0xba1   :  { %v11320_v23 = vpop.eup %9405 }
 0xba2   :  { %v6242_v46 = vsel %vm1207_vm3, %v11320_v23, 0.0 }
 0xba3   :  { %6243 = vadd.xlane.f32.xlu0 %v6242_v46 }
 0xbb0   :  { %9023 = vrot.lane.b32.xlu1 %v9839_v49, %s9457_s1  ;;  %v11708_v49 = vld [vmem:[#allocation12_spill] sm:$0xff] }
 0xbb1   :  { %v11710_v63 = vpack.i.bf16 %v11708_v49, %v11709_v31 }
 0xbb4   :  { %9033 = vrot.lane.b32.xlu1 %v11704_v14, %s9458_s13 }
 0xbb8   :  { %9043 = vrot.lane.b32.xlu1 %v9042_v38, %s9459_s14 }
 0xbb9   :  { %9018 = vrot.lane.b32.xlu0 %v9843_v50, %s9457_s1  ;;  %v11711_v50 = vld [vmem:[#allocation35_spill] sm:$0xff] }
 0xbba   :  { %v11713_v38 = vpack.i.bf16 %v11711_v50, %v11712_v34 }
 0xbbc   :  { %9053 = vrot.lane.b32.xlu1 %v11707_v51, %s9458_s13  ;;  %v9015_v51 = vunpack.i.l.bf16 %v9014_v58 }
 0xbbd   :  { %9028 = vrot.lane.b32.xlu0 %v11710_v63, %s9458_s13 }
 0xbc0   :  { %9063 = vrot.lane.b32.xlu1 %v9062_v33, %s9459_s14 }
 0xbc1   :  { %9038 = vrot.lane.b32.xlu0 %v9037_v55, %s9459_s14  ;;  %v11718_v55 = vld [vmem:[#allocation30_spill] sm:$0xff] }
 0xbc2   :  { %v11719_v48 = vpack.i.bf16 %v11717_v22, %v11718_v55 }
 0xbc4   :  { %9073 = vrot.lane.b32.xlu1 %v11713_v38, %s9458_s13 }
 0xbc5   :  { %9048 = vrot.lane.b32.xlu0 %v11716_v20, %s9458_s13 }
 0xbc7   :  { %v6202_v17 = vpop.xlane.xlu0 %6201 }
 0xbc8   :  { %9407 = vrcp.f32 %v6202_v17 }
 0xbc9   :  { %9058 = vrot.lane.b32.xlu0 %v9057_v29, %s9459_s14 }
 0xbcb   :  { %v6205_v47 = vpop.xlane.xlu1 %6204 }
 0xbcc   :  { %9409 = vrcp.f32 %v6205_v47 }
 0xbcd   :  { %9068 = vrot.lane.b32.xlu0 %v11719_v48, %s9458_s13 }
 0xbd2   :  { %v9408_v37 = vpop.eup %9407 }
 0xbd3   :  { %v6264_v33 = vmul.f32 %v9408_v37, %v11243_v43 }
 0xbd5   :  { %8297 = vmatprep.mubr.msk.f32.mxu0 %vm1207_vm3, %v6264_v33  ;;  %v6217_v26 = vpop.xlane.xlu1 %6216 }
 0xbd6   :  { %v9410_v60 = vpop.eup %9409  ;;  %9411 = vrcp.f32 %v6217_v26  ;;  %v6214_v25 = vpop.xlane.xlu0 %6213 }
 0xbd7   :  { %v6265_v16 = vmul.f32 %v9410_v60, %v11249_v24  ;;  %9413 = vrcp.f32 %v6214_v25 }
 0xbd9   :  { %8298 = vmatmul.mubr.msk.f32.vlgmr.msra.gmra.mrb[60].mxu0 %vm1207_vm3, %v6265_v16 }
 0xbda   :  { %8668 = vmatpush3.bf16.msra.mxu0 %v8665_v59 }
 0xbdb   :  { %8674 = vmatprep.subr.bf16.mxu0 %v8673_v0 }
 0xbe0   :  { %v9412_v29 = vpop.eup %9411 }
 0xbe1   :  { %v9414_v40 = vpop.eup %9413  ;;  %v6269_v46 = vmul.f32 %v9412_v29, %v11253_v18  ;;  %v9016_v18 = vunpack.i.h.bf16 %v9014_v58 }
 0xbe2   :  { %v6268_v43 = vmul.f32 %v9414_v40, %v11255_v53 }
 0xbe3   :  { %v8677_v38 = vpack.c.bf16 %v9016_v18, %v9015_v51 }
 0xbe4   :  { %8311 = vmatprep.mubr.msk.f32.mxu0 %vm1207_vm3, %v6268_v43 }
 0xbe5   :  { %8312 = vmatmul.mubr.msk.f32.vlgmr.msra.gmra.mrb[62].mxu0 %vm1207_vm3, %v6269_v46 }
 0xbe6   :  { %8676 = vmatpush3.bf16.msra.mxu0 %v8673_v0 }
 0xbe7   :  { %v6211_v30 = vpop.xlane.xlu1 %6210 }
 0xbe8   :  { %9415 = vrcp.f32 %v6211_v30 }
 0xbeb   :  { %v6229_v28 = vpop.xlane.xlu1 %6228  ;;  %v6208_v24 = vpop.xlane.xlu0 %6207 }
 0xbec   :  { %9417 = vrcp.f32 %v6208_v24  ;;  %v11720_v24 = vld [vmem:[#allocation33_spill] sm:$0xff] }
 0xbed   :  { %9419 = vrcp.f32 %v6229_v28 }
 0xbef   :  { %v6226_v14 = vpop.xlane.xlu0 %6225 }
 0xbf0   :  { %9421 = vrcp.f32 %v6226_v14  ;;  %v6223_v59 = vpop.xlane.xlu1 %6222  ;;  %v11721_v14 = vld [vmem:[#allocation34_spill] sm:$0xff] }
 0xbf1   :  { %9423 = vrcp.f32 %v6223_v59  ;;  %v11722_v59 = vpack.i.bf16 %v11720_v24, %v11721_v14 }
 0xbf2   :  { %v9416_v53 = vpop.eup %9415 }
 0xbf3   :  { %v6220_v57 = vpop.xlane.xlu0 %6219  ;;  %v6267_v50 = vmul.f32 %v9416_v53, %v11268_v19 }
 0xbf4   :  { %9425 = vrcp.f32 %v6220_v57 }
 0xbf6   :  { %v9418_v56 = vpop.eup %9417 }
 0xbf7   :  { %v6238_v49 = vpop.xlane.xlu1 %6237  ;;  %v6241_v31 = vpop.xlane.xlu0 %6240  ;;  %v6266_v63 = vmul.f32 %v9418_v56, %v11276_v3 }
 0xbf8   :  { %9427 = vrcp.f32 %v6238_v49  ;;  %v9420_v11 = vpop.eup %9419 }
 0xbf9   :  { %8304 = vmatprep.mubr.msk.f32.mxu1 %vm1207_vm3, %v6266_v63  ;;  %v6273_v20 = vmul.f32 %v9420_v11, %v11272_v9  ;;  %v11723_v63 = vld [vmem:[#allocation37_spill] sm:$0xff]  ;;  %v11724_v11 = vld [vmem:[#allocation38_spill] sm:$0xff] }
 0xbfa   :  { %v9422_v34 = vpop.eup %9421  ;;  %8305 = vmatmul.mubr.msk.f32.vlgmr.msra.gmra.mrb[68].mxu1 %vm1207_vm3, %v6267_v50  ;;  %v11725_v50 = vpack.i.bf16 %v11723_v63, %v11724_v11 }
 0xbfb   :  { %v6235_v10 = vpop.xlane.xlu1 %6234  ;;  %v6272_v54 = vmul.f32 %v9422_v34, %v11283_v61  ;;  %8672 = vmatpush3.bf16.msra.mxu1 %v11313_v35  ;;  %v6232_v58 = vpop.xlane.xlu0 %6231 }
 0xbfc   :  { %9429 = vrcp.f32 %v6235_v10  ;;  %8678 = vmatprep.subr.bf16.mxu1 %v8677_v38  ;;  %v9424_v19 = vpop.eup %9423 }
 0xbfd   :  { %9431 = vrcp.f32 %v6232_v58  ;;  %8325 = vmatprep.mubr.msk.f32.mxu0 %vm1207_vm3, %v6272_v54  ;;  %v6271_v47 = vmul.f32 %v9424_v19, %v11285_v44 }
 0xbfe   :  { %8326 = vmatmul.mubr.msk.f32.vlgmr.msra.gmra.mrb[64].mxu0 %vm1207_vm3, %v6273_v20  ;;  %v9426_v3 = vpop.eup %9425  ;;  %9433 = vrcp.f32 %v6241_v31 }
 0xbff   :  { %v6270_v17 = vmul.f32 %v9426_v3, %v11291_v39 }
 0xc01   :  { %8318 = vmatprep.mubr.msk.f32.mxu1 %vm1207_vm3, %v6270_v17 }
 0xc02   :  { %v9428_v22 = vpop.eup %9427  ;;  %8319 = vmatmul.mubr.msk.f32.vlgmr.msra.gmra.mrb[70].mxu1 %vm1207_vm3, %v6271_v47 }
 0xc03   :  { %v6276_v9 = vmul.f32 %v9428_v22, %v11297_v7  ;;  %8680 = vmatpush3.bf16.msra.mxu1 %v8677_v38 }
 0xc05   :  { %8339 = vmatprep.mubr.msk.f32.mxu0 %vm1207_vm3, %v6276_v9 }
 0xc06   :  { %v9430_v61 = vpop.eup %9429 }
 0xc07   :  { %v9432_v35 = vpop.eup %9431  ;;  %v6275_v55 = vmul.f32 %v9430_v61, %v11301_v4  ;;  %v11727_v61 = vld [vmem:[#allocation16_spill] sm:$0xff] }
 0xc08   :  { %v6274_v48 = vmul.f32 %v9432_v35, %v11305_v2  ;;  %v9434_v2 = vpop.eup %9433 }
 0xc09   :  { %v6277_v0 = vmul.f32 %v9434_v2, %v11295_v36  ;;  %v9149_v36 = vld [vmem:[%s11588_s6] sm:$0xff]  }
 0xc0a   :  { %8332 = vmatprep.mubr.msk.f32.mxu1 %vm1207_vm3, %v6274_v48 }
 0xc0b   :  { %8333 = vmatmul.mubr.msk.f32.vlgmr.msra.gmra.mrb[72].mxu1 %vm1207_vm3, %v6275_v55 }
 0xc2c   :  { %v6247_v44 = vpop.xlane.xlu1 %6246 }
 0xc2d   :  { %9435 = vrcp.f32 %v6247_v44 }
 0xc30   :  { %v9024_v39 = vpop.permute.xlu1 %9023  ;;  %v6244_v37 = vpop.xlane.xlu0 %6243 }
 0xc31   :  { %v9026_v33 = vunpack.i.h.bf16 %v9024_v39  ;;  %v9025_v7 = vunpack.i.l.bf16 %v9024_v39  ;;  %9437 = vrcp.f32 %v6244_v37 }
 0xc33   :  { %v8685_v27 = vpack.c.bf16 %v9026_v33, %v9025_v7 }
 0xc34   :  { %v9019_v13 = vpop.permute.xlu0 %9018 }
 0xc35   :  { %v9021_v26 = vunpack.i.h.bf16 %v9019_v13  ;;  %v9020_v60 = vunpack.i.l.bf16 %v9019_v13  ;;  %8686 = vmatprep.subr.bf16.mxu1 %v8685_v27 }
 0xc36   :  { %8688 = vmatpush3.bf16.msra.mxu1 %v8685_v27  ;;  %v9034_v27 = vpop.permute.xlu1 %9033 }
 0xc37   :  { %v8681_v4 = vpack.c.bf16 %v9021_v26, %v9020_v60  ;;  %v9436_v25 = vpop.eup %9435 }
 0xc38   :  { %v6279_v40 = vmul.f32 %v9436_v25, %v11316_v15  ;;  %v9029_v45 = vpop.permute.xlu0 %9028 }
 0xc39   :  { %8682 = vmatprep.subr.bf16.mxu0 %v8681_v4  ;;  %v9031_v17 = vunpack.i.h.bf16 %v9029_v45  ;;  %v9030_v47 = vunpack.i.l.bf16 %v9029_v45 }
 0xc3a   :  { %8684 = vmatpush3.bf16.msra.mxu0 %v8681_v4  ;;  %v9044_v25 = vpop.permute.xlu1 %9043 }
 0xc3b   :  { %v9438_v16 = vpop.eup %9437  ;;  %8349 = vmatprep.subr.bf16.mxu0 %v9149_v36  ;;  %v7168_v35 = vsel %vm468_vm1, %v11727_v61, %v9030_v47 }
 0xc3c   :  { %v6278_v29 = vmul.f32 %v9438_v16, %v11320_v23  ;;  %v9039_v52 = vpop.permute.xlu0 %9038 }
 0xc3d   :  { %8340 = vmatmul.mubr.msk.f32.vlgmr.msra.gmra.mrb[66].mxu0 %vm1207_vm3, %v6277_v0  ;;  %v9041_v22 = vunpack.i.h.bf16 %v9039_v52  ;;  %v9040_v21 = vunpack.i.l.bf16 %v9039_v52  ;;  %v11728_v0 = vld [vmem:[#allocation19_spill] sm:$0xff] }
 0xc3e   :  { %8346 = vmatprep.mubr.msk.f32.mxu1 %vm1207_vm3, %v6278_v29  ;;  %8350 = vmatpush3.bf16.msra.mxu0 %v9149_v36  ;;  %v9054_v14 = vpop.permute.xlu1 %9053 }
 0xc3f   :  { %8347 = vmatmul.mubr.msk.f32.vlgmr.msra.gmra.mrb[74].mxu1 %vm1207_vm3, %v6279_v40  ;;  %8351 = vmatprep.subr.bf16.mxu0 %v9150_v32  ;;  %v7184_v44 = vsel %vm1207_vm3, %v7168_v35, %v9040_v21  ;;  %v11729_v40 = vld [vmem:[#allocation20_spill] sm:$0xff]  ;;  %v9056_v21 = vunpack.i.h.bf16 %v9054_v14 }
 0xc40   :  { %v9049_v6 = vpop.permute.xlu0 %9048 }
 0xc41   :  { %v9051_v26 = vunpack.i.h.bf16 %v9049_v6  ;;  %v9050_v60 = vunpack.i.l.bf16 %v9049_v6 }
 0xc42   :  { %8352 = vmatpush3.bf16.msra.mxu0 %v9150_v32  ;;  %v9036_v32 = vunpack.i.h.bf16 %v9034_v27 }
 0xc43   :  { %v7173_v29 = vsel %vm468_vm1, %v11728_v0, %v9051_v26 }
 0xc44   :  { %v9059_v19 = vpop.permute.xlu0 %9058 }
 0xc45   :  { %v9061_v4 = vunpack.i.h.bf16 %v9059_v19  ;;  %v9060_v2 = vunpack.i.l.bf16 %v9059_v19 }
 0xc48   :  { %v9069_v3 = vpop.permute.xlu0 %9068 }
 0xc49   :  { %v9070_v11 = vunpack.i.l.bf16 %v9069_v3 }
 0xcac   :  { %v8299_v43 = vpop.f32.mrb[60].mxu0 }
 0xcad   :  { %v6358_v46 = vpop.f32.mrb[61].mxu0 }
 0xcae   :  { %v9077_v30 = vpack.i.bf16 %v8299_v43, %v6358_v46  ;;  %v7172_v43 = vsel %vm468_vm1, %v11729_v40, %v9050_v60 }
 0xcaf   :  { %v7188_v36 = vsel %vm1207_vm3, %v7172_v43, %v9060_v2 }
 0xcb0   :  { %9078 = vrot.lane.b32.xlu0 %v9077_v30, %s9460_s0 }
 0xcb4   :  { %9083 = vrot.lane.b32.xlu0 %v9082_v42, %s9459_s14 }
 0xcb8   :  { %v8313_v15 = vpop.f32.mrb[62].mxu0 }
 0xcb9   :  { %v6532_v23 = vpop.f32.mrb[63].mxu0 }
 0xcba   :  { %v9087_v28 = vpack.i.bf16 %v8313_v15, %v6532_v23  ;;  %v7189_v15 = vsel %vm1207_vm3, %v7173_v29, %v9061_v4 }
 0xcbc   :  { %9088 = vrot.lane.b32.xlu0 %v9087_v28, %s9460_s0 }
 0xcc0   :  { %9103 = vrot.lane.b32.xlu0 %v11722_v59, %s9458_s13  ;;  %v9064_v59 = vpop.permute.xlu1 %9063 }
 0xcc1   :  { %v9066_v61 = vunpack.i.h.bf16 %v9064_v59  ;;  %v9065_v35 = vunpack.i.l.bf16 %v9064_v59 }
 0xccd   :  { %v8306_v12 = vpop.f32.mrb[68].mxu1 }
 0xcce   :  { %v6445_v42 = vpop.f32.mrb[69].mxu1 }
 0xccf   :  { %v9092_v57 = vpack.i.bf16 %v8306_v12, %v6445_v42  ;;  %v9035_v12 = vunpack.i.l.bf16 %v9034_v27  ;;  %v9074_v42 = vpop.permute.xlu1 %9073 }
 0xcd0   :  { %v9076_v29 = vunpack.i.h.bf16 %v9074_v42  ;;  %v9075_v40 = vunpack.i.l.bf16 %v9074_v42 }
 0xcd1   :  { %v8327_v53 = vpop.f32.mrb[64].mxu0  ;;  %9093 = vrot.lane.b32.xlu1 %v9092_v57, %s9460_s0  ;;  %v9046_v57 = vunpack.i.h.bf16 %v9044_v25 }
 0xcd2   :  { %v6706_v56 = vpop.f32.mrb[65].mxu0 }
 0xcd3   :  { %v9107_v18 = vpack.i.bf16 %v8327_v53, %v6706_v56  ;;  %v9045_v53 = vunpack.i.l.bf16 %v9044_v25  ;;  %v9071_v56 = vunpack.i.h.bf16 %v9069_v3 }
 0xcd5   :  { %9108 = vrot.lane.b32.xlu0 %v9107_v18, %s9460_s0  ;;  %9098 = vrot.lane.b32.xlu1 %v9097_v5, %s9459_s14  ;;  %v8320_v51 = vpop.f32.mrb[70].mxu1 }
 0xcd6   :  { %v6619_v49 = vpop.f32.mrb[71].mxu1 }
 0xcd7   :  { %v9112_v31 = vpack.i.bf16 %v8320_v51, %v6619_v49  ;;  %v11730_v51 = vld [vmem:[#allocation17_spill] sm:$0xff] }
 0xcd8   :  { %v7171_v49 = vsel %vm468_vm1, %v11730_v51, %v9036_v32 }
 0xcd9   :  { %9123 = vrot.lane.b32.xlu0 %v9122_v1, %s9459_s14  ;;  %9113 = vrot.lane.b32.xlu1 %v9112_v31, %s9460_s0  ;;  %v11731_v31 = vld [vmem:[#allocation18_spill] sm:$0xff] }
 0xcda   :  { %v7170_v63 = vsel %vm468_vm1, %v11731_v31, %v9035_v12 }
 0xcdb   :  { %v7186_v52 = vsel %vm1207_vm3, %v7170_v63, %v9045_v53 }
 0xcdd   :  { %9118 = vrot.lane.b32.xlu1 %v11725_v50, %s9458_s13 }
 0xcde   :  { %v8334_v34 = vpop.f32.mrb[72].mxu1 }
 0xcdf   :  { %v6793_v38 = vpop.f32.mrb[73].mxu1 }
 0xce0   :  { %v9127_v10 = vpack.i.bf16 %v8334_v34, %v6793_v38 }
 0xce2   :  { %9128 = vrot.lane.b32.xlu1 %v9127_v10, %s9460_s0 }
 0xce6   :  { %9133 = vrot.lane.b32.xlu1 %v9132_v41, %s9459_s14  ;;  %v11726_v41 = vld [vmem:[#allocation15_spill] sm:$0xff] }
 0xce7   :  { %v7169_v9 = vsel %vm468_vm1, %v11726_v41, %v9031_v17 }
 0xce8   :  { %v7185_v39 = vsel %vm1207_vm3, %v7169_v9, %v9041_v22 }
 0xd10   :  { %v8341_v8 = vpop.f32.mrb[66].mxu0 }
 0xd11   :  { %v6880_v1 = vpop.f32.mrb[67].mxu0 }
 0xd12   :  { %v9137_v5 = vpack.i.bf16 %v8341_v8, %v6880_v1  ;;  %v8348_v54 = vpop.f32.mrb[74].mxu1  ;;  %v7187_v8 = vsel %vm1207_vm3, %v7171_v49, %v9046_v57  ;;  %v11732_v1 = vld [vmem:[#allocation22_spill] sm:$0xff] }
 0xd13   :  { %v6967_v20 = vpop.f32.mrb[75].mxu1  ;;  %v7177_v6 = vsel %vm468_vm1, %v11732_v1, %v9071_v56 }
 0xd14   :  { %v9142_v58 = vpack.i.bf16 %v8348_v54, %v6967_v20  ;;  %9138 = vrot.lane.b32.xlu0 %v9137_v5, %s9460_s0 }
 0xd16   :  { %9143 = vrot.lane.b32.xlu1 %v9142_v58, %s9460_s0  ;;  %v11733_v58 = vld [vmem:[#allocation24_spill] sm:$0xff] }
 0xd17   :  { %v7176_v19 = vsel %vm468_vm1, %v11733_v58, %v9070_v11 }
 0xd22   :  { %v9079_v62 = vpop.permute.xlu0 %9078 }
 0xd23   :  { %v9081_v55 = vunpack.i.h.bf16 %v9079_v62  ;;  %v9080_v48 = vunpack.i.l.bf16 %v9079_v62  ;;  %v9055_v62 = vunpack.i.l.bf16 %v9054_v14 }
 0xd25   :  { %v7201_v37 = vsel %vm7200_vm4, %v7184_v44, %v9080_v48  ;;  %v7202_v33 = vsel %vm7200_vm4, %v7185_v39, %v9081_v55 }
 0xd26   :  { %v7217_v7 = vpack.c.bf16 %v7202_v33, %v7201_v37  ;;  %v9084_v13 = vpop.permute.xlu0 %9083  ;;  %v11734_v37 = vld [vmem:[#allocation21_spill] sm:$0xff] }
 0xd27   :  { %v9086_v34 = vunpack.i.h.bf16 %v9084_v13  ;;  %v9085_v38 = vunpack.i.l.bf16 %v9084_v13  ;;  %v7175_v33 = vsel %vm468_vm1, %v11734_v37, %v9056_v21 }
 0xd28   :  { %8353 = vmatprep.mubr.msk.bf16.mxu0 %vm46_vm0, %v7217_v7  ;;  %v11735_v7 = vld [vmem:[#allocation23_spill] sm:$0xff]  ;;  %v7191_v4 = vsel %vm1207_vm3, %v7175_v33, %v9066_v61 }
 0xd29   :  { %v7192_v41 = vsel %vm1207_vm3, %v7176_v19, %v9085_v38  ;;  %v7193_v9 = vsel %vm1207_vm3, %v7177_v6, %v9086_v34  ;;  %v7174_v27 = vsel %vm468_vm1, %v11735_v7, %v9055_v62  ;;  %v11741_v19 = vld [vmem:[#allocation11_spill] sm:$0xff] }
 0xd2a   :  { %v7190_v60 = vsel %vm1207_vm3, %v7174_v27, %v9065_v35 }
 0xd2e   :  { %v9089_v16 = vpop.permute.xlu0 %9088 }
 0xd2f   :  { %v9091_v46 = vunpack.i.h.bf16 %v9089_v16  ;;  %v9090_v30 = vunpack.i.l.bf16 %v9089_v16 }
 0xd31   :  { %v7206_v23 = vsel %vm7200_vm4, %v7189_v15, %v9091_v46  ;;  %v7205_v28 = vsel %vm7200_vm4, %v7188_v36, %v9090_v30  ;;  %v11736_v36 = vld [vmem:[#allocation25_spill] sm:$0xff] }
 0xd32   :  { %v7219_v24 = vpack.c.bf16 %v7206_v23, %v7205_v28  ;;  %v11456_v18 = vpop.permute.xlu0 %9103  ;;  %v7179_v15 = vsel %vm468_vm1, %v11736_v36, %v9076_v29  ;;  %v11737_v23 = vld [vmem:[#allocation27_spill] sm:$0xff] }
 0xd33   :  { %v7178_v28 = vsel %vm468_vm1, %v11737_v23, %v9075_v40  ;;  %v9106_v56 = vunpack.i.h.bf16 %v11456_v18  ;;  %v9105_v51 = vunpack.i.l.bf16 %v11456_v18 }
 0xd43   :  { %v9094_v50 = vpop.permute.xlu1 %9093 }
 0xd44   :  { %v9096_v10 = vunpack.i.h.bf16 %v9094_v50  ;;  %v9095_v45 = vunpack.i.l.bf16 %v9094_v50 }
 0xd46   :  { %v7204_v5 = vsel %vm7200_vm4, %v7187_v8, %v9096_v10  ;;  %v7203_v54 = vsel %vm7200_vm4, %v7186_v52, %v9095_v45  ;;  %v11738_v45 = vld [vmem:[#allocation26_spill] sm:$0xff]  ;;  %v11739_v8 = vld [vmem:[#allocation28_spill] sm:$0xff] }
 0xd47   :  { %v9109_v20 = vpop.permute.xlu0 %9108  ;;  %v7218_v3 = vpack.c.bf16 %v7204_v5, %v7203_v54  ;;  %v9099_v17 = vpop.permute.xlu1 %9098  ;;  %v7181_v52 = vsel %vm468_vm1, %v11738_v45, %v9106_v56  ;;  %v7180_v1 = vsel %vm468_vm1, %v11739_v8, %v9105_v51 }
 0xd48   :  { %v9111_v47 = vunpack.i.h.bf16 %v9109_v20  ;;  %v9110_v22 = vunpack.i.l.bf16 %v9109_v20  ;;  %v9101_v43 = vunpack.i.h.bf16 %v9099_v17  ;;  %v9100_v46 = vunpack.i.l.bf16 %v9099_v17  ;;  %v11740_v20 = vld [vmem:[#allocation8_spill] sm:$0xff] }
 0xd49   :  { %8354 = vmatmul.mubr.msk.bf16.vlgmr.msra.gmra.mrb[68].mxu0 %vm46_vm0, %v7218_v3 }
 0xd4a   :  { %v7210_v55 = vsel %vm7200_vm4, %v7193_v9, %v9111_v47  ;;  %v7209_v48 = vsel %vm7200_vm4, %v7192_v41, %v9110_v22  ;;  %8357 = vmatprep.mubr.msk.bf16.mxu0 %vm46_vm0, %v7219_v24  ;;  %v7195_v59 = vsel %vm1207_vm3, %v7179_v15, %v9101_v43  ;;  %v7194_v32 = vsel %vm1207_vm3, %v7178_v28, %v9100_v46 }
 0xd4b   :  { %v7221_v44 = vpack.c.bf16 %v7210_v55, %v7209_v48  ;;  %v9114_v39 = vpop.permute.xlu1 %9113  ;;  %v9124_v53 = vpop.permute.xlu0 %9123 }
 0xd4c   :  { %v9116_v13 = vunpack.i.h.bf16 %v9114_v39  ;;  %v9115_v26 = vunpack.i.l.bf16 %v9114_v39  ;;  %v9126_v31 = vunpack.i.h.bf16 %v9124_v53  ;;  %v9125_v63 = vunpack.i.l.bf16 %v9124_v53 }
 0xd4e   :  { %v7208_v2 = vsel %vm7200_vm4, %v7191_v4, %v9116_v13  ;;  %v7207_v25 = vsel %vm7200_vm4, %v7190_v60, %v9115_v26  ;;  %v7197_v54 = vsel %vm1207_vm3, %v7181_v52, %v9126_v31  ;;  %v7196_v18 = vsel %vm1207_vm3, %v7180_v1, %v9125_v63 }
 0xd4f   :  { %v7220_v16 = vpack.c.bf16 %v7208_v2, %v7207_v25  ;;  %v9119_v0 = vpop.permute.xlu1 %9118 }
 0xd50   :  { %v9121_v11 = vunpack.i.h.bf16 %v9119_v0  ;;  %v9120_v50 = vunpack.i.l.bf16 %v9119_v0 }
 0xd51   :  { %8358 = vmatmul.mubr.msk.bf16.gmra.mrb[72].mxu0 %vm46_vm0, %v7220_v16 }
 0xd52   :  { %8361 = vmatprep.mubr.msk.bf16.mxu0 %vm46_vm0, %v7221_v44  ;;  %v7183_v58 = vsel %vm468_vm1, %v11740_v20, %v9121_v11  ;;  %v7182_v3 = vsel %vm468_vm1, %v11741_v19, %v9120_v50  ;;  %v7594_v44 = vld [vmem:[%s11589_s7] ss:$0 sm:$0xff] }
 0xd54   :  { %v9129_v30 = vpop.permute.xlu1 %9128 }
 0xd55   :  { %v9131_v24 = vunpack.i.h.bf16 %v9129_v30  ;;  %v9130_v14 = vunpack.i.l.bf16 %v9129_v30 }
 0xd57   :  { %v7212_v12 = vsel %vm7200_vm4, %v7195_v59, %v9131_v24  ;;  %v7211_v42 = vsel %vm7200_vm4, %v7194_v32, %v9130_v14 }
 0xd58   :  { %v7222_v57 = vpack.c.bf16 %v7212_v12, %v7211_v42  ;;  %v9134_v49 = vpop.permute.xlu1 %9133 }
 0xd59   :  { %v9136_v34 = vunpack.i.h.bf16 %v9134_v49  ;;  %v9135_v38 = vunpack.i.l.bf16 %v9134_v49 }
 0xd5a   :  { %8362 = vmatmul.mubr.msk.bf16.gmra.mrb[76].mxu0 %vm46_vm0, %v7222_v57 }
 0xd5b   :  { %v7199_v41 = vsel %vm1207_vm3, %v7183_v58, %v9136_v34  ;;  %v7198_v9 = vsel %vm1207_vm3, %v7182_v3, %v9135_v38 }
 0xd86   :  { %v9139_v10 = vpop.permute.xlu0 %9138 }
 0xd87   :  { %v9141_v6 = vunpack.i.h.bf16 %v9139_v10  ;;  %v9140_v5 = vunpack.i.l.bf16 %v9139_v10 }
 0xd88   :  { %v9144_v17 = vpop.permute.xlu1 %9143 }
 0xd89   :  { %v7214_v47 = vsel %vm7200_vm4, %v7197_v54, %v9141_v6  ;;  %v7213_v22 = vsel %vm7200_vm4, %v7196_v18, %v9140_v5  ;;  %v9146_v21 = vunpack.i.h.bf16 %v9144_v17  ;;  %v9145_v62 = vunpack.i.l.bf16 %v9144_v17 }
 0xd8a   :  { %v7223_v61 = vpack.c.bf16 %v7214_v47, %v7213_v22 }
 0xd8b   :  { %v7216_v35 = vsel %vm7200_vm4, %v7199_v41, %v9146_v21  ;;  %v7215_v55 = vsel %vm7200_vm4, %v7198_v9, %v9145_v62 }
 0xd8c   :  { %v7224_v48 = vpack.c.bf16 %v7216_v35, %v7215_v55  ;;  %8365 = vmatprep.mubr.msk.bf16.mxu0 %vm46_vm0, %v7223_v61 }
 0xd8e   :  { %8366 = vmatmul.mubr.msk.bf16.gmra.mrb[80].mxu0 %vm46_vm0, %v7224_v48 }
 0xe1c   :  { %v8355_v39 = vpop.f32.mrb[68].mxu0 }
 0xe1d   :  { %v7315_v37 = vadd.f32 %v8355_v39, %v7594_v44  ;;  %v7306_v33 = vpop.f32.mrb[69].mxu0 }
 0xe1e   :  { %v7307_v7 = vadd.f32 %v7594_v44, %v7306_v33  ;;  %v8356_v27 = vpop.f32.mrb[70].mxu0 }
 0xe1f   :  { %7371 = vst.msk [vmem:[%s11590_s8 + $0x10] sm:$0xff] %vm46_vm0, %v7315_v37  ;;  %v7318_v13 = vadd.f32 %v8356_v27, %v7594_v44  ;;  %v7309_v26 = vpop.f32.mrb[71].mxu0 }
 0xe20   :  { %7369 = vst.msk [vmem:[%s11590_s8] sm:$0xff] %vm46_vm0, %v7307_v7  ;;  %v7310_v60 = vadd.f32 %v7594_v44, %v7309_v26 }
 0xe21   :  { %7372 = vst.msk [vmem:[%s11590_s8 + $0x18] sm:$0xff] %vm46_vm0, %v7318_v13 }
 0xe22   :  { %7370 = vst.msk [vmem:[%s11590_s8 + $0x8] sm:$0xff] %vm46_vm0, %v7310_v60 }
 0xe24   :  { %v8359_v4 = vpop.f32.mrb[72].mxu0 }
 0xe25   :  { %v7331_v2 = vadd.f32 %v8359_v4, %v7594_v44  ;;  %v7322_v25 = vpop.f32.mrb[73].mxu0 }
 0xe26   :  { %v7323_v16 = vadd.f32 %v7594_v44, %v7322_v25  ;;  %v8360_v0 = vpop.f32.mrb[74].mxu0 }
 0xe27   :  { %7375 = vst.msk [vmem:[%s11590_s8 + $0x30] sm:$0xff] %vm46_vm0, %v7331_v2  ;;  %v7334_v29 = vadd.f32 %v8360_v0, %v7594_v44  ;;  %v7325_v40 = vpop.f32.mrb[75].mxu0 }
 0xe28   :  { %7373 = vst.msk [vmem:[%s11590_s8 + $0x20] sm:$0xff] %vm46_vm0, %v7323_v16  ;;  %v7326_v43 = vadd.f32 %v7594_v44, %v7325_v40 }
 0xe29   :  { %7376 = vst.msk [vmem:[%s11590_s8 + $0x38] sm:$0xff] %vm46_vm0, %v7334_v29 }
 0xe2a   :  { %7374 = vst.msk [vmem:[%s11590_s8 + $0x28] sm:$0xff] %vm46_vm0, %v7326_v43 }
 0xe2d   :  { %v8363_v46 = vpop.f32.mrb[76].mxu0 }
 0xe2e   :  { %v7347_v30 = vadd.f32 %v8363_v46, %v7594_v44  ;;  %v7338_v36 = vpop.f32.mrb[77].mxu0 }
 0xe2f   :  { %v7339_v15 = vadd.f32 %v7594_v44, %v7338_v36  ;;  %v8364_v23 = vpop.f32.mrb[78].mxu0 }
 0xe30   :  { %7379 = vst.msk [vmem:[%s11590_s8 + $0x50] sm:$0xff] %vm46_vm0, %v7347_v30  ;;  %v7350_v28 = vadd.f32 %v8364_v23, %v7594_v44  ;;  %v7341_v24 = vpop.f32.mrb[79].mxu0 }
 0xe31   :  { %7377 = vst.msk [vmem:[%s11590_s8 + $0x40] sm:$0xff] %vm46_vm0, %v7339_v15  ;;  %v7342_v14 = vadd.f32 %v7594_v44, %v7341_v24 }
 0xe32   :  { %7380 = vst.msk [vmem:[%s11590_s8 + $0x58] sm:$0xff] %vm46_vm0, %v7350_v28 }
 0xe33   :  { %7378 = vst.msk [vmem:[%s11590_s8 + $0x48] sm:$0xff] %vm46_vm0, %v7342_v14 }
 0xe61   :  { %v8367_v59 = vpop.f32.mrb[80].mxu0 }
 0xe62   :  { %v7363_v32 = vadd.f32 %v8367_v59, %v7594_v44  ;;  %v7354_v12 = vpop.f32.mrb[81].mxu0 }
 0xe63   :  { %v7355_v42 = vadd.f32 %v7594_v44, %v7354_v12  ;;  %v8368_v57 = vpop.f32.mrb[82].mxu0 }
 0xe64   :  { %7383 = vst.msk [vmem:[%s11590_s8 + $0x70] sm:$0xff] %vm46_vm0, %v7363_v32  ;;  %v7366_v53 = vadd.f32 %v8368_v57, %v7594_v44  ;;  %v7357_v56 = vpop.f32.mrb[83].mxu0 }
 0xe65   :  { %7381 = vst.msk [vmem:[%s11590_s8 + $0x60] sm:$0xff] %vm46_vm0, %v7355_v42  ;;  %v7358_v51 = vadd.f32 %v7594_v44, %v7357_v56 }
 0xe66   :  { %7384 = vst.msk [vmem:[%s11590_s8 + $0x78] sm:$0xff] %vm46_vm0, %v7366_v53 }
 0xe67   :  { %7382 = vst.msk [vmem:[%s11590_s8 + $0x68] sm:$0xff] %vm46_vm0, %v7358_v51 }

</bundles_post_ra>
